<compile_context>
chip_gen: v6e
topology: v6e:2x2x1
jax: 0.10.0
libtpu: 0.0.40
codegen_flags: <defaults>
</compile_context>

<pallas_src>
import jax
import jax.numpy as jnp
from jax import lax
from jax.experimental import pallas as pl
from jax.experimental.pallas import tpu as pltpu


# Padded (lane-dense) feature sizes.
XPAD = 256     # 196 pixels + 1 bias-ones column + zero pad
C1PAD = 1664   # 1600 conv1-map lanes (NHWC flatten of 10x10x16) -> 13 * 128
HPAD = 128     # 120 / 82 / 10 all padded to a single 128-lane MXU pass


def _round_up(x, m):
    return ((x + m - 1) // m) * m


def _cdiv(a, b):
    return -(-a // b)


def _num_tensorcores():
    """Best-effort TensorCore count of the local device (v7x has 2)."""
    try:
        dev = jax.devices()[0]
        for attr in ("num_cores", "core_count"):
            try:
                v = int(getattr(dev, attr, 0) or 0)
            except (TypeError, ValueError):
                v = 0
            if v > 0:
                return v
    except Exception:
        pass
    return 1


# ----------------------------- Pallas kernel -------------------------------

def _fused_twin_kernel(x1_ref, x2_ref, w1_ref, w2_ref, b2_ref,
                       wf1_ref, bf1_ref, wf2_ref, bf2_ref,
                       o1_ref, o2_ref):
    # Resident, lane-dense weights (read once; both branches reuse them).
    w1 = w1_ref[...]      # (256, 1664)  conv1 Toeplitz + folded bias row
    w2 = w2_ref[...]      # (1664, 128)  avgpool folded into conv2
    b2 = b2_ref[...]      # (1, 128)
    wf1 = wf1_ref[...]    # (128, 128)
    bf1 = bf1_ref[...]    # (1, 128)
    wf2 = wf2_ref[...]    # (128, 128)
    bf2 = bf2_ref[...]    # (1, 128)    pad lanes carry -1e30

    def branch(x):                                   # x: (tm, 256)
        # tanh(conv1): Toeplitz matmul; bias comes via the constant-1 column.
        a1 = jnp.tanh(jnp.dot(x, w1, preferred_element_type=jnp.float32))
        # tanh(avgpool folded into conv2)
        a2 = jnp.tanh(jnp.dot(a1, w2, preferred_element_type=jnp.float32) + b2)
        # relu(fc1)
        h = jnp.maximum(
            jnp.dot(a2, wf1, preferred_element_type=jnp.float32) + bf1, 0.0)
        # fc2 (128 lanes; pad bias = -1e30 keeps softmax exact) + log_softmax
        z = jnp.dot(h, wf2, preferred_element_type=jnp.float32) + bf2
        zs = z - jnp.max(z, axis=1, keepdims=True)
        lse = jnp.log(jnp.sum(jnp.exp(zs), axis=1, keepdims=True))
        return zs - lse

    o1_ref[...] = branch(x1_ref[...])
    o2_ref[...] = branch(x2_ref[...])


# ----------------------------- kernel wrapper -------------------------------

def fused_forward(x1, x2, p, max_tile=512):
    """x1, x2: (rows, 256) f32 -> two (rows, 128) log-prob slabs (pad lanes junk)."""
    rows = x1.shape[0]
    num_cores = _num_tensorcores()

    # Balanced tiling: one big tile on single-TC chips, an even (per-core
    # balanced) tile count on multi-TC chips, minimal row padding.
    num_tiles = max(num_cores, _cdiv(max(rows, 1), max_tile))
    num_tiles = _round_up(num_tiles, max(num_cores, 1))
    tm = _round_up(_cdiv(max(rows, 1), num_tiles), 8)       # (8,128) sublane rule
    padded = num_tiles * tm
    if padded != rows:
        pad = ((0, padded - rows), (0, 0))
        x1 = jnp.pad(x1, pad)
        x2 = jnp.pad(x2, pad)
    grid = (num_tiles,)

    flops = 2 * 2 * padded * (XPAD * C1PAD + C1PAD * HPAD + 2 * HPAD * HPAD)
    transcendentals = 2 * padded * (C1PAD + HPAD + HPAD + 1)   # tanh,tanh,exp,log
    bytes_accessed = 4 * (2 * padded * (XPAD + HPAD)
                          + XPAD * C1PAD + C1PAD * HPAD + 2 * HPAD * HPAD
                          + 3 * HPAD)

    def run(single_buffer_weights):
        if single_buffer_weights:
            def w_spec(shape):
                # Grid-invariant weights: single VMEM buffer (no double-buffer).
                return pl.BlockSpec(shape, lambda i: (0, 0),
                                    pipeline_mode=pl.Buffered(1))
        else:
            def w_spec(shape):
                return pl.BlockSpec(shape, lambda i: (0, 0))

        return pl.pallas_call(
            _fused_twin_kernel,
            out_shape=(jax.ShapeDtypeStruct((padded, HPAD), jnp.float32),
                       jax.ShapeDtypeStruct((padded, HPAD), jnp.float32)),
            grid_spec=pltpu.PrefetchScalarGridSpec(
                num_scalar_prefetch=0,
                grid=grid,
                in_specs=[
                    pl.BlockSpec((tm, XPAD), lambda i: (i, 0)),   # im1 tile
                    pl.BlockSpec((tm, XPAD), lambda i: (i, 0)),   # im2 tile
                    w_spec((XPAD, C1PAD)),
                    w_spec((C1PAD, HPAD)),
                    w_spec((1, HPAD)),
                    w_spec((HPAD, HPAD)),
                    w_spec((1, HPAD)),
                    w_spec((HPAD, HPAD)),
                    w_spec((1, HPAD)),
                ],
                out_specs=[pl.BlockSpec((tm, HPAD), lambda i: (i, 0)),
                           pl.BlockSpec((tm, HPAD), lambda i: (i, 0))],
            ),
            compiler_params=pltpu.CompilerParams(
                dimension_semantics=("parallel",),
                vmem_limit_bytes=32 * 1024 * 1024),
            cost_estimate=pl.CostEstimate(
                flops=flops, transcendentals=transcendentals,
                bytes_accessed=bytes_accessed),
        )(x1, x2, p["w1p"], p["w2p"], p["b2p"],
          p["wf1p"], p["bf1p"], p["wf2p"], p["bf2p"])

    try:
        return run(True)
    except Exception:
        # Fallback if this JAX build rejects pipeline_mode=pl.Buffered(1);
        # weights then simply stay double-buffered (still grid-invariant).
        return run(False)


def _prep_input(im):
    """(B, 14, 14) image -> (B, 256) flat, lane-dense, with a ones column that
    carries conv1's bias (folded into the Toeplitz weight)."""
    B = im.shape[0]
    x = im.reshape(B, 196).astype(jnp.float32)
    return jnp.concatenate(
        [x,
         jnp.ones((B, 1), jnp.float32),
         jnp.zeros((B, XPAD - 197), jnp.float32)], axis=1)


def forward(im1, im2, params):
    """Weight-shared twin branches in ONE pallas_call (two inputs / outputs)."""
    B = im1.shape[0]
    o1, o2 = fused_forward(_prep_input(im1), _prep_input(im2), params)
    return o1[:B, :10], o2[:B, :10]


# ------------------------------- parameters ---------------------------------

def init_params(key):
    ks = jax.random.split(key, 8)

    def u(k, shape, fan_in):
        bound = 1.0 / jnp.sqrt(jnp.float32(fan_in))
        return jax.random.uniform(k, shape, jnp.float32, -bound, bound)

    conv1_w = u(ks[0], (16, 1, 5, 5), 25)            # torch OIHW
    conv1_b = u(ks[1], (16,), 25)
    conv2_w = u(ks[2], (120, 16, 5, 5), 16 * 25)
    conv2_b = u(ks[3], (120,), 16 * 25)
    fc1_w = u(ks[4], (82, 120), 120)                 # torch Linear (out, in)
    fc1_b = u(ks[5], (82,), 120)
    fc2_w = u(ks[6], (10, 82), 82)
    fc2_b = u(ks[7], (10,), 82)

    # conv1 lowered to a dense Toeplitz matmul weight (196, 1600): apply the
    # (linear) conv to the 196 pixel-basis images once at init.  Column layout
    # = NHWC flatten of the (10,10,16) output map: (pos*16 + channel).
    basis = jnp.eye(196, dtype=jnp.float32).reshape(196, 1, 14, 14)
    z = lax.conv_general_dilated(basis, conv1_w, (1, 1), "VALID",
                                 dimension_numbers=("NCHW", "OIHW", "NCHW"))
    w1toep = jnp.transpose(z, (0, 2, 3, 1)).reshape(196, 1600)
    b1row = jnp.tile(conv1_b, 100)                                   # (1600,)

    # Padded (256, 1664): rows 0..195 = Toeplitz, row 196 = bias (driven by the
    # constant-1 input column), everything else zero (zero pad stays inert).
    w1p = jnp.zeros((XPAD, C1PAD), jnp.float32)
    w1p = w1p.at[:196, :1600].set(w1toep)
    w1p = w1p.at[196, :1600].set(b1row)

    # Fold AvgPool2d(2,2) into conv2: effective weight acting on the
    # NHWC-flattened tanh(conv1) map (B,10,10,16) -> (1600, 120) -> padded.
    w2_hw = jnp.transpose(conv2_w, (0, 2, 3, 1))                       # (120,5,5,16)
    w2_up = jnp.repeat(jnp.repeat(w2_hw, 2, axis=1), 2, axis=2) / 4.0  # (120,10,10,16)
    w2eff = w2_up.reshape(120, 1600).T                                 # (1600,120)
    w2p = jnp.zeros((C1PAD, HPAD), jnp.float32).at[:1600, :120].set(w2eff)
    b2p = jnp.zeros((1, HPAD), jnp.float32).at[0, :120].set(conv2_b)

    # fc1 / fc2 padded to 128x128.  Hidden pad weights / biases are ZERO; only
    # fc2's pad lanes get -1e30 bias so they vanish from the softmax normalizer.
    wf1p = jnp.zeros((HPAD, HPAD), jnp.float32).at[:120, :82].set(fc1_w.T)
    bf1p = jnp.zeros((1, HPAD), jnp.float32).at[0, :82].set(fc1_b)
    wf2p = jnp.zeros((HPAD, HPAD), jnp.float32).at[:82, :10].set(fc2_w.T)
    bf2p = jnp.full((1, HPAD), -1e30, jnp.float32).at[0, :10].set(fc2_b)

    return dict(
        # original torch-layout params (used by the pure-JAX reference)
        conv1_w=conv1_w, conv1_b=conv1_b, conv2_w=conv2_w, conv2_b=conv2_b,
        fc1_w=fc1_w, fc1_b=fc1_b, fc2_w=fc2_w, fc2_b=fc2_b,
        # padded, kernel-ready params
        w1p=w1p, w2p=w2p, b2p=b2p, wf1p=wf1p, bf1p=bf1p, wf2p=wf2p, bf2p=bf2p,
    )


# -------- pure-JAX reference (mirrors the PyTorch forward exactly) ----------

def reference_branch(x, p):
    B = x.shape[0]
    xi = x.reshape(B, 1, 14, 14)
    z1 = lax.conv_general_dilated(xi, p["conv1_w"], (1, 1), "VALID",
                                  dimension_numbers=("NCHW", "OIHW", "NCHW"))
    a1 = jnp.tanh(z1 + p["conv1_b"][None, :, None, None])               # (B,16,10,10)
    pooled = a1.reshape(B, 16, 5, 2, 5, 2).mean(axis=(3, 5))            # (B,16,5,5)
    z2 = lax.conv_general_dilated(pooled, p["conv2_w"], (1, 1), "VALID",
                                  dimension_numbers=("NCHW", "OIHW", "NCHW"))
    a2 = jnp.tanh(z2 + p["conv2_b"][None, :, None, None]).reshape(B, 120)
    h = jnp.maximum(a2 @ p["fc1_w"].T + p["fc1_b"], 0.0)
    z = h @ p["fc2_w"].T + p["fc2_b"]
    return jax.nn.log_softmax(z, axis=1)


if __name__ == "__main__":
    key = jax.random.PRNGKey(0)
    kp, k1, k2, k3, k4 = jax.random.split(key, 5)
    params = init_params(kp)

    # Small demo batch (module spec: images are 14x14, two weight-shared inputs)
    B = 2
    im1 = jax.random.normal(k1, (B, 14, 14), jnp.float32)
    im2 = jax.random.normal(k2, (B, 14, 14), jnp.float32)

    out1, out2 = forward(im1, im2, params)
    out1 = jax.block_until_ready(out1)
    out2 = jax.block_until_ready(out2)

    ref1 = reference_branch(im1, params)
    ref2 = reference_branch(im2, params)

    assert out1.shape == (B, 10) and out2.shape == (B, 10)
    assert jnp.allclose(out1, ref1, atol=2e-4, rtol=2e-4)
    assert jnp.allclose(out2, ref2, atol=2e-4, rtol=2e-4)

    # Larger batch exercises row padding + the multi-tile parallel grid.
    Bl = 700
    im1l = jax.random.normal(k3, (Bl, 14, 14), jnp.float32)
    im2l = jax.random.normal(k4, (Bl, 14, 14), jnp.float32)
    o1l, o2l = forward(im1l, im2l, params)
    o1l = jax.block_until_ready(o1l)
    o2l = jax.block_until_ready(o2l)
    assert o1l.shape == (Bl, 10) and o2l.shape == (Bl, 10)
    assert jnp.allclose(o1l, reference_branch(im1l, params), atol=2e-4, rtol=2e-4)
    assert jnp.allclose(o2l, reference_branch(im2l, params), atol=2e-4, rtol=2e-4)

    print("KERNEL_OK")
</pallas_src>

<mosaic_0001>
module attributes {stable_mosaic.version = 11 : i64} {
  func.func @_fused_twin_kernel(%arg0: i32, %arg1: memref<8x256xf32, #tpu.memory_space<vmem>>, %arg2: memref<8x256xf32, #tpu.memory_space<vmem>>, %arg3: memref<256x1664xf32, #tpu.memory_space<vmem>>, %arg4: memref<1664x128xf32, #tpu.memory_space<vmem>>, %arg5: memref<1x128xf32, #tpu.memory_space<vmem>>, %arg6: memref<128x128xf32, #tpu.memory_space<vmem>>, %arg7: memref<1x128xf32, #tpu.memory_space<vmem>>, %arg8: memref<128x128xf32, #tpu.memory_space<vmem>>, %arg9: memref<1x128xf32, #tpu.memory_space<vmem>>, %arg10: memref<8x128xf32, #tpu.memory_space<vmem>>, %arg11: memref<8x128xf32, #tpu.memory_space<vmem>>) attributes {dimension_semantics = [#tpu.dimension_semantics<parallel>], iteration_bounds = array<i64: 1>, scalar_prefetch = 0 : i64, scratch_operands = 0 : i64, tpu.core_type = #tpu.core_type<tc>, window_params = [{transform_indices = @transform_0, window_bounds = array<i64: 8, 256>}, {transform_indices = @transform_1, window_bounds = array<i64: 8, 256>}, {pipeline_mode = #tpu.pipeline_mode<synchronous>, transform_indices = @transform_2, window_bounds = array<i64: 256, 1664>}, {pipeline_mode = #tpu.pipeline_mode<synchronous>, transform_indices = @transform_3, window_bounds = array<i64: 1664, 128>}, {pipeline_mode = #tpu.pipeline_mode<synchronous>, transform_indices = @transform_4, window_bounds = array<i64: 1, 128>}, {pipeline_mode = #tpu.pipeline_mode<synchronous>, transform_indices = @transform_5, window_bounds = array<i64: 128, 128>}, {pipeline_mode = #tpu.pipeline_mode<synchronous>, transform_indices = @transform_6, window_bounds = array<i64: 1, 128>}, {pipeline_mode = #tpu.pipeline_mode<synchronous>, transform_indices = @transform_7, window_bounds = array<i64: 128, 128>}, {pipeline_mode = #tpu.pipeline_mode<synchronous>, transform_indices = @transform_8, window_bounds = array<i64: 1, 128>}, {transform_indices = @transform_9, window_bounds = array<i64: 8, 128>}, {transform_indices = @transform_10, window_bounds = array<i64: 8, 128>}]} {
    %c0 = arith.constant 0 : index
    %c0_0 = arith.constant 0 : index
    %0 = vector.load %arg3[%c0, %c0_0] : memref<256x1664xf32, #tpu.memory_space<vmem>>, vector<256x1664xf32>
    %c0_1 = arith.constant 0 : index
    %c0_2 = arith.constant 0 : index
    %1 = vector.load %arg4[%c0_1, %c0_2] : memref<1664x128xf32, #tpu.memory_space<vmem>>, vector<1664x128xf32>
    %c0_3 = arith.constant 0 : index
    %c0_4 = arith.constant 0 : index
    %2 = vector.load %arg5[%c0_3, %c0_4] : memref<1x128xf32, #tpu.memory_space<vmem>>, vector<1x128xf32>
    %c0_5 = arith.constant 0 : index
    %c0_6 = arith.constant 0 : index
    %3 = vector.load %arg6[%c0_5, %c0_6] : memref<128x128xf32, #tpu.memory_space<vmem>>, vector<128x128xf32>
    %c0_7 = arith.constant 0 : index
    %c0_8 = arith.constant 0 : index
    %4 = vector.load %arg7[%c0_7, %c0_8] : memref<1x128xf32, #tpu.memory_space<vmem>>, vector<1x128xf32>
    %c0_9 = arith.constant 0 : index
    %c0_10 = arith.constant 0 : index
    %5 = vector.load %arg8[%c0_9, %c0_10] : memref<128x128xf32, #tpu.memory_space<vmem>>, vector<128x128xf32>
    %c0_11 = arith.constant 0 : index
    %c0_12 = arith.constant 0 : index
    %6 = vector.load %arg9[%c0_11, %c0_12] : memref<1x128xf32, #tpu.memory_space<vmem>>, vector<1x128xf32>
    %c0_13 = arith.constant 0 : index
    %c0_14 = arith.constant 0 : index
    %7 = vector.load %arg1[%c0_13, %c0_14] : memref<8x256xf32, #tpu.memory_space<vmem>>, vector<8x256xf32>
    %cst = arith.constant dense<0.000000e+00> : vector<8x1664xf32>
    %8 = tpu.matmul %7, %0, %cst {dimension_numbers = #tpu.dot_dimension_numbers<[1], [0], [0], [1], [0, 0, 1, 1], [], []>} : vector<8x256xf32>, vector<256x1664xf32>, vector<8x1664xf32> -> vector<8x1664xf32>
    %9 = math.tanh %8 : vector<8x1664xf32>
    %cst_15 = arith.constant dense<0.000000e+00> : vector<8x128xf32>
    %10 = tpu.matmul %9, %1, %cst_15 {dimension_numbers = #tpu.dot_dimension_numbers<[1], [0], [0], [1], [0, 0, 1, 1], [], []>} : vector<8x1664xf32>, vector<1664x128xf32>, vector<8x128xf32> -> vector<8x128xf32>
    %11 = vector.broadcast %2 : vector<1x128xf32> to vector<8x128xf32>
    %12 = arith.addf %10, %11 : vector<8x128xf32>
    %13 = math.tanh %12 : vector<8x128xf32>
    %cst_16 = arith.constant dense<0.000000e+00> : vector<8x128xf32>
    %14 = tpu.matmul %13, %3, %cst_16 {dimension_numbers = #tpu.dot_dimension_numbers<[1], [0], [0], [1], [0, 0, 1, 1], [], []>} : vector<8x128xf32>, vector<128x128xf32>, vector<8x128xf32> -> vector<8x128xf32>
    %15 = vector.broadcast %4 : vector<1x128xf32> to vector<8x128xf32>
    %16 = arith.addf %14, %15 : vector<8x128xf32>
    %cst_17 = arith.constant 0.000000e+00 : f32
    %17 = vector.broadcast %cst_17 : f32 to vector<8x128xf32>
    %18 = arith.maximumf %16, %17 : vector<8x128xf32>
    %cst_18 = arith.constant dense<0.000000e+00> : vector<8x128xf32>
    %19 = tpu.matmul %18, %5, %cst_18 {dimension_numbers = #tpu.dot_dimension_numbers<[1], [0], [0], [1], [0, 0, 1, 1], [], []>} : vector<8x128xf32>, vector<128x128xf32>, vector<8x128xf32> -> vector<8x128xf32>
    %20 = vector.broadcast %6 : vector<1x128xf32> to vector<8x128xf32>
    %21 = arith.addf %19, %20 : vector<8x128xf32>
    %cst_19 = arith.constant dense<0xFF800000> : vector<8xf32>
    %22 = vector.multi_reduction <maximumf>, %21, %cst_19 [1] : vector<8x128xf32> to vector<8xf32>
    %23 = vector.shape_cast %22 : vector<8xf32> to vector<8x1xf32>
    %24 = vector.broadcast %23 : vector<8x1xf32> to vector<8x128xf32>
    %25 = arith.subf %21, %24 : vector<8x128xf32>
    %26 = math.exp %25 : vector<8x128xf32>
    %cst_20 = arith.constant dense<0.000000e+00> : vector<8xf32>
    %27 = vector.multi_reduction <add>, %26, %cst_20 [1] : vector<8x128xf32> to vector<8xf32>
    %28 = vector.shape_cast %27 : vector<8xf32> to vector<8x1xf32>
    %29 = math.log %28 : vector<8x1xf32>
    %30 = vector.broadcast %29 : vector<8x1xf32> to vector<8x128xf32>
    %31 = arith.subf %25, %30 : vector<8x128xf32>
    %c0_21 = arith.constant 0 : index
    %c0_22 = arith.constant 0 : index
    %32 = vector.load %arg10[%c0_21, %c0_22] : memref<8x128xf32, #tpu.memory_space<vmem>>, vector<8x128xf32>
    tpu.vector_store %arg10[%c0_21, %c0_22], %31 {strides = array<i32>} : memref<8x128xf32, #tpu.memory_space<vmem>>, vector<8x128xf32>,
    %c0_23 = arith.constant 0 : index
    %c0_24 = arith.constant 0 : index
    %33 = vector.load %arg2[%c0_23, %c0_24] : memref<8x256xf32, #tpu.memory_space<vmem>>, vector<8x256xf32>
    %cst_25 = arith.constant dense<0.000000e+00> : vector<8x1664xf32>
    %34 = tpu.matmul %33, %0, %cst_25 {dimension_numbers = #tpu.dot_dimension_numbers<[1], [0], [0], [1], [0, 0, 1, 1], [], []>} : vector<8x256xf32>, vector<256x1664xf32>, vector<8x1664xf32> -> vector<8x1664xf32>
    %35 = math.tanh %34 : vector<8x1664xf32>
    %cst_26 = arith.constant dense<0.000000e+00> : vector<8x128xf32>
    %36 = tpu.matmul %35, %1, %cst_26 {dimension_numbers = #tpu.dot_dimension_numbers<[1], [0], [0], [1], [0, 0, 1, 1], [], []>} : vector<8x1664xf32>, vector<1664x128xf32>, vector<8x128xf32> -> vector<8x128xf32>
    %37 = vector.broadcast %2 : vector<1x128xf32> to vector<8x128xf32>
    %38 = arith.addf %36, %37 : vector<8x128xf32>
    %39 = math.tanh %38 : vector<8x128xf32>
    %cst_27 = arith.constant dense<0.000000e+00> : vector<8x128xf32>
    %40 = tpu.matmul %39, %3, %cst_27 {dimension_numbers = #tpu.dot_dimension_numbers<[1], [0], [0], [1], [0, 0, 1, 1], [], []>} : vector<8x128xf32>, vector<128x128xf32>, vector<8x128xf32> -> vector<8x128xf32>
    %41 = vector.broadcast %4 : vector<1x128xf32> to vector<8x128xf32>
    %42 = arith.addf %40, %41 : vector<8x128xf32>
    %cst_28 = arith.constant 0.000000e+00 : f32
    %43 = vector.broadcast %cst_28 : f32 to vector<8x128xf32>
    %44 = arith.maximumf %42, %43 : vector<8x128xf32>
    %cst_29 = arith.constant dense<0.000000e+00> : vector<8x128xf32>
    %45 = tpu.matmul %44, %5, %cst_29 {dimension_numbers = #tpu.dot_dimension_numbers<[1], [0], [0], [1], [0, 0, 1, 1], [], []>} : vector<8x128xf32>, vector<128x128xf32>, vector<8x128xf32> -> vector<8x128xf32>
    %46 = vector.broadcast %6 : vector<1x128xf32> to vector<8x128xf32>
    %47 = arith.addf %45, %46 : vector<8x128xf32>
    %cst_30 = arith.constant dense<0xFF800000> : vector<8xf32>
    %48 = vector.multi_reduction <maximumf>, %47, %cst_30 [1] : vector<8x128xf32> to vector<8xf32>
    %49 = vector.shape_cast %48 : vector<8xf32> to vector<8x1xf32>
    %50 = vector.broadcast %49 : vector<8x1xf32> to vector<8x128xf32>
    %51 = arith.subf %47, %50 : vector<8x128xf32>
    %52 = math.exp %51 : vector<8x128xf32>
    %cst_31 = arith.constant dense<0.000000e+00> : vector<8xf32>
    %53 = vector.multi_reduction <add>, %52, %cst_31 [1] : vector<8x128xf32> to vector<8xf32>
    %54 = vector.shape_cast %53 : vector<8xf32> to vector<8x1xf32>
    %55 = math.log %54 : vector<8x1xf32>
    %56 = vector.broadcast %55 : vector<8x1xf32> to vector<8x128xf32>
    %57 = arith.subf %51, %56 : vector<8x128xf32>
    %c0_32 = arith.constant 0 : index
    %c0_33 = arith.constant 0 : index
    %58 = vector.load %arg11[%c0_32, %c0_33] : memref<8x128xf32, #tpu.memory_space<vmem>>, vector<8x128xf32>
    tpu.vector_store %arg11[%c0_32, %c0_33], %57 {strides = array<i32>} : memref<8x128xf32, #tpu.memory_space<vmem>>, vector<8x128xf32>,
    return
  }
  func.func @transform_0(%arg0: i32) -> (i32, i32) {
    %c0_i32 = arith.constant 0 : i32
    %c0_i32_0 = arith.constant 0 : i32
    return %arg0, %c0_i32 : i32, i32
  }
  func.func @transform_1(%arg0: i32) -> (i32, i32) {
    %c0_i32 = arith.constant 0 : i32
    %c0_i32_0 = arith.constant 0 : i32
    return %arg0, %c0_i32 : i32, i32
  }
  func.func @transform_2(%arg0: i32) -> (i32, i32) {
    %c0_i32 = arith.constant 0 : i32
    %c0_i32_0 = arith.constant 0 : i32
    %c0_i32_1 = arith.constant 0 : i32
    return %c0_i32, %c0_i32_0 : i32, i32
  }
  func.func @transform_3(%arg0: i32) -> (i32, i32) {
    %c0_i32 = arith.constant 0 : i32
    %c0_i32_0 = arith.constant 0 : i32
    %c0_i32_1 = arith.constant 0 : i32
    return %c0_i32, %c0_i32_0 : i32, i32
  }
  func.func @transform_4(%arg0: i32) -> (i32, i32) {
    %c0_i32 = arith.constant 0 : i32
    %c0_i32_0 = arith.constant 0 : i32
    %c0_i32_1 = arith.constant 0 : i32
    return %c0_i32, %c0_i32_0 : i32, i32
  }
  func.func @transform_5(%arg0: i32) -> (i32, i32) {
    %c0_i32 = arith.constant 0 : i32
    %c0_i32_0 = arith.constant 0 : i32
    %c0_i32_1 = arith.constant 0 : i32
    return %c0_i32, %c0_i32_0 : i32, i32
  }
  func.func @transform_6(%arg0: i32) -> (i32, i32) {
    %c0_i32 = arith.constant 0 : i32
    %c0_i32_0 = arith.constant 0 : i32
    %c0_i32_1 = arith.constant 0 : i32
    return %c0_i32, %c0_i32_0 : i32, i32
  }
  func.func @transform_7(%arg0: i32) -> (i32, i32) {
    %c0_i32 = arith.constant 0 : i32
    %c0_i32_0 = arith.constant 0 : i32
    %c0_i32_1 = arith.constant 0 : i32
    return %c0_i32, %c0_i32_0 : i32, i32
  }
  func.func @transform_8(%arg0: i32) -> (i32, i32) {
    %c0_i32 = arith.constant 0 : i32
    %c0_i32_0 = arith.constant 0 : i32
    %c0_i32_1 = arith.constant 0 : i32
    return %c0_i32, %c0_i32_0 : i32, i32
  }
  func.func @transform_9(%arg0: i32) -> (i32, i32) {
    %c0_i32 = arith.constant 0 : i32
    %c0_i32_0 = arith.constant 0 : i32
    return %arg0, %c0_i32 : i32, i32
  }
  func.func @transform_10(%arg0: i32) -> (i32, i32) {
    %c0_i32 = arith.constant 0 : i32
    %c0_i32_0 = arith.constant 0 : i32
    return %arg0, %c0_i32 : i32, i32
  }
}

module attributes {stable_mosaic.version = 11 : i64} {
  func.func @_fused_twin_kernel(%arg0: i32, %arg1: memref<8x256xf32, #tpu.memory_space<vmem>>, %arg2: memref<8x256xf32, #tpu.memory_space<vmem>>, %arg3: memref<256x1664xf32, #tpu.memory_space<vmem>>, %arg4: memref<1664x128xf32, #tpu.memory_space<vmem>>, %arg5: memref<1x128xf32, #tpu.memory_space<vmem>>, %arg6: memref<128x128xf32, #tpu.memory_space<vmem>>, %arg7: memref<1x128xf32, #tpu.memory_space<vmem>>, %arg8: memref<128x128xf32, #tpu.memory_space<vmem>>, %arg9: memref<1x128xf32, #tpu.memory_space<vmem>>, %arg10: memref<8x128xf32, #tpu.memory_space<vmem>>, %arg11: memref<8x128xf32, #tpu.memory_space<vmem>>) attributes {dimension_semantics = [#tpu.dimension_semantics<parallel>], iteration_bounds = array<i64: 1>, scalar_prefetch = 0 : i64, scratch_operands = 0 : i64, tpu.core_type = #tpu.core_type<tc>, window_params = [{transform_indices = @transform_0, window_bounds = array<i64: 8, 256>}, {transform_indices = @transform_1, window_bounds = array<i64: 8, 256>}, {pipeline_mode = #tpu.pipeline_mode<synchronous>, transform_indices = @transform_2, window_bounds = array<i64: 256, 1664>}, {pipeline_mode = #tpu.pipeline_mode<synchronous>, transform_indices = @transform_3, window_bounds = array<i64: 1664, 128>}, {pipeline_mode = #tpu.pipeline_mode<synchronous>, transform_indices = @transform_4, window_bounds = array<i64: 1, 128>}, {pipeline_mode = #tpu.pipeline_mode<synchronous>, transform_indices = @transform_5, window_bounds = array<i64: 128, 128>}, {pipeline_mode = #tpu.pipeline_mode<synchronous>, transform_indices = @transform_6, window_bounds = array<i64: 1, 128>}, {pipeline_mode = #tpu.pipeline_mode<synchronous>, transform_indices = @transform_7, window_bounds = array<i64: 128, 128>}, {pipeline_mode = #tpu.pipeline_mode<synchronous>, transform_indices = @transform_8, window_bounds = array<i64: 1, 128>}, {transform_indices = @transform_9, window_bounds = array<i64: 8, 128>}, {transform_indices = @transform_10, window_bounds = array<i64: 8, 128>}]} {
    %c0 = arith.constant 0 : index
    %c0_0 = arith.constant 0 : index
    %0 = vector.load %arg3[%c0, %c0_0] : memref<256x1664xf32, #tpu.memory_space<vmem>>, vector<256x1664xf32>
    %c0_1 = arith.constant 0 : index
    %c0_2 = arith.constant 0 : index
    %1 = vector.load %arg4[%c0_1, %c0_2] : memref<1664x128xf32, #tpu.memory_space<vmem>>, vector<1664x128xf32>
    %c0_3 = arith.constant 0 : index
    %c0_4 = arith.constant 0 : index
    %2 = vector.load %arg5[%c0_3, %c0_4] : memref<1x128xf32, #tpu.memory_space<vmem>>, vector<1x128xf32>
    %c0_5 = arith.constant 0 : index
    %c0_6 = arith.constant 0 : index
    %3 = vector.load %arg6[%c0_5, %c0_6] : memref<128x128xf32, #tpu.memory_space<vmem>>, vector<128x128xf32>
    %c0_7 = arith.constant 0 : index
    %c0_8 = arith.constant 0 : index
    %4 = vector.load %arg7[%c0_7, %c0_8] : memref<1x128xf32, #tpu.memory_space<vmem>>, vector<1x128xf32>
    %c0_9 = arith.constant 0 : index
    %c0_10 = arith.constant 0 : index
    %5 = vector.load %arg8[%c0_9, %c0_10] : memref<128x128xf32, #tpu.memory_space<vmem>>, vector<128x128xf32>
    %c0_11 = arith.constant 0 : index
    %c0_12 = arith.constant 0 : index
    %6 = vector.load %arg9[%c0_11, %c0_12] : memref<1x128xf32, #tpu.memory_space<vmem>>, vector<1x128xf32>
    %c0_13 = arith.constant 0 : index
    %c0_14 = arith.constant 0 : index
    %7 = vector.load %arg1[%c0_13, %c0_14] : memref<8x256xf32, #tpu.memory_space<vmem>>, vector<8x256xf32>
    %cst = arith.constant dense<0.000000e+00> : vector<8x1664xf32>
    %8 = tpu.matmul %7, %0, %cst {dimension_numbers = #tpu.dot_dimension_numbers<[1], [0], [0], [1], [0, 0, 1, 1], [], []>} : vector<8x256xf32>, vector<256x1664xf32>, vector<8x1664xf32> -> vector<8x1664xf32>
    %9 = math.tanh %8 : vector<8x1664xf32>
    %cst_15 = arith.constant dense<0.000000e+00> : vector<8x128xf32>
    %10 = tpu.matmul %9, %1, %cst_15 {dimension_numbers = #tpu.dot_dimension_numbers<[1], [0], [0], [1], [0, 0, 1, 1], [], []>} : vector<8x1664xf32>, vector<1664x128xf32>, vector<8x128xf32> -> vector<8x128xf32>
    %11 = vector.broadcast %2 : vector<1x128xf32> to vector<8x128xf32>
    %12 = arith.addf %10, %11 : vector<8x128xf32>
    %13 = math.tanh %12 : vector<8x128xf32>
    %cst_16 = arith.constant dense<0.000000e+00> : vector<8x128xf32>
    %14 = tpu.matmul %13, %3, %cst_16 {dimension_numbers = #tpu.dot_dimension_numbers<[1], [0], [0], [1], [0, 0, 1, 1], [], []>} : vector<8x128xf32>, vector<128x128xf32>, vector<8x128xf32> -> vector<8x128xf32>
    %15 = vector.broadcast %4 : vector<1x128xf32> to vector<8x128xf32>
    %16 = arith.addf %14, %15 : vector<8x128xf32>
    %cst_17 = arith.constant 0.000000e+00 : f32
    %17 = vector.broadcast %cst_17 : f32 to vector<8x128xf32>
    %18 = arith.maximumf %16, %17 : vector<8x128xf32>
    %cst_18 = arith.constant dense<0.000000e+00> : vector<8x128xf32>
    %19 = tpu.matmul %18, %5, %cst_18 {dimension_numbers = #tpu.dot_dimension_numbers<[1], [0], [0], [1], [0, 0, 1, 1], [], []>} : vector<8x128xf32>, vector<128x128xf32>, vector<8x128xf32> -> vector<8x128xf32>
    %20 = vector.broadcast %6 : vector<1x128xf32> to vector<8x128xf32>
    %21 = arith.addf %19, %20 : vector<8x128xf32>
    %cst_19 = arith.constant dense<0xFF800000> : vector<8xf32>
    %22 = vector.multi_reduction <maximumf>, %21, %cst_19 [1] : vector<8x128xf32> to vector<8xf32>
    %23 = vector.shape_cast %22 : vector<8xf32> to vector<8x1xf32>
    %24 = vector.broadcast %23 : vector<8x1xf32> to vector<8x128xf32>
    %25 = arith.subf %21, %24 : vector<8x128xf32>
    %26 = math.exp %25 : vector<8x128xf32>
    %cst_20 = arith.constant dense<0.000000e+00> : vector<8xf32>
    %27 = vector.multi_reduction <add>, %26, %cst_20 [1] : vector<8x128xf32> to vector<8xf32>
    %28 = vector.shape_cast %27 : vector<8xf32> to vector<8x1xf32>
    %29 = math.log %28 : vector<8x1xf32>
    %30 = vector.broadcast %29 : vector<8x1xf32> to vector<8x128xf32>
    %31 = arith.subf %25, %30 : vector<8x128xf32>
    %c0_21 = arith.constant 0 : index
    %c0_22 = arith.constant 0 : index
    %32 = vector.load %arg10[%c0_21, %c0_22] : memref<8x128xf32, #tpu.memory_space<vmem>>, vector<8x128xf32>
    tpu.vector_store %arg10[%c0_21, %c0_22], %31 {strides = array<i32>} : memref<8x128xf32, #tpu.memory_space<vmem>>, vector<8x128xf32>,
    %c0_23 = arith.constant 0 : index
    %c0_24 = arith.constant 0 : index
    %33 = vector.load %arg2[%c0_23, %c0_24] : memref<8x256xf32, #tpu.memory_space<vmem>>, vector<8x256xf32>
    %cst_25 = arith.constant dense<0.000000e+00> : vector<8x1664xf32>
    %34 = tpu.matmul %33, %0, %cst_25 {dimension_numbers = #tpu.dot_dimension_numbers<[1], [0], [0], [1], [0, 0, 1, 1], [], []>} : vector<8x256xf32>, vector<256x1664xf32>, vector<8x1664xf32> -> vector<8x1664xf32>
    %35 = math.tanh %34 : vector<8x1664xf32>
    %cst_26 = arith.constant dense<0.000000e+00> : vector<8x128xf32>
    %36 = tpu.matmul %35, %1, %cst_26 {dimension_numbers = #tpu.dot_dimension_numbers<[1], [0], [0], [1], [0, 0, 1, 1], [], []>} : vector<8x1664xf32>, vector<1664x128xf32>, vector<8x128xf32> -> vector<8x128xf32>
    %37 = vector.broadcast %2 : vector<1x128xf32> to vector<8x128xf32>
    %38 = arith.addf %36, %37 : vector<8x128xf32>
    %39 = math.tanh %38 : vector<8x128xf32>
    %cst_27 = arith.constant dense<0.000000e+00> : vector<8x128xf32>
    %40 = tpu.matmul %39, %3, %cst_27 {dimension_numbers = #tpu.dot_dimension_numbers<[1], [0], [0], [1], [0, 0, 1, 1], [], []>} : vector<8x128xf32>, vector<128x128xf32>, vector<8x128xf32> -> vector<8x128xf32>
    %41 = vector.broadcast %4 : vector<1x128xf32> to vector<8x128xf32>
    %42 = arith.addf %40, %41 : vector<8x128xf32>
    %cst_28 = arith.constant 0.000000e+00 : f32
    %43 = vector.broadcast %cst_28 : f32 to vector<8x128xf32>
    %44 = arith.maximumf %42, %43 : vector<8x128xf32>
    %cst_29 = arith.constant dense<0.000000e+00> : vector<8x128xf32>
    %45 = tpu.matmul %44, %5, %cst_29 {dimension_numbers = #tpu.dot_dimension_numbers<[1], [0], [0], [1], [0, 0, 1, 1], [], []>} : vector<8x128xf32>, vector<128x128xf32>, vector<8x128xf32> -> vector<8x128xf32>
    %46 = vector.broadcast %6 : vector<1x128xf32> to vector<8x128xf32>
    %47 = arith.addf %45, %46 : vector<8x128xf32>
    %cst_30 = arith.constant dense<0xFF800000> : vector<8xf32>
    %48 = vector.multi_reduction <maximumf>, %47, %cst_30 [1] : vector<8x128xf32> to vector<8xf32>
    %49 = vector.shape_cast %48 : vector<8xf32> to vector<8x1xf32>
    %50 = vector.broadcast %49 : vector<8x1xf32> to vector<8x128xf32>
    %51 = arith.subf %47, %50 : vector<8x128xf32>
    %52 = math.exp %51 : vector<8x128xf32>
    %cst_31 = arith.constant dense<0.000000e+00> : vector<8xf32>
    %53 = vector.multi_reduction <add>, %52, %cst_31 [1] : vector<8x128xf32> to vector<8xf32>
    %54 = vector.shape_cast %53 : vector<8xf32> to vector<8x1xf32>
    %55 = math.log %54 : vector<8x1xf32>
    %56 = vector.broadcast %55 : vector<8x1xf32> to vector<8x128xf32>
    %57 = arith.subf %51, %56 : vector<8x128xf32>
    %c0_32 = arith.constant 0 : index
    %c0_33 = arith.constant 0 : index
    %58 = vector.load %arg11[%c0_32, %c0_33] : memref<8x128xf32, #tpu.memory_space<vmem>>, vector<8x128xf32>
    tpu.vector_store %arg11[%c0_32, %c0_33], %57 {strides = array<i32>} : memref<8x128xf32, #tpu.memory_space<vmem>>, vector<8x128xf32>,
    return
  }
  func.func @transform_0(%arg0: i32) -> (i32, i32) {
    %c0_i32 = arith.constant 0 : i32
    %c0_i32_0 = arith.constant 0 : i32
    return %arg0, %c0_i32 : i32, i32
  }
  func.func @transform_1(%arg0: i32) -> (i32, i32) {
    %c0_i32 = arith.constant 0 : i32
    %c0_i32_0 = arith.constant 0 : i32
    return %arg0, %c0_i32 : i32, i32
  }
  func.func @transform_2(%arg0: i32) -> (i32, i32) {
    %c0_i32 = arith.constant 0 : i32
    %c0_i32_0 = arith.constant 0 : i32
    %c0_i32_1 = arith.constant 0 : i32
    return %c0_i32, %c0_i32_0 : i32, i32
  }
  func.func @transform_3(%arg0: i32) -> (i32, i32) {
    %c0_i32 = arith.constant 0 : i32
    %c0_i32_0 = arith.constant 0 : i32
    %c0_i32_1 = arith.constant 0 : i32
    return %c0_i32, %c0_i32_0 : i32, i32
  }
  func.func @transform_4(%arg0: i32) -> (i32, i32) {
    %c0_i32 = arith.constant 0 : i32
    %c0_i32_0 = arith.constant 0 : i32
    %c0_i32_1 = arith.constant 0 : i32
    return %c0_i32, %c0_i32_0 : i32, i32
  }
  func.func @transform_5(%arg0: i32) -> (i32, i32) {
    %c0_i32 = arith.constant 0 : i32
    %c0_i32_0 = arith.constant 0 : i32
    %c0_i32_1 = arith.constant 0 : i32
    return %c0_i32, %c0_i32_0 : i32, i32
  }
  func.func @transform_6(%arg0: i32) -> (i32, i32) {
    %c0_i32 = arith.constant 0 : i32
    %c0_i32_0 = arith.constant 0 : i32
    %c0_i32_1 = arith.constant 0 : i32
    return %c0_i32, %c0_i32_0 : i32, i32
  }
  func.func @transform_7(%arg0: i32) -> (i32, i32) {
    %c0_i32 = arith.constant 0 : i32
    %c0_i32_0 = arith.constant 0 : i32
    %c0_i32_1 = arith.constant 0 : i32
    return %c0_i32, %c0_i32_0 : i32, i32
  }
  func.func @transform_8(%arg0: i32) -> (i32, i32) {
    %c0_i32 = arith.constant 0 : i32
    %c0_i32_0 = arith.constant 0 : i32
    %c0_i32_1 = arith.constant 0 : i32
    return %c0_i32, %c0_i32_0 : i32, i32
  }
  func.func @transform_9(%arg0: i32) -> (i32, i32) {
    %c0_i32 = arith.constant 0 : i32
    %c0_i32_0 = arith.constant 0 : i32
    return %arg0, %c0_i32 : i32, i32
  }
  func.func @transform_10(%arg0: i32) -> (i32, i32) {
    %c0_i32 = arith.constant 0 : i32
    %c0_i32_0 = arith.constant 0 : i32
    return %arg0, %c0_i32 : i32, i32
  }
}

</mosaic_0001>

<bundles_post_ra>
// kernel: tpu_custom_call.1
= control target key start
LH: loop header
LB: loop body
LE: loop exit
PB: predicated region body
PF: predicated region fallthrough
CT: control target
= control target key end

     0   :  { %16 = vsyncpa [#allocation3], 0  ;;  %s5215_s0 = inlined_call_operand.hbm [shape: f32[8,256], index: 0, kind: input, shape index: {}]   ;;  %s5216_s1 = inlined_call_operand.hbm [shape: f32[8,256], index: 1, kind: input, shape index: {}]   ;;  %s5217_s2 = inlined_call_operand.hbm [shape: f32[256,1664], index: 2, kind: input, shape index: {}]   ;;  %s5218_s3 = inlined_call_operand.hbm [shape: f32[1664,128], index: 3, kind: input, shape index: {}]   ;;  %s5219_s4 = inlined_call_operand.hbm [shape: f32[1,128], index: 4, kind: input, shape index: {}]   ;;  %s5220_s5 = inlined_call_operand.hbm [shape: f32[128,128], index: 5, kind: input, shape index: {}]   ;;  %s5221_s6 = inlined_call_operand.hbm [shape: f32[1,128], index: 6, kind: input, shape index: {}]   ;;  %s5222_s7 = inlined_call_operand.hbm [shape: f32[128,128], index: 7, kind: input, shape index: {}]   ;;  %s5223_s8 = inlined_call_operand.hbm [shape: f32[1,128], index: 8, kind: input, shape index: {}]   ;;  %s5224_s9 = inlined_call_operand.hbm [shape: f32[8,128], index: 9, kind: output, shape index: {0}]   ;;  %s5225_s10 = inlined_call_operand.hbm [shape: f32[8,128], index: 10, kind: output, shape index: {1}]  }
   0x1   :  { %17 = vsyncpa [#allocation6], 0 }
   0x2   :  { %18 = vsyncpa [#allocation9], 0 }
   0x3   :  { %19 = vsyncpa [#allocation12], 0 }
   0x4   :  { %20 = vsyncpa [#allocation15], 0 }
   0x5   :  { %21 = vsyncpa [#allocation4], 0 }
   0x6   :  { %22 = vsyncpa [#allocation19], 0  ;;  %s4946_s13 = smov [#allocation5]   ;;  %s4947_s15 = smov [#allocation8]  }
   0x7   :  { %s39_s14 = sshll.u32 %s4946_s13, 4  ;;  %s60_s16 = sshll.u32 %s4947_s15, 4  ;;  %s40_s14 = int_to_ptr.vmem [resolvable:$true] %s39_s14  ;;  %s61_s16 = int_to_ptr.vmem [resolvable:$true] %s60_s16 }
   0x8   :  { %s4720_s17 = scalar_lea.vmem %s40_s14, 256  ;;  %p4725_p1 = scmp.lt.s32.totalorder %s40_s14, %s40_s14 }
   0x9   :  { %p4721_p0 = scmp.ne.s32.totalorder %s40_s14, %s4720_s17  ;;  %p4726_p2 = scmp.lt.s32.totalorder %s4720_s17, %s4720_s17 }
   0xb   :  { %p4727_p3 = por %p4726_p2, %p4725_p1 }
   0xd   :  { %p4728_p4 = pnand %p4727_p3, %p4721_p0 }
   0xf   :  { %4731 = shalt.err (!%p4728_p4)
}
  0x10   :  { %42 = dma.hbm_to_vmem [thread:$0]  %s5216_s1, 256, %s40_s14, [#allocation6]  }
  0x11   :  { %s4740_s20 = scalar_lea.vmem %s61_s16, 26624  ;;  %p4745_p6 = scmp.lt.s32.totalorder %s61_s16, %s61_s16 }
  0x12   :  { %p4741_p5 = scmp.ne.s32.totalorder %s61_s16, %s4740_s20  ;;  %p4746_p7 = scmp.lt.s32.totalorder %s4740_s20, %s4740_s20 }
  0x14   :  { %p4747_p8 = por %p4746_p7, %p4745_p6 }
  0x16   :  { %p4748_p9 = pnand %p4747_p8, %p4741_p5 }
  0x18   :  { %4751 = shalt.err (!%p4748_p9)
}
  0x19   :  { %s4948_s21 = smov 128   ;;  %s4949_s22 = smov 8  }
  0x1a   :  { %66 = dma.hbm_to_vmem [thread:$0]  %s5218_s3, 26624, %s61_s16, [#allocation9], %s4948_s21, %s4948_s21, %s4949_s22  }
  0x1b   :  { %s4950_s25 = smov [#allocation11]   ;;  %s4951_s27 = smov [#allocation14]  }
  0x1c   :  { %s82_s26 = sshll.u32 %s4950_s25, 4  ;;  %s104_s28 = sshll.u32 %s4951_s27, 4  ;;  %s83_s26 = int_to_ptr.vmem [resolvable:$true] %s82_s26  ;;  %s105_s28 = int_to_ptr.vmem [resolvable:$true] %s104_s28 }
  0x1d   :  { %s4760_s1 = scalar_lea.vmem %s83_s26, 2048  ;;  %p4765_p11 = scmp.lt.s32.totalorder %s83_s26, %s83_s26 }
  0x1e   :  { %p4761_p10 = scmp.ne.s32.totalorder %s83_s26, %s4760_s1  ;;  %p4766_p12 = scmp.lt.s32.totalorder %s4760_s1, %s4760_s1 }
  0x20   :  { %p4767_p13 = por %p4766_p12, %p4765_p11 }
  0x22   :  { %p4768_p0 = pnand %p4767_p13, %p4761_p10 }
  0x24   :  { %4771 = shalt.err (!%p4768_p0)
}
  0x25   :  { %88 = dma.hbm_to_vmem [thread:$0]  %s5220_s5, 2048, %s83_s26, [#allocation12], %s4948_s21, %s4948_s21, %s4949_s22  }
  0x26   :  { %s4780_s11 = scalar_lea.vmem %s105_s28, 2048  ;;  %p4785_p2 = scmp.lt.s32.totalorder %s105_s28, %s105_s28 }
  0x27   :  { %p4781_p1 = scmp.ne.s32.totalorder %s105_s28, %s4780_s11  ;;  %p4786_p3 = scmp.lt.s32.totalorder %s4780_s11, %s4780_s11 }
  0x29   :  { %p4787_p4 = por %p4786_p3, %p4785_p2 }
  0x2b   :  { %p4788_p5 = pnand %p4787_p4, %p4781_p1 }
  0x2d   :  { %4791 = shalt.err (!%p4788_p5)
}
  0x2e   :  { %110 = dma.hbm_to_vmem [thread:$0]  %s5222_s7, 2048, %s105_s28, [#allocation15], %s4948_s21, %s4948_s21, %s4949_s22  }
  0x2f   :  { %s4952_s13 = smov [#allocation2]   ;;  %s4953_s15 = smov [#allocation7]  }
  0x30   :  { %s29_s14 = sshll.u32 %s4952_s13, 4  ;;  %s48_s16 = sshll.u32 %s4953_s15, 4  ;;  %s30_s14 = int_to_ptr.vmem [resolvable:$true] %s29_s14  ;;  %s49_s16 = int_to_ptr.vmem [resolvable:$true] %s48_s16 }
  0x31   :  { %s4800_s17 = scalar_lea.vmem %s30_s14, 256  ;;  %p4805_p7 = scmp.lt.s32.totalorder %s30_s14, %s30_s14 }
  0x32   :  { %p4801_p6 = scmp.ne.s32.totalorder %s30_s14, %s4800_s17  ;;  %p4806_p8 = scmp.lt.s32.totalorder %s4800_s17, %s4800_s17 }
  0x34   :  { %p4807_p9 = por %p4806_p8, %p4805_p7 }
  0x36   :  { %p4808_p10 = pnand %p4807_p9, %p4801_p6 }
  0x38   :  { %4811 = shalt.err (!%p4808_p10)
}
  0x39   :  { %32 = dma.hbm_to_vmem [thread:$0]  %s5215_s0, 256, %s30_s14, [#allocation3]  }
  0x3a   :  { %s4820_s19 = scalar_lea.vmem %s49_s16, 53248  ;;  %p4825_p12 = scmp.lt.s32.totalorder %s49_s16, %s49_s16 }
  0x3b   :  { %p4821_p11 = scmp.ne.s32.totalorder %s49_s16, %s4820_s19  ;;  %p4826_p13 = scmp.lt.s32.totalorder %s4820_s19, %s4820_s19 }
  0x3d   :  { %p4827_p0 = por %p4826_p13, %p4825_p12 }
  0x3f   :  { %p4828_p1 = pnand %p4827_p0, %p4821_p11 }
  0x41   :  { %4831 = shalt.err (!%p4828_p1)
}
  0x42   :  { %s4954_s7 = smov 1664   ;;  %s4955_s20 = smov 104  }
  0x43   :  { %54 = dma.hbm_to_vmem [thread:$0]  %s5217_s2, 53248, %s49_s16, [#allocation6], %s4954_s7, %s4954_s7, %s4955_s20  }
  0x44   :  { %s4956_s23 = smov [#allocation10]   ;;  %s4957_s25 = smov [#allocation13]  }
  0x45   :  { %s73_s24 = sshll.u32 %s4956_s23, 4  ;;  %s95_s26 = sshll.u32 %s4957_s25, 4  ;;  %s74_s24 = int_to_ptr.vmem [resolvable:$true] %s73_s24  ;;  %s96_s26 = int_to_ptr.vmem [resolvable:$true] %s95_s26 }
  0x46   :  { %s4840_s0 = scalar_lea.vmem %s74_s24, 16  ;;  %s4844_s27 = scalar_lea.vmem %s74_s24, 32 }
  0x47   :  { %p4841_p2 = scmp.ne.s32.totalorder %s74_s24, %s4840_s0  ;;  %p4845_p3 = scmp.lt.s32.totalorder %s74_s24, %s74_s24 }
  0x48   :  { %p4846_p4 = scmp.lt.s32.totalorder %s4844_s27, %s4840_s0 }
  0x4a   :  { %p4847_p5 = por %p4846_p4, %p4845_p3 }
  0x4c   :  { %p4848_p6 = pnand %p4847_p5, %p4841_p2 }
  0x4e   :  { %4851 = shalt.err (!%p4848_p6)
}
  0x4f   :  { %76 = dma.hbm_to_vmem [thread:$0]  %s5219_s4, 16, %s74_s24, [#allocation9]  }
  0x50   :  { %s4860_s29 = scalar_lea.vmem %s96_s26, 16  ;;  %s4864_s2 = scalar_lea.vmem %s96_s26, 32 }
  0x51   :  { %p4861_p7 = scmp.ne.s32.totalorder %s96_s26, %s4860_s29  ;;  %p4865_p8 = scmp.lt.s32.totalorder %s96_s26, %s96_s26 }
  0x52   :  { %p4866_p9 = scmp.lt.s32.totalorder %s4864_s2, %s4860_s29 }
  0x54   :  { %p4867_p10 = por %p4866_p9, %p4865_p8 }
  0x56   :  { %p4868_p11 = pnand %p4867_p10, %p4861_p7 }
  0x58   :  { %4871 = shalt.err (!%p4868_p11)
}
  0x59   :  { %98 = dma.hbm_to_vmem [thread:$0]  %s5221_s6, 16, %s96_s26, [#allocation12]  }
  0x5a   :  { %s4958_s3 = smov [#allocation16]  }
  0x5b   :  { %s117_s12 = sshll.u32 %s4958_s3, 4  ;;  %s118_s12 = int_to_ptr.vmem [resolvable:$true] %s117_s12 }
  0x5c   :  { %s4880_s13 = scalar_lea.vmem %s118_s12, 16  ;;  %s4884_s14 = scalar_lea.vmem %s118_s12, 32 }
  0x5d   :  { %p4881_p12 = scmp.ne.s32.totalorder %s118_s12, %s4880_s13  ;;  %p4885_p13 = scmp.lt.s32.totalorder %s118_s12, %s118_s12 }
  0x5e   :  { %p4886_p0 = scmp.lt.s32.totalorder %s4884_s14, %s4880_s13 }
  0x60   :  { %p4887_p1 = por %p4886_p0, %p4885_p13 }
  0x62   :  { %p4888_p2 = pnand %p4887_p1, %p4881_p12 }
  0x64   :  { %4891 = shalt.err (!%p4888_p2)
}
  0x65   :  { %120 = dma.hbm_to_vmem [thread:$0]  %s5223_s8, 16, %s118_s12, [#allocation15]  }
  0x66   :  { %4932 = dma.done.wait [#allocation3], 256  }
  0x67   :  { %4933 = vsyncadd [#allocation3], 4294967040 }
  0x68   :  { %4934 = dma.done.wait [#allocation6], 53504  }
  0x69   :  { %4935 = vsyncadd [#allocation6], 4294913792 }
  0x6a   :  { %4936 = dma.done.wait [#allocation9], 26640  }
  0x6b   :  { %4937 = vsyncadd [#allocation9], 4294940656 }
  0x6c   :  { %4938 = dma.done.wait [#allocation12], 2064  }
  0x6d   :  { %4939 = vsyncadd [#allocation12], 4294965232 }
  0x6e   :  { %4940 = dma.done.wait [#allocation15], 2064  }
  0x6f   :  { %4941 = vsyncadd [#allocation15], 4294965232  ;;  %v344_v0 = vld [vmem:[#allocation7 + $0x620] sm:$0xff]  ;;  %v343_v1 = vld [vmem:[#allocation7 + $0x618] sm:$0xff]  ;;  %vm4960_vm0 = vmmov 0   ;;  %s4961_s6 = smov [#allocation17]  }
  0x70   :  { %v331_v2 = vld [vmem:[#allocation7 + $0x5b8] sm:$0xff]  ;;  %809 = vmatprep.subr.mxu0 %v344_v0  ;;  %v346_v3 = vld [vmem:[#allocation7 + $0x630] sm:$0xff]  ;;  %v345_v5 = vld [vmem:[#allocation7 + $0x628] sm:$0xff]  ;;  %s3139_s8 = sshll.u32 %s4961_s6, 4  ;;  %s3140_s8 = int_to_ptr.vmem [resolvable:$true] %s3139_s8 }
  0x71   :  { %v330_v4 = vld [vmem:[#allocation7 + $0x5b0] sm:$0xff]  ;;  %810 = vmatpush1.msra.mxu0 %v343_v1  ;;  %880 = vmatprep.subr.mxu1 %v346_v3  ;;  %v333_v7 = vld [vmem:[#allocation7 + $0x5c8] sm:$0xff]  ;;  %v332_v9 = vld [vmem:[#allocation7 + $0x5c0] sm:$0xff]  ;;  %s4892_s16 = scalar_lea.vmem %s3140_s8, 128  ;;  %p4897_p4 = scmp.lt.s32.totalorder %s3140_s8, %s3140_s8 }
  0x72   :  { %v318_v6 = vld [vmem:[#allocation7 + $0x550] sm:$0xff]  ;;  %811 = vmatprep.subr.mxu0 %v331_v2  ;;  %881 = vmatpush1.msra.mxu1 %v345_v5  ;;  %v317_v8 = vld [vmem:[#allocation7 + $0x548] sm:$0xff]  ;;  %v320_v10 = vld [vmem:[#allocation7 + $0x560] sm:$0xff]  ;;  %p4893_p3 = scmp.ne.s32.totalorder %s3140_s8, %s4892_s16  ;;  %p4898_p5 = scmp.lt.s32.totalorder %s4892_s16, %s4892_s16 }
  0x73   :  { %812 = vmatpush1.msra.mxu0 %v330_v4  ;;  %882 = vmatprep.subr.mxu1 %v333_v7  ;;  %v305_v11 = vld [vmem:[#allocation7 + $0x4e8] sm:$0xff]  ;;  %v319_v12 = vld [vmem:[#allocation7 + $0x558] sm:$0xff]  ;;  %v304_v13 = vld [vmem:[#allocation7 + $0x4e0] sm:$0xff] }
  0x74   :  { %813 = vmatprep.subr.mxu0 %v318_v6  ;;  %883 = vmatpush1.msra.mxu1 %v332_v9  ;;  %v307_v14 = vld [vmem:[#allocation7 + $0x4f8] sm:$0xff]  ;;  %v292_v15 = vld [vmem:[#allocation7 + $0x480] sm:$0xff]  ;;  %v306_v16 = vld [vmem:[#allocation7 + $0x4f0] sm:$0xff]  ;;  %p4899_p6 = por %p4898_p5, %p4897_p4 }
  0x75   :  { %814 = vmatpush1.msra.mxu0 %v317_v8  ;;  %884 = vmatprep.subr.mxu1 %v320_v10  ;;  %v291_v17 = vld [vmem:[#allocation7 + $0x478] sm:$0xff]  ;;  %v294_v18 = vld [vmem:[#allocation7 + $0x490] sm:$0xff]  ;;  %v293_v20 = vld [vmem:[#allocation7 + $0x488] sm:$0xff] }
  0x76   :  { %815 = vmatprep.subr.mxu0 %v305_v11  ;;  %885 = vmatpush1.msra.mxu1 %v319_v12  ;;  %v279_v19 = vld [vmem:[#allocation7 + $0x418] sm:$0xff]  ;;  %v278_v21 = vld [vmem:[#allocation7 + $0x410] sm:$0xff]  ;;  %v281_v22 = vld [vmem:[#allocation7 + $0x428] sm:$0xff]  ;;  %p4900_p7 = pnand %p4899_p6, %p4893_p3 }
  0x77   :  { %816 = vmatpush1.msra.mxu0 %v304_v13  ;;  %886 = vmatprep.subr.mxu1 %v307_v14  ;;  %v266_v23 = vld [vmem:[#allocation7 + $0x3b0] sm:$0xff]  ;;  %v280_v24 = vld [vmem:[#allocation7 + $0x420] sm:$0xff]  ;;  %v265_v25 = vld [vmem:[#allocation7 + $0x3a8] sm:$0xff] }
  0x78   :  { %817 = vmatprep.subr.mxu0 %v292_v15  ;;  %887 = vmatpush1.msra.mxu1 %v306_v16  ;;  %v268_v26 = vld [vmem:[#allocation7 + $0x3c0] sm:$0xff]  ;;  %v253_v27 = vld [vmem:[#allocation7 + $0x348] sm:$0xff]  ;;  %v267_v28 = vld [vmem:[#allocation7 + $0x3b8] sm:$0xff] }
  0x79   :  { %818 = vmatpush1.msra.mxu0 %v291_v17  ;;  %888 = vmatprep.subr.mxu1 %v294_v18  ;;  %v252_v29 = vld [vmem:[#allocation7 + $0x340] sm:$0xff]  ;;  %v255_v30 = vld [vmem:[#allocation7 + $0x358] sm:$0xff]  ;;  %v254_v32 = vld [vmem:[#allocation7 + $0x350] sm:$0xff] }
  0x7a   :  { %819 = vmatprep.subr.mxu0 %v279_v19  ;;  %889 = vmatpush1.msra.mxu1 %v293_v20  ;;  %v240_v31 = vld [vmem:[#allocation7 + $0x2e0] sm:$0xff]  ;;  %v239_v33 = vld [vmem:[#allocation7 + $0x2d8] sm:$0xff]  ;;  %v242_v34 = vld [vmem:[#allocation7 + $0x2f0] sm:$0xff] }
  0x7b   :  { %820 = vmatpush1.msra.mxu0 %v278_v21  ;;  %890 = vmatprep.subr.mxu1 %v281_v22  ;;  %v227_v35 = vld [vmem:[#allocation7 + $0x278] sm:$0xff]  ;;  %v241_v36 = vld [vmem:[#allocation7 + $0x2e8] sm:$0xff]  ;;  %v226_v37 = vld [vmem:[#allocation7 + $0x270] sm:$0xff] }
  0x7c   :  { %821 = vmatprep.subr.mxu0 %v266_v23  ;;  %891 = vmatpush1.msra.mxu1 %v280_v24  ;;  %v229_v38 = vld [vmem:[#allocation7 + $0x288] sm:$0xff]  ;;  %v214_v39 = vld [vmem:[#allocation7 + $0x210] sm:$0xff]  ;;  %v228_v40 = vld [vmem:[#allocation7 + $0x280] sm:$0xff] }
  0x7d   :  { %822 = vmatpush1.msra.mxu0 %v265_v25  ;;  %892 = vmatprep.subr.mxu1 %v268_v26  ;;  %v213_v41 = vld [vmem:[#allocation7 + $0x208] sm:$0xff]  ;;  %v216_v42 = vld [vmem:[#allocation7 + $0x220] sm:$0xff]  ;;  %v215_v44 = vld [vmem:[#allocation7 + $0x218] sm:$0xff] }
  0x7e   :  { %823 = vmatprep.subr.mxu0 %v253_v27  ;;  %893 = vmatpush1.msra.mxu1 %v267_v28  ;;  %v201_v43 = vld [vmem:[#allocation7 + $0x1a8] sm:$0xff]  ;;  %v200_v45 = vld [vmem:[#allocation7 + $0x1a0] sm:$0xff]  ;;  %v203_v46 = vld [vmem:[#allocation7 + $0x1b8] sm:$0xff] }
  0x7f   :  { %824 = vmatpush1.msra.mxu0 %v252_v29  ;;  %894 = vmatprep.subr.mxu1 %v255_v30  ;;  %v188_v47 = vld [vmem:[#allocation7 + $0x140] sm:$0xff]  ;;  %v202_v48 = vld [vmem:[#allocation7 + $0x1b0] sm:$0xff]  ;;  %v187_v49 = vld [vmem:[#allocation7 + $0x138] sm:$0xff] }
  0x80   :  { %825 = vmatprep.subr.mxu0 %v240_v31  ;;  %895 = vmatpush1.msra.mxu1 %v254_v32  ;;  %v190_v50 = vld [vmem:[#allocation7 + $0x150] sm:$0xff]  ;;  %v175_v51 = vld [vmem:[#allocation7 + $0xd8] sm:$0xff]  ;;  %v189_v52 = vld [vmem:[#allocation7 + $0x148] sm:$0xff] }
  0x81   :  { %826 = vmatpush1.msra.mxu0 %v239_v33  ;;  %896 = vmatprep.subr.mxu1 %v242_v34  ;;  %v174_v53 = vld [vmem:[#allocation7 + $0xd0] sm:$0xff]  ;;  %v177_v54 = vld [vmem:[#allocation7 + $0xe8] sm:$0xff]  ;;  %v176_v56 = vld [vmem:[#allocation7 + $0xe0] sm:$0xff] }
  0x82   :  { %827 = vmatprep.subr.mxu0 %v227_v35  ;;  %897 = vmatpush1.msra.mxu1 %v241_v36  ;;  %v162_v55 = vld [vmem:[#allocation7 + $0x70] sm:$0xff]  ;;  %v161_v57 = vld [vmem:[#allocation7 + $0x68] sm:$0xff]  ;;  %v164_v58 = vld [vmem:[#allocation7 + $0x80] sm:$0xff] }
  0x83   :  { %828 = vmatpush1.msra.mxu0 %v226_v37  ;;  %898 = vmatprep.subr.mxu1 %v229_v38  ;;  %v149_v59 = vld [vmem:[#allocation7 + $0x8] sm:$0xff]  ;;  %v163_v60 = vld [vmem:[#allocation7 + $0x78] sm:$0xff]  ;;  %v148_v61 = vld [vmem:[#allocation7] sm:$0xff] }
  0x84   :  { %829 = vmatprep.subr.mxu0 %v214_v39  ;;  %899 = vmatpush1.msra.mxu1 %v228_v40  ;;  %v151_v62 = vld [vmem:[#allocation7 + $0x18] sm:$0xff]  ;;  %v552_v63 = vld [vmem:[#allocation7 + $0xca0] sm:$0xff]  ;;  %v150_v0 = vld [vmem:[#allocation7 + $0x10] sm:$0xff] }
  0x85   :  { %830 = vmatpush1.msra.mxu0 %v213_v41  ;;  %900 = vmatprep.subr.mxu1 %v216_v42  ;;  %v551_v1 = vld [vmem:[#allocation7 + $0xc98] sm:$0xff]  ;;  %v554_v2 = vld [vmem:[#allocation7 + $0xcb0] sm:$0xff]  ;;  %v553_v4 = vld [vmem:[#allocation7 + $0xca8] sm:$0xff] }
  0x86   :  { %831 = vmatprep.subr.mxu0 %v201_v43  ;;  %901 = vmatpush1.msra.mxu1 %v215_v44  ;;  %v539_v3 = vld [vmem:[#allocation7 + $0xc38] sm:$0xff]  ;;  %v538_v5 = vld [vmem:[#allocation7 + $0xc30] sm:$0xff]  ;;  %v541_v6 = vld [vmem:[#allocation7 + $0xc48] sm:$0xff] }
  0x87   :  { %832 = vmatpush1.msra.mxu0 %v200_v45  ;;  %902 = vmatprep.subr.mxu1 %v203_v46  ;;  %v526_v7 = vld [vmem:[#allocation7 + $0xbd0] sm:$0xff]  ;;  %v540_v8 = vld [vmem:[#allocation7 + $0xc40] sm:$0xff]  ;;  %v525_v9 = vld [vmem:[#allocation7 + $0xbc8] sm:$0xff] }
  0x88   :  { %833 = vmatprep.subr.mxu0 %v188_v47  ;;  %903 = vmatpush1.msra.mxu1 %v202_v48  ;;  %v528_v10 = vld [vmem:[#allocation7 + $0xbe0] sm:$0xff]  ;;  %v513_v11 = vld [vmem:[#allocation7 + $0xb68] sm:$0xff]  ;;  %v527_v12 = vld [vmem:[#allocation7 + $0xbd8] sm:$0xff] }
  0x89   :  { %834 = vmatpush1.msra.mxu0 %v187_v49  ;;  %904 = vmatprep.subr.mxu1 %v190_v50  ;;  %v512_v13 = vld [vmem:[#allocation7 + $0xb60] sm:$0xff]  ;;  %v515_v14 = vld [vmem:[#allocation7 + $0xb78] sm:$0xff]  ;;  %v514_v16 = vld [vmem:[#allocation7 + $0xb70] sm:$0xff] }
  0x8a   :  { %835 = vmatprep.subr.mxu0 %v175_v51  ;;  %905 = vmatpush1.msra.mxu1 %v189_v52  ;;  %v500_v15 = vld [vmem:[#allocation7 + $0xb00] sm:$0xff]  ;;  %v499_v17 = vld [vmem:[#allocation7 + $0xaf8] sm:$0xff]  ;;  %v502_v18 = vld [vmem:[#allocation7 + $0xb10] sm:$0xff] }
  0x8b   :  { %836 = vmatpush1.msra.mxu0 %v174_v53  ;;  %906 = vmatprep.subr.mxu1 %v177_v54  ;;  %v487_v19 = vld [vmem:[#allocation7 + $0xa98] sm:$0xff]  ;;  %v501_v20 = vld [vmem:[#allocation7 + $0xb08] sm:$0xff]  ;;  %v486_v21 = vld [vmem:[#allocation7 + $0xa90] sm:$0xff] }
  0x8c   :  { %837 = vmatprep.subr.mxu0 %v162_v55  ;;  %907 = vmatpush1.msra.mxu1 %v176_v56  ;;  %v489_v22 = vld [vmem:[#allocation7 + $0xaa8] sm:$0xff]  ;;  %v474_v23 = vld [vmem:[#allocation7 + $0xa30] sm:$0xff]  ;;  %v488_v24 = vld [vmem:[#allocation7 + $0xaa0] sm:$0xff] }
  0x8d   :  { %838 = vmatpush1.msra.mxu0 %v161_v57  ;;  %908 = vmatprep.subr.mxu1 %v164_v58  ;;  %v473_v25 = vld [vmem:[#allocation7 + $0xa28] sm:$0xff]  ;;  %v476_v26 = vld [vmem:[#allocation7 + $0xa40] sm:$0xff]  ;;  %v475_v28 = vld [vmem:[#allocation7 + $0xa38] sm:$0xff] }
  0x8e   :  { %839 = vmatprep.subr.mxu0 %v149_v59  ;;  %909 = vmatpush1.msra.mxu1 %v163_v60  ;;  %v461_v27 = vld [vmem:[#allocation7 + $0x9c8] sm:$0xff]  ;;  %v460_v29 = vld [vmem:[#allocation7 + $0x9c0] sm:$0xff]  ;;  %v463_v30 = vld [vmem:[#allocation7 + $0x9d8] sm:$0xff] }
  0x8f   :  { %840 = vmatpush1.msra.mxu0 %v148_v61  ;;  %910 = vmatprep.subr.mxu1 %v151_v62  ;;  %v448_v31 = vld [vmem:[#allocation7 + $0x960] sm:$0xff]  ;;  %v462_v32 = vld [vmem:[#allocation7 + $0x9d0] sm:$0xff]  ;;  %v447_v33 = vld [vmem:[#allocation7 + $0x958] sm:$0xff] }
  0x90   :  { %841 = vmatprep.subr.mxu0 %v552_v63  ;;  %911 = vmatpush1.msra.mxu1 %v150_v0  ;;  %v450_v34 = vld [vmem:[#allocation7 + $0x970] sm:$0xff]  ;;  %v435_v35 = vld [vmem:[#allocation7 + $0x8f8] sm:$0xff]  ;;  %v449_v36 = vld [vmem:[#allocation7 + $0x968] sm:$0xff] }
  0x91   :  { %842 = vmatpush2.msra.mxu0 %v551_v1  ;;  %912 = vmatprep.subr.mxu1 %v554_v2  ;;  %v434_v37 = vld [vmem:[#allocation7 + $0x8f0] sm:$0xff]  ;;  %v437_v38 = vld [vmem:[#allocation7 + $0x908] sm:$0xff]  ;;  %v436_v40 = vld [vmem:[#allocation7 + $0x900] sm:$0xff] }
  0x92   :  { %843 = vmatprep.subr.mxu0 %v539_v3  ;;  %913 = vmatpush2.msra.mxu1 %v553_v4  ;;  %v422_v39 = vld [vmem:[#allocation7 + $0x890] sm:$0xff]  ;;  %v421_v41 = vld [vmem:[#allocation7 + $0x888] sm:$0xff]  ;;  %v424_v42 = vld [vmem:[#allocation7 + $0x8a0] sm:$0xff] }
  0x93   :  { %844 = vmatpush2.msra.mxu0 %v538_v5  ;;  %914 = vmatprep.subr.mxu1 %v541_v6  ;;  %v409_v43 = vld [vmem:[#allocation7 + $0x828] sm:$0xff]  ;;  %v423_v44 = vld [vmem:[#allocation7 + $0x898] sm:$0xff]  ;;  %v408_v45 = vld [vmem:[#allocation7 + $0x820] sm:$0xff] }
  0x94   :  { %845 = vmatprep.subr.mxu0 %v526_v7  ;;  %915 = vmatpush2.msra.mxu1 %v540_v8  ;;  %v411_v46 = vld [vmem:[#allocation7 + $0x838] sm:$0xff]  ;;  %v396_v47 = vld [vmem:[#allocation7 + $0x7c0] sm:$0xff]  ;;  %v410_v48 = vld [vmem:[#allocation7 + $0x830] sm:$0xff] }
  0x95   :  { %846 = vmatpush2.msra.mxu0 %v525_v9  ;;  %916 = vmatprep.subr.mxu1 %v528_v10  ;;  %v395_v49 = vld [vmem:[#allocation7 + $0x7b8] sm:$0xff]  ;;  %v398_v50 = vld [vmem:[#allocation7 + $0x7d0] sm:$0xff]  ;;  %v397_v52 = vld [vmem:[#allocation7 + $0x7c8] sm:$0xff] }
  0x96   :  { %847 = vmatprep.subr.mxu0 %v513_v11  ;;  %917 = vmatpush2.msra.mxu1 %v527_v12  ;;  %v383_v51 = vld [vmem:[#allocation7 + $0x758] sm:$0xff]  ;;  %v382_v53 = vld [vmem:[#allocation7 + $0x750] sm:$0xff]  ;;  %v385_v54 = vld [vmem:[#allocation7 + $0x768] sm:$0xff] }
  0x97   :  { %848 = vmatpush2.msra.mxu0 %v512_v13  ;;  %918 = vmatprep.subr.mxu1 %v515_v14  ;;  %v370_v55 = vld [vmem:[#allocation7 + $0x6f0] sm:$0xff]  ;;  %v384_v56 = vld [vmem:[#allocation7 + $0x760] sm:$0xff]  ;;  %v369_v57 = vld [vmem:[#allocation7 + $0x6e8] sm:$0xff] }
  0x98   :  { %849 = vmatprep.subr.mxu0 %v500_v15  ;;  %919 = vmatpush2.msra.mxu1 %v514_v16  ;;  %v372_v58 = vld [vmem:[#allocation7 + $0x700] sm:$0xff]  ;;  %v357_v59 = vld [vmem:[#allocation7 + $0x688] sm:$0xff]  ;;  %v371_v62 = vld [vmem:[#allocation7 + $0x6f8] sm:$0xff] }
  0x99   :  { %850 = vmatpush2.msra.mxu0 %v499_v17  ;;  %920 = vmatprep.subr.mxu1 %v502_v18  ;;  %v5045_v60 = vld [vmem:[#allocation2 + $0x8] sm:$0xff]  ;;  %v356_v61 = vld [vmem:[#allocation7 + $0x680] sm:$0xff]  ;;  %v359_v0 = vld [vmem:[#allocation7 + $0x698] sm:$0xff] }
  0x9a   :  { %851 = vmatprep.subr.mxu0 %v487_v19  ;;  %921 = vmatpush2.msra.mxu1 %v501_v20  ;;  %v5047_v63 = vld [vmem:[#allocation2] sm:$0xff]  ;;  %v358_v2 = vld [vmem:[#allocation7 + $0x690] sm:$0xff]  ;;  %v347_v3 = vld [vmem:[#allocation7 + $0x638] sm:$0xff] }
  0x9b   :  { %852 = vmatpush2.msra.mxu0 %v486_v21  ;;  %922 = vmatprep.subr.mxu1 %v489_v22  ;;  %v348_v1 = vld [vmem:[#allocation7 + $0x640] sm:$0xff]  ;;  %v335_v4 = vld [vmem:[#allocation7 + $0x5d8] sm:$0xff]  ;;  %v350_v5 = vld [vmem:[#allocation7 + $0x650] sm:$0xff] }
  0x9c   :  { %853 = vmatprep.subr.mxu0 %v474_v23  ;;  %923 = vmatpush2.msra.mxu1 %v488_v24  ;;  %v334_v6 = vld [vmem:[#allocation7 + $0x5d0] sm:$0xff]  ;;  %v349_v7 = vld [vmem:[#allocation7 + $0x648] sm:$0xff]  ;;  %v336_v11 = vld [vmem:[#allocation7 + $0x5e0] sm:$0xff] }
  0x9d   :  { %854 = vmatpush2.msra.mxu0 %v473_v25  ;;  %924 = vmatprep.subr.mxu1 %v476_v26  ;;  %v322_v8 = vld [vmem:[#allocation7 + $0x570] sm:$0xff]  ;;  %v337_v9 = vld [vmem:[#allocation7 + $0x5e8] sm:$0xff]  ;;  %v324_v13 = vld [vmem:[#allocation7 + $0x580] sm:$0xff] }
  0x9e   :  { %855 = vmatprep.subr.mxu0 %v461_v27  ;;  %925 = vmatpush2.msra.mxu1 %v475_v28  ;;  %v321_v10 = vld [vmem:[#allocation7 + $0x568] sm:$0xff]  ;;  %v308_v14 = vld [vmem:[#allocation7 + $0x500] sm:$0xff]  ;;  %v323_v15 = vld [vmem:[#allocation7 + $0x578] sm:$0xff] }
  0x9f   :  { %856 = vmatpush2.msra.mxu0 %v460_v29  ;;  %926 = vmatprep.subr.mxu1 %v463_v30  ;;  %v309_v12 = vld [vmem:[#allocation7 + $0x508] sm:$0xff]  ;;  %v296_v16 = vld [vmem:[#allocation7 + $0x4a0] sm:$0xff]  ;;  %v311_v17 = vld [vmem:[#allocation7 + $0x518] sm:$0xff] }
  0xa0   :  { %857 = vmatprep.subr.mxu0 %v448_v31  ;;  %927 = vmatpush2.msra.mxu1 %v462_v32  ;;  %v295_v18 = vld [vmem:[#allocation7 + $0x498] sm:$0xff]  ;;  %v310_v19 = vld [vmem:[#allocation7 + $0x510] sm:$0xff]  ;;  %v297_v23 = vld [vmem:[#allocation7 + $0x4a8] sm:$0xff] }
  0xa1   :  { %858 = vmatpush2.msra.mxu0 %v447_v33  ;;  %928 = vmatprep.subr.mxu1 %v450_v34  ;;  %v283_v20 = vld [vmem:[#allocation7 + $0x438] sm:$0xff]  ;;  %v298_v21 = vld [vmem:[#allocation7 + $0x4b0] sm:$0xff]  ;;  %v285_v25 = vld [vmem:[#allocation7 + $0x448] sm:$0xff] }
  0xa2   :  { %859 = vmatprep.subr.mxu0 %v435_v35  ;;  %929 = vmatpush2.msra.mxu1 %v449_v36  ;;  %v282_v22 = vld [vmem:[#allocation7 + $0x430] sm:$0xff]  ;;  %v269_v26 = vld [vmem:[#allocation7 + $0x3c8] sm:$0xff]  ;;  %v284_v27 = vld [vmem:[#allocation7 + $0x440] sm:$0xff] }
  0xa3   :  { %860 = vmatpush2.msra.mxu0 %v434_v37  ;;  %930 = vmatprep.subr.mxu1 %v437_v38  ;;  %v270_v24 = vld [vmem:[#allocation7 + $0x3d0] sm:$0xff]  ;;  %v257_v28 = vld [vmem:[#allocation7 + $0x368] sm:$0xff]  ;;  %v272_v29 = vld [vmem:[#allocation7 + $0x3e0] sm:$0xff] }
  0xa4   :  { %861 = vmatprep.subr.mxu0 %v422_v39  ;;  %931 = vmatpush2.msra.mxu1 %v436_v40  ;;  %v256_v30 = vld [vmem:[#allocation7 + $0x360] sm:$0xff]  ;;  %v271_v31 = vld [vmem:[#allocation7 + $0x3d8] sm:$0xff]  ;;  %v258_v35 = vld [vmem:[#allocation7 + $0x370] sm:$0xff] }
  0xa5   :  { %862 = vmatpush2.msra.mxu0 %v421_v41  ;;  %932 = vmatprep.subr.mxu1 %v424_v42  ;;  %v244_v32 = vld [vmem:[#allocation7 + $0x300] sm:$0xff]  ;;  %v259_v33 = vld [vmem:[#allocation7 + $0x378] sm:$0xff]  ;;  %v246_v37 = vld [vmem:[#allocation7 + $0x310] sm:$0xff] }
  0xa6   :  { %863 = vmatprep.subr.mxu0 %v409_v43  ;;  %933 = vmatpush2.msra.mxu1 %v423_v44  ;;  %v243_v34 = vld [vmem:[#allocation7 + $0x2f8] sm:$0xff]  ;;  %v230_v38 = vld [vmem:[#allocation7 + $0x290] sm:$0xff]  ;;  %v245_v39 = vld [vmem:[#allocation7 + $0x308] sm:$0xff] }
  0xa7   :  { %864 = vmatpush2.msra.mxu0 %v408_v45  ;;  %934 = vmatprep.subr.mxu1 %v411_v46  ;;  %v231_v36 = vld [vmem:[#allocation7 + $0x298] sm:$0xff]  ;;  %v218_v40 = vld [vmem:[#allocation7 + $0x230] sm:$0xff]  ;;  %v233_v41 = vld [vmem:[#allocation7 + $0x2a8] sm:$0xff] }
  0xa8   :  { %865 = vmatprep.subr.mxu0 %v396_v47  ;;  %935 = vmatpush2.msra.mxu1 %v410_v48  ;;  %v217_v42 = vld [vmem:[#allocation7 + $0x228] sm:$0xff]  ;;  %v232_v43 = vld [vmem:[#allocation7 + $0x2a0] sm:$0xff]  ;;  %v219_v47 = vld [vmem:[#allocation7 + $0x238] sm:$0xff] }
  0xa9   :  { %866 = vmatpush2.msra.mxu0 %v395_v49  ;;  %936 = vmatprep.subr.mxu1 %v398_v50  ;;  %v205_v44 = vld [vmem:[#allocation7 + $0x1c8] sm:$0xff]  ;;  %v220_v45 = vld [vmem:[#allocation7 + $0x240] sm:$0xff]  ;;  %v207_v49 = vld [vmem:[#allocation7 + $0x1d8] sm:$0xff] }
  0xaa   :  { %867 = vmatprep.subr.mxu0 %v383_v51  ;;  %937 = vmatpush2.msra.mxu1 %v397_v52  ;;  %v204_v46 = vld [vmem:[#allocation7 + $0x1c0] sm:$0xff]  ;;  %v191_v50 = vld [vmem:[#allocation7 + $0x158] sm:$0xff]  ;;  %v206_v51 = vld [vmem:[#allocation7 + $0x1d0] sm:$0xff] }
  0xab   :  { %868 = vmatpush2.msra.mxu0 %v382_v53  ;;  %938 = vmatprep.subr.mxu1 %v385_v54  ;;  %v192_v48 = vld [vmem:[#allocation7 + $0x160] sm:$0xff]  ;;  %v179_v52 = vld [vmem:[#allocation7 + $0xf8] sm:$0xff]  ;;  %v194_v53 = vld [vmem:[#allocation7 + $0x170] sm:$0xff] }
  0xac   :  { %869 = vmatprep.subr.mxu0 %v370_v55  ;;  %939 = vmatpush2.msra.mxu1 %v384_v56  ;;  %v178_v54 = vld [vmem:[#allocation7 + $0xf0] sm:$0xff]  ;;  %v193_v55 = vld [vmem:[#allocation7 + $0x168] sm:$0xff] }
  0xad   :  { %870 = vmatpush2.msra.mxu0 %v369_v57  ;;  %940 = vmatprep.subr.mxu1 %v372_v58  ;;  %v166_v56 = vld [vmem:[#allocation7 + $0x90] sm:$0xff]  ;;  %v181_v57 = vld [vmem:[#allocation7 + $0x108] sm:$0xff] }
  0xae   :  { %871 = vmatprep.subr.mxu0 %v357_v59  ;;  %873 = vmatprep.mubr.f32.mxu0 %v5045_v60  ;;  %v165_v58 = vld [vmem:[#allocation7 + $0x88] sm:$0xff]  ;;  %v180_v59 = vld [vmem:[#allocation7 + $0x100] sm:$0xff] }
  0xaf   :  { %872 = vmatpush2.msra.mxu0 %v356_v61  ;;  %941 = vmatpush2.msra.mxu1 %v371_v62  ;;  %v153_v61 = vld [vmem:[#allocation7 + $0x28] sm:$0xff]  ;;  %v168_v62 = vld [vmem:[#allocation7 + $0xa0] sm:$0xff] }
  0xb0   :  { %874 = vmatmul.mubr.f32.vlgmr.msra.gmra.mxu0 %v5047_v63  ;;  %942 = vmatprep.subr.mxu1 %v359_v0  ;;  %v152_v0 = vld [vmem:[#allocation7 + $0x20] sm:$0xff] }
  0xb1   :  { %951 = vmatprep.subr.mxu0 %v348_v1  ;;  %943 = vmatpush2.msra.mxu1 %v358_v2  ;;  %v167_v1 = vld [vmem:[#allocation7 + $0x98] sm:$0xff]  ;;  %v556_v2 = vld [vmem:[#allocation7 + $0xcc0] sm:$0xff] }
  0xb2   :  { %944 = vmatprep.mubr.f32.mxu1 %v5045_v60  ;;  %952 = vmatpush1.msra.mxu0 %v347_v3  ;;  %v155_v3 = vld [vmem:[#allocation7 + $0x38] sm:$0xff] }
  0xb3   :  { %945 = vmatmul.mubr.f32.vlgmr.msra.gmra.mxu1 %v5047_v63  ;;  %953 = vmatprep.subr.mxu0 %v335_v4  ;;  %v555_v4 = vld [vmem:[#allocation7 + $0xcb8] sm:$0xff] }
  0xb4   :  { %1022 = vmatprep.subr.mxu1 %v350_v5  ;;  %954 = vmatpush1.msra.mxu0 %v334_v6  ;;  %v154_v5 = vld [vmem:[#allocation7 + $0x30] sm:$0xff]  ;;  %v543_v6 = vld [vmem:[#allocation7 + $0xc58] sm:$0xff] }
  0xb5   :  { %1023 = vmatpush1.msra.mxu1 %v349_v7  ;;  %955 = vmatprep.subr.mxu0 %v322_v8  ;;  %v558_v7 = vld [vmem:[#allocation7 + $0xcd0] sm:$0xff] }
  0xb6   :  { %1024 = vmatprep.subr.mxu1 %v337_v9  ;;  %956 = vmatpush1.msra.mxu0 %v321_v10  ;;  %v542_v8 = vld [vmem:[#allocation7 + $0xc50] sm:$0xff]  ;;  %v557_v9 = vld [vmem:[#allocation7 + $0xcc8] sm:$0xff] }
  0xb7   :  { %1025 = vmatpush1.msra.mxu1 %v336_v11  ;;  %957 = vmatprep.subr.mxu0 %v309_v12  ;;  %v530_v10 = vld [vmem:[#allocation7 + $0xbf0] sm:$0xff]  ;;  %v545_v11 = vld [vmem:[#allocation7 + $0xc68] sm:$0xff] }
  0xb8   :  { %1026 = vmatprep.subr.mxu1 %v324_v13  ;;  %958 = vmatpush1.msra.mxu0 %v308_v14  ;;  %v529_v12 = vld [vmem:[#allocation7 + $0xbe8] sm:$0xff]  ;;  %v544_v13 = vld [vmem:[#allocation7 + $0xc60] sm:$0xff] }
  0xb9   :  { %1027 = vmatpush1.msra.mxu1 %v323_v15  ;;  %959 = vmatprep.subr.mxu0 %v296_v16  ;;  %v517_v14 = vld [vmem:[#allocation7 + $0xb88] sm:$0xff]  ;;  %v532_v15 = vld [vmem:[#allocation7 + $0xc00] sm:$0xff] }
  0xba   :  { %1028 = vmatprep.subr.mxu1 %v311_v17  ;;  %960 = vmatpush1.msra.mxu0 %v295_v18  ;;  %v516_v16 = vld [vmem:[#allocation7 + $0xb80] sm:$0xff]  ;;  %v531_v17 = vld [vmem:[#allocation7 + $0xbf8] sm:$0xff] }
  0xbb   :  { %1029 = vmatpush1.msra.mxu1 %v310_v19  ;;  %961 = vmatprep.subr.mxu0 %v283_v20  ;;  %v504_v18 = vld [vmem:[#allocation7 + $0xb20] sm:$0xff]  ;;  %v519_v19 = vld [vmem:[#allocation7 + $0xb98] sm:$0xff] }
  0xbc   :  { %1030 = vmatprep.subr.mxu1 %v298_v21  ;;  %962 = vmatpush1.msra.mxu0 %v282_v22  ;;  %v503_v20 = vld [vmem:[#allocation7 + $0xb18] sm:$0xff]  ;;  %v518_v21 = vld [vmem:[#allocation7 + $0xb90] sm:$0xff] }
  0xbd   :  { %1031 = vmatpush1.msra.mxu1 %v297_v23  ;;  %963 = vmatprep.subr.mxu0 %v270_v24  ;;  %v491_v22 = vld [vmem:[#allocation7 + $0xab8] sm:$0xff]  ;;  %v506_v23 = vld [vmem:[#allocation7 + $0xb30] sm:$0xff] }
  0xbe   :  { %1032 = vmatprep.subr.mxu1 %v285_v25  ;;  %964 = vmatpush1.msra.mxu0 %v269_v26  ;;  %v490_v24 = vld [vmem:[#allocation7 + $0xab0] sm:$0xff]  ;;  %v505_v25 = vld [vmem:[#allocation7 + $0xb28] sm:$0xff] }
  0xbf   :  { %1033 = vmatpush1.msra.mxu1 %v284_v27  ;;  %965 = vmatprep.subr.mxu0 %v257_v28  ;;  %v478_v26 = vld [vmem:[#allocation7 + $0xa50] sm:$0xff]  ;;  %v493_v27 = vld [vmem:[#allocation7 + $0xac8] sm:$0xff] }
  0xc0   :  { %1034 = vmatprep.subr.mxu1 %v272_v29  ;;  %966 = vmatpush1.msra.mxu0 %v256_v30  ;;  %v477_v28 = vld [vmem:[#allocation7 + $0xa48] sm:$0xff]  ;;  %v492_v29 = vld [vmem:[#allocation7 + $0xac0] sm:$0xff] }
  0xc1   :  { %1035 = vmatpush1.msra.mxu1 %v271_v31  ;;  %967 = vmatprep.subr.mxu0 %v244_v32  ;;  %v465_v30 = vld [vmem:[#allocation7 + $0x9e8] sm:$0xff]  ;;  %v480_v31 = vld [vmem:[#allocation7 + $0xa60] sm:$0xff] }
  0xc2   :  { %1036 = vmatprep.subr.mxu1 %v259_v33  ;;  %968 = vmatpush1.msra.mxu0 %v243_v34  ;;  %v464_v32 = vld [vmem:[#allocation7 + $0x9e0] sm:$0xff]  ;;  %v479_v33 = vld [vmem:[#allocation7 + $0xa58] sm:$0xff] }
  0xc3   :  { %1037 = vmatpush1.msra.mxu1 %v258_v35  ;;  %969 = vmatprep.subr.mxu0 %v231_v36  ;;  %v452_v34 = vld [vmem:[#allocation7 + $0x980] sm:$0xff]  ;;  %v467_v35 = vld [vmem:[#allocation7 + $0x9f8] sm:$0xff] }
  0xc4   :  { %1038 = vmatprep.subr.mxu1 %v246_v37  ;;  %970 = vmatpush1.msra.mxu0 %v230_v38  ;;  %v451_v36 = vld [vmem:[#allocation7 + $0x978] sm:$0xff]  ;;  %v466_v37 = vld [vmem:[#allocation7 + $0x9f0] sm:$0xff] }
  0xc5   :  { %1039 = vmatpush1.msra.mxu1 %v245_v39  ;;  %971 = vmatprep.subr.mxu0 %v218_v40  ;;  %v439_v38 = vld [vmem:[#allocation7 + $0x918] sm:$0xff]  ;;  %v454_v39 = vld [vmem:[#allocation7 + $0x990] sm:$0xff] }
  0xc6   :  { %1040 = vmatprep.subr.mxu1 %v233_v41  ;;  %972 = vmatpush1.msra.mxu0 %v217_v42  ;;  %v438_v40 = vld [vmem:[#allocation7 + $0x910] sm:$0xff]  ;;  %v453_v41 = vld [vmem:[#allocation7 + $0x988] sm:$0xff] }
  0xc7   :  { %1041 = vmatpush1.msra.mxu1 %v232_v43  ;;  %973 = vmatprep.subr.mxu0 %v205_v44  ;;  %v426_v42 = vld [vmem:[#allocation7 + $0x8b0] sm:$0xff]  ;;  %v441_v43 = vld [vmem:[#allocation7 + $0x928] sm:$0xff] }
  0xc8   :  { %1042 = vmatprep.subr.mxu1 %v220_v45  ;;  %974 = vmatpush1.msra.mxu0 %v204_v46  ;;  %v425_v44 = vld [vmem:[#allocation7 + $0x8a8] sm:$0xff]  ;;  %v440_v45 = vld [vmem:[#allocation7 + $0x920] sm:$0xff] }
  0xc9   :  { %1043 = vmatpush1.msra.mxu1 %v219_v47  ;;  %975 = vmatprep.subr.mxu0 %v192_v48  ;;  %v413_v46 = vld [vmem:[#allocation7 + $0x848] sm:$0xff]  ;;  %v428_v47 = vld [vmem:[#allocation7 + $0x8c0] sm:$0xff] }
  0xca   :  { %1044 = vmatprep.subr.mxu1 %v207_v49  ;;  %976 = vmatpush1.msra.mxu0 %v191_v50  ;;  %v412_v48 = vld [vmem:[#allocation7 + $0x840] sm:$0xff]  ;;  %v427_v49 = vld [vmem:[#allocation7 + $0x8b8] sm:$0xff] }
  0xcb   :  { %1045 = vmatpush1.msra.mxu1 %v206_v51  ;;  %977 = vmatprep.subr.mxu0 %v179_v52  ;;  %v400_v50 = vld [vmem:[#allocation7 + $0x7e0] sm:$0xff]  ;;  %v415_v51 = vld [vmem:[#allocation7 + $0x858] sm:$0xff] }
  0xcc   :  { %1046 = vmatprep.subr.mxu1 %v194_v53  ;;  %978 = vmatpush1.msra.mxu0 %v178_v54  ;;  %v399_v52 = vld [vmem:[#allocation7 + $0x7d8] sm:$0xff]  ;;  %v414_v53 = vld [vmem:[#allocation7 + $0x850] sm:$0xff] }
  0xcd   :  { %1047 = vmatpush1.msra.mxu1 %v193_v55  ;;  %979 = vmatprep.subr.mxu0 %v166_v56  ;;  %v387_v54 = vld [vmem:[#allocation7 + $0x778] sm:$0xff]  ;;  %v402_v55 = vld [vmem:[#allocation7 + $0x7f0] sm:$0xff] }
  0xce   :  { %1048 = vmatprep.subr.mxu1 %v181_v57  ;;  %980 = vmatpush1.msra.mxu0 %v165_v58  ;;  %v386_v56 = vld [vmem:[#allocation7 + $0x770] sm:$0xff]  ;;  %v401_v57 = vld [vmem:[#allocation7 + $0x7e8] sm:$0xff] }
  0xcf   :  { %1049 = vmatpush1.msra.mxu1 %v180_v59  ;;  %981 = vmatprep.subr.mxu0 %v153_v61  ;;  %v374_v58 = vld [vmem:[#allocation7 + $0x710] sm:$0xff]  ;;  %v389_v59 = vld [vmem:[#allocation7 + $0x788] sm:$0xff] }
  0xd0   :  { %1050 = vmatprep.subr.mxu1 %v168_v62  ;;  %982 = vmatpush1.msra.mxu0 %v152_v0  ;;  %v373_v61 = vld [vmem:[#allocation7 + $0x708] sm:$0xff]  ;;  %v388_v62 = vld [vmem:[#allocation7 + $0x780] sm:$0xff] }
  0xd1   :  { %1051 = vmatpush1.msra.mxu1 %v167_v1  ;;  %983 = vmatprep.subr.mxu0 %v556_v2  ;;  %v361_v0 = vld [vmem:[#allocation7 + $0x6a8] sm:$0xff]  ;;  %v376_v1 = vld [vmem:[#allocation7 + $0x720] sm:$0xff] }
  0xd2   :  { %1052 = vmatprep.subr.mxu1 %v155_v3  ;;  %984 = vmatpush2.msra.mxu0 %v555_v4  ;;  %v360_v2 = vld [vmem:[#allocation7 + $0x6a0] sm:$0xff]  ;;  %v375_v3 = vld [vmem:[#allocation7 + $0x718] sm:$0xff] }
  0xd3   :  { %1053 = vmatpush1.msra.mxu1 %v154_v5  ;;  %985 = vmatprep.subr.mxu0 %v543_v6  ;;  %v363_v4 = vld [vmem:[#allocation7 + $0x6b8] sm:$0xff]  ;;  %v352_v5 = vld [vmem:[#allocation7 + $0x660] sm:$0xff]  ;;  %v362_v6 = vld [vmem:[#allocation7 + $0x6b0] sm:$0xff] }
  0xd4   :  { %1054 = vmatprep.subr.mxu1 %v558_v7  ;;  %986 = vmatpush2.msra.mxu0 %v542_v8  ;;  %v351_v7 = vld [vmem:[#allocation7 + $0x658] sm:$0xff] }
  0xd5   :  { %1055 = vmatpush2.msra.mxu1 %v557_v9  ;;  %987 = vmatprep.subr.mxu0 %v530_v10  ;;  %v339_v8 = vld [vmem:[#allocation7 + $0x5f8] sm:$0xff]  ;;  %v354_v9 = vld [vmem:[#allocation7 + $0x670] sm:$0xff] }
  0xd6   :  { %1056 = vmatprep.subr.mxu1 %v545_v11  ;;  %988 = vmatpush2.msra.mxu0 %v529_v12  ;;  %v338_v10 = vld [vmem:[#allocation7 + $0x5f0] sm:$0xff]  ;;  %v353_v11 = vld [vmem:[#allocation7 + $0x668] sm:$0xff] }
  0xd7   :  { %1057 = vmatpush2.msra.mxu1 %v544_v13  ;;  %989 = vmatprep.subr.mxu0 %v517_v14  ;;  %v326_v12 = vld [vmem:[#allocation7 + $0x590] sm:$0xff]  ;;  %v341_v13 = vld [vmem:[#allocation7 + $0x608] sm:$0xff] }
  0xd8   :  { %1058 = vmatprep.subr.mxu1 %v532_v15  ;;  %990 = vmatpush2.msra.mxu0 %v516_v16  ;;  %v325_v14 = vld [vmem:[#allocation7 + $0x588] sm:$0xff]  ;;  %v340_v15 = vld [vmem:[#allocation7 + $0x600] sm:$0xff] }
  0xd9   :  { %1059 = vmatpush2.msra.mxu1 %v531_v17  ;;  %991 = vmatprep.subr.mxu0 %v504_v18  ;;  %v313_v16 = vld [vmem:[#allocation7 + $0x528] sm:$0xff]  ;;  %v328_v17 = vld [vmem:[#allocation7 + $0x5a0] sm:$0xff] }
  0xda   :  { %1060 = vmatprep.subr.mxu1 %v519_v19  ;;  %992 = vmatpush2.msra.mxu0 %v503_v20  ;;  %v312_v18 = vld [vmem:[#allocation7 + $0x520] sm:$0xff]  ;;  %v327_v19 = vld [vmem:[#allocation7 + $0x598] sm:$0xff] }
  0xdb   :  { %1061 = vmatpush2.msra.mxu1 %v518_v21  ;;  %993 = vmatprep.subr.mxu0 %v491_v22  ;;  %v315_v20 = vld [vmem:[#allocation7 + $0x538] sm:$0xff] }
  0xdc   :  { %1062 = vmatprep.subr.mxu1 %v506_v23  ;;  %994 = vmatpush2.msra.mxu0 %v490_v24  ;;  %v299_v21 = vld [vmem:[#allocation7 + $0x4b8] sm:$0xff]  ;;  %v302_v23 = vld [vmem:[#allocation7 + $0x4d0] sm:$0xff] }
  0xdd   :  { %1063 = vmatpush2.msra.mxu1 %v505_v25  ;;  %995 = vmatprep.subr.mxu0 %v478_v26  ;;  %v287_v22 = vld [vmem:[#allocation7 + $0x458] sm:$0xff]  ;;  %v286_v24 = vld [vmem:[#allocation7 + $0x450] sm:$0xff]  ;;  %v301_v25 = vld [vmem:[#allocation7 + $0x4c8] sm:$0xff] }
  0xde   :  { %1064 = vmatprep.subr.mxu1 %v493_v27  ;;  %996 = vmatpush2.msra.mxu0 %v477_v28  ;;  %v274_v26 = vld [vmem:[#allocation7 + $0x3f0] sm:$0xff]  ;;  %v289_v27 = vld [vmem:[#allocation7 + $0x468] sm:$0xff] }
  0xdf   :  { %1065 = vmatpush2.msra.mxu1 %v492_v29  ;;  %997 = vmatprep.subr.mxu0 %v465_v30  ;;  %v273_v28 = vld [vmem:[#allocation7 + $0x3e8] sm:$0xff]  ;;  %v288_v29 = vld [vmem:[#allocation7 + $0x460] sm:$0xff] }
  0xe0   :  { %1066 = vmatprep.subr.mxu1 %v480_v31  ;;  %998 = vmatpush2.msra.mxu0 %v464_v32  ;;  %v261_v30 = vld [vmem:[#allocation7 + $0x388] sm:$0xff]  ;;  %v276_v31 = vld [vmem:[#allocation7 + $0x400] sm:$0xff] }
  0xe1   :  { %1067 = vmatpush2.msra.mxu1 %v479_v33  ;;  %999 = vmatprep.subr.mxu0 %v452_v34  ;;  %v260_v32 = vld [vmem:[#allocation7 + $0x380] sm:$0xff]  ;;  %v275_v33 = vld [vmem:[#allocation7 + $0x3f8] sm:$0xff] }
  0xe2   :  { %1068 = vmatprep.subr.mxu1 %v467_v35  ;;  %1000 = vmatpush2.msra.mxu0 %v451_v36  ;;  %v248_v34 = vld [vmem:[#allocation7 + $0x320] sm:$0xff]  ;;  %v263_v35 = vld [vmem:[#allocation7 + $0x398] sm:$0xff] }
  0xe3   :  { %1069 = vmatpush2.msra.mxu1 %v466_v37  ;;  %1001 = vmatprep.subr.mxu0 %v439_v38  ;;  %v247_v36 = vld [vmem:[#allocation7 + $0x318] sm:$0xff]  ;;  %v262_v37 = vld [vmem:[#allocation7 + $0x390] sm:$0xff] }
  0xe4   :  { %1070 = vmatprep.subr.mxu1 %v454_v39  ;;  %1002 = vmatpush2.msra.mxu0 %v438_v40  ;;  %v235_v38 = vld [vmem:[#allocation7 + $0x2b8] sm:$0xff]  ;;  %v250_v39 = vld [vmem:[#allocation7 + $0x330] sm:$0xff] }
  0xe5   :  { %1071 = vmatpush2.msra.mxu1 %v453_v41  ;;  %1003 = vmatprep.subr.mxu0 %v426_v42  ;;  %v234_v40 = vld [vmem:[#allocation7 + $0x2b0] sm:$0xff]  ;;  %v249_v41 = vld [vmem:[#allocation7 + $0x328] sm:$0xff] }
  0xe6   :  { %1072 = vmatprep.subr.mxu1 %v441_v43  ;;  %1004 = vmatpush2.msra.mxu0 %v425_v44  ;;  %v222_v42 = vld [vmem:[#allocation7 + $0x250] sm:$0xff]  ;;  %v237_v43 = vld [vmem:[#allocation7 + $0x2c8] sm:$0xff] }
  0xe7   :  { %1073 = vmatpush2.msra.mxu1 %v440_v45  ;;  %1005 = vmatprep.subr.mxu0 %v413_v46  ;;  %v221_v44 = vld [vmem:[#allocation7 + $0x248] sm:$0xff]  ;;  %v236_v45 = vld [vmem:[#allocation7 + $0x2c0] sm:$0xff] }
  0xe8   :  { %1074 = vmatprep.subr.mxu1 %v428_v47  ;;  %1006 = vmatpush2.msra.mxu0 %v412_v48  ;;  %v209_v46 = vld [vmem:[#allocation7 + $0x1e8] sm:$0xff]  ;;  %v224_v47 = vld [vmem:[#allocation7 + $0x260] sm:$0xff] }
  0xe9   :  { %1075 = vmatpush2.msra.mxu1 %v427_v49  ;;  %1007 = vmatprep.subr.mxu0 %v400_v50  ;;  %v208_v48 = vld [vmem:[#allocation7 + $0x1e0] sm:$0xff]  ;;  %v223_v49 = vld [vmem:[#allocation7 + $0x258] sm:$0xff] }
  0xea   :  { %1076 = vmatprep.subr.mxu1 %v415_v51  ;;  %1008 = vmatpush2.msra.mxu0 %v399_v52  ;;  %v196_v50 = vld [vmem:[#allocation7 + $0x180] sm:$0xff]  ;;  %v211_v51 = vld [vmem:[#allocation7 + $0x1f8] sm:$0xff] }
  0xeb   :  { %1077 = vmatpush2.msra.mxu1 %v414_v53  ;;  %1009 = vmatprep.subr.mxu0 %v387_v54  ;;  %v195_v52 = vld [vmem:[#allocation7 + $0x178] sm:$0xff]  ;;  %v210_v53 = vld [vmem:[#allocation7 + $0x1f0] sm:$0xff] }
  0xec   :  { %1078 = vmatprep.subr.mxu1 %v402_v55  ;;  %1010 = vmatpush2.msra.mxu0 %v386_v56  ;;  %v183_v54 = vld [vmem:[#allocation7 + $0x118] sm:$0xff]  ;;  %v198_v55 = vld [vmem:[#allocation7 + $0x190] sm:$0xff] }
  0xed   :  { %1079 = vmatpush2.msra.mxu1 %v401_v57  ;;  %1011 = vmatprep.subr.mxu0 %v374_v58  ;;  %v182_v56 = vld [vmem:[#allocation7 + $0x110] sm:$0xff]  ;;  %v197_v57 = vld [vmem:[#allocation7 + $0x188] sm:$0xff] }
  0xee   :  { %1080 = vmatprep.subr.mxu1 %v389_v59  ;;  %1012 = vmatpush2.msra.mxu0 %v373_v61  ;;  %v170_v58 = vld [vmem:[#allocation7 + $0xb0] sm:$0xff]  ;;  %v185_v59 = vld [vmem:[#allocation7 + $0x128] sm:$0xff] }
  0xef   :  { %1081 = vmatpush2.msra.mxu1 %v388_v62  ;;  %1013 = vmatprep.subr.mxu0 %v361_v0  ;;  %v169_v61 = vld [vmem:[#allocation7 + $0xa8] sm:$0xff]  ;;  %v184_v62 = vld [vmem:[#allocation7 + $0x120] sm:$0xff] }
  0xf0   :  { %1082 = vmatprep.subr.mxu1 %v376_v1  ;;  %1014 = vmatpush2.msra.mxu0 %v360_v2  ;;  %v157_v0 = vld [vmem:[#allocation7 + $0x48] sm:$0xff]  ;;  %v172_v1 = vld [vmem:[#allocation7 + $0xc0] sm:$0xff] }
  0xf1   :  { %1015 = vmatprep.mubr.f32.mxu0 %v5045_v60  ;;  %1083 = vmatpush2.msra.mxu1 %v375_v3  ;;  %v156_v2 = vld [vmem:[#allocation7 + $0x40] sm:$0xff]  ;;  %v171_v3 = vld [vmem:[#allocation7 + $0xb8] sm:$0xff] }
  0xf2   :  { %1016 = vmatmul.mubr.f32.vlgmr.msra.gmra.mxu0 %v5047_v63  ;;  %1084 = vmatprep.subr.mxu1 %v363_v4  ;;  %v560_v4 = vld [vmem:[#allocation7 + $0xce0] sm:$0xff] }
  0xf3   :  { %1093 = vmatprep.subr.mxu0 %v352_v5  ;;  %1085 = vmatpush2.msra.mxu1 %v362_v6  ;;  %v159_v5 = vld [vmem:[#allocation7 + $0x58] sm:$0xff] }
  0xf4   :  { %1086 = vmatprep.mubr.f32.mxu1 %v5045_v60  ;;  %1094 = vmatpush1.msra.mxu0 %v351_v7  ;;  %v300_v60 = vld [vmem:[#allocation7 + $0x4c0] sm:$0xff]  ;;  %v559_v6 = vld [vmem:[#allocation7 + $0xcd8] sm:$0xff]  ;;  %v158_v7 = vld [vmem:[#allocation7 + $0x50] sm:$0xff] }
  0xf5   :  { %1087 = vmatmul.mubr.f32.vlgmr.msra.gmra.mxu1 %v5047_v63  ;;  %1095 = vmatprep.subr.mxu0 %v339_v8  ;;  %v314_v63 = vld [vmem:[#allocation7 + $0x530] sm:$0xff]  ;;  %v547_v8 = vld [vmem:[#allocation7 + $0xc78] sm:$0xff] }
  0xf6   :  { %1164 = vmatprep.subr.mxu1 %v354_v9  ;;  %1096 = vmatpush1.msra.mxu0 %v338_v10  ;;  %v562_v9 = vld [vmem:[#allocation7 + $0xcf0] sm:$0xff] }
  0xf7   :  { %1165 = vmatpush1.msra.mxu1 %v353_v11  ;;  %1097 = vmatprep.subr.mxu0 %v326_v12  ;;  %v546_v10 = vld [vmem:[#allocation7 + $0xc70] sm:$0xff]  ;;  %v561_v11 = vld [vmem:[#allocation7 + $0xce8] sm:$0xff] }
  0xf8   :  { %1166 = vmatprep.subr.mxu1 %v341_v13  ;;  %1098 = vmatpush1.msra.mxu0 %v325_v14  ;;  %v534_v12 = vld [vmem:[#allocation7 + $0xc10] sm:$0xff]  ;;  %v549_v13 = vld [vmem:[#allocation7 + $0xc88] sm:$0xff] }
  0xf9   :  { %1167 = vmatpush1.msra.mxu1 %v340_v15  ;;  %1099 = vmatprep.subr.mxu0 %v313_v16  ;;  %v533_v14 = vld [vmem:[#allocation7 + $0xc08] sm:$0xff]  ;;  %v548_v15 = vld [vmem:[#allocation7 + $0xc80] sm:$0xff] }
  0xfa   :  { %1168 = vmatprep.subr.mxu1 %v328_v17  ;;  %1100 = vmatpush1.msra.mxu0 %v312_v18  ;;  %v521_v16 = vld [vmem:[#allocation7 + $0xba8] sm:$0xff]  ;;  %v536_v17 = vld [vmem:[#allocation7 + $0xc20] sm:$0xff] }
  0xfb   :  { %1169 = vmatpush1.msra.mxu1 %v327_v19  ;;  %1101 = vmatprep.subr.mxu0 %v300_v60  ;;  %v520_v18 = vld [vmem:[#allocation7 + $0xba0] sm:$0xff]  ;;  %v535_v19 = vld [vmem:[#allocation7 + $0xc18] sm:$0xff] }
  0xfc   :  { %1170 = vmatprep.subr.mxu1 %v315_v20  ;;  %1102 = vmatpush1.msra.mxu0 %v299_v21  ;;  %v508_v60 = vld [vmem:[#allocation7 + $0xb40] sm:$0xff]  ;;  %v523_v20 = vld [vmem:[#allocation7 + $0xbb8] sm:$0xff] }
  0xfd   :  { %1171 = vmatpush1.msra.mxu1 %v314_v63  ;;  %1103 = vmatprep.subr.mxu0 %v287_v22  ;;  %v507_v21 = vld [vmem:[#allocation7 + $0xb38] sm:$0xff]  ;;  %v522_v63 = vld [vmem:[#allocation7 + $0xbb0] sm:$0xff] }
  0xfe   :  { %1172 = vmatprep.subr.mxu1 %v302_v23  ;;  %1104 = vmatpush1.msra.mxu0 %v286_v24  ;;  %v495_v22 = vld [vmem:[#allocation7 + $0xad8] sm:$0xff]  ;;  %v510_v23 = vld [vmem:[#allocation7 + $0xb50] sm:$0xff] }
  0xff   :  { %1173 = vmatpush1.msra.mxu1 %v301_v25  ;;  %1105 = vmatprep.subr.mxu0 %v274_v26  ;;  %v494_v24 = vld [vmem:[#allocation7 + $0xad0] sm:$0xff]  ;;  %v509_v25 = vld [vmem:[#allocation7 + $0xb48] sm:$0xff] }
 0x100   :  { %1174 = vmatprep.subr.mxu1 %v289_v27  ;;  %1106 = vmatpush1.msra.mxu0 %v273_v28  ;;  %v482_v26 = vld [vmem:[#allocation7 + $0xa70] sm:$0xff]  ;;  %v497_v27 = vld [vmem:[#allocation7 + $0xae8] sm:$0xff] }
 0x101   :  { %1175 = vmatpush1.msra.mxu1 %v288_v29  ;;  %1107 = vmatprep.subr.mxu0 %v261_v30  ;;  %v481_v28 = vld [vmem:[#allocation7 + $0xa68] sm:$0xff]  ;;  %v496_v29 = vld [vmem:[#allocation7 + $0xae0] sm:$0xff] }
 0x102   :  { %1176 = vmatprep.subr.mxu1 %v276_v31  ;;  %1108 = vmatpush1.msra.mxu0 %v260_v32  ;;  %v469_v30 = vld [vmem:[#allocation7 + $0xa08] sm:$0xff]  ;;  %v484_v31 = vld [vmem:[#allocation7 + $0xa80] sm:$0xff] }
 0x103   :  { %1177 = vmatpush1.msra.mxu1 %v275_v33  ;;  %1109 = vmatprep.subr.mxu0 %v248_v34  ;;  %v468_v32 = vld [vmem:[#allocation7 + $0xa00] sm:$0xff]  ;;  %v483_v33 = vld [vmem:[#allocation7 + $0xa78] sm:$0xff] }
 0x104   :  { %1178 = vmatprep.subr.mxu1 %v263_v35  ;;  %1110 = vmatpush1.msra.mxu0 %v247_v36  ;;  %v456_v34 = vld [vmem:[#allocation7 + $0x9a0] sm:$0xff]  ;;  %v471_v35 = vld [vmem:[#allocation7 + $0xa18] sm:$0xff] }
 0x105   :  { %1179 = vmatpush1.msra.mxu1 %v262_v37  ;;  %1111 = vmatprep.subr.mxu0 %v235_v38  ;;  %v455_v36 = vld [vmem:[#allocation7 + $0x998] sm:$0xff]  ;;  %v470_v37 = vld [vmem:[#allocation7 + $0xa10] sm:$0xff] }
 0x106   :  { %1180 = vmatprep.subr.mxu1 %v250_v39  ;;  %1112 = vmatpush1.msra.mxu0 %v234_v40  ;;  %v443_v38 = vld [vmem:[#allocation7 + $0x938] sm:$0xff]  ;;  %v458_v39 = vld [vmem:[#allocation7 + $0x9b0] sm:$0xff] }
 0x107   :  { %1181 = vmatpush1.msra.mxu1 %v249_v41  ;;  %1113 = vmatprep.subr.mxu0 %v222_v42  ;;  %v442_v40 = vld [vmem:[#allocation7 + $0x930] sm:$0xff]  ;;  %v457_v41 = vld [vmem:[#allocation7 + $0x9a8] sm:$0xff] }
 0x108   :  { %1182 = vmatprep.subr.mxu1 %v237_v43  ;;  %1114 = vmatpush1.msra.mxu0 %v221_v44  ;;  %v430_v42 = vld [vmem:[#allocation7 + $0x8d0] sm:$0xff]  ;;  %v445_v43 = vld [vmem:[#allocation7 + $0x948] sm:$0xff] }
 0x109   :  { %1183 = vmatpush1.msra.mxu1 %v236_v45  ;;  %1115 = vmatprep.subr.mxu0 %v209_v46  ;;  %v429_v44 = vld [vmem:[#allocation7 + $0x8c8] sm:$0xff]  ;;  %v444_v45 = vld [vmem:[#allocation7 + $0x940] sm:$0xff] }
 0x10a   :  { %1184 = vmatprep.subr.mxu1 %v224_v47  ;;  %1116 = vmatpush1.msra.mxu0 %v208_v48  ;;  %v417_v46 = vld [vmem:[#allocation7 + $0x868] sm:$0xff]  ;;  %v432_v47 = vld [vmem:[#allocation7 + $0x8e0] sm:$0xff] }
 0x10b   :  { %1185 = vmatpush1.msra.mxu1 %v223_v49  ;;  %1117 = vmatprep.subr.mxu0 %v196_v50  ;;  %v416_v48 = vld [vmem:[#allocation7 + $0x860] sm:$0xff]  ;;  %v431_v49 = vld [vmem:[#allocation7 + $0x8d8] sm:$0xff] }
 0x10c   :  { %1186 = vmatprep.subr.mxu1 %v211_v51  ;;  %1118 = vmatpush1.msra.mxu0 %v195_v52  ;;  %v404_v50 = vld [vmem:[#allocation7 + $0x800] sm:$0xff]  ;;  %v419_v51 = vld [vmem:[#allocation7 + $0x878] sm:$0xff] }
 0x10d   :  { %1187 = vmatpush1.msra.mxu1 %v210_v53  ;;  %1119 = vmatprep.subr.mxu0 %v183_v54  ;;  %v403_v52 = vld [vmem:[#allocation7 + $0x7f8] sm:$0xff]  ;;  %v418_v53 = vld [vmem:[#allocation7 + $0x870] sm:$0xff] }
 0x10e   :  { %1188 = vmatprep.subr.mxu1 %v198_v55  ;;  %1120 = vmatpush1.msra.mxu0 %v182_v56  ;;  %v391_v54 = vld [vmem:[#allocation7 + $0x798] sm:$0xff]  ;;  %v406_v55 = vld [vmem:[#allocation7 + $0x810] sm:$0xff] }
 0x10f   :  { %1189 = vmatpush1.msra.mxu1 %v197_v57  ;;  %1121 = vmatprep.subr.mxu0 %v170_v58  ;;  %v390_v56 = vld [vmem:[#allocation7 + $0x790] sm:$0xff]  ;;  %v405_v57 = vld [vmem:[#allocation7 + $0x808] sm:$0xff] }
 0x110   :  { %1190 = vmatprep.subr.mxu1 %v185_v59  ;;  %1122 = vmatpush1.msra.mxu0 %v169_v61  ;;  %v378_v58 = vld [vmem:[#allocation7 + $0x730] sm:$0xff]  ;;  %v393_v59 = vld [vmem:[#allocation7 + $0x7a8] sm:$0xff] }
 0x111   :  { %1191 = vmatpush1.msra.mxu1 %v184_v62  ;;  %1123 = vmatprep.subr.mxu0 %v157_v0  ;;  %v377_v61 = vld [vmem:[#allocation7 + $0x728] sm:$0xff]  ;;  %v392_v62 = vld [vmem:[#allocation7 + $0x7a0] sm:$0xff] }
 0x112   :  { %1192 = vmatprep.subr.mxu1 %v172_v1  ;;  %1124 = vmatpush1.msra.mxu0 %v156_v2  ;;  %v365_v0 = vld [vmem:[#allocation7 + $0x6c8] sm:$0xff]  ;;  %v380_v1 = vld [vmem:[#allocation7 + $0x740] sm:$0xff] }
 0x113   :  { %1193 = vmatpush1.msra.mxu1 %v171_v3  ;;  %1125 = vmatprep.subr.mxu0 %v560_v4  ;;  %v364_v2 = vld [vmem:[#allocation7 + $0x6c0] sm:$0xff]  ;;  %v379_v3 = vld [vmem:[#allocation7 + $0x738] sm:$0xff] }
 0x114   :  { %1194 = vmatprep.subr.mxu1 %v159_v5  ;;  %1126 = vmatpush2.msra.mxu0 %v559_v6  ;;  %v367_v4 = vld [vmem:[#allocation7 + $0x6d8] sm:$0xff]  ;;  %v366_v6 = vld [vmem:[#allocation7 + $0x6d0] sm:$0xff] }
 0x115   :  { %1195 = vmatpush1.msra.mxu1 %v158_v7  ;;  %1127 = vmatprep.subr.mxu0 %v547_v8  ;;  %v563_v5 = vld [vmem:[#allocation7 + $0xcf8] sm:$0xff]  ;;  %v4052_v7 = vld [vmem:[#allocation2 + $0x8] sm:$0xff] }
 0x116   :  { %1196 = vmatprep.subr.mxu1 %v562_v9  ;;  %1128 = vmatpush2.msra.mxu0 %v546_v10  ;;  %v355_v8 = vld [vmem:[#allocation7 + $0x678] sm:$0xff]  ;;  %v5057_v9 = vld [vmem:[#allocation2] sm:$0xff]  ;;  %v550_v10 = vld [vmem:[#allocation7 + $0xc90] sm:$0xff] }
 0x117   :  { %1197 = vmatpush2.msra.mxu1 %v561_v11  ;;  %1129 = vmatprep.subr.mxu0 %v534_v12  ;;  %v342_v11 = vld [vmem:[#allocation7 + $0x610] sm:$0xff]  ;;  %v537_v12 = vld [vmem:[#allocation7 + $0xc28] sm:$0xff] }
 0x118   :  { %1198 = vmatprep.subr.mxu1 %v549_v13  ;;  %1130 = vmatpush2.msra.mxu0 %v533_v14  ;;  %v595_v13 = vld [vmem:[#allocation8 + $0xf8] sm:$0xff]  ;;  %v329_v14 = vld [vmem:[#allocation7 + $0x5a8] sm:$0xff] }
 0x119   :  { %1199 = vmatpush2.msra.mxu1 %v548_v15  ;;  %1131 = vmatprep.subr.mxu0 %v521_v16  ;;  %v579_v15 = vld [vmem:[#allocation8 + $0x78] sm:$0xff]  ;;  %v524_v16 = vld [vmem:[#allocation7 + $0xbc0] sm:$0xff] }
 0x11a   :  { %1200 = vmatprep.subr.mxu1 %v536_v17  ;;  %1132 = vmatpush2.msra.mxu0 %v520_v18  ;;  %v594_v17 = vld [vmem:[#allocation8 + $0xf0] sm:$0xff]  ;;  %v316_v18 = vld [vmem:[#allocation7 + $0x540] sm:$0xff] }
 0x11b   :  { %1201 = vmatpush2.msra.mxu1 %v535_v19  ;;  %1133 = vmatprep.subr.mxu0 %v508_v60  ;;  %v578_v19 = vld [vmem:[#allocation8 + $0x70] sm:$0xff]  ;;  %v511_v60 = vld [vmem:[#allocation7 + $0xb58] sm:$0xff] }
 0x11c   :  { %1202 = vmatprep.subr.mxu1 %v523_v20  ;;  %1134 = vmatpush2.msra.mxu0 %v507_v21  ;;  %v593_v20 = vld [vmem:[#allocation8 + $0xe8] sm:$0xff]  ;;  %v303_v21 = vld [vmem:[#allocation7 + $0x4d8] sm:$0xff] }
 0x11d   :  { %1203 = vmatpush2.msra.mxu1 %v522_v63  ;;  %1135 = vmatprep.subr.mxu0 %v495_v22  ;;  %v577_v63 = vld [vmem:[#allocation8 + $0x68] sm:$0xff]  ;;  %v498_v22 = vld [vmem:[#allocation7 + $0xaf0] sm:$0xff] }
 0x11e   :  { %1204 = vmatprep.subr.mxu1 %v510_v23  ;;  %1136 = vmatpush2.msra.mxu0 %v494_v24  ;;  %v592_v23 = vld [vmem:[#allocation8 + $0xe0] sm:$0xff]  ;;  %v290_v24 = vld [vmem:[#allocation7 + $0x470] sm:$0xff] }
 0x11f   :  { %1205 = vmatpush2.msra.mxu1 %v509_v25  ;;  %1137 = vmatprep.subr.mxu0 %v482_v26  ;;  %v576_v25 = vld [vmem:[#allocation8 + $0x60] sm:$0xff]  ;;  %v485_v26 = vld [vmem:[#allocation7 + $0xa88] sm:$0xff] }
 0x120   :  { %1206 = vmatprep.subr.mxu1 %v497_v27  ;;  %1138 = vmatpush2.msra.mxu0 %v481_v28  ;;  %v591_v27 = vld [vmem:[#allocation8 + $0xd8] sm:$0xff]  ;;  %v277_v28 = vld [vmem:[#allocation7 + $0x408] sm:$0xff] }
 0x121   :  { %1207 = vmatpush2.msra.mxu1 %v496_v29  ;;  %1139 = vmatprep.subr.mxu0 %v469_v30  ;;  %v575_v29 = vld [vmem:[#allocation8 + $0x58] sm:$0xff]  ;;  %v472_v30 = vld [vmem:[#allocation7 + $0xa20] sm:$0xff] }
 0x122   :  { %1208 = vmatprep.subr.mxu1 %v484_v31  ;;  %1140 = vmatpush2.msra.mxu0 %v468_v32  ;;  %v590_v31 = vld [vmem:[#allocation8 + $0xd0] sm:$0xff]  ;;  %v264_v32 = vld [vmem:[#allocation7 + $0x3a0] sm:$0xff] }
 0x123   :  { %1209 = vmatpush2.msra.mxu1 %v483_v33  ;;  %1141 = vmatprep.subr.mxu0 %v456_v34  ;;  %v574_v33 = vld [vmem:[#allocation8 + $0x50] sm:$0xff]  ;;  %v459_v34 = vld [vmem:[#allocation7 + $0x9b8] sm:$0xff] }
 0x124   :  { %1210 = vmatprep.subr.mxu1 %v471_v35  ;;  %1142 = vmatpush2.msra.mxu0 %v455_v36  ;;  %v589_v35 = vld [vmem:[#allocation8 + $0xc8] sm:$0xff]  ;;  %v251_v36 = vld [vmem:[#allocation7 + $0x338] sm:$0xff] }
 0x125   :  { %1211 = vmatpush2.msra.mxu1 %v470_v37  ;;  %1143 = vmatprep.subr.mxu0 %v443_v38  ;;  %v573_v37 = vld [vmem:[#allocation8 + $0x48] sm:$0xff]  ;;  %v446_v38 = vld [vmem:[#allocation7 + $0x950] sm:$0xff] }
 0x126   :  { %1212 = vmatprep.subr.mxu1 %v458_v39  ;;  %1144 = vmatpush2.msra.mxu0 %v442_v40  ;;  %v588_v39 = vld [vmem:[#allocation8 + $0xc0] sm:$0xff]  ;;  %v238_v40 = vld [vmem:[#allocation7 + $0x2d0] sm:$0xff] }
 0x127   :  { %1213 = vmatpush2.msra.mxu1 %v457_v41  ;;  %1145 = vmatprep.subr.mxu0 %v430_v42  ;;  %v572_v41 = vld [vmem:[#allocation8 + $0x40] sm:$0xff]  ;;  %v433_v42 = vld [vmem:[#allocation7 + $0x8e8] sm:$0xff] }
 0x128   :  { %1214 = vmatprep.subr.mxu1 %v445_v43  ;;  %1146 = vmatpush2.msra.mxu0 %v429_v44  ;;  %v587_v43 = vld [vmem:[#allocation8 + $0xb8] sm:$0xff]  ;;  %v225_v44 = vld [vmem:[#allocation7 + $0x268] sm:$0xff] }
 0x129   :  { %1215 = vmatpush2.msra.mxu1 %v444_v45  ;;  %1147 = vmatprep.subr.mxu0 %v417_v46  ;;  %v571_v45 = vld [vmem:[#allocation8 + $0x38] sm:$0xff]  ;;  %v420_v46 = vld [vmem:[#allocation7 + $0x880] sm:$0xff] }
 0x12a   :  { %1216 = vmatprep.subr.mxu1 %v432_v47  ;;  %1148 = vmatpush2.msra.mxu0 %v416_v48  ;;  %v586_v47 = vld [vmem:[#allocation8 + $0xb0] sm:$0xff]  ;;  %v212_v48 = vld [vmem:[#allocation7 + $0x200] sm:$0xff] }
 0x12b   :  { %1217 = vmatpush2.msra.mxu1 %v431_v49  ;;  %1149 = vmatprep.subr.mxu0 %v404_v50  ;;  %v570_v49 = vld [vmem:[#allocation8 + $0x30] sm:$0xff]  ;;  %v407_v50 = vld [vmem:[#allocation7 + $0x818] sm:$0xff] }
 0x12c   :  { %1218 = vmatprep.subr.mxu1 %v419_v51  ;;  %1150 = vmatpush2.msra.mxu0 %v403_v52  ;;  %v585_v51 = vld [vmem:[#allocation8 + $0xa8] sm:$0xff]  ;;  %v199_v52 = vld [vmem:[#allocation7 + $0x198] sm:$0xff] }
 0x12d   :  { %1219 = vmatpush2.msra.mxu1 %v418_v53  ;;  %1151 = vmatprep.subr.mxu0 %v391_v54  ;;  %v569_v53 = vld [vmem:[#allocation8 + $0x28] sm:$0xff]  ;;  %v394_v54 = vld [vmem:[#allocation7 + $0x7b0] sm:$0xff] }
 0x12e   :  { %1220 = vmatprep.subr.mxu1 %v406_v55  ;;  %1152 = vmatpush2.msra.mxu0 %v390_v56  ;;  %v584_v55 = vld [vmem:[#allocation8 + $0xa0] sm:$0xff]  ;;  %v186_v56 = vld [vmem:[#allocation7 + $0x130] sm:$0xff] }
 0x12f   :  { %1221 = vmatpush2.msra.mxu1 %v405_v57  ;;  %1153 = vmatprep.subr.mxu0 %v378_v58  ;;  %v568_v57 = vld [vmem:[#allocation8 + $0x20] sm:$0xff]  ;;  %v381_v58 = vld [vmem:[#allocation7 + $0x748] sm:$0xff] }
 0x130   :  { %1222 = vmatprep.subr.mxu1 %v393_v59  ;;  %1154 = vmatpush2.msra.mxu0 %v377_v61  ;;  %v583_v59 = vld [vmem:[#allocation8 + $0x98] sm:$0xff]  ;;  %v173_v61 = vld [vmem:[#allocation7 + $0xc8] sm:$0xff] }
 0x131   :  { %1223 = vmatpush2.msra.mxu1 %v392_v62  ;;  %1155 = vmatprep.subr.mxu0 %v365_v0  ;;  %v567_v62 = vld [vmem:[#allocation8 + $0x18] sm:$0xff]  ;;  %v368_v0 = vld [vmem:[#allocation7 + $0x6e0] sm:$0xff] }
 0x132   :  { %1224 = vmatprep.subr.mxu1 %v380_v1  ;;  %1156 = vmatpush2.msra.mxu0 %v364_v2  ;;  %v582_v1 = vld [vmem:[#allocation8 + $0x90] sm:$0xff]  ;;  %v160_v2 = vld [vmem:[#allocation7 + $0x60] sm:$0xff] }
 0x133   :  { %1157 = vmatprep.mubr.f32.mxu0 %v4052_v7  ;;  %1225 = vmatpush2.msra.mxu1 %v379_v3  ;;  %v566_v3 = vld [vmem:[#allocation8 + $0x10] sm:$0xff] }
 0x134   :  { %1158 = vmatmul.mubr.f32.vlgmr.msra.gmra.mxu0 %v5057_v9  ;;  %1226 = vmatprep.subr.mxu1 %v367_v4  ;;  %v627_v4 = vld [vmem:[#allocation8 + $0x1f8] sm:$0xff] }
 0x135   :  { %3169 = vmatprep.subr.mxu0 %v563_v5  ;;  %1227 = vmatpush2.msra.mxu1 %v366_v6  ;;  %v611_v5 = vld [vmem:[#allocation8 + $0x178] sm:$0xff]  ;;  %v581_v6 = vld [vmem:[#allocation8 + $0x88] sm:$0xff] }
 0x136   :  { %1228 = vmatprep.mubr.f32.mxu1 %v4052_v7  ;;  %3170 = vmatpush3.msra.mxu0 %v355_v8  ;;  %v565_v8 = vld [vmem:[#allocation8 + $0x8] sm:$0xff] }
 0x137   :  { %1229 = vmatmul.mubr.f32.vlgmr.msra.gmra.mxu1 %v5057_v9  ;;  %3171 = vmatprep.subr.mxu0 %v550_v10  ;;  %v610_v10 = vld [vmem:[#allocation8 + $0x170] sm:$0xff] }
 0x138   :  { %3172 = vmatpush3.msra.mxu0 %v342_v11  ;;  %1299 = vmatprep.mubr.f32.mxu0 %v4052_v7  ;;  %v626_v7 = vld [vmem:[#allocation8 + $0x1f0] sm:$0xff]  ;;  %v580_v11 = vld [vmem:[#allocation8 + $0x80] sm:$0xff] }
 0x139   :  { %3173 = vmatprep.subr.mxu0 %v537_v12  ;;  %3204 = vmatprep.subr.mxu1 %v595_v13  ;;  %v625_v12 = vld [vmem:[#allocation8 + $0x1e8] sm:$0xff]  ;;  %v564_v13 = vld [vmem:[#allocation8] sm:$0xff] }
 0x13a   :  { %3174 = vmatpush3.msra.mxu0 %v329_v14  ;;  %3205 = vmatpush3.msra.mxu1 %v579_v15  ;;  %v609_v14 = vld [vmem:[#allocation8 + $0x168] sm:$0xff]  ;;  %v659_v15 = vld [vmem:[#allocation8 + $0x2f8] sm:$0xff] }
 0x13b   :  { %3175 = vmatprep.subr.mxu0 %v524_v16  ;;  %3206 = vmatprep.subr.mxu1 %v594_v17  ;;  %v624_v16 = vld [vmem:[#allocation8 + $0x1e0] sm:$0xff] }
 0x13c   :  { %3176 = vmatpush3.msra.mxu0 %v316_v18  ;;  %3207 = vmatpush3.msra.mxu1 %v578_v19  ;;  %v608_v17 = vld [vmem:[#allocation8 + $0x160] sm:$0xff]  ;;  %v623_v18 = vld [vmem:[#allocation8 + $0x1d8] sm:$0xff]  ;;  %v622_v19 = vld [vmem:[#allocation8 + $0x1d0] sm:$0xff] }
 0x13d   :  { %3177 = vmatprep.subr.mxu0 %v511_v60  ;;  %3208 = vmatprep.subr.mxu1 %v593_v20  ;;  %v606_v60 = vld [vmem:[#allocation8 + $0x150] sm:$0xff]  ;;  %v621_v20 = vld [vmem:[#allocation8 + $0x1c8] sm:$0xff] }
 0x13e   :  { %3178 = vmatpush3.msra.mxu0 %v303_v21  ;;  %3209 = vmatpush3.msra.mxu1 %v577_v63  ;;  %v605_v21 = vld [vmem:[#allocation8 + $0x148] sm:$0xff]  ;;  %v620_v63 = vld [vmem:[#allocation8 + $0x1c0] sm:$0xff] }
 0x13f   :  { %3179 = vmatprep.subr.mxu0 %v498_v22  ;;  %3210 = vmatprep.subr.mxu1 %v592_v23  ;;  %v604_v22 = vld [vmem:[#allocation8 + $0x140] sm:$0xff]  ;;  %v619_v23 = vld [vmem:[#allocation8 + $0x1b8] sm:$0xff] }
 0x140   :  { %3180 = vmatpush3.msra.mxu0 %v290_v24  ;;  %3211 = vmatpush3.msra.mxu1 %v576_v25  ;;  %v603_v24 = vld [vmem:[#allocation8 + $0x138] sm:$0xff]  ;;  %v618_v25 = vld [vmem:[#allocation8 + $0x1b0] sm:$0xff] }
 0x141   :  { %3181 = vmatprep.subr.mxu0 %v485_v26  ;;  %3212 = vmatprep.subr.mxu1 %v591_v27  ;;  %v602_v26 = vld [vmem:[#allocation8 + $0x130] sm:$0xff]  ;;  %v617_v27 = vld [vmem:[#allocation8 + $0x1a8] sm:$0xff] }
 0x142   :  { %3182 = vmatpush3.msra.mxu0 %v277_v28  ;;  %3213 = vmatpush3.msra.mxu1 %v575_v29  ;;  %v601_v28 = vld [vmem:[#allocation8 + $0x128] sm:$0xff]  ;;  %v616_v29 = vld [vmem:[#allocation8 + $0x1a0] sm:$0xff] }
 0x143   :  { %3183 = vmatprep.subr.mxu0 %v472_v30  ;;  %3214 = vmatprep.subr.mxu1 %v590_v31  ;;  %v600_v30 = vld [vmem:[#allocation8 + $0x120] sm:$0xff]  ;;  %v615_v31 = vld [vmem:[#allocation8 + $0x198] sm:$0xff] }
 0x144   :  { %3184 = vmatpush3.msra.mxu0 %v264_v32  ;;  %3215 = vmatpush3.msra.mxu1 %v574_v33  ;;  %v599_v32 = vld [vmem:[#allocation8 + $0x118] sm:$0xff]  ;;  %v614_v33 = vld [vmem:[#allocation8 + $0x190] sm:$0xff] }
 0x145   :  { %3185 = vmatprep.subr.mxu0 %v459_v34  ;;  %3216 = vmatprep.subr.mxu1 %v589_v35  ;;  %v598_v34 = vld [vmem:[#allocation8 + $0x110] sm:$0xff]  ;;  %v613_v35 = vld [vmem:[#allocation8 + $0x188] sm:$0xff] }
 0x146   :  { %3186 = vmatpush3.msra.mxu0 %v251_v36  ;;  %3217 = vmatpush3.msra.mxu1 %v573_v37  ;;  %v597_v36 = vld [vmem:[#allocation8 + $0x108] sm:$0xff] }
 0x147   :  { %3187 = vmatprep.subr.mxu0 %v446_v38  ;;  %3218 = vmatprep.subr.mxu1 %v588_v39  ;;  %v612_v38 = vld [vmem:[#allocation8 + $0x180] sm:$0xff] }
 0x148   :  { %3188 = vmatpush3.msra.mxu0 %v238_v40  ;;  %3219 = vmatpush3.msra.mxu1 %v572_v41  ;;  %v596_v39 = vld [vmem:[#allocation8 + $0x100] sm:$0xff]  ;;  %v691_v41 = vld [vmem:[#allocation8 + $0x3f8] sm:$0xff] }
 0x149   :  { %3189 = vmatprep.subr.mxu0 %v433_v42  ;;  %3220 = vmatprep.subr.mxu1 %v587_v43 }
 0x14a   :  { %3190 = vmatpush3.msra.mxu0 %v225_v44  ;;  %3221 = vmatpush3.msra.mxu1 %v571_v45  ;;  %v643_v45 = vld [vmem:[#allocation8 + $0x278] sm:$0xff] }
 0x14b   :  { %3191 = vmatprep.subr.mxu0 %v420_v46  ;;  %3222 = vmatprep.subr.mxu1 %v586_v47  ;;  %v658_v47 = vld [vmem:[#allocation8 + $0x2f0] sm:$0xff] }
 0x14c   :  { %3192 = vmatpush3.msra.mxu0 %v212_v48  ;;  %3223 = vmatpush3.msra.mxu1 %v570_v49  ;;  %v642_v49 = vld [vmem:[#allocation8 + $0x270] sm:$0xff] }
 0x14d   :  { %3193 = vmatprep.subr.mxu0 %v407_v50  ;;  %3224 = vmatprep.subr.mxu1 %v585_v51  ;;  %v675_v51 = vld [vmem:[#allocation8 + $0x378] sm:$0xff] }
 0x14e   :  { %3194 = vmatpush3.msra.mxu0 %v199_v52  ;;  %3225 = vmatpush3.msra.mxu1 %v569_v53  ;;  %v657_v52 = vld [vmem:[#allocation8 + $0x2e8] sm:$0xff]  ;;  %v690_v53 = vld [vmem:[#allocation8 + $0x3f0] sm:$0xff] }
 0x14f   :  { %3195 = vmatprep.subr.mxu0 %v394_v54  ;;  %3226 = vmatprep.subr.mxu1 %v584_v55  ;;  %v641_v54 = vld [vmem:[#allocation8 + $0x268] sm:$0xff]  ;;  %v674_v55 = vld [vmem:[#allocation8 + $0x370] sm:$0xff] }
 0x150   :  { %3196 = vmatpush3.msra.mxu0 %v186_v56  ;;  %3227 = vmatpush3.msra.mxu1 %v568_v57  ;;  %v656_v56 = vld [vmem:[#allocation8 + $0x2e0] sm:$0xff]  ;;  %v689_v57 = vld [vmem:[#allocation8 + $0x3e8] sm:$0xff] }
 0x151   :  { %3197 = vmatprep.subr.mxu0 %v381_v58  ;;  %3228 = vmatprep.subr.mxu1 %v583_v59  ;;  %v640_v58 = vld [vmem:[#allocation8 + $0x260] sm:$0xff]  ;;  %v673_v59 = vld [vmem:[#allocation8 + $0x368] sm:$0xff] }
 0x152   :  { %3198 = vmatpush3.msra.mxu0 %v173_v61  ;;  %3229 = vmatpush3.msra.mxu1 %v567_v62  ;;  %v655_v61 = vld [vmem:[#allocation8 + $0x2d8] sm:$0xff]  ;;  %v688_v62 = vld [vmem:[#allocation8 + $0x3e0] sm:$0xff] }
 0x153   :  { %3199 = vmatprep.subr.mxu0 %v368_v0  ;;  %3230 = vmatprep.subr.mxu1 %v582_v1  ;;  %v639_v0 = vld [vmem:[#allocation8 + $0x258] sm:$0xff]  ;;  %v672_v1 = vld [vmem:[#allocation8 + $0x360] sm:$0xff] }
 0x154   :  { %3200 = vmatpush3.msra.mxu0 %v160_v2  ;;  %3231 = vmatpush3.msra.mxu1 %v566_v3  ;;  %v654_v2 = vld [vmem:[#allocation8 + $0x2d0] sm:$0xff]  ;;  %v687_v3 = vld [vmem:[#allocation8 + $0x3d8] sm:$0xff] }
 0x155   :  { %1300 = vmatmul.mubr.f32.vlgmr.msra.gmra.mxu0 %v5057_v9  ;;  %3239 = vmatprep.subr.mxu0 %v627_v4  ;;  %v607_v9 = vld [vmem:[#allocation8 + $0x158] sm:$0xff]  ;;  %v638_v4 = vld [vmem:[#allocation8 + $0x250] sm:$0xff] }
 0x156   :  { %3240 = vmatpush3.msra.mxu0 %v611_v5  ;;  %3232 = vmatprep.subr.mxu1 %v581_v6  ;;  %v671_v5 = vld [vmem:[#allocation8 + $0x358] sm:$0xff]  ;;  %v653_v6 = vld [vmem:[#allocation8 + $0x2c8] sm:$0xff] }
 0x157   :  { %3241 = vmatprep.subr.mxu0 %v626_v7  ;;  %3233 = vmatpush3.msra.mxu1 %v565_v8  ;;  %v686_v7 = vld [vmem:[#allocation8 + $0x3d0] sm:$0xff]  ;;  %v637_v8 = vld [vmem:[#allocation8 + $0x248] sm:$0xff] }
 0x158   :  { %3242 = vmatpush3.msra.mxu0 %v610_v10  ;;  %3234 = vmatprep.subr.mxu1 %v580_v11  ;;  %v670_v10 = vld [vmem:[#allocation8 + $0x350] sm:$0xff]  ;;  %v652_v11 = vld [vmem:[#allocation8 + $0x2c0] sm:$0xff] }
 0x159   :  { %3243 = vmatprep.subr.mxu0 %v625_v12  ;;  %3235 = vmatpush3.msra.mxu1 %v564_v13  ;;  %v685_v12 = vld [vmem:[#allocation8 + $0x3c8] sm:$0xff]  ;;  %v636_v13 = vld [vmem:[#allocation8 + $0x240] sm:$0xff] }
 0x15a   :  { %3244 = vmatpush3.msra.mxu0 %v609_v14  ;;  %3274 = vmatprep.subr.mxu1 %v659_v15  ;;  %v669_v14 = vld [vmem:[#allocation8 + $0x348] sm:$0xff]  ;;  %v651_v15 = vld [vmem:[#allocation8 + $0x2b8] sm:$0xff] }
 0x15b   :  { %3245 = vmatprep.subr.mxu0 %v624_v16  ;;  %v684_v16 = vld [vmem:[#allocation8 + $0x3c0] sm:$0xff] }
 0x15c   :  { %3246 = vmatpush3.msra.mxu0 %v608_v17  ;;  %v635_v17 = vld [vmem:[#allocation8 + $0x238] sm:$0xff] }
 0x15d   :  { %3247 = vmatprep.subr.mxu0 %v623_v18  ;;  %v668_v18 = vld [vmem:[#allocation8 + $0x340] sm:$0xff] }
 0x15e   :  { %3248 = vmatpush3.msra.mxu0 %v607_v9  ;;  %v650_v9 = vld [vmem:[#allocation8 + $0x2b0] sm:$0xff] }
 0x15f   :  { %3249 = vmatprep.subr.mxu0 %v622_v19  ;;  %v683_v19 = vld [vmem:[#allocation8 + $0x3b8] sm:$0xff] }
 0x160   :  { %3250 = vmatpush3.msra.mxu0 %v606_v60  ;;  %v634_v60 = vld [vmem:[#allocation8 + $0x230] sm:$0xff] }
 0x161   :  { %3251 = vmatprep.subr.mxu0 %v621_v20  ;;  %v667_v20 = vld [vmem:[#allocation8 + $0x338] sm:$0xff] }
 0x162   :  { %3252 = vmatpush3.msra.mxu0 %v605_v21  ;;  %v649_v21 = vld [vmem:[#allocation8 + $0x2a8] sm:$0xff] }
 0x163   :  { %3253 = vmatprep.subr.mxu0 %v620_v63  ;;  %v682_v63 = vld [vmem:[#allocation8 + $0x3b0] sm:$0xff] }
 0x164   :  { %3254 = vmatpush3.msra.mxu0 %v604_v22  ;;  %v633_v22 = vld [vmem:[#allocation8 + $0x228] sm:$0xff] }
 0x165   :  { %3255 = vmatprep.subr.mxu0 %v619_v23  ;;  %v666_v23 = vld [vmem:[#allocation8 + $0x330] sm:$0xff] }
 0x166   :  { %3256 = vmatpush3.msra.mxu0 %v603_v24  ;;  %v648_v24 = vld [vmem:[#allocation8 + $0x2a0] sm:$0xff] }
 0x167   :  { %3257 = vmatprep.subr.mxu0 %v618_v25  ;;  %v681_v25 = vld [vmem:[#allocation8 + $0x3a8] sm:$0xff] }
 0x168   :  { %3258 = vmatpush3.msra.mxu0 %v602_v26  ;;  %v632_v26 = vld [vmem:[#allocation8 + $0x220] sm:$0xff] }
 0x169   :  { %3259 = vmatprep.subr.mxu0 %v617_v27  ;;  %v665_v27 = vld [vmem:[#allocation8 + $0x328] sm:$0xff] }
 0x16a   :  { %3260 = vmatpush3.msra.mxu0 %v601_v28  ;;  %v647_v28 = vld [vmem:[#allocation8 + $0x298] sm:$0xff] }
 0x16b   :  { %3261 = vmatprep.subr.mxu0 %v616_v29  ;;  %v680_v29 = vld [vmem:[#allocation8 + $0x3a0] sm:$0xff] }
 0x16c   :  { %3262 = vmatpush3.msra.mxu0 %v600_v30  ;;  %v631_v30 = vld [vmem:[#allocation8 + $0x218] sm:$0xff] }
 0x16d   :  { %3263 = vmatprep.subr.mxu0 %v615_v31  ;;  %v664_v31 = vld [vmem:[#allocation8 + $0x320] sm:$0xff] }
 0x16e   :  { %3264 = vmatpush3.msra.mxu0 %v599_v32  ;;  %v646_v32 = vld [vmem:[#allocation8 + $0x290] sm:$0xff] }
 0x16f   :  { %3265 = vmatprep.subr.mxu0 %v614_v33  ;;  %v679_v33 = vld [vmem:[#allocation8 + $0x398] sm:$0xff] }
 0x170   :  { %v875_v37 = vpop.f32.mrf.mxu0  ;;  %3266 = vmatpush3.msra.mxu0 %v598_v34  ;;  %v630_v34 = vld [vmem:[#allocation8 + $0x210] sm:$0xff] }
 0x171   :  { %3267 = vmatprep.subr.mxu0 %v613_v35  ;;  %v663_v35 = vld [vmem:[#allocation8 + $0x318] sm:$0xff] }
 0x172   :  { %v877_v40 = vpop.f32.mrf.mxu0  ;;  %3268 = vmatpush3.msra.mxu0 %v597_v36  ;;  %v645_v36 = vld [vmem:[#allocation8 + $0x288] sm:$0xff] }
 0x173   :  { %3988 = vtanh.f32 %v877_v40  ;;  %v946_v42 = vpop.f32.mrf.mxu1  ;;  %3269 = vmatprep.subr.mxu0 %v612_v38  ;;  %v629_v38 = vld [vmem:[#allocation8 + $0x208] sm:$0xff]  ;;  %v644_v40 = vld [vmem:[#allocation8 + $0x280] sm:$0xff] }
 0x174   :  { %3990 = vtanh.f32 %v875_v37  ;;  %3270 = vmatpush3.msra.mxu0 %v596_v39  ;;  %v678_v37 = vld [vmem:[#allocation8 + $0x390] sm:$0xff] }
 0x175   :  { %3992 = vtanh.f32 %v946_v42  ;;  %v948_v43 = vpop.f32.mrf.mxu1  ;;  %3309 = vmatprep.subr.mxu0 %v691_v41  ;;  %v662_v39 = vld [vmem:[#allocation8 + $0x310] sm:$0xff]  ;;  %v677_v41 = vld [vmem:[#allocation8 + $0x388] sm:$0xff]  ;;  %v628_v42 = vld [vmem:[#allocation8 + $0x200] sm:$0xff] }
 0x176   :  { %3994 = vtanh.f32 %v948_v43  ;;  %v661_v43 = vld [vmem:[#allocation8 + $0x308] sm:$0xff] }
 0x180   :  { %v3989_v44 = vpop.eup %3988 }
 0x181   :  { %v3991_v46 = vpop.eup %3990  ;;  %1388 = vmatprep.mubr.f32.mxu1 %v3989_v44  ;;  %v723_v44 = vld [vmem:[#allocation8 + $0x4f8] sm:$0xff] }
 0x182   :  { %v3993_v48 = vpop.eup %3992  ;;  %1389 = vmatmul.mubr.f32.vlgmr.msra.gmra.mxu1 %v3991_v46  ;;  %v660_v46 = vld [vmem:[#allocation8 + $0x300] sm:$0xff] }
 0x183   :  { %v3995_v50 = vpop.eup %3994  ;;  %3275 = vmatpush3.msra.mxu1 %v643_v45  ;;  %v676_v45 = vld [vmem:[#allocation8 + $0x380] sm:$0xff] }
 0x184   :  { %1458 = vmatprep.mubr.f32.mxu0 %v3995_v50  ;;  %3276 = vmatprep.subr.mxu1 %v658_v47  ;;  %v755_v47 = vld [vmem:[#allocation8 + $0x5f8] sm:$0xff] }
 0x185   :  { %1459 = vmatmul.mubr.f32.vlgmr.msra.gmra.mxu0 %v3993_v48  ;;  %3277 = vmatpush3.msra.mxu1 %v642_v49 }
 0x186   :  { %3310 = vmatpush3.msra.mxu0 %v675_v51  ;;  %3278 = vmatprep.subr.mxu1 %v657_v52 }
 0x187   :  { %3311 = vmatprep.subr.mxu0 %v690_v53  ;;  %3279 = vmatpush3.msra.mxu1 %v641_v54  ;;  %v707_v53 = vld [vmem:[#allocation8 + $0x478] sm:$0xff] }
 0x188   :  { %3312 = vmatpush3.msra.mxu0 %v674_v55  ;;  %3280 = vmatprep.subr.mxu1 %v656_v56  ;;  %v722_v55 = vld [vmem:[#allocation8 + $0x4f0] sm:$0xff] }
 0x189   :  { %3313 = vmatprep.subr.mxu0 %v689_v57  ;;  %3281 = vmatpush3.msra.mxu1 %v640_v58  ;;  %v706_v57 = vld [vmem:[#allocation8 + $0x470] sm:$0xff] }
 0x18a   :  { %3314 = vmatpush3.msra.mxu0 %v673_v59  ;;  %3282 = vmatprep.subr.mxu1 %v655_v61  ;;  %v739_v59 = vld [vmem:[#allocation8 + $0x578] sm:$0xff]  ;;  %v721_v61 = vld [vmem:[#allocation8 + $0x4e8] sm:$0xff] }
 0x18b   :  { %3315 = vmatprep.subr.mxu0 %v688_v62  ;;  %3283 = vmatpush3.msra.mxu1 %v639_v0  ;;  %v754_v62 = vld [vmem:[#allocation8 + $0x5f0] sm:$0xff]  ;;  %v705_v0 = vld [vmem:[#allocation8 + $0x468] sm:$0xff] }
 0x18c   :  { %3316 = vmatpush3.msra.mxu0 %v672_v1  ;;  %3284 = vmatprep.subr.mxu1 %v654_v2  ;;  %v738_v1 = vld [vmem:[#allocation8 + $0x570] sm:$0xff]  ;;  %v720_v2 = vld [vmem:[#allocation8 + $0x4e0] sm:$0xff] }
 0x18d   :  { %3317 = vmatprep.subr.mxu0 %v687_v3  ;;  %3285 = vmatpush3.msra.mxu1 %v638_v4  ;;  %v753_v3 = vld [vmem:[#allocation8 + $0x5e8] sm:$0xff]  ;;  %v704_v4 = vld [vmem:[#allocation8 + $0x460] sm:$0xff] }
 0x18e   :  { %3318 = vmatpush3.msra.mxu0 %v671_v5  ;;  %3286 = vmatprep.subr.mxu1 %v653_v6  ;;  %v737_v5 = vld [vmem:[#allocation8 + $0x568] sm:$0xff]  ;;  %v719_v6 = vld [vmem:[#allocation8 + $0x4d8] sm:$0xff] }
 0x18f   :  { %3319 = vmatprep.subr.mxu0 %v686_v7  ;;  %3287 = vmatpush3.msra.mxu1 %v637_v8  ;;  %v752_v7 = vld [vmem:[#allocation8 + $0x5e0] sm:$0xff]  ;;  %v703_v8 = vld [vmem:[#allocation8 + $0x458] sm:$0xff] }
 0x190   :  { %3320 = vmatpush3.msra.mxu0 %v670_v10  ;;  %3288 = vmatprep.subr.mxu1 %v652_v11  ;;  %v736_v10 = vld [vmem:[#allocation8 + $0x560] sm:$0xff]  ;;  %v718_v11 = vld [vmem:[#allocation8 + $0x4d0] sm:$0xff] }
 0x191   :  { %3321 = vmatprep.subr.mxu0 %v685_v12  ;;  %3289 = vmatpush3.msra.mxu1 %v636_v13  ;;  %v751_v12 = vld [vmem:[#allocation8 + $0x5d8] sm:$0xff]  ;;  %v702_v13 = vld [vmem:[#allocation8 + $0x450] sm:$0xff] }
 0x192   :  { %3322 = vmatpush3.msra.mxu0 %v669_v14  ;;  %3290 = vmatprep.subr.mxu1 %v651_v15  ;;  %v735_v14 = vld [vmem:[#allocation8 + $0x558] sm:$0xff]  ;;  %v717_v15 = vld [vmem:[#allocation8 + $0x4c8] sm:$0xff] }
 0x193   :  { %3323 = vmatprep.subr.mxu0 %v684_v16  ;;  %3291 = vmatpush3.msra.mxu1 %v635_v17  ;;  %v750_v16 = vld [vmem:[#allocation8 + $0x5d0] sm:$0xff]  ;;  %v701_v17 = vld [vmem:[#allocation8 + $0x448] sm:$0xff] }
 0x194   :  { %3324 = vmatpush3.msra.mxu0 %v668_v18  ;;  %3292 = vmatprep.subr.mxu1 %v650_v9  ;;  %v734_v18 = vld [vmem:[#allocation8 + $0x550] sm:$0xff]  ;;  %v716_v9 = vld [vmem:[#allocation8 + $0x4c0] sm:$0xff] }
 0x195   :  { %3325 = vmatprep.subr.mxu0 %v683_v19  ;;  %3293 = vmatpush3.msra.mxu1 %v634_v60  ;;  %v749_v19 = vld [vmem:[#allocation8 + $0x5c8] sm:$0xff]  ;;  %v700_v60 = vld [vmem:[#allocation8 + $0x440] sm:$0xff] }
 0x196   :  { %3326 = vmatpush3.msra.mxu0 %v667_v20  ;;  %3294 = vmatprep.subr.mxu1 %v649_v21  ;;  %v733_v20 = vld [vmem:[#allocation8 + $0x548] sm:$0xff]  ;;  %v715_v21 = vld [vmem:[#allocation8 + $0x4b8] sm:$0xff] }
 0x197   :  { %3327 = vmatprep.subr.mxu0 %v682_v63  ;;  %3295 = vmatpush3.msra.mxu1 %v633_v22  ;;  %v748_v63 = vld [vmem:[#allocation8 + $0x5c0] sm:$0xff]  ;;  %v699_v22 = vld [vmem:[#allocation8 + $0x438] sm:$0xff] }
 0x198   :  { %3328 = vmatpush3.msra.mxu0 %v666_v23  ;;  %3296 = vmatprep.subr.mxu1 %v648_v24  ;;  %v732_v23 = vld [vmem:[#allocation8 + $0x540] sm:$0xff]  ;;  %v714_v24 = vld [vmem:[#allocation8 + $0x4b0] sm:$0xff] }
 0x199   :  { %3329 = vmatprep.subr.mxu0 %v681_v25  ;;  %3297 = vmatpush3.msra.mxu1 %v632_v26  ;;  %v747_v25 = vld [vmem:[#allocation8 + $0x5b8] sm:$0xff]  ;;  %v698_v26 = vld [vmem:[#allocation8 + $0x430] sm:$0xff] }
 0x19a   :  { %3330 = vmatpush3.msra.mxu0 %v665_v27  ;;  %3298 = vmatprep.subr.mxu1 %v647_v28  ;;  %v731_v27 = vld [vmem:[#allocation8 + $0x538] sm:$0xff]  ;;  %v713_v28 = vld [vmem:[#allocation8 + $0x4a8] sm:$0xff] }
 0x19b   :  { %3331 = vmatprep.subr.mxu0 %v680_v29  ;;  %3299 = vmatpush3.msra.mxu1 %v631_v30  ;;  %v746_v29 = vld [vmem:[#allocation8 + $0x5b0] sm:$0xff]  ;;  %v697_v30 = vld [vmem:[#allocation8 + $0x428] sm:$0xff] }
 0x19c   :  { %3332 = vmatpush3.msra.mxu0 %v664_v31  ;;  %3300 = vmatprep.subr.mxu1 %v646_v32  ;;  %v730_v31 = vld [vmem:[#allocation8 + $0x530] sm:$0xff]  ;;  %v712_v32 = vld [vmem:[#allocation8 + $0x4a0] sm:$0xff] }
 0x19d   :  { %3333 = vmatprep.subr.mxu0 %v679_v33  ;;  %3301 = vmatpush3.msra.mxu1 %v630_v34  ;;  %v745_v33 = vld [vmem:[#allocation8 + $0x5a8] sm:$0xff]  ;;  %v696_v34 = vld [vmem:[#allocation8 + $0x420] sm:$0xff] }
 0x19e   :  { %3334 = vmatpush3.msra.mxu0 %v663_v35  ;;  %3302 = vmatprep.subr.mxu1 %v645_v36  ;;  %v729_v35 = vld [vmem:[#allocation8 + $0x528] sm:$0xff]  ;;  %v711_v36 = vld [vmem:[#allocation8 + $0x498] sm:$0xff] }
 0x19f   :  { %3335 = vmatprep.subr.mxu0 %v678_v37  ;;  %3303 = vmatpush3.msra.mxu1 %v629_v38  ;;  %v744_v37 = vld [vmem:[#allocation8 + $0x5a0] sm:$0xff]  ;;  %v695_v38 = vld [vmem:[#allocation8 + $0x418] sm:$0xff] }
 0x1a0   :  { %3336 = vmatpush3.msra.mxu0 %v662_v39  ;;  %3304 = vmatprep.subr.mxu1 %v644_v40  ;;  %v728_v39 = vld [vmem:[#allocation8 + $0x520] sm:$0xff]  ;;  %v710_v40 = vld [vmem:[#allocation8 + $0x490] sm:$0xff] }
 0x1a1   :  { %3337 = vmatprep.subr.mxu0 %v677_v41  ;;  %3305 = vmatpush3.msra.mxu1 %v628_v42  ;;  %v743_v41 = vld [vmem:[#allocation8 + $0x598] sm:$0xff]  ;;  %v694_v42 = vld [vmem:[#allocation8 + $0x410] sm:$0xff] }
 0x1a2   :  { %3338 = vmatpush3.msra.mxu0 %v661_v43  ;;  %3344 = vmatprep.subr.mxu1 %v723_v44  ;;  %v727_v43 = vld [vmem:[#allocation8 + $0x518] sm:$0xff]  ;;  %v709_v44 = vld [vmem:[#allocation8 + $0x488] sm:$0xff] }
 0x1a3   :  { %3339 = vmatprep.subr.mxu0 %v676_v45  ;;  %v742_v45 = vld [vmem:[#allocation8 + $0x590] sm:$0xff] }
 0x1a4   :  { %3340 = vmatpush3.msra.mxu0 %v660_v46  ;;  %v693_v46 = vld [vmem:[#allocation8 + $0x408] sm:$0xff] }
 0x1a5   :  { %3379 = vmatprep.subr.mxu0 %v755_v47  ;;  %v726_v47 = vld [vmem:[#allocation8 + $0x510] sm:$0xff] }
 0x1b2   :  { %v1017_v48 = vpop.f32.mrf.mxu0 }
 0x1b4   :  { %v1019_v49 = vpop.f32.mrf.mxu0 }
 0x1b5   :  { %3996 = vtanh.f32 %v1019_v49  ;;  %v1088_v50 = vpop.f32.mrf.mxu1  ;;  %v741_v49 = vld [vmem:[#allocation8 + $0x588] sm:$0xff] }
 0x1b6   :  { %3998 = vtanh.f32 %v1017_v48  ;;  %v708_v48 = vld [vmem:[#allocation8 + $0x480] sm:$0xff] }
 0x1b7   :  { %4000 = vtanh.f32 %v1088_v50  ;;  %v1090_v51 = vpop.f32.mrf.mxu1  ;;  %v692_v50 = vld [vmem:[#allocation8 + $0x400] sm:$0xff] }
 0x1b8   :  { %4002 = vtanh.f32 %v1090_v51  ;;  %v725_v51 = vld [vmem:[#allocation8 + $0x508] sm:$0xff] }
 0x1c2   :  { %v3997_v52 = vpop.eup %3996 }
 0x1c3   :  { %v3999_v54 = vpop.eup %3998  ;;  %1528 = vmatprep.mubr.f32.mxu1 %v3997_v52  ;;  %v740_v52 = vld [vmem:[#allocation8 + $0x580] sm:$0xff] }
 0x1c4   :  { %v4001_v56 = vpop.eup %4000  ;;  %1529 = vmatmul.mubr.f32.vlgmr.msra.gmra.mxu1 %v3999_v54  ;;  %v4959_v54 = vmov 0.0  }
 0x1c5   :  { %v4003_v58 = vpop.eup %4002  ;;  %3345 = vmatpush3.msra.mxu1 %v707_v53  ;;  %v724_v53 = vld [vmem:[#allocation8 + $0x500] sm:$0xff] }
 0x1c6   :  { %1598 = vmatprep.mubr.f32.mxu0 %v4003_v58  ;;  %3346 = vmatprep.subr.mxu1 %v722_v55 }
 0x1c7   :  { %1599 = vmatmul.mubr.f32.vlgmr.msra.gmra.mxu0 %v4001_v56  ;;  %3347 = vmatpush3.msra.mxu1 %v706_v57 }
 0x1c8   :  { %3380 = vmatpush3.msra.mxu0 %v739_v59  ;;  %3348 = vmatprep.subr.mxu1 %v721_v61  ;;  %v771_v61 = vld [vmem:[#allocation8 + $0x678] sm:$0xff] }
 0x1c9   :  { %3381 = vmatprep.subr.mxu0 %v754_v62  ;;  %3349 = vmatpush3.msra.mxu1 %v705_v0 }
 0x1ca   :  { %3382 = vmatpush3.msra.mxu0 %v738_v1  ;;  %3350 = vmatprep.subr.mxu1 %v720_v2  ;;  %v770_v1 = vld [vmem:[#allocation8 + $0x670] sm:$0xff] }
 0x1cb   :  { %3383 = vmatprep.subr.mxu0 %v753_v3  ;;  %3351 = vmatpush3.msra.mxu1 %v704_v4  ;;  %v769_v3 = vld [vmem:[#allocation8 + $0x668] sm:$0xff]  ;;  %v768_v4 = vld [vmem:[#allocation8 + $0x660] sm:$0xff] }
 0x1cc   :  { %3384 = vmatpush3.msra.mxu0 %v737_v5  ;;  %3352 = vmatprep.subr.mxu1 %v719_v6  ;;  %v767_v5 = vld [vmem:[#allocation8 + $0x658] sm:$0xff]  ;;  %v766_v6 = vld [vmem:[#allocation8 + $0x650] sm:$0xff] }
 0x1cd   :  { %3385 = vmatprep.subr.mxu0 %v752_v7  ;;  %3353 = vmatpush3.msra.mxu1 %v703_v8  ;;  %v765_v7 = vld [vmem:[#allocation8 + $0x648] sm:$0xff]  ;;  %v764_v8 = vld [vmem:[#allocation8 + $0x640] sm:$0xff] }
 0x1ce   :  { %3386 = vmatpush3.msra.mxu0 %v736_v10  ;;  %3354 = vmatprep.subr.mxu1 %v718_v11  ;;  %v763_v10 = vld [vmem:[#allocation8 + $0x638] sm:$0xff] }
 0x1cf   :  { %3387 = vmatprep.subr.mxu0 %v751_v12  ;;  %3355 = vmatpush3.msra.mxu1 %v702_v13  ;;  %v762_v12 = vld [vmem:[#allocation8 + $0x630] sm:$0xff] }
 0x1d0   :  { %3388 = vmatpush3.msra.mxu0 %v735_v14  ;;  %3356 = vmatprep.subr.mxu1 %v717_v15  ;;  %v761_v15 = vld [vmem:[#allocation8 + $0x628] sm:$0xff] }
 0x1d1   :  { %3389 = vmatprep.subr.mxu0 %v750_v16  ;;  %3357 = vmatpush3.msra.mxu1 %v701_v17  ;;  %v760_v16 = vld [vmem:[#allocation8 + $0x620] sm:$0xff]  ;;  %v759_v17 = vld [vmem:[#allocation8 + $0x618] sm:$0xff] }
 0x1d2   :  { %3390 = vmatpush3.msra.mxu0 %v734_v18  ;;  %3358 = vmatprep.subr.mxu1 %v716_v9  ;;  %v758_v18 = vld [vmem:[#allocation8 + $0x610] sm:$0xff]  ;;  %v757_v9 = vld [vmem:[#allocation8 + $0x608] sm:$0xff] }
 0x1d3   :  { %3391 = vmatprep.subr.mxu0 %v749_v19  ;;  %3359 = vmatpush3.msra.mxu1 %v700_v60  ;;  %v756_v19 = vld [vmem:[#allocation8 + $0x600] sm:$0xff] }
 0x1d4   :  { %3392 = vmatpush3.msra.mxu0 %v733_v20  ;;  %3360 = vmatprep.subr.mxu1 %v715_v21  ;;  %v788_v20 = vld [vmem:[#allocation11 + $0x78] sm:$0xff]  ;;  %v787_v21 = vld [vmem:[#allocation11 + $0x70] sm:$0xff] }
 0x1d5   :  { %3393 = vmatprep.subr.mxu0 %v748_v63  ;;  %3361 = vmatpush3.msra.mxu1 %v699_v22  ;;  %v786_v63 = vld [vmem:[#allocation11 + $0x68] sm:$0xff]  ;;  %v785_v22 = vld [vmem:[#allocation11 + $0x60] sm:$0xff] }
 0x1d6   :  { %3394 = vmatpush3.msra.mxu0 %v732_v23  ;;  %3362 = vmatprep.subr.mxu1 %v714_v24  ;;  %v784_v23 = vld [vmem:[#allocation11 + $0x58] sm:$0xff]  ;;  %v783_v24 = vld [vmem:[#allocation11 + $0x50] sm:$0xff] }
 0x1d7   :  { %3395 = vmatprep.subr.mxu0 %v747_v25  ;;  %3363 = vmatpush3.msra.mxu1 %v698_v26  ;;  %v782_v25 = vld [vmem:[#allocation11 + $0x48] sm:$0xff]  ;;  %v781_v26 = vld [vmem:[#allocation11 + $0x40] sm:$0xff] }
 0x1d8   :  { %3396 = vmatpush3.msra.mxu0 %v731_v27  ;;  %3364 = vmatprep.subr.mxu1 %v713_v28  ;;  %v780_v27 = vld [vmem:[#allocation11 + $0x38] sm:$0xff]  ;;  %v779_v28 = vld [vmem:[#allocation11 + $0x30] sm:$0xff] }
 0x1d9   :  { %3397 = vmatprep.subr.mxu0 %v746_v29  ;;  %3365 = vmatpush3.msra.mxu1 %v697_v30  ;;  %v778_v29 = vld [vmem:[#allocation11 + $0x28] sm:$0xff]  ;;  %v777_v30 = vld [vmem:[#allocation11 + $0x20] sm:$0xff] }
 0x1da   :  { %3398 = vmatpush3.msra.mxu0 %v730_v31  ;;  %3366 = vmatprep.subr.mxu1 %v712_v32  ;;  %v776_v31 = vld [vmem:[#allocation11 + $0x18] sm:$0xff]  ;;  %v775_v32 = vld [vmem:[#allocation11 + $0x10] sm:$0xff] }
 0x1db   :  { %3399 = vmatprep.subr.mxu0 %v745_v33  ;;  %3367 = vmatpush3.msra.mxu1 %v696_v34  ;;  %v774_v33 = vld [vmem:[#allocation11 + $0x8] sm:$0xff]  ;;  %v773_v34 = vld [vmem:[#allocation11] sm:$0xff] }
 0x1dc   :  { %3400 = vmatpush3.msra.mxu0 %v729_v35  ;;  %3368 = vmatprep.subr.mxu1 %v711_v36  ;;  %v4054_v35 = vld [vmem:[#allocation7 + $0x620] sm:$0xff] }
 0x1dd   :  { %3401 = vmatprep.subr.mxu0 %v744_v37  ;;  %3369 = vmatpush3.msra.mxu1 %v695_v38  ;;  %v805_v36 = vld [vmem:[#allocation14 + $0x78] sm:$0xff]  ;;  %v804_v37 = vld [vmem:[#allocation14 + $0x70] sm:$0xff]  ;;  %v803_v38 = vld [vmem:[#allocation14 + $0x68] sm:$0xff] }
 0x1de   :  { %3402 = vmatpush3.msra.mxu0 %v728_v39  ;;  %3370 = vmatprep.subr.mxu1 %v710_v40  ;;  %v802_v39 = vld [vmem:[#allocation14 + $0x60] sm:$0xff]  ;;  %v801_v40 = vld [vmem:[#allocation14 + $0x58] sm:$0xff] }
 0x1df   :  { %3403 = vmatprep.subr.mxu0 %v743_v41  ;;  %3371 = vmatpush3.msra.mxu1 %v694_v42  ;;  %v800_v41 = vld [vmem:[#allocation14 + $0x50] sm:$0xff]  ;;  %v799_v42 = vld [vmem:[#allocation14 + $0x48] sm:$0xff] }
 0x1e0   :  { %3404 = vmatpush3.msra.mxu0 %v727_v43  ;;  %3372 = vmatprep.subr.mxu1 %v709_v44  ;;  %v798_v43 = vld [vmem:[#allocation14 + $0x40] sm:$0xff]  ;;  %v797_v44 = vld [vmem:[#allocation14 + $0x38] sm:$0xff] }
 0x1e1   :  { %3405 = vmatprep.subr.mxu0 %v742_v45  ;;  %3373 = vmatpush3.msra.mxu1 %v693_v46  ;;  %v796_v45 = vld [vmem:[#allocation14 + $0x30] sm:$0xff]  ;;  %v795_v46 = vld [vmem:[#allocation14 + $0x28] sm:$0xff] }
 0x1e2   :  { %3406 = vmatpush3.msra.mxu0 %v726_v47  ;;  %3374 = vmatprep.subr.mxu1 %v708_v48  ;;  %v794_v47 = vld [vmem:[#allocation14 + $0x20] sm:$0xff]  ;;  %v793_v48 = vld [vmem:[#allocation14 + $0x18] sm:$0xff] }
 0x1e3   :  { %3407 = vmatprep.subr.mxu0 %v741_v49  ;;  %3375 = vmatpush3.msra.mxu1 %v692_v50  ;;  %v792_v49 = vld [vmem:[#allocation14 + $0x10] sm:$0xff] }
 0x1e4   :  { %3408 = vmatpush3.msra.mxu0 %v725_v51  ;;  %3761 = vmatprep.subr.mxu1 %v4959_v54 }
 0x1e5   :  { %3409 = vmatprep.subr.mxu0 %v740_v52 }
 0x1e6   :  { %3410 = vmatpush3.msra.mxu0 %v724_v53 }
 0x1e7   :  { %3796 = vmatprep.subr.mxu0 %v4959_v54 }
 0x1f4   :  { %v1159_v55 = vpop.f32.mrf.mxu0 }
 0x1f6   :  { %v1161_v56 = vpop.f32.mrf.mxu0 }
 0x1f7   :  { %4004 = vtanh.f32 %v1161_v56  ;;  %v1230_v57 = vpop.f32.mrf.mxu1  ;;  %v3166_v56 = vld [vmem:[#allocation10] ss:$0 sm:$0xff] }
 0x1f8   :  { %4006 = vtanh.f32 %v1159_v55 }
 0x1f9   :  { %4008 = vtanh.f32 %v1230_v57  ;;  %v1232_v58 = vpop.f32.mrf.mxu1 }
 0x1fa   :  { %4010 = vtanh.f32 %v1232_v58 }
 0x204   :  { %v4005_v59 = vpop.eup %4004 }
 0x205   :  { %v4007_v62 = vpop.eup %4006  ;;  %1668 = vmatprep.mubr.f32.mxu1 %v4005_v59 }
 0x206   :  { %v4009_v0 = vpop.eup %4008  ;;  %1669 = vmatmul.mubr.f32.vlgmr.msra.gmra.mxu1 %v4007_v62 }
 0x207   :  { %v4011_v2 = vpop.eup %4010  ;;  %3762 = vmatpush3.msra.mxu1 %v771_v61  ;;  %3793 = vmatprep.mubr.msk.f32.mxu1 %vm4960_vm0, %v4959_v54 }
 0x208   :  { %1738 = vmatprep.mubr.f32.mxu0 %v4011_v2  ;;  %3763 = vmatprep.subr.mxu1 %v4959_v54 }
 0x209   :  { %1739 = vmatmul.mubr.f32.vlgmr.msra.gmra.mxu0 %v4009_v0  ;;  %3764 = vmatpush3.msra.mxu1 %v770_v1 }
 0x20a   :  { %3765 = vmatprep.subr.mxu1 %v4959_v54  ;;  %3828 = vmatprep.mubr.msk.f32.mxu0 %vm4960_vm0, %v4959_v54 }
 0x20b   :  { %3766 = vmatpush3.msra.mxu1 %v769_v3  ;;  %3797 = vmatpush3.msra.mxu0 %v788_v20  ;;  %v4058_v20 = vld [vmem:[#allocation7 + $0x550] sm:$0xff] }
 0x20c   :  { %3767 = vmatprep.subr.mxu1 %v4959_v54  ;;  %3798 = vmatprep.subr.mxu0 %v4959_v54 }
 0x20d   :  { %3768 = vmatpush3.msra.mxu1 %v768_v4  ;;  %3799 = vmatpush3.msra.mxu0 %v787_v21  ;;  %v4059_v21 = vld [vmem:[#allocation7 + $0x548] sm:$0xff] }
 0x20e   :  { %3769 = vmatprep.subr.mxu1 %v4959_v54  ;;  %3800 = vmatprep.subr.mxu0 %v4959_v54 }
 0x20f   :  { %3770 = vmatpush3.msra.mxu1 %v767_v5  ;;  %3801 = vmatpush3.msra.mxu0 %v786_v63  ;;  %v4060_v63 = vld [vmem:[#allocation7 + $0x4e8] sm:$0xff] }
 0x210   :  { %3771 = vmatprep.subr.mxu1 %v4959_v54  ;;  %3802 = vmatprep.subr.mxu0 %v4959_v54 }
 0x211   :  { %3772 = vmatpush3.msra.mxu1 %v766_v6  ;;  %3803 = vmatpush3.msra.mxu0 %v785_v22  ;;  %v4061_v22 = vld [vmem:[#allocation7 + $0x4e0] sm:$0xff] }
 0x212   :  { %3773 = vmatprep.subr.mxu1 %v4959_v54  ;;  %3804 = vmatprep.subr.mxu0 %v4959_v54 }
 0x213   :  { %3774 = vmatpush3.msra.mxu1 %v765_v7  ;;  %3805 = vmatpush3.msra.mxu0 %v784_v23  ;;  %v4062_v23 = vld [vmem:[#allocation7 + $0x480] sm:$0xff] }
 0x214   :  { %3775 = vmatprep.subr.mxu1 %v4959_v54  ;;  %3806 = vmatprep.subr.mxu0 %v4959_v54 }
 0x215   :  { %v3201_v11 = vpop.f32.mrf.mxu0  ;;  %3776 = vmatpush3.msra.mxu1 %v764_v8  ;;  %3807 = vmatpush3.msra.mxu0 %v783_v24  ;;  %v4063_v24 = vld [vmem:[#allocation7 + $0x478] sm:$0xff] }
 0x216   :  { %3777 = vmatprep.subr.mxu1 %v4959_v54  ;;  %3808 = vmatprep.subr.mxu0 %v4959_v54 }
 0x217   :  { %v3202_v13 = vpop.f32.mrf.mxu0  ;;  %3778 = vmatpush3.msra.mxu1 %v763_v10  ;;  %3809 = vmatpush3.msra.mxu0 %v782_v25  ;;  %v4064_v25 = vld [vmem:[#allocation7 + $0x418] sm:$0xff] }
 0x218   :  { %v3203_v14 = vadd.f32 %v3202_v13, %v3201_v11  ;;  %3779 = vmatprep.subr.mxu1 %v4959_v54  ;;  %3810 = vmatprep.subr.mxu0 %v4959_v54 }
 0x219   :  { %3780 = vmatpush3.msra.mxu1 %v762_v12  ;;  %3811 = vmatpush3.msra.mxu0 %v781_v26  ;;  %v4065_v26 = vld [vmem:[#allocation7 + $0x410] sm:$0xff] }
 0x21a   :  { %4012 = vtanh.f32 %v3203_v14  ;;  %3781 = vmatprep.subr.mxu1 %v4959_v54  ;;  %3812 = vmatprep.subr.mxu0 %v4959_v54 }
 0x21b   :  { %3782 = vmatpush3.msra.mxu1 %v761_v15  ;;  %3813 = vmatpush3.msra.mxu0 %v780_v27  ;;  %v4066_v27 = vld [vmem:[#allocation7 + $0x3b0] sm:$0xff] }
 0x21c   :  { %3783 = vmatprep.subr.mxu1 %v4959_v54  ;;  %3814 = vmatprep.subr.mxu0 %v4959_v54 }
 0x21d   :  { %3784 = vmatpush3.msra.mxu1 %v760_v16  ;;  %3815 = vmatpush3.msra.mxu0 %v779_v28  ;;  %v4067_v28 = vld [vmem:[#allocation7 + $0x3a8] sm:$0xff] }
 0x21e   :  { %3785 = vmatprep.subr.mxu1 %v4959_v54  ;;  %3816 = vmatprep.subr.mxu0 %v4959_v54 }
 0x21f   :  { %3786 = vmatpush3.msra.mxu1 %v759_v17  ;;  %3817 = vmatpush3.msra.mxu0 %v778_v29  ;;  %v4068_v29 = vld [vmem:[#allocation7 + $0x348] sm:$0xff] }
 0x220   :  { %3787 = vmatprep.subr.mxu1 %v4959_v54  ;;  %3818 = vmatprep.subr.mxu0 %v4959_v54 }
 0x221   :  { %3788 = vmatpush3.msra.mxu1 %v758_v18  ;;  %3819 = vmatpush3.msra.mxu0 %v777_v30  ;;  %v4069_v30 = vld [vmem:[#allocation7 + $0x340] sm:$0xff] }
 0x222   :  { %3789 = vmatprep.subr.mxu1 %v4959_v54  ;;  %3820 = vmatprep.subr.mxu0 %v4959_v54 }
 0x223   :  { %3790 = vmatpush3.msra.mxu1 %v757_v9  ;;  %3821 = vmatpush3.msra.mxu0 %v776_v31  ;;  %v4055_v9 = vld [vmem:[#allocation7 + $0x618] sm:$0xff]  ;;  %v4070_v31 = vld [vmem:[#allocation7 + $0x2e0] sm:$0xff] }
 0x224   :  { %3791 = vmatprep.subr.mxu1 %v4959_v54  ;;  %3822 = vmatprep.subr.mxu0 %v4959_v54 }
 0x225   :  { %3792 = vmatpush3.msra.mxu1 %v756_v19  ;;  %3823 = vmatpush3.msra.mxu0 %v775_v32  ;;  %v4056_v19 = vld [vmem:[#allocation7 + $0x5b8] sm:$0xff] }
 0x226   :  { %3831 = vmatprep.subr.mxu1 %v4959_v54  ;;  %3824 = vmatprep.subr.mxu0 %v4959_v54  ;;  %v4071_v32 = vld [vmem:[#allocation7 + $0x2d8] sm:$0xff] }
 0x227   :  { %v4013_v60 = vpop.eup %4012  ;;  %3825 = vmatpush3.msra.mxu0 %v774_v33  ;;  %v4072_v33 = vld [vmem:[#allocation7 + $0x278] sm:$0xff] }
 0x228   :  { %3794 = vmatmul.mubr.f32.vlgmr.msra.gmra.mxu1 %v4013_v60  ;;  %3826 = vmatprep.subr.mxu0 %v4959_v54  ;;  %v4057_v60 = vld [vmem:[#allocation7 + $0x5b0] sm:$0xff] }
 0x229   :  { %3863 = vmatprep.mubr.msk.f32.mxu1 %vm4960_vm0, %v4959_v54  ;;  %3827 = vmatpush3.msra.mxu0 %v773_v34  ;;  %v4073_v34 = vld [vmem:[#allocation7 + $0x270] sm:$0xff] }
 0x22a   :  { %1981 = vmatprep.subr.mxu0 %v4054_v35  ;;  %3832 = vmatpush3.msra.mxu1 %v805_v36  ;;  %v4074_v35 = vld [vmem:[#allocation7 + $0x210] sm:$0xff]  ;;  %v4075_v36 = vld [vmem:[#allocation7 + $0x208] sm:$0xff] }
 0x22b   :  { %3833 = vmatprep.subr.mxu1 %v4959_v54 }
 0x22c   :  { %3834 = vmatpush3.msra.mxu1 %v804_v37  ;;  %v4076_v37 = vld [vmem:[#allocation7 + $0x1a8] sm:$0xff] }
 0x22d   :  { %3835 = vmatprep.subr.mxu1 %v4959_v54 }
 0x22e   :  { %3836 = vmatpush3.msra.mxu1 %v803_v38  ;;  %v4077_v38 = vld [vmem:[#allocation7 + $0x1a0] sm:$0xff] }
 0x22f   :  { %3837 = vmatprep.subr.mxu1 %v4959_v54 }
 0x230   :  { %3838 = vmatpush3.msra.mxu1 %v802_v39  ;;  %v4078_v39 = vld [vmem:[#allocation7 + $0x140] sm:$0xff] }
 0x231   :  { %3839 = vmatprep.subr.mxu1 %v4959_v54 }
 0x232   :  { %3840 = vmatpush3.msra.mxu1 %v801_v40  ;;  %v4079_v40 = vld [vmem:[#allocation7 + $0x138] sm:$0xff] }
 0x233   :  { %3841 = vmatprep.subr.mxu1 %v4959_v54 }
 0x234   :  { %3842 = vmatpush3.msra.mxu1 %v800_v41  ;;  %v4080_v41 = vld [vmem:[#allocation7 + $0xd8] sm:$0xff] }
 0x235   :  { %3843 = vmatprep.subr.mxu1 %v4959_v54 }
 0x236   :  { %3844 = vmatpush3.msra.mxu1 %v799_v42  ;;  %v4081_v42 = vld [vmem:[#allocation7 + $0xd0] sm:$0xff] }
 0x237   :  { %3845 = vmatprep.subr.mxu1 %v4959_v54 }
 0x238   :  { %3846 = vmatpush3.msra.mxu1 %v798_v43  ;;  %v4082_v43 = vld [vmem:[#allocation7 + $0x70] sm:$0xff] }
 0x239   :  { %3847 = vmatprep.subr.mxu1 %v4959_v54 }
 0x23a   :  { %3848 = vmatpush3.msra.mxu1 %v797_v44  ;;  %v4083_v44 = vld [vmem:[#allocation7 + $0x68] sm:$0xff] }
 0x23b   :  { %3849 = vmatprep.subr.mxu1 %v4959_v54 }
 0x23c   :  { %3850 = vmatpush3.msra.mxu1 %v796_v45  ;;  %v4084_v45 = vld [vmem:[#allocation7 + $0x8] sm:$0xff] }
 0x23d   :  { %3851 = vmatprep.subr.mxu1 %v4959_v54 }
 0x23e   :  { %3852 = vmatpush3.msra.mxu1 %v795_v46  ;;  %v4085_v46 = vld [vmem:[#allocation7] sm:$0xff] }
 0x23f   :  { %3853 = vmatprep.subr.mxu1 %v4959_v54 }
 0x240   :  { %3854 = vmatpush3.msra.mxu1 %v794_v47  ;;  %v4086_v47 = vld [vmem:[#allocation7 + $0xca0] sm:$0xff] }
 0x241   :  { %3855 = vmatprep.subr.mxu1 %v4959_v54 }
 0x242   :  { %3856 = vmatpush3.msra.mxu1 %v793_v48  ;;  %v3236_v50 = vpop.f32.mrf.mxu1  ;;  %v4087_v48 = vld [vmem:[#allocation7 + $0xc98] sm:$0xff] }
 0x243   :  { %3857 = vmatprep.subr.mxu1 %v4959_v54 }
 0x244   :  { %3858 = vmatpush3.msra.mxu1 %v792_v49  ;;  %v3237_v51 = vpop.f32.mrf.mxu1  ;;  %v4088_v49 = vld [vmem:[#allocation7 + $0xc38] sm:$0xff] }
 0x245   :  { %3859 = vmatprep.subr.mxu1 %v4959_v54  ;;  %v3271_v52 = vpop.f32.mrf.mxu0  ;;  %v3238_v55 = vadd.f32 %v3237_v51, %v3236_v50  ;;  %v4089_v50 = vld [vmem:[#allocation7 + $0xc30] sm:$0xff] }
 0x246   :  { %v4090_v51 = vld [vmem:[#allocation7 + $0xbd0] sm:$0xff] }
 0x247   :  { %v3272_v57 = vpop.f32.mrf.mxu0  ;;  %v1391_v61 = vadd.f32 %v3238_v55, %v3166_v56  ;;  %v4093_v55 = vld [vmem:[#allocation7 + $0xb60] sm:$0xff] }
 0x248   :  { %v3273_v62 = vadd.f32 %v3272_v57, %v3271_v52  ;;  %v4091_v52 = vld [vmem:[#allocation7 + $0xbc8] sm:$0xff]  ;;  %v4094_v56 = vld [vmem:[#allocation7 + $0xb00] sm:$0xff]  ;;  %v4095_v57 = vld [vmem:[#allocation7 + $0xaf8] sm:$0xff] }
 0x24a   :  { %v1461_v3 = vadd.f32 %v3273_v62, %v1391_v61  ;;  %v4098_v61 = vld [vmem:[#allocation7 + $0xa30] sm:$0xff]  ;;  %v4099_v62 = vld [vmem:[#allocation7 + $0xa28] sm:$0xff] }
 0x284   :  { %v3306_v53 = vpop.f32.mrf.mxu1 }
 0x286   :  { %v3307_v58 = vpop.f32.mrf.mxu1 }
 0x287   :  { %v3341_v59 = vpop.f32.mrf.mxu0  ;;  %v3308_v1 = vadd.f32 %v3307_v58, %v3306_v53  ;;  %v4092_v53 = vld [vmem:[#allocation7 + $0xb68] sm:$0xff]  ;;  %v4096_v58 = vld [vmem:[#allocation7 + $0xa98] sm:$0xff] }
 0x289   :  { %v3342_v2 = vpop.f32.mrf.mxu0  ;;  %v1531_v6 = vadd.f32 %v3308_v1, %v1461_v3  ;;  %v4101_v1 = vld [vmem:[#allocation7 + $0x9c0] sm:$0xff]  ;;  %v4103_v3 = vld [vmem:[#allocation7 + $0x958] sm:$0xff] }
 0x28a   :  { %v3343_v7 = vadd.f32 %v3342_v2, %v3341_v59  ;;  %v4097_v59 = vld [vmem:[#allocation7 + $0xa90] sm:$0xff]  ;;  %v4102_v2 = vld [vmem:[#allocation7 + $0x960] sm:$0xff] }
 0x28c   :  { %v1601_v11 = vadd.f32 %v3343_v7, %v1531_v6  ;;  %v4106_v6 = vld [vmem:[#allocation7 + $0x890] sm:$0xff]  ;;  %v4107_v7 = vld [vmem:[#allocation7 + $0x888] sm:$0xff] }
 0x2c6   :  { %v3376_v0 = vpop.f32.mrf.mxu1 }
 0x2c8   :  { %v3377_v4 = vpop.f32.mrf.mxu1 }
 0x2c9   :  { %v3411_v5 = vpop.f32.mrf.mxu0  ;;  %v3378_v8 = vadd.f32 %v3377_v4, %v3376_v0  ;;  %v4100_v0 = vld [vmem:[#allocation7 + $0x9c8] sm:$0xff]  ;;  %v4104_v4 = vld [vmem:[#allocation7 + $0x8f8] sm:$0xff] }
 0x2cb   :  { %v3412_v10 = vpop.f32.mrf.mxu0  ;;  %v1671_v12 = vadd.f32 %v3378_v8, %v1601_v11  ;;  %v4108_v8 = vld [vmem:[#allocation7 + $0x828] sm:$0xff]  ;;  %v4110_v11 = vld [vmem:[#allocation7 + $0x7c0] sm:$0xff] }
 0x2cc   :  { %v3413_v13 = vadd.f32 %v3412_v10, %v3411_v5  ;;  %v4105_v5 = vld [vmem:[#allocation7 + $0x8f0] sm:$0xff]  ;;  %v4109_v10 = vld [vmem:[#allocation7 + $0x820] sm:$0xff] }
 0x2ce   :  { %v1741_v14 = vadd.f32 %v3413_v13, %v1671_v12  ;;  %v4111_v12 = vld [vmem:[#allocation7 + $0x7b8] sm:$0xff] }
 0x2cf   :  { %v4112_v13 = vld [vmem:[#allocation7 + $0x758] sm:$0xff] }
 0x2e8   :  { %v1810_v15 = vpop.f32.mrf.mxu1 }
 0x2e9   :  { %v1811_v16 = vadd.f32 %v1810_v15, %v1741_v14  ;;  %v4113_v14 = vld [vmem:[#allocation7 + $0x750] sm:$0xff] }
 0x2ea   :  { %v3795_v17 = vpop.f32.mrf.mxu1  ;;  %v4114_v15 = vld [vmem:[#allocation7 + $0x6f0] sm:$0xff] }
 0x2eb   :  { %4014 = vtanh.f32 %v1811_v16  ;;  %v4115_v16 = vld [vmem:[#allocation7 + $0x6e8] sm:$0xff] }
 0x2ec   :  { %v4116_v17 = vld [vmem:[#allocation7 + $0x688] sm:$0xff] }
 0x2f8   :  { %v4015_v18 = vpop.eup %4014 }
 0x2f9   :  { %3829 = vmatmul.mubr.f32.vlgmr.msra.gmra.mxu0 %v4015_v18  ;;  %v4117_v18 = vld [vmem:[#allocation7 + $0x680] sm:$0xff] }
 0x2fa   :  { %1982 = vmatpush1.msra.mxu0 %v4055_v9  ;;  %v791_v9 = vld [vmem:[#allocation14 + $0x8] sm:$0xff] }
 0x2fb   :  { %1983 = vmatprep.subr.mxu0 %v4056_v19  ;;  %v4118_v19 = vld [vmem:[#allocation7 + $0x640] sm:$0xff]  ;;  %3860 = vmatpush3.msra.mxu1 %v791_v9  ;;  %v4177_v9 = vld [vmem:[#allocation7 + $0x778] sm:$0xff] }
 0x2fc   :  { %1984 = vmatpush1.msra.mxu0 %v4057_v60  ;;  %3861 = vmatprep.subr.mxu1 %v4959_v54  ;;  %v790_v60 = vld [vmem:[#allocation14] sm:$0xff] }
 0x2fd   :  { %1985 = vmatprep.subr.mxu0 %v4058_v20  ;;  %3862 = vmatpush3.msra.mxu1 %v790_v60  ;;  %v4119_v20 = vld [vmem:[#allocation7 + $0x630] sm:$0xff] }
 0x2fe   :  { %1986 = vmatpush1.msra.mxu0 %v4059_v21  ;;  %2052 = vmatprep.subr.mxu1 %v4119_v20  ;;  %v5116_v21 = vld [vmem:[#allocation5 + $0x8] sm:$0xff]  ;;  %v4179_v60 = vld [vmem:[#allocation7 + $0x710] sm:$0xff]  ;;  %v4180_v20 = vld [vmem:[#allocation7 + $0x708] sm:$0xff] }
 0x2ff   :  { %1987 = vmatprep.subr.mxu0 %v4060_v63  ;;  %2045 = vmatprep.mubr.f32.mxu0 %v5116_v21  ;;  %v5119_v63 = vld [vmem:[#allocation5] sm:$0xff] }
 0x300   :  { %1988 = vmatpush1.msra.mxu0 %v4061_v22  ;;  %v4120_v22 = vld [vmem:[#allocation7 + $0x638] sm:$0xff] }
 0x301   :  { %1989 = vmatprep.subr.mxu0 %v4062_v23  ;;  %v4121_v23 = vld [vmem:[#allocation7 + $0x5d8] sm:$0xff] }
 0x302   :  { %1990 = vmatpush1.msra.mxu0 %v4063_v24  ;;  %v4122_v24 = vld [vmem:[#allocation7 + $0x5d0] sm:$0xff] }
 0x303   :  { %1991 = vmatprep.subr.mxu0 %v4064_v25  ;;  %v4123_v25 = vld [vmem:[#allocation7 + $0x570] sm:$0xff] }
 0x304   :  { %1992 = vmatpush1.msra.mxu0 %v4065_v26  ;;  %v4124_v26 = vld [vmem:[#allocation7 + $0x568] sm:$0xff] }
 0x305   :  { %1993 = vmatprep.subr.mxu0 %v4066_v27  ;;  %v4125_v27 = vld [vmem:[#allocation7 + $0x508] sm:$0xff] }
 0x306   :  { %1994 = vmatpush1.msra.mxu0 %v4067_v28  ;;  %v4126_v28 = vld [vmem:[#allocation7 + $0x500] sm:$0xff] }
 0x307   :  { %1995 = vmatprep.subr.mxu0 %v4068_v29  ;;  %v4127_v29 = vld [vmem:[#allocation7 + $0x4a0] sm:$0xff] }
 0x308   :  { %1996 = vmatpush1.msra.mxu0 %v4069_v30  ;;  %v4128_v30 = vld [vmem:[#allocation7 + $0x498] sm:$0xff] }
 0x309   :  { %1997 = vmatprep.subr.mxu0 %v4070_v31  ;;  %v4129_v31 = vld [vmem:[#allocation7 + $0x438] sm:$0xff] }
 0x30a   :  { %1998 = vmatpush1.msra.mxu0 %v4071_v32  ;;  %v4130_v32 = vld [vmem:[#allocation7 + $0x430] sm:$0xff] }
 0x30b   :  { %1999 = vmatprep.subr.mxu0 %v4072_v33  ;;  %v4131_v33 = vld [vmem:[#allocation7 + $0x3d0] sm:$0xff] }
 0x30c   :  { %2000 = vmatpush1.msra.mxu0 %v4073_v34  ;;  %v4132_v34 = vld [vmem:[#allocation7 + $0x3c8] sm:$0xff] }
 0x30d   :  { %2001 = vmatprep.subr.mxu0 %v4074_v35  ;;  %v4133_v35 = vld [vmem:[#allocation7 + $0x368] sm:$0xff] }
 0x30e   :  { %2002 = vmatpush1.msra.mxu0 %v4075_v36  ;;  %v4134_v36 = vld [vmem:[#allocation7 + $0x360] sm:$0xff] }
 0x30f   :  { %2003 = vmatprep.subr.mxu0 %v4076_v37  ;;  %v4135_v37 = vld [vmem:[#allocation7 + $0x300] sm:$0xff] }
 0x310   :  { %2004 = vmatpush1.msra.mxu0 %v4077_v38  ;;  %v4136_v38 = vld [vmem:[#allocation7 + $0x2f8] sm:$0xff] }
 0x311   :  { %2005 = vmatprep.subr.mxu0 %v4078_v39  ;;  %v4137_v39 = vld [vmem:[#allocation7 + $0x298] sm:$0xff] }
 0x312   :  { %2006 = vmatpush1.msra.mxu0 %v4079_v40  ;;  %v4138_v40 = vld [vmem:[#allocation7 + $0x290] sm:$0xff] }
 0x313   :  { %2007 = vmatprep.subr.mxu0 %v4080_v41  ;;  %v4139_v41 = vld [vmem:[#allocation7 + $0x230] sm:$0xff] }
 0x314   :  { %2008 = vmatpush1.msra.mxu0 %v4081_v42  ;;  %v4140_v42 = vld [vmem:[#allocation7 + $0x228] sm:$0xff] }
 0x315   :  { %2009 = vmatprep.subr.mxu0 %v4082_v43  ;;  %v4141_v43 = vld [vmem:[#allocation7 + $0x1c8] sm:$0xff] }
 0x316   :  { %2010 = vmatpush1.msra.mxu0 %v4083_v44  ;;  %v4142_v44 = vld [vmem:[#allocation7 + $0x1c0] sm:$0xff] }
 0x317   :  { %2011 = vmatprep.subr.mxu0 %v4084_v45  ;;  %v4143_v45 = vld [vmem:[#allocation7 + $0x160] sm:$0xff] }
 0x318   :  { %2012 = vmatpush1.msra.mxu0 %v4085_v46  ;;  %v4144_v46 = vld [vmem:[#allocation7 + $0x158] sm:$0xff] }
 0x319   :  { %2013 = vmatprep.subr.mxu0 %v4086_v47  ;;  %v4145_v47 = vld [vmem:[#allocation7 + $0xf8] sm:$0xff] }
 0x31a   :  { %2014 = vmatpush2.msra.mxu0 %v4087_v48  ;;  %v4146_v48 = vld [vmem:[#allocation7 + $0xf0] sm:$0xff] }
 0x31b   :  { %2015 = vmatprep.subr.mxu0 %v4088_v49  ;;  %v4147_v49 = vld [vmem:[#allocation7 + $0x90] sm:$0xff] }
 0x31c   :  { %2016 = vmatpush2.msra.mxu0 %v4089_v50  ;;  %v4148_v50 = vld [vmem:[#allocation7 + $0x88] sm:$0xff] }
 0x31d   :  { %2017 = vmatprep.subr.mxu0 %v4090_v51  ;;  %v4149_v51 = vld [vmem:[#allocation7 + $0x28] sm:$0xff] }
 0x31e   :  { %2018 = vmatpush2.msra.mxu0 %v4091_v52  ;;  %v4150_v52 = vld [vmem:[#allocation7 + $0x20] sm:$0xff] }
 0x31f   :  { %2019 = vmatprep.subr.mxu0 %v4092_v53  ;;  %v4151_v53 = vld [vmem:[#allocation7 + $0xcc0] sm:$0xff] }
 0x320   :  { %2020 = vmatpush2.msra.mxu0 %v4093_v55  ;;  %v4152_v55 = vld [vmem:[#allocation7 + $0xcb8] sm:$0xff] }
 0x321   :  { %2021 = vmatprep.subr.mxu0 %v4094_v56  ;;  %v4153_v56 = vld [vmem:[#allocation7 + $0xc58] sm:$0xff] }
 0x322   :  { %2022 = vmatpush2.msra.mxu0 %v4095_v57  ;;  %v4154_v57 = vld [vmem:[#allocation7 + $0xc50] sm:$0xff] }
 0x323   :  { %2023 = vmatprep.subr.mxu0 %v4096_v58  ;;  %v4155_v58 = vld [vmem:[#allocation7 + $0xbf0] sm:$0xff] }
 0x324   :  { %2024 = vmatpush2.msra.mxu0 %v4097_v59  ;;  %v4156_v59 = vld [vmem:[#allocation7 + $0xbe8] sm:$0xff] }
 0x325   :  { %2025 = vmatprep.subr.mxu0 %v4098_v61  ;;  %v4157_v61 = vld [vmem:[#allocation7 + $0xb88] sm:$0xff] }
 0x326   :  { %2026 = vmatpush2.msra.mxu0 %v4099_v62  ;;  %v4158_v62 = vld [vmem:[#allocation7 + $0xb80] sm:$0xff] }
 0x327   :  { %2027 = vmatprep.subr.mxu0 %v4100_v0  ;;  %v4159_v0 = vld [vmem:[#allocation7 + $0xb20] sm:$0xff] }
 0x328   :  { %2028 = vmatpush2.msra.mxu0 %v4101_v1  ;;  %v4160_v1 = vld [vmem:[#allocation7 + $0xb18] sm:$0xff] }
 0x329   :  { %2029 = vmatprep.subr.mxu0 %v4102_v2  ;;  %v4161_v2 = vld [vmem:[#allocation7 + $0xab8] sm:$0xff] }
 0x32a   :  { %2030 = vmatpush2.msra.mxu0 %v4103_v3  ;;  %v4162_v3 = vld [vmem:[#allocation7 + $0xab0] sm:$0xff] }
 0x32b   :  { %2031 = vmatprep.subr.mxu0 %v4104_v4  ;;  %v4163_v4 = vld [vmem:[#allocation7 + $0xa50] sm:$0xff] }
 0x32c   :  { %2032 = vmatpush2.msra.mxu0 %v4105_v5  ;;  %v4164_v5 = vld [vmem:[#allocation7 + $0xa48] sm:$0xff] }
 0x32d   :  { %2033 = vmatprep.subr.mxu0 %v4106_v6  ;;  %v4165_v6 = vld [vmem:[#allocation7 + $0x9e8] sm:$0xff] }
 0x32e   :  { %2034 = vmatpush2.msra.mxu0 %v4107_v7  ;;  %v4166_v7 = vld [vmem:[#allocation7 + $0x9e0] sm:$0xff] }
 0x32f   :  { %2035 = vmatprep.subr.mxu0 %v4108_v8  ;;  %v4167_v8 = vld [vmem:[#allocation7 + $0x980] sm:$0xff] }
 0x330   :  { %2036 = vmatpush2.msra.mxu0 %v4109_v10  ;;  %v4168_v10 = vld [vmem:[#allocation7 + $0x978] sm:$0xff] }
 0x331   :  { %2037 = vmatprep.subr.mxu0 %v4110_v11  ;;  %v4169_v11 = vld [vmem:[#allocation7 + $0x918] sm:$0xff] }
 0x332   :  { %2038 = vmatpush2.msra.mxu0 %v4111_v12  ;;  %v4170_v12 = vld [vmem:[#allocation7 + $0x910] sm:$0xff] }
 0x333   :  { %2039 = vmatprep.subr.mxu0 %v4112_v13  ;;  %v4171_v13 = vld [vmem:[#allocation7 + $0x8b0] sm:$0xff] }
 0x334   :  { %2040 = vmatpush2.msra.mxu0 %v4113_v14  ;;  %v4172_v14 = vld [vmem:[#allocation7 + $0x8a8] sm:$0xff] }
 0x335   :  { %2041 = vmatprep.subr.mxu0 %v4114_v15  ;;  %v4173_v15 = vld [vmem:[#allocation7 + $0x848] sm:$0xff] }
 0x336   :  { %2042 = vmatpush2.msra.mxu0 %v4115_v16  ;;  %v4174_v16 = vld [vmem:[#allocation7 + $0x840] sm:$0xff] }
 0x337   :  { %2043 = vmatprep.subr.mxu0 %v4116_v17  ;;  %v4175_v17 = vld [vmem:[#allocation7 + $0x7e0] sm:$0xff] }
 0x338   :  { %2044 = vmatpush2.msra.mxu0 %v4117_v18  ;;  %v4176_v18 = vld [vmem:[#allocation7 + $0x7d8] sm:$0xff] }
 0x339   :  { %2123 = vmatprep.subr.mxu0 %v4118_v19  ;;  %2046 = vmatmul.mubr.f32.vlgmr.msra.gmra.mxu0 %v5119_v63  ;;  %v4178_v19 = vld [vmem:[#allocation7 + $0x770] sm:$0xff] }
 0x33a   :  { %2124 = vmatpush1.msra.mxu0 %v4120_v22  ;;  %2187 = vmatprep.mubr.f32.mxu0 %v5116_v21  ;;  %v4181_v22 = vld [vmem:[#allocation7 + $0x6a8] sm:$0xff] }
 0x33b   :  { %2125 = vmatprep.subr.mxu0 %v4121_v23  ;;  %v4182_v23 = vld [vmem:[#allocation7 + $0x6a0] sm:$0xff] }
 0x33c   :  { %2126 = vmatpush1.msra.mxu0 %v4122_v24  ;;  %v4183_v24 = vld [vmem:[#allocation7 + $0x660] sm:$0xff] }
 0x33d   :  { %2127 = vmatprep.subr.mxu0 %v4123_v25  ;;  %v4184_v25 = vld [vmem:[#allocation7 + $0x658] sm:$0xff] }
 0x33e   :  { %2128 = vmatpush1.msra.mxu0 %v4124_v26  ;;  %v4185_v26 = vld [vmem:[#allocation7 + $0x5f8] sm:$0xff] }
 0x33f   :  { %2129 = vmatprep.subr.mxu0 %v4125_v27  ;;  %v4186_v27 = vld [vmem:[#allocation7 + $0x5f0] sm:$0xff] }
 0x340   :  { %2130 = vmatpush1.msra.mxu0 %v4126_v28  ;;  %v4187_v28 = vld [vmem:[#allocation7 + $0x590] sm:$0xff] }
 0x341   :  { %2131 = vmatprep.subr.mxu0 %v4127_v29  ;;  %v4188_v29 = vld [vmem:[#allocation7 + $0x588] sm:$0xff] }
 0x342   :  { %2132 = vmatpush1.msra.mxu0 %v4128_v30  ;;  %v4189_v30 = vld [vmem:[#allocation7 + $0x528] sm:$0xff] }
 0x343   :  { %2133 = vmatprep.subr.mxu0 %v4129_v31  ;;  %v4190_v31 = vld [vmem:[#allocation7 + $0x520] sm:$0xff] }
 0x344   :  { %2134 = vmatpush1.msra.mxu0 %v4130_v32  ;;  %v4191_v32 = vld [vmem:[#allocation7 + $0x4c0] sm:$0xff] }
 0x345   :  { %2135 = vmatprep.subr.mxu0 %v4131_v33  ;;  %v4192_v33 = vld [vmem:[#allocation7 + $0x4b8] sm:$0xff] }
 0x346   :  { %2136 = vmatpush1.msra.mxu0 %v4132_v34  ;;  %v4193_v34 = vld [vmem:[#allocation7 + $0x458] sm:$0xff] }
 0x347   :  { %2137 = vmatprep.subr.mxu0 %v4133_v35  ;;  %v4194_v35 = vld [vmem:[#allocation7 + $0x450] sm:$0xff] }
 0x348   :  { %2138 = vmatpush1.msra.mxu0 %v4134_v36  ;;  %v4195_v36 = vld [vmem:[#allocation7 + $0x3f0] sm:$0xff] }
 0x349   :  { %2139 = vmatprep.subr.mxu0 %v4135_v37  ;;  %v4196_v37 = vld [vmem:[#allocation7 + $0x3e8] sm:$0xff] }
 0x34a   :  { %2140 = vmatpush1.msra.mxu0 %v4136_v38  ;;  %v4197_v38 = vld [vmem:[#allocation7 + $0x388] sm:$0xff] }
 0x34b   :  { %2141 = vmatprep.subr.mxu0 %v4137_v39  ;;  %v4198_v39 = vld [vmem:[#allocation7 + $0x380] sm:$0xff] }
 0x34c   :  { %2142 = vmatpush1.msra.mxu0 %v4138_v40  ;;  %v4199_v40 = vld [vmem:[#allocation7 + $0x320] sm:$0xff] }
 0x34d   :  { %2143 = vmatprep.subr.mxu0 %v4139_v41  ;;  %v4200_v41 = vld [vmem:[#allocation7 + $0x318] sm:$0xff] }
 0x34e   :  { %2144 = vmatpush1.msra.mxu0 %v4140_v42  ;;  %v4201_v42 = vld [vmem:[#allocation7 + $0x2b8] sm:$0xff] }
 0x34f   :  { %2145 = vmatprep.subr.mxu0 %v4141_v43  ;;  %v4202_v43 = vld [vmem:[#allocation7 + $0x2b0] sm:$0xff] }
 0x350   :  { %2146 = vmatpush1.msra.mxu0 %v4142_v44  ;;  %v4203_v44 = vld [vmem:[#allocation7 + $0x250] sm:$0xff] }
 0x351   :  { %2147 = vmatprep.subr.mxu0 %v4143_v45  ;;  %v4204_v45 = vld [vmem:[#allocation7 + $0x248] sm:$0xff] }
 0x352   :  { %2148 = vmatpush1.msra.mxu0 %v4144_v46  ;;  %v4205_v46 = vld [vmem:[#allocation7 + $0x1e8] sm:$0xff] }
 0x353   :  { %2149 = vmatprep.subr.mxu0 %v4145_v47  ;;  %v4206_v47 = vld [vmem:[#allocation7 + $0x1e0] sm:$0xff] }
 0x354   :  { %2150 = vmatpush1.msra.mxu0 %v4146_v48  ;;  %v4207_v48 = vld [vmem:[#allocation7 + $0x180] sm:$0xff] }
 0x355   :  { %2151 = vmatprep.subr.mxu0 %v4147_v49  ;;  %v4208_v49 = vld [vmem:[#allocation7 + $0x178] sm:$0xff] }
 0x356   :  { %2152 = vmatpush1.msra.mxu0 %v4148_v50  ;;  %v4209_v50 = vld [vmem:[#allocation7 + $0x118] sm:$0xff] }
 0x357   :  { %2153 = vmatprep.subr.mxu0 %v4149_v51  ;;  %v4210_v51 = vld [vmem:[#allocation7 + $0x110] sm:$0xff] }
 0x358   :  { %2154 = vmatpush1.msra.mxu0 %v4150_v52  ;;  %v4211_v52 = vld [vmem:[#allocation7 + $0xb0] sm:$0xff] }
 0x359   :  { %2155 = vmatprep.subr.mxu0 %v4151_v53  ;;  %v4212_v53 = vld [vmem:[#allocation7 + $0xa8] sm:$0xff] }
 0x35a   :  { %2156 = vmatpush2.msra.mxu0 %v4152_v55  ;;  %v4213_v55 = vld [vmem:[#allocation7 + $0x48] sm:$0xff] }
 0x35b   :  { %2157 = vmatprep.subr.mxu0 %v4153_v56  ;;  %v4214_v56 = vld [vmem:[#allocation7 + $0x40] sm:$0xff] }
 0x35c   :  { %2158 = vmatpush2.msra.mxu0 %v4154_v57  ;;  %v4215_v57 = vld [vmem:[#allocation7 + $0xce0] sm:$0xff] }
 0x35d   :  { %2159 = vmatprep.subr.mxu0 %v4155_v58  ;;  %v4216_v58 = vld [vmem:[#allocation7 + $0xcd8] sm:$0xff] }
 0x35e   :  { %2160 = vmatpush2.msra.mxu0 %v4156_v59  ;;  %v4217_v59 = vld [vmem:[#allocation7 + $0xc78] sm:$0xff] }
 0x35f   :  { %2161 = vmatprep.subr.mxu0 %v4157_v61  ;;  %v4218_v61 = vld [vmem:[#allocation7 + $0xc70] sm:$0xff] }
 0x360   :  { %2162 = vmatpush2.msra.mxu0 %v4158_v62  ;;  %v4219_v62 = vld [vmem:[#allocation7 + $0xc10] sm:$0xff] }
 0x361   :  { %2163 = vmatprep.subr.mxu0 %v4159_v0  ;;  %v4220_v0 = vld [vmem:[#allocation7 + $0xc08] sm:$0xff] }
 0x362   :  { %2164 = vmatpush2.msra.mxu0 %v4160_v1  ;;  %v4221_v1 = vld [vmem:[#allocation7 + $0xba8] sm:$0xff] }
 0x363   :  { %2165 = vmatprep.subr.mxu0 %v4161_v2  ;;  %v4222_v2 = vld [vmem:[#allocation7 + $0xba0] sm:$0xff] }
 0x364   :  { %2166 = vmatpush2.msra.mxu0 %v4162_v3  ;;  %v4223_v3 = vld [vmem:[#allocation7 + $0xb40] sm:$0xff] }
 0x365   :  { %2167 = vmatprep.subr.mxu0 %v4163_v4  ;;  %v4224_v4 = vld [vmem:[#allocation7 + $0xb38] sm:$0xff] }
 0x366   :  { %2168 = vmatpush2.msra.mxu0 %v4164_v5  ;;  %v4225_v5 = vld [vmem:[#allocation7 + $0xad8] sm:$0xff] }
 0x367   :  { %2169 = vmatprep.subr.mxu0 %v4165_v6  ;;  %v4226_v6 = vld [vmem:[#allocation7 + $0xad0] sm:$0xff] }
 0x368   :  { %2170 = vmatpush2.msra.mxu0 %v4166_v7  ;;  %v4227_v7 = vld [vmem:[#allocation7 + $0xa70] sm:$0xff] }
 0x369   :  { %2171 = vmatprep.subr.mxu0 %v4167_v8  ;;  %v4228_v8 = vld [vmem:[#allocation7 + $0xa68] sm:$0xff] }
 0x36a   :  { %2172 = vmatpush2.msra.mxu0 %v4168_v10  ;;  %v4229_v10 = vld [vmem:[#allocation7 + $0xa08] sm:$0xff] }
 0x36b   :  { %2173 = vmatprep.subr.mxu0 %v4169_v11  ;;  %v4230_v11 = vld [vmem:[#allocation7 + $0xa00] sm:$0xff] }
 0x36c   :  { %2174 = vmatpush2.msra.mxu0 %v4170_v12  ;;  %v4231_v12 = vld [vmem:[#allocation7 + $0x9a0] sm:$0xff] }
 0x36d   :  { %2175 = vmatprep.subr.mxu0 %v4171_v13  ;;  %v4232_v13 = vld [vmem:[#allocation7 + $0x998] sm:$0xff] }
 0x36e   :  { %2176 = vmatpush2.msra.mxu0 %v4172_v14  ;;  %v4233_v14 = vld [vmem:[#allocation7 + $0x938] sm:$0xff] }
 0x36f   :  { %2177 = vmatprep.subr.mxu0 %v4173_v15  ;;  %v4234_v15 = vld [vmem:[#allocation7 + $0x930] sm:$0xff] }
 0x370   :  { %2178 = vmatpush2.msra.mxu0 %v4174_v16  ;;  %v4235_v16 = vld [vmem:[#allocation7 + $0x8d0] sm:$0xff] }
 0x371   :  { %2179 = vmatprep.subr.mxu0 %v4175_v17  ;;  %v4236_v17 = vld [vmem:[#allocation7 + $0x8c8] sm:$0xff] }
 0x372   :  { %2180 = vmatpush2.msra.mxu0 %v4176_v18  ;;  %v3167_v18 = vld [vmem:[#allocation13] ss:$0 sm:$0xff] }
 0x373   :  { %2181 = vmatprep.subr.mxu0 %v4177_v9  ;;  %v4237_v9 = vld [vmem:[#allocation7 + $0x868] sm:$0xff] }
 0x374   :  { %2182 = vmatpush2.msra.mxu0 %v4178_v19  ;;  %v4238_v19 = vld [vmem:[#allocation7 + $0x860] sm:$0xff] }
 0x375   :  { %2183 = vmatprep.subr.mxu0 %v4179_v60 }
 0x376   :  { %2184 = vmatpush2.msra.mxu0 %v4180_v20  ;;  %v4239_v20 = vld [vmem:[#allocation7 + $0x800] sm:$0xff] }
 0x377   :  { %2185 = vmatprep.subr.mxu0 %v4181_v22 }
 0x378   :  { %2186 = vmatpush2.msra.mxu0 %v4182_v23  ;;  %v4240_v23 = vld [vmem:[#allocation7 + $0x7f8] sm:$0xff] }
 0x379   :  { %2188 = vmatmul.mubr.f32.vlgmr.msra.gmra.mxu0 %v5119_v63  ;;  %2265 = vmatprep.subr.mxu0 %v4183_v24 }
 0x37a   :  { %2266 = vmatpush1.msra.mxu0 %v4184_v25  ;;  %2329 = vmatprep.mubr.f32.mxu0 %v5116_v21  ;;  %v4241_v25 = vld [vmem:[#allocation7 + $0x798] sm:$0xff] }
 0x37b   :  { %2267 = vmatprep.subr.mxu0 %v4185_v26 }
 0x37c   :  { %2268 = vmatpush1.msra.mxu0 %v4186_v27  ;;  %v4242_v27 = vld [vmem:[#allocation7 + $0x790] sm:$0xff] }
 0x37d   :  { %2269 = vmatprep.subr.mxu0 %v4187_v28  ;;  %v4243_v28 = vld [vmem:[#allocation7 + $0x730] sm:$0xff] }
 0x37e   :  { %2270 = vmatpush1.msra.mxu0 %v4188_v29  ;;  %v4244_v29 = vld [vmem:[#allocation7 + $0x728] sm:$0xff] }
 0x37f   :  { %2271 = vmatprep.subr.mxu0 %v4189_v30  ;;  %v4245_v30 = vld [vmem:[#allocation7 + $0x628] sm:$0xff] }
 0x380   :  { %2272 = vmatpush1.msra.mxu0 %v4190_v31  ;;  %v4246_v31 = vld [vmem:[#allocation7 + $0x5c8] sm:$0xff] }
 0x381   :  { %2273 = vmatprep.subr.mxu0 %v4191_v32  ;;  %v4247_v32 = vld [vmem:[#allocation7 + $0x6c8] sm:$0xff] }
 0x382   :  { %2274 = vmatpush1.msra.mxu0 %v4192_v33  ;;  %v4248_v33 = vld [vmem:[#allocation7 + $0x5c0] sm:$0xff] }
 0x383   :  { %2275 = vmatprep.subr.mxu0 %v4193_v34  ;;  %v4249_v34 = vld [vmem:[#allocation7 + $0x6c0] sm:$0xff] }
 0x384   :  { %2276 = vmatpush1.msra.mxu0 %v4194_v35  ;;  %v4250_v35 = vld [vmem:[#allocation7 + $0x560] sm:$0xff] }
 0x385   :  { %2277 = vmatprep.subr.mxu0 %v4195_v36  ;;  %v4251_v36 = vld [vmem:[#allocation7 + $0x558] sm:$0xff] }
 0x386   :  { %2278 = vmatpush1.msra.mxu0 %v4196_v37  ;;  %v4252_v37 = vld [vmem:[#allocation7 + $0xcf8] sm:$0xff] }
 0x387   :  { %2279 = vmatprep.subr.mxu0 %v4197_v38  ;;  %v4253_v38 = vld [vmem:[#allocation7 + $0x4f8] sm:$0xff] }
 0x388   :  { %2280 = vmatpush1.msra.mxu0 %v4198_v39  ;;  %v4254_v39 = vld [vmem:[#allocation7 + $0x678] sm:$0xff] }
 0x389   :  { %2281 = vmatprep.subr.mxu0 %v4199_v40  ;;  %v4255_v40 = vld [vmem:[#allocation7 + $0x4f0] sm:$0xff] }
 0x38a   :  { %2282 = vmatpush1.msra.mxu0 %v4200_v41  ;;  %v4256_v41 = vld [vmem:[#allocation7 + $0xc90] sm:$0xff] }
 0x38b   :  { %2283 = vmatprep.subr.mxu0 %v4201_v42  ;;  %v4257_v42 = vld [vmem:[#allocation7 + $0x490] sm:$0xff] }
 0x38c   :  { %2284 = vmatpush1.msra.mxu0 %v4202_v43  ;;  %v4258_v43 = vld [vmem:[#allocation7 + $0x610] sm:$0xff] }
 0x38d   :  { %2285 = vmatprep.subr.mxu0 %v4203_v44  ;;  %v4259_v44 = vld [vmem:[#allocation7 + $0x488] sm:$0xff] }
 0x38e   :  { %2286 = vmatpush1.msra.mxu0 %v4204_v45  ;;  %v4260_v45 = vld [vmem:[#allocation7 + $0xc28] sm:$0xff] }
 0x38f   :  { %2287 = vmatprep.subr.mxu0 %v4205_v46  ;;  %v4261_v46 = vld [vmem:[#allocation7 + $0x428] sm:$0xff] }
 0x390   :  { %2288 = vmatpush1.msra.mxu0 %v4206_v47  ;;  %v4262_v47 = vld [vmem:[#allocation7 + $0x5a8] sm:$0xff] }
 0x391   :  { %2289 = vmatprep.subr.mxu0 %v4207_v48  ;;  %v4263_v48 = vld [vmem:[#allocation7 + $0x420] sm:$0xff] }
 0x392   :  { %2290 = vmatpush1.msra.mxu0 %v4208_v49  ;;  %v4264_v49 = vld [vmem:[#allocation7 + $0xbc0] sm:$0xff] }
 0x393   :  { %2291 = vmatprep.subr.mxu0 %v4209_v50  ;;  %v4265_v50 = vld [vmem:[#allocation7 + $0x3c0] sm:$0xff] }
 0x394   :  { %2292 = vmatpush1.msra.mxu0 %v4210_v51  ;;  %v4266_v51 = vld [vmem:[#allocation7 + $0x540] sm:$0xff] }
 0x395   :  { %2293 = vmatprep.subr.mxu0 %v4211_v52  ;;  %v4267_v52 = vld [vmem:[#allocation7 + $0x3b8] sm:$0xff] }
 0x396   :  { %2294 = vmatpush1.msra.mxu0 %v4212_v53  ;;  %v4268_v53 = vld [vmem:[#allocation7 + $0xb58] sm:$0xff] }
 0x397   :  { %2295 = vmatprep.subr.mxu0 %v4213_v55  ;;  %v4269_v55 = vld [vmem:[#allocation7 + $0x358] sm:$0xff] }
 0x398   :  { %2296 = vmatpush1.msra.mxu0 %v4214_v56  ;;  %v4270_v56 = vld [vmem:[#allocation7 + $0x4d8] sm:$0xff] }
 0x399   :  { %2297 = vmatprep.subr.mxu0 %v4215_v57  ;;  %v4271_v57 = vld [vmem:[#allocation7 + $0x350] sm:$0xff] }
 0x39a   :  { %2298 = vmatpush2.msra.mxu0 %v4216_v58  ;;  %v4272_v58 = vld [vmem:[#allocation7 + $0xaf0] sm:$0xff] }
 0x39b   :  { %2299 = vmatprep.subr.mxu0 %v4217_v59  ;;  %v4273_v59 = vld [vmem:[#allocation7 + $0x2f0] sm:$0xff] }
 0x39c   :  { %2300 = vmatpush2.msra.mxu0 %v4218_v61  ;;  %v4274_v61 = vld [vmem:[#allocation7 + $0x470] sm:$0xff] }
 0x39d   :  { %2301 = vmatprep.subr.mxu0 %v4219_v62  ;;  %v4275_v62 = vld [vmem:[#allocation7 + $0x2e8] sm:$0xff] }
 0x39e   :  { %2302 = vmatpush2.msra.mxu0 %v4220_v0  ;;  %v4276_v0 = vld [vmem:[#allocation7 + $0xa88] sm:$0xff] }
 0x39f   :  { %2303 = vmatprep.subr.mxu0 %v4221_v1  ;;  %v4277_v1 = vld [vmem:[#allocation7 + $0x288] sm:$0xff] }
 0x3a0   :  { %2304 = vmatpush2.msra.mxu0 %v4222_v2  ;;  %v4278_v2 = vld [vmem:[#allocation7 + $0x408] sm:$0xff] }
 0x3a1   :  { %2305 = vmatprep.subr.mxu0 %v4223_v3  ;;  %v4279_v3 = vld [vmem:[#allocation7 + $0x280] sm:$0xff] }
 0x3a2   :  { %2306 = vmatpush2.msra.mxu0 %v4224_v4  ;;  %v4280_v4 = vld [vmem:[#allocation7 + $0xa20] sm:$0xff] }
 0x3a3   :  { %2307 = vmatprep.subr.mxu0 %v4225_v5  ;;  %v4281_v5 = vld [vmem:[#allocation7 + $0x220] sm:$0xff] }
 0x3a4   :  { %2308 = vmatpush2.msra.mxu0 %v4226_v6  ;;  %v4282_v6 = vld [vmem:[#allocation7 + $0x3a0] sm:$0xff] }
 0x3a5   :  { %2309 = vmatprep.subr.mxu0 %v4227_v7  ;;  %v4283_v7 = vld [vmem:[#allocation7 + $0x218] sm:$0xff] }
 0x3a6   :  { %2310 = vmatpush2.msra.mxu0 %v4228_v8  ;;  %v4284_v8 = vld [vmem:[#allocation7 + $0x9b8] sm:$0xff] }
 0x3a7   :  { %2311 = vmatprep.subr.mxu0 %v4229_v10  ;;  %v4285_v10 = vld [vmem:[#allocation7 + $0x1b8] sm:$0xff] }
 0x3a8   :  { %2312 = vmatpush2.msra.mxu0 %v4230_v11  ;;  %v4286_v11 = vld [vmem:[#allocation7 + $0x338] sm:$0xff] }
 0x3a9   :  { %2313 = vmatprep.subr.mxu0 %v4231_v12  ;;  %v4287_v12 = vld [vmem:[#allocation7 + $0x1b0] sm:$0xff] }
 0x3aa   :  { %2314 = vmatpush2.msra.mxu0 %v4232_v13  ;;  %v4288_v13 = vld [vmem:[#allocation7 + $0x950] sm:$0xff] }
 0x3ab   :  { %2315 = vmatprep.subr.mxu0 %v4233_v14  ;;  %v4289_v14 = vld [vmem:[#allocation7 + $0x150] sm:$0xff] }
 0x3ac   :  { %2316 = vmatpush2.msra.mxu0 %v4234_v15  ;;  %v4290_v15 = vld [vmem:[#allocation7 + $0x2d0] sm:$0xff] }
 0x3ad   :  { %2317 = vmatprep.subr.mxu0 %v4235_v16  ;;  %v4291_v16 = vld [vmem:[#allocation7 + $0x148] sm:$0xff] }
 0x3ae   :  { %2318 = vmatpush2.msra.mxu0 %v4236_v17  ;;  %v4292_v17 = vld [vmem:[#allocation7 + $0x8e8] sm:$0xff] }
 0x3af   :  { %2319 = vmatprep.subr.mxu0 %v4237_v9  ;;  %v4294_v9 = vld [vmem:[#allocation7 + $0x268] sm:$0xff] }
 0x3b0   :  { %2320 = vmatpush2.msra.mxu0 %v4238_v19  ;;  %v4295_v19 = vld [vmem:[#allocation7 + $0xe0] sm:$0xff] }
 0x3b1   :  { %2321 = vmatprep.subr.mxu0 %v4239_v20  ;;  %v4297_v20 = vld [vmem:[#allocation7 + $0x80] sm:$0xff] }
 0x3b2   :  { %2322 = vmatpush2.msra.mxu0 %v4240_v23  ;;  %v4299_v23 = vld [vmem:[#allocation7 + $0x78] sm:$0xff] }
 0x3b3   :  { %2323 = vmatprep.subr.mxu0 %v4241_v25  ;;  %v4301_v25 = vld [vmem:[#allocation7 + $0x18] sm:$0xff] }
 0x3b4   :  { %2324 = vmatpush2.msra.mxu0 %v4242_v27  ;;  %v4303_v27 = vld [vmem:[#allocation7 + $0x10] sm:$0xff] }
 0x3b5   :  { %2325 = vmatprep.subr.mxu0 %v4243_v28  ;;  %v4304_v28 = vld [vmem:[#allocation7 + $0x7b0] sm:$0xff] }
 0x3b6   :  { %2326 = vmatpush2.msra.mxu0 %v4244_v29  ;;  %v4305_v29 = vld [vmem:[#allocation7 + $0xcb0] sm:$0xff] }
 0x3b7   :  { %2327 = vmatprep.subr.mxu0 %v4247_v32  ;;  %v4308_v32 = vld [vmem:[#allocation7 + $0x748] sm:$0xff] }
 0x3b8   :  { %2328 = vmatpush2.msra.mxu0 %v4249_v34  ;;  %v4310_v34 = vld [vmem:[#allocation7 + $0xc8] sm:$0xff] }
 0x3b9   :  { %v1887_v60 = vpop.f32.mrf.mxu0  ;;  %2330 = vmatmul.mubr.f32.vlgmr.msra.gmra.mxu0 %v5119_v63  ;;  %3465 = vmatprep.subr.mxu0 %v4252_v37  ;;  %v4313_v37 = vld [vmem:[#allocation7 + $0xbe0] sm:$0xff] }
 0x3ba   :  { %v1888_v22 = vadd.f32 %v3167_v18, %v1887_v60  ;;  %3466 = vmatpush3.msra.mxu0 %v4254_v39  ;;  %v4293_v18 = vld [vmem:[#allocation7 + $0xe8] sm:$0xff]  ;;  %v4296_v60 = vld [vmem:[#allocation7 + $0x880] sm:$0xff]  ;;  %v4315_v39 = vld [vmem:[#allocation7 + $0xbd8] sm:$0xff]  ;;  %2471 = vmatprep.mubr.f32.mxu0 %v5116_v21 }
 0x3bb   :  { %v3830_v24 = vpop.f32.mrf.mxu0  ;;  %3467 = vmatprep.subr.mxu0 %v4256_v41  ;;  %v4317_v41 = vld [vmem:[#allocation7 + $0xb70] sm:$0xff] }
 0x3bc   :  { %v1891_v26 = vmax.f32 %v1888_v22, 0.0  ;;  %3468 = vmatpush3.msra.mxu0 %v4258_v43  ;;  %v4298_v22 = vld [vmem:[#allocation7 + $0x200] sm:$0xff]  ;;  %v4300_v24 = vld [vmem:[#allocation7 + $0x818] sm:$0xff]  ;;  %v4319_v43 = vld [vmem:[#allocation7 + $0xb10] sm:$0xff] }
 0x3bd   :  { %3469 = vmatprep.subr.mxu0 %v4260_v45  ;;  %v4321_v45 = vld [vmem:[#allocation7 + $0xb08] sm:$0xff] }
 0x3be   :  { %3864 = vmatmul.mubr.f32.vlgmr.msra.gmra.mxu1 %v1891_v26  ;;  %3470 = vmatpush3.msra.mxu0 %v4262_v47  ;;  %v4302_v26 = vld [vmem:[#allocation7 + $0x198] sm:$0xff]  ;;  %v4323_v47 = vld [vmem:[#allocation7 + $0xaa8] sm:$0xff] }
 0x3bf   :  { %2053 = vmatpush1.msra.mxu1 %v4245_v30  ;;  %2116 = vmatprep.mubr.f32.mxu1 %v5116_v21  ;;  %v4306_v30 = vld [vmem:[#allocation7 + $0x130] sm:$0xff] }
 0x3c0   :  { %2054 = vmatprep.subr.mxu1 %v4246_v31  ;;  %3471 = vmatprep.subr.mxu0 %v4264_v49  ;;  %v4307_v31 = vld [vmem:[#allocation7 + $0xca8] sm:$0xff]  ;;  %v4325_v49 = vld [vmem:[#allocation7 + $0xaa0] sm:$0xff] }
 0x3c1   :  { %2055 = vmatpush1.msra.mxu1 %v4248_v33  ;;  %3472 = vmatpush3.msra.mxu0 %v4266_v51  ;;  %v4309_v33 = vld [vmem:[#allocation7 + $0xc48] sm:$0xff]  ;;  %v4327_v51 = vld [vmem:[#allocation7 + $0xa40] sm:$0xff] }
 0x3c2   :  { %2056 = vmatprep.subr.mxu1 %v4250_v35  ;;  %3473 = vmatprep.subr.mxu0 %v4268_v53  ;;  %v4311_v35 = vld [vmem:[#allocation7 + $0xc40] sm:$0xff]  ;;  %v4329_v53 = vld [vmem:[#allocation7 + $0xa38] sm:$0xff] }
 0x3c3   :  { %2057 = vmatpush1.msra.mxu1 %v4251_v36  ;;  %3474 = vmatpush3.msra.mxu0 %v4270_v56  ;;  %v4312_v36 = vld [vmem:[#allocation7 + $0x6e0] sm:$0xff]  ;;  %v4331_v56 = vld [vmem:[#allocation7 + $0x9d8] sm:$0xff] }
 0x3c4   :  { %2058 = vmatprep.subr.mxu1 %v4253_v38  ;;  %3475 = vmatprep.subr.mxu0 %v4272_v58  ;;  %v4314_v38 = vld [vmem:[#allocation7 + $0x60] sm:$0xff]  ;;  %v4333_v58 = vld [vmem:[#allocation7 + $0x9d0] sm:$0xff] }
 0x3c5   :  { %2059 = vmatpush1.msra.mxu1 %v4255_v40  ;;  %3476 = vmatpush3.msra.mxu0 %v4274_v61  ;;  %v4316_v40 = vld [vmem:[#allocation7 + $0xb78] sm:$0xff]  ;;  %v4335_v61 = vld [vmem:[#allocation7 + $0x970] sm:$0xff] }
 0x3c6   :  { %2060 = vmatprep.subr.mxu1 %v4257_v42  ;;  %3477 = vmatprep.subr.mxu0 %v4276_v0  ;;  %v4318_v42 = vld [vmem:[#allocation8 + $0x1f8] sm:$0xff]  ;;  %v4337_v0 = vld [vmem:[#allocation7 + $0x968] sm:$0xff] }
 0x3c7   :  { %2061 = vmatpush1.msra.mxu1 %v4259_v44  ;;  %3478 = vmatpush3.msra.mxu0 %v4278_v2  ;;  %v4320_v44 = vld [vmem:[#allocation8 + $0x178] sm:$0xff]  ;;  %v4339_v2 = vld [vmem:[#allocation7 + $0x908] sm:$0xff] }
 0x3c8   :  { %2062 = vmatprep.subr.mxu1 %v4261_v46  ;;  %3479 = vmatprep.subr.mxu0 %v4280_v4  ;;  %v4322_v46 = vld [vmem:[#allocation8 + $0x1f0] sm:$0xff]  ;;  %v4341_v4 = vld [vmem:[#allocation7 + $0x900] sm:$0xff] }
 0x3c9   :  { %2063 = vmatpush1.msra.mxu1 %v4263_v48  ;;  %3480 = vmatpush3.msra.mxu0 %v4282_v6  ;;  %v4324_v48 = vld [vmem:[#allocation8 + $0x170] sm:$0xff]  ;;  %v4343_v6 = vld [vmem:[#allocation7 + $0x8a0] sm:$0xff] }
 0x3ca   :  { %2064 = vmatprep.subr.mxu1 %v4265_v50  ;;  %3481 = vmatprep.subr.mxu0 %v4284_v8  ;;  %v4326_v50 = vld [vmem:[#allocation8 + $0x1e8] sm:$0xff]  ;;  %v4345_v8 = vld [vmem:[#allocation7 + $0x898] sm:$0xff] }
 0x3cb   :  { %2065 = vmatpush1.msra.mxu1 %v4267_v52  ;;  %3482 = vmatpush3.msra.mxu0 %v4286_v11  ;;  %v4328_v52 = vld [vmem:[#allocation8 + $0x168] sm:$0xff]  ;;  %v4347_v11 = vld [vmem:[#allocation7 + $0x838] sm:$0xff] }
 0x3cc   :  { %2066 = vmatprep.subr.mxu1 %v4269_v55  ;;  %3483 = vmatprep.subr.mxu0 %v4288_v13  ;;  %v4330_v55 = vld [vmem:[#allocation8 + $0x1e0] sm:$0xff]  ;;  %v4349_v13 = vld [vmem:[#allocation7 + $0x830] sm:$0xff] }
 0x3cd   :  { %2067 = vmatpush1.msra.mxu1 %v4271_v57  ;;  %3484 = vmatpush3.msra.mxu0 %v4290_v15  ;;  %v4332_v57 = vld [vmem:[#allocation8 + $0x160] sm:$0xff]  ;;  %v4351_v15 = vld [vmem:[#allocation7 + $0x7d0] sm:$0xff] }
 0x3ce   :  { %2068 = vmatprep.subr.mxu1 %v4273_v59  ;;  %3485 = vmatprep.subr.mxu0 %v4292_v17  ;;  %v4334_v59 = vld [vmem:[#allocation8 + $0x1d8] sm:$0xff]  ;;  %v4353_v17 = vld [vmem:[#allocation7 + $0x7c8] sm:$0xff] }
 0x3cf   :  { %2069 = vmatpush1.msra.mxu1 %v4275_v62  ;;  %3486 = vmatpush3.msra.mxu0 %v4294_v9  ;;  %v4336_v62 = vld [vmem:[#allocation8 + $0x158] sm:$0xff]  ;;  %v4355_v9 = vld [vmem:[#allocation7 + $0x768] sm:$0xff] }
 0x3d0   :  { %2070 = vmatprep.subr.mxu1 %v4277_v1  ;;  %3487 = vmatprep.subr.mxu0 %v4296_v60  ;;  %v4338_v1 = vld [vmem:[#allocation8 + $0x1d0] sm:$0xff]  ;;  %v4357_v60 = vld [vmem:[#allocation7 + $0x760] sm:$0xff] }
 0x3d1   :  { %2071 = vmatpush1.msra.mxu1 %v4279_v3  ;;  %3488 = vmatpush3.msra.mxu0 %v4298_v22  ;;  %v4340_v3 = vld [vmem:[#allocation8 + $0x150] sm:$0xff]  ;;  %v4359_v22 = vld [vmem:[#allocation7 + $0x700] sm:$0xff] }
 0x3d2   :  { %2072 = vmatprep.subr.mxu1 %v4281_v5  ;;  %3489 = vmatprep.subr.mxu0 %v4300_v24  ;;  %v4342_v5 = vld [vmem:[#allocation8 + $0x1c8] sm:$0xff]  ;;  %v4361_v24 = vld [vmem:[#allocation7 + $0x6f8] sm:$0xff] }
 0x3d3   :  { %2073 = vmatpush1.msra.mxu1 %v4283_v7  ;;  %3490 = vmatpush3.msra.mxu0 %v4302_v26  ;;  %v4344_v7 = vld [vmem:[#allocation8 + $0x148] sm:$0xff]  ;;  %v4363_v26 = vld [vmem:[#allocation7 + $0x698] sm:$0xff] }
 0x3d4   :  { %2074 = vmatprep.subr.mxu1 %v4285_v10  ;;  %3491 = vmatprep.subr.mxu0 %v4304_v28  ;;  %v4346_v10 = vld [vmem:[#allocation8 + $0x1c0] sm:$0xff]  ;;  %v4365_v28 = vld [vmem:[#allocation7 + $0x690] sm:$0xff] }
 0x3d5   :  { %2075 = vmatpush1.msra.mxu1 %v4287_v12  ;;  %3492 = vmatpush3.msra.mxu0 %v4306_v30  ;;  %v4348_v12 = vld [vmem:[#allocation8 + $0x140] sm:$0xff]  ;;  %v4367_v30 = vld [vmem:[#allocation7 + $0x650] sm:$0xff] }
 0x3d6   :  { %2076 = vmatprep.subr.mxu1 %v4289_v14  ;;  %3493 = vmatprep.subr.mxu0 %v4308_v32  ;;  %v4350_v14 = vld [vmem:[#allocation8 + $0x1b8] sm:$0xff]  ;;  %v4369_v32 = vld [vmem:[#allocation7 + $0x5e8] sm:$0xff] }
 0x3d7   :  { %2077 = vmatpush1.msra.mxu1 %v4291_v16  ;;  %3494 = vmatpush3.msra.mxu0 %v4310_v34  ;;  %v4352_v16 = vld [vmem:[#allocation8 + $0x138] sm:$0xff]  ;;  %v4371_v34 = vld [vmem:[#allocation7 + $0x5e0] sm:$0xff] }
 0x3d8   :  { %2078 = vmatprep.subr.mxu1 %v4293_v18  ;;  %3495 = vmatprep.subr.mxu0 %v4312_v36  ;;  %v4354_v18 = vld [vmem:[#allocation8 + $0x1b0] sm:$0xff]  ;;  %v4373_v36 = vld [vmem:[#allocation7 + $0x580] sm:$0xff] }
 0x3d9   :  { %2079 = vmatpush1.msra.mxu1 %v4295_v19  ;;  %3496 = vmatpush3.msra.mxu0 %v4314_v38  ;;  %v4356_v19 = vld [vmem:[#allocation8 + $0x130] sm:$0xff]  ;;  %v4375_v38 = vld [vmem:[#allocation7 + $0x578] sm:$0xff] }
 0x3da   :  { %2080 = vmatprep.subr.mxu1 %v4297_v20  ;;  %2472 = vmatmul.mubr.f32.vlgmr.msra.gmra.mxu0 %v5119_v63  ;;  %v4358_v20 = vld [vmem:[#allocation8 + $0x1a8] sm:$0xff] }
 0x3db   :  { %2081 = vmatpush1.msra.mxu1 %v4299_v23  ;;  %3535 = vmatprep.subr.mxu0 %v4318_v42  ;;  %v4360_v23 = vld [vmem:[#allocation8 + $0x128] sm:$0xff]  ;;  %v4379_v42 = vld [vmem:[#allocation7 + $0x510] sm:$0xff] }
 0x3dc   :  { %2082 = vmatprep.subr.mxu1 %v4301_v25  ;;  %3536 = vmatpush3.msra.mxu0 %v4320_v44  ;;  %v4362_v25 = vld [vmem:[#allocation8 + $0x1a0] sm:$0xff]  ;;  %v4381_v44 = vld [vmem:[#allocation7 + $0x4b0] sm:$0xff] }
 0x3dd   :  { %2083 = vmatpush1.msra.mxu1 %v4303_v27  ;;  %3537 = vmatprep.subr.mxu0 %v4322_v46  ;;  %v4364_v27 = vld [vmem:[#allocation8 + $0x120] sm:$0xff]  ;;  %v4383_v46 = vld [vmem:[#allocation7 + $0x4a8] sm:$0xff] }
 0x3de   :  { %2084 = vmatprep.subr.mxu1 %v4305_v29  ;;  %3538 = vmatpush3.msra.mxu0 %v4324_v48  ;;  %v4366_v29 = vld [vmem:[#allocation8 + $0x198] sm:$0xff]  ;;  %v4385_v48 = vld [vmem:[#allocation7 + $0x448] sm:$0xff] }
 0x3df   :  { %2085 = vmatpush2.msra.mxu1 %v4307_v31  ;;  %3539 = vmatprep.subr.mxu0 %v4326_v50  ;;  %v4368_v31 = vld [vmem:[#allocation7 + $0x648] sm:$0xff]  ;;  %v4387_v50 = vld [vmem:[#allocation7 + $0x3e0] sm:$0xff] }
 0x3e0   :  { %2086 = vmatprep.subr.mxu1 %v4309_v33  ;;  %3540 = vmatpush3.msra.mxu0 %v4328_v52  ;;  %v4370_v33 = vld [vmem:[#allocation8 + $0x118] sm:$0xff] }
 0x3e1   :  { %2087 = vmatpush2.msra.mxu1 %v4311_v35  ;;  %3541 = vmatprep.subr.mxu0 %v4330_v55  ;;  %v4372_v35 = vld [vmem:[#allocation8 + $0x190] sm:$0xff]  ;;  %v4389_v52 = vld [vmem:[#allocation7 + $0x378] sm:$0xff] }
 0x3e2   :  { %2088 = vmatprep.subr.mxu1 %v4313_v37  ;;  %3542 = vmatpush3.msra.mxu0 %v4332_v57  ;;  %v4374_v37 = vld [vmem:[#allocation8 + $0x110] sm:$0xff]  ;;  %v4393_v57 = vld [vmem:[#allocation7 + $0x2a8] sm:$0xff] }
 0x3e3   :  { %2089 = vmatpush2.msra.mxu1 %v4315_v39  ;;  %3543 = vmatprep.subr.mxu0 %v4334_v59  ;;  %v4376_v39 = vld [vmem:[#allocation8 + $0x188] sm:$0xff]  ;;  %v4391_v55 = vld [vmem:[#allocation7 + $0x310] sm:$0xff]  ;;  %v4395_v59 = vld [vmem:[#allocation7 + $0x240] sm:$0xff] }
 0x3e4   :  { %2090 = vmatprep.subr.mxu1 %v4316_v40  ;;  %3544 = vmatpush3.msra.mxu0 %v4336_v62  ;;  %v4377_v40 = vld [vmem:[#allocation7 + $0x518] sm:$0xff] }
 0x3e5   :  { %2091 = vmatpush2.msra.mxu1 %v4317_v41  ;;  %3545 = vmatprep.subr.mxu0 %v4338_v1  ;;  %v4378_v41 = vld [vmem:[#allocation8 + $0x108] sm:$0xff]  ;;  %v4397_v62 = vld [vmem:[#allocation7 + $0x1d8] sm:$0xff]  ;;  %v4399_v1 = vld [vmem:[#allocation7 + $0x170] sm:$0xff] }
 0x3e6   :  { %2092 = vmatprep.subr.mxu1 %v4319_v43  ;;  %3546 = vmatpush3.msra.mxu0 %v4340_v3  ;;  %v4380_v43 = vld [vmem:[#allocation8 + $0x180] sm:$0xff]  ;;  %v4401_v3 = vld [vmem:[#allocation7 + $0x108] sm:$0xff] }
 0x3e7   :  { %2093 = vmatpush2.msra.mxu1 %v4321_v45  ;;  %3547 = vmatprep.subr.mxu0 %v4342_v5  ;;  %v4382_v45 = vld [vmem:[#allocation8 + $0x100] sm:$0xff] }
 0x3e8   :  { %2094 = vmatprep.subr.mxu1 %v4323_v47  ;;  %3548 = vmatpush3.msra.mxu0 %v4344_v7  ;;  %v4384_v47 = vld [vmem:[#allocation8 + $0x3f8] sm:$0xff]  ;;  %v4403_v5 = vld [vmem:[#allocation7 + $0xa0] sm:$0xff] }
 0x3e9   :  { %2095 = vmatpush2.msra.mxu1 %v4325_v49  ;;  %3549 = vmatprep.subr.mxu0 %v4346_v10  ;;  %v4386_v49 = vld [vmem:[#allocation7 + $0x440] sm:$0xff]  ;;  %v4405_v7 = vld [vmem:[#allocation7 + $0x38] sm:$0xff]  ;;  %v4407_v10 = vld [vmem:[#allocation7 + $0xcd0] sm:$0xff] }
 0x3ea   :  { %2096 = vmatprep.subr.mxu1 %v4327_v51  ;;  %3550 = vmatpush3.msra.mxu0 %v4348_v12  ;;  %v4388_v51 = vld [vmem:[#allocation7 + $0x3d8] sm:$0xff]  ;;  %v4409_v12 = vld [vmem:[#allocation7 + $0xc68] sm:$0xff] }
 0x3eb   :  { %2097 = vmatpush2.msra.mxu1 %v4329_v53  ;;  %3551 = vmatprep.subr.mxu0 %v4350_v14  ;;  %v4390_v53 = vld [vmem:[#allocation7 + $0x370] sm:$0xff]  ;;  %v4411_v14 = vld [vmem:[#allocation7 + $0xc00] sm:$0xff] }
 0x3ec   :  { %2098 = vmatprep.subr.mxu1 %v4331_v56  ;;  %3552 = vmatpush3.msra.mxu0 %v4352_v16  ;;  %v4392_v56 = vld [vmem:[#allocation7 + $0x308] sm:$0xff]  ;;  %v4413_v16 = vld [vmem:[#allocation7 + $0xb98] sm:$0xff] }
 0x3ed   :  { %2099 = vmatpush2.msra.mxu1 %v4333_v58  ;;  %3553 = vmatprep.subr.mxu0 %v4354_v18  ;;  %v4394_v58 = vld [vmem:[#allocation7 + $0x2a0] sm:$0xff]  ;;  %v4415_v18 = vld [vmem:[#allocation7 + $0xb30] sm:$0xff] }
 0x3ee   :  { %2100 = vmatprep.subr.mxu1 %v4335_v61  ;;  %3554 = vmatpush3.msra.mxu0 %v4356_v19  ;;  %v4396_v61 = vld [vmem:[#allocation7 + $0x238] sm:$0xff]  ;;  %v4417_v19 = vld [vmem:[#allocation7 + $0xac8] sm:$0xff] }
 0x3ef   :  { %2101 = vmatpush2.msra.mxu1 %v4337_v0  ;;  %3555 = vmatprep.subr.mxu0 %v4358_v20  ;;  %v4398_v0 = vld [vmem:[#allocation7 + $0x1d0] sm:$0xff]  ;;  %v4419_v20 = vld [vmem:[#allocation7 + $0xa60] sm:$0xff] }
 0x3f0   :  { %2102 = vmatprep.subr.mxu1 %v4339_v2  ;;  %3556 = vmatpush3.msra.mxu0 %v4360_v23  ;;  %v4400_v2 = vld [vmem:[#allocation7 + $0x168] sm:$0xff]  ;;  %v4421_v23 = vld [vmem:[#allocation7 + $0x9f8] sm:$0xff] }
 0x3f1   :  { %2103 = vmatpush2.msra.mxu1 %v4341_v4  ;;  %3557 = vmatprep.subr.mxu0 %v4362_v25  ;;  %v4402_v4 = vld [vmem:[#allocation7 + $0x100] sm:$0xff]  ;;  %v4423_v25 = vld [vmem:[#allocation7 + $0x990] sm:$0xff] }
 0x3f2   :  { %2104 = vmatprep.subr.mxu1 %v4343_v6  ;;  %3558 = vmatpush3.msra.mxu0 %v4364_v27  ;;  %v4404_v6 = vld [vmem:[#allocation7 + $0x98] sm:$0xff]  ;;  %v4425_v27 = vld [vmem:[#allocation7 + $0x928] sm:$0xff] }
 0x3f3   :  { %2105 = vmatpush2.msra.mxu1 %v4345_v8  ;;  %3559 = vmatprep.subr.mxu0 %v4366_v29  ;;  %v4406_v8 = vld [vmem:[#allocation7 + $0x30] sm:$0xff]  ;;  %v4427_v29 = vld [vmem:[#allocation7 + $0x8c0] sm:$0xff] }
 0x3f4   :  { %2106 = vmatprep.subr.mxu1 %v4347_v11  ;;  %3560 = vmatpush3.msra.mxu0 %v4370_v33  ;;  %v4408_v11 = vld [vmem:[#allocation7 + $0xcc8] sm:$0xff]  ;;  %v4431_v33 = vld [vmem:[#allocation7 + $0x7f0] sm:$0xff] }
 0x3f5   :  { %2107 = vmatpush2.msra.mxu1 %v4349_v13  ;;  %3561 = vmatprep.subr.mxu0 %v4372_v35  ;;  %v4410_v13 = vld [vmem:[#allocation7 + $0xc60] sm:$0xff]  ;;  %v4433_v35 = vld [vmem:[#allocation7 + $0x788] sm:$0xff] }
 0x3f6   :  { %2108 = vmatprep.subr.mxu1 %v4351_v15  ;;  %3562 = vmatpush3.msra.mxu0 %v4374_v37  ;;  %v4412_v15 = vld [vmem:[#allocation7 + $0xbf8] sm:$0xff]  ;;  %v4435_v37 = vld [vmem:[#allocation7 + $0x720] sm:$0xff] }
 0x3f7   :  { %2109 = vmatpush2.msra.mxu1 %v4353_v17  ;;  %3563 = vmatprep.subr.mxu0 %v4376_v39  ;;  %v4414_v17 = vld [vmem:[#allocation7 + $0xb90] sm:$0xff]  ;;  %v4437_v39 = vld [vmem:[#allocation7 + $0x6b8] sm:$0xff] }
 0x3f8   :  { %2110 = vmatprep.subr.mxu1 %v4355_v9  ;;  %3564 = vmatpush3.msra.mxu0 %v4378_v41  ;;  %v4416_v9 = vld [vmem:[#allocation7 + $0xb28] sm:$0xff]  ;;  %v4439_v41 = vld [vmem:[#allocation7 + $0x670] sm:$0xff] }
 0x3f9   :  { %2111 = vmatpush2.msra.mxu1 %v4357_v60  ;;  %3565 = vmatprep.subr.mxu0 %v4380_v43  ;;  %v4418_v60 = vld [vmem:[#allocation7 + $0xac0] sm:$0xff]  ;;  %v4441_v43 = vld [vmem:[#allocation7 + $0x608] sm:$0xff] }
 0x3fa   :  { %2112 = vmatprep.subr.mxu1 %v4359_v22  ;;  %3566 = vmatpush3.msra.mxu0 %v4382_v45  ;;  %v4420_v22 = vld [vmem:[#allocation7 + $0xa58] sm:$0xff]  ;;  %v4443_v45 = vld [vmem:[#allocation7 + $0x5a0] sm:$0xff] }
 0x3fb   :  { %2113 = vmatpush2.msra.mxu1 %v4361_v24  ;;  %3605 = vmatprep.subr.mxu0 %v4384_v47  ;;  %v4422_v24 = vld [vmem:[#allocation7 + $0x9f0] sm:$0xff]  ;;  %v4445_v47 = vld [vmem:[#allocation7 + $0x538] sm:$0xff] }
 0x3fc   :  { %2114 = vmatprep.subr.mxu1 %v4363_v26  ;;  %v4424_v26 = vld [vmem:[#allocation7 + $0x988] sm:$0xff] }
 0x3fd   :  { %2115 = vmatpush2.msra.mxu1 %v4365_v28  ;;  %v4426_v28 = vld [vmem:[#allocation7 + $0x920] sm:$0xff] }
 0x3fe   :  { %2117 = vmatmul.mubr.f32.vlgmr.msra.gmra.mxu1 %v5119_v63  ;;  %2194 = vmatprep.subr.mxu1 %v4367_v30  ;;  %v4428_v30 = vld [vmem:[#allocation7 + $0x8b8] sm:$0xff] }
 0x3ff   :  { %2195 = vmatpush1.msra.mxu1 %v4368_v31  ;;  %2258 = vmatprep.mubr.f32.mxu1 %v5116_v21  ;;  %v4429_v31 = vld [vmem:[#allocation7 + $0x858] sm:$0xff] }
 0x400   :  { %2196 = vmatprep.subr.mxu1 %v4369_v32  ;;  %v4430_v32 = vld [vmem:[#allocation7 + $0x850] sm:$0xff] }
 0x401   :  { %2197 = vmatpush1.msra.mxu1 %v4371_v34  ;;  %v4432_v34 = vld [vmem:[#allocation7 + $0x7e8] sm:$0xff] }
 0x402   :  { %2198 = vmatprep.subr.mxu1 %v4373_v36  ;;  %v4434_v36 = vld [vmem:[#allocation7 + $0x780] sm:$0xff] }
 0x403   :  { %2199 = vmatpush1.msra.mxu1 %v4375_v38  ;;  %v4436_v38 = vld [vmem:[#allocation7 + $0x718] sm:$0xff] }
 0x404   :  { %2200 = vmatprep.subr.mxu1 %v4377_v40  ;;  %v4438_v40 = vld [vmem:[#allocation7 + $0x6b0] sm:$0xff] }
 0x405   :  { %2201 = vmatpush1.msra.mxu1 %v4379_v42  ;;  %v4440_v42 = vld [vmem:[#allocation7 + $0x668] sm:$0xff] }
 0x406   :  { %2202 = vmatprep.subr.mxu1 %v4381_v44  ;;  %v4442_v44 = vld [vmem:[#allocation7 + $0x600] sm:$0xff] }
 0x407   :  { %2203 = vmatpush1.msra.mxu1 %v4383_v46  ;;  %v4444_v46 = vld [vmem:[#allocation7 + $0x598] sm:$0xff] }
 0x408   :  { %2204 = vmatprep.subr.mxu1 %v4385_v48  ;;  %v4446_v48 = vld [vmem:[#allocation7 + $0x530] sm:$0xff] }
 0x409   :  { %2205 = vmatpush1.msra.mxu1 %v4386_v49  ;;  %v4447_v49 = vld [vmem:[#allocation7 + $0x4d0] sm:$0xff] }
 0x40a   :  { %2206 = vmatprep.subr.mxu1 %v4387_v50  ;;  %v4448_v50 = vld [vmem:[#allocation7 + $0x4c8] sm:$0xff] }
 0x40b   :  { %2207 = vmatpush1.msra.mxu1 %v4388_v51  ;;  %v4449_v51 = vld [vmem:[#allocation7 + $0x468] sm:$0xff] }
 0x40c   :  { %2208 = vmatprep.subr.mxu1 %v4389_v52  ;;  %v4450_v52 = vld [vmem:[#allocation7 + $0x460] sm:$0xff] }
 0x40d   :  { %2209 = vmatpush1.msra.mxu1 %v4390_v53  ;;  %v4452_v53 = vld [vmem:[#allocation7 + $0x3f8] sm:$0xff] }
 0x40e   :  { %2210 = vmatprep.subr.mxu1 %v4391_v55  ;;  %v4453_v55 = vld [vmem:[#allocation7 + $0x398] sm:$0xff] }
 0x40f   :  { %2211 = vmatpush1.msra.mxu1 %v4392_v56  ;;  %v4454_v56 = vld [vmem:[#allocation7 + $0x390] sm:$0xff] }
 0x410   :  { %2212 = vmatprep.subr.mxu1 %v4393_v57  ;;  %v4455_v57 = vld [vmem:[#allocation7 + $0x330] sm:$0xff] }
 0x411   :  { %2213 = vmatpush1.msra.mxu1 %v4394_v58  ;;  %v4456_v58 = vld [vmem:[#allocation7 + $0x328] sm:$0xff] }
 0x412   :  { %2214 = vmatprep.subr.mxu1 %v4395_v59  ;;  %v4457_v59 = vld [vmem:[#allocation7 + $0x2c8] sm:$0xff] }
 0x413   :  { %2215 = vmatpush1.msra.mxu1 %v4396_v61  ;;  %v4458_v61 = vld [vmem:[#allocation7 + $0x2c0] sm:$0xff] }
 0x414   :  { %2216 = vmatprep.subr.mxu1 %v4397_v62  ;;  %v4459_v62 = vld [vmem:[#allocation7 + $0x260] sm:$0xff] }
 0x415   :  { %2217 = vmatpush1.msra.mxu1 %v4398_v0  ;;  %v4460_v0 = vld [vmem:[#allocation7 + $0x258] sm:$0xff] }
 0x416   :  { %2218 = vmatprep.subr.mxu1 %v4399_v1  ;;  %v4461_v1 = vld [vmem:[#allocation7 + $0x1f8] sm:$0xff] }
 0x417   :  { %2219 = vmatpush1.msra.mxu1 %v4400_v2  ;;  %v4462_v2 = vld [vmem:[#allocation7 + $0x1f0] sm:$0xff] }
 0x418   :  { %2220 = vmatprep.subr.mxu1 %v4401_v3  ;;  %v4463_v3 = vld [vmem:[#allocation7 + $0x190] sm:$0xff] }
 0x419   :  { %2221 = vmatpush1.msra.mxu1 %v4402_v4  ;;  %v4464_v4 = vld [vmem:[#allocation7 + $0x188] sm:$0xff] }
 0x41a   :  { %2222 = vmatprep.subr.mxu1 %v4403_v5  ;;  %v4465_v5 = vld [vmem:[#allocation7 + $0x128] sm:$0xff] }
 0x41b   :  { %2223 = vmatpush1.msra.mxu1 %v4404_v6  ;;  %v4466_v6 = vld [vmem:[#allocation7 + $0x120] sm:$0xff] }
 0x41c   :  { %2224 = vmatprep.subr.mxu1 %v4405_v7  ;;  %v4467_v7 = vld [vmem:[#allocation7 + $0xc0] sm:$0xff] }
 0x41d   :  { %2225 = vmatpush1.msra.mxu1 %v4406_v8  ;;  %v4468_v8 = vld [vmem:[#allocation7 + $0xb8] sm:$0xff] }
 0x41e   :  { %2226 = vmatprep.subr.mxu1 %v4407_v10  ;;  %v4469_v10 = vld [vmem:[#allocation7 + $0x58] sm:$0xff] }
 0x41f   :  { %2227 = vmatpush2.msra.mxu1 %v4408_v11  ;;  %v4470_v11 = vld [vmem:[#allocation7 + $0x50] sm:$0xff] }
 0x420   :  { %2228 = vmatprep.subr.mxu1 %v4409_v12  ;;  %v4471_v12 = vld [vmem:[#allocation7 + $0xcf0] sm:$0xff] }
 0x421   :  { %2229 = vmatpush2.msra.mxu1 %v4410_v13  ;;  %v4472_v13 = vld [vmem:[#allocation7 + $0xce8] sm:$0xff] }
 0x422   :  { %2230 = vmatprep.subr.mxu1 %v4411_v14  ;;  %v4473_v14 = vld [vmem:[#allocation7 + $0xc88] sm:$0xff] }
 0x423   :  { %2231 = vmatpush2.msra.mxu1 %v4412_v15  ;;  %v4474_v15 = vld [vmem:[#allocation7 + $0xc80] sm:$0xff] }
 0x424   :  { %2232 = vmatprep.subr.mxu1 %v4413_v16  ;;  %v4475_v16 = vld [vmem:[#allocation7 + $0xc20] sm:$0xff] }
 0x425   :  { %2233 = vmatpush2.msra.mxu1 %v4414_v17  ;;  %v4476_v17 = vld [vmem:[#allocation7 + $0xc18] sm:$0xff] }
 0x426   :  { %2234 = vmatprep.subr.mxu1 %v4415_v18  ;;  %v4477_v18 = vld [vmem:[#allocation7 + $0xbb8] sm:$0xff] }
 0x427   :  { %2235 = vmatpush2.msra.mxu1 %v4416_v9  ;;  %v4478_v9 = vld [vmem:[#allocation7 + $0xbb0] sm:$0xff] }
 0x428   :  { %2236 = vmatprep.subr.mxu1 %v4417_v19  ;;  %v4479_v19 = vld [vmem:[#allocation7 + $0xb50] sm:$0xff] }
 0x429   :  { %2237 = vmatpush2.msra.mxu1 %v4418_v60  ;;  %v4480_v60 = vld [vmem:[#allocation7 + $0xb48] sm:$0xff] }
 0x42a   :  { %2238 = vmatprep.subr.mxu1 %v4419_v20  ;;  %v4481_v20 = vld [vmem:[#allocation7 + $0xae8] sm:$0xff] }
 0x42b   :  { %2239 = vmatpush2.msra.mxu1 %v4420_v22  ;;  %v5133_v22 = vpop.f32.mrf.mxu0 }
 0x42c   :  { %2240 = vmatprep.subr.mxu1 %v4421_v23  ;;  %v4482_v23 = vld [vmem:[#allocation7 + $0xae0] sm:$0xff] }
 0x42d   :  { %2241 = vmatpush2.msra.mxu1 %v4422_v24  ;;  %v4483_v24 = vld [vmem:[#allocation7 + $0xa80] sm:$0xff] }
 0x42e   :  { %2242 = vmatprep.subr.mxu1 %v4423_v25  ;;  %v4484_v25 = vld [vmem:[#allocation7 + $0xa78] sm:$0xff] }
 0x42f   :  { %2243 = vmatpush2.msra.mxu1 %v4424_v26  ;;  %v4485_v26 = vld [vmem:[#allocation7 + $0xa18] sm:$0xff] }
 0x430   :  { %2244 = vmatprep.subr.mxu1 %v4425_v27  ;;  %v2049_v27 = vpop.f32.mrf.mxu0 }
 0x431   :  { %2245 = vmatpush2.msra.mxu1 %v4426_v28  ;;  %v4486_v28 = vld [vmem:[#allocation7 + $0xa10] sm:$0xff]  ;;  %4016 = vtanh.f32 %v2049_v27  ;;  %v4539_v27 = vld [vmem:[#allocation8 + $0x2e8] sm:$0xff] }
 0x432   :  { %2246 = vmatprep.subr.mxu1 %v4427_v29  ;;  %v4487_v29 = vld [vmem:[#allocation7 + $0x9b0] sm:$0xff]  ;;  %4018 = vtanh.f32 %v5133_v22  ;;  %v4534_v22 = vld [vmem:[#allocation8] sm:$0xff] }
 0x433   :  { %2247 = vmatpush2.msra.mxu1 %v4428_v30  ;;  %v4488_v30 = vld [vmem:[#allocation7 + $0x9a8] sm:$0xff] }
 0x434   :  { %2248 = vmatprep.subr.mxu1 %v4429_v31  ;;  %v4489_v31 = vld [vmem:[#allocation7 + $0x948] sm:$0xff] }
 0x435   :  { %2249 = vmatpush2.msra.mxu1 %v4430_v32  ;;  %v4490_v32 = vld [vmem:[#allocation7 + $0x940] sm:$0xff] }
 0x436   :  { %2250 = vmatprep.subr.mxu1 %v4431_v33  ;;  %v4491_v33 = vld [vmem:[#allocation7 + $0x8e0] sm:$0xff] }
 0x437   :  { %2251 = vmatpush2.msra.mxu1 %v4432_v34  ;;  %v4492_v34 = vld [vmem:[#allocation7 + $0x8d8] sm:$0xff] }
 0x438   :  { %2252 = vmatprep.subr.mxu1 %v4433_v35  ;;  %v4493_v35 = vld [vmem:[#allocation7 + $0x878] sm:$0xff] }
 0x439   :  { %2253 = vmatpush2.msra.mxu1 %v4434_v36  ;;  %v4494_v36 = vld [vmem:[#allocation7 + $0x870] sm:$0xff] }
 0x43a   :  { %2254 = vmatprep.subr.mxu1 %v4435_v37  ;;  %v4495_v37 = vld [vmem:[#allocation7 + $0x810] sm:$0xff] }
 0x43b   :  { %2255 = vmatpush2.msra.mxu1 %v4436_v38  ;;  %v4496_v38 = vld [vmem:[#allocation7 + $0x808] sm:$0xff] }
 0x43c   :  { %2256 = vmatprep.subr.mxu1 %v4437_v39  ;;  %v4497_v39 = vld [vmem:[#allocation7 + $0x7a8] sm:$0xff] }
 0x43d   :  { %2257 = vmatpush2.msra.mxu1 %v4438_v40  ;;  %v4498_v40 = vld [vmem:[#allocation7 + $0x7a0] sm:$0xff] }
 0x43e   :  { %2259 = vmatmul.mubr.f32.vlgmr.msra.gmra.mxu1 %v5119_v63  ;;  %2336 = vmatprep.subr.mxu1 %v4439_v41  ;;  %v4499_v41 = vld [vmem:[#allocation7 + $0x740] sm:$0xff] }
 0x43f   :  { %2337 = vmatpush1.msra.mxu1 %v4440_v42  ;;  %2400 = vmatprep.mubr.f32.mxu1 %v5116_v21  ;;  %v4451_v21 = vld [vmem:[#allocation7 + $0x400] sm:$0xff]  ;;  %v4500_v42 = vld [vmem:[#allocation7 + $0x738] sm:$0xff] }
 0x440   :  { %2338 = vmatprep.subr.mxu1 %v4441_v43  ;;  %v4017_v43 = vpop.eup %4016 }
 0x441   :  { %2339 = vmatpush1.msra.mxu1 %v4442_v44  ;;  %v4501_v44 = vld [vmem:[#allocation7 + $0x6d8] sm:$0xff] }
 0x442   :  { %2340 = vmatprep.subr.mxu1 %v4443_v45  ;;  %v5135_v45 = vld [vmem:[#allocation16] ss:$0 sm:$0xff] }
 0x443   :  { %2341 = vmatpush1.msra.mxu1 %v4444_v46  ;;  %v4502_v46 = vld [vmem:[#allocation7 + $0x6d0] sm:$0xff] }
 0x444   :  { %2342 = vmatprep.subr.mxu1 %v4445_v47 }
 0x445   :  { %2343 = vmatpush1.msra.mxu1 %v4446_v48  ;;  %v4503_v48 = vld [vmem:[#allocation8 + $0xf8] sm:$0xff] }
 0x446   :  { %2344 = vmatprep.subr.mxu1 %v4447_v49 }
 0x447   :  { %2345 = vmatpush1.msra.mxu1 %v4448_v50  ;;  %v4504_v50 = vld [vmem:[#allocation8 + $0x78] sm:$0xff] }
 0x448   :  { %2346 = vmatprep.subr.mxu1 %v4449_v51 }
 0x449   :  { %2347 = vmatpush1.msra.mxu1 %v4450_v52  ;;  %v4505_v52 = vld [vmem:[#allocation8 + $0xf0] sm:$0xff] }
 0x44a   :  { %2348 = vmatprep.subr.mxu1 %v4451_v21  ;;  %v4506_v21 = vld [vmem:[#allocation8 + $0x70] sm:$0xff] }
 0x44b   :  { %2349 = vmatpush1.msra.mxu1 %v4452_v53  ;;  %v4507_v53 = vld [vmem:[#allocation8 + $0xe8] sm:$0xff] }
 0x44c   :  { %2350 = vmatprep.subr.mxu1 %v4453_v55  ;;  %v4508_v55 = vld [vmem:[#allocation8 + $0x68] sm:$0xff] }
 0x44d   :  { %2351 = vmatpush1.msra.mxu1 %v4454_v56  ;;  %v4510_v56 = vld [vmem:[#allocation8 + $0x60] sm:$0xff] }
 0x44e   :  { %2352 = vmatprep.subr.mxu1 %v4455_v57  ;;  %v4511_v57 = vld [vmem:[#allocation8 + $0xd8] sm:$0xff] }
 0x44f   :  { %2353 = vmatpush1.msra.mxu1 %v4456_v58  ;;  %v4512_v58 = vld [vmem:[#allocation8 + $0x58] sm:$0xff] }
 0x450   :  { %2354 = vmatprep.subr.mxu1 %v4457_v59  ;;  %v4513_v59 = vld [vmem:[#allocation8 + $0xd0] sm:$0xff] }
 0x451   :  { %2355 = vmatpush1.msra.mxu1 %v4458_v61  ;;  %v5142_v61 = vpop.f32.mrf.mxu0 }
 0x452   :  { %2356 = vmatprep.subr.mxu1 %v4459_v62  ;;  %v4514_v62 = vld [vmem:[#allocation8 + $0x50] sm:$0xff] }
 0x453   :  { %2357 = vmatpush1.msra.mxu1 %v4460_v0  ;;  %v4515_v0 = vld [vmem:[#allocation8 + $0xc8] sm:$0xff] }
 0x454   :  { %2358 = vmatprep.subr.mxu1 %v4461_v1  ;;  %v4516_v1 = vld [vmem:[#allocation8 + $0x48] sm:$0xff] }
 0x455   :  { %2359 = vmatpush1.msra.mxu1 %v4462_v2  ;;  %v4517_v2 = vld [vmem:[#allocation8 + $0xc0] sm:$0xff] }
 0x456   :  { %2360 = vmatprep.subr.mxu1 %v4463_v3  ;;  %v2191_v3 = vpop.f32.mrf.mxu0 }
 0x457   :  { %2361 = vmatpush1.msra.mxu1 %v4464_v4  ;;  %v4518_v4 = vld [vmem:[#allocation8 + $0x40] sm:$0xff]  ;;  %4020 = vtanh.f32 %v2191_v3  ;;  %v4570_v3 = vld [vmem:[#allocation8 + $0x470] sm:$0xff] }
 0x458   :  { %2362 = vmatprep.subr.mxu1 %v4465_v5  ;;  %v4519_v5 = vld [vmem:[#allocation8 + $0xb8] sm:$0xff]  ;;  %4022 = vtanh.f32 %v5142_v61 }
 0x459   :  { %2363 = vmatpush1.msra.mxu1 %v4466_v6  ;;  %v4520_v6 = vld [vmem:[#allocation8 + $0x38] sm:$0xff] }
 0x45a   :  { %2364 = vmatprep.subr.mxu1 %v4467_v7  ;;  %v4521_v7 = vld [vmem:[#allocation8 + $0xb0] sm:$0xff] }
 0x45b   :  { %2365 = vmatpush1.msra.mxu1 %v4468_v8  ;;  %v4522_v8 = vld [vmem:[#allocation8 + $0x30] sm:$0xff] }
 0x45c   :  { %2366 = vmatprep.subr.mxu1 %v4469_v10  ;;  %v4523_v10 = vld [vmem:[#allocation8 + $0xa8] sm:$0xff] }
 0x45d   :  { %2367 = vmatpush1.msra.mxu1 %v4470_v11  ;;  %v4524_v11 = vld [vmem:[#allocation8 + $0x28] sm:$0xff] }
 0x45e   :  { %2368 = vmatprep.subr.mxu1 %v4471_v12  ;;  %v4525_v12 = vld [vmem:[#allocation8 + $0xa0] sm:$0xff] }
 0x45f   :  { %2369 = vmatpush2.msra.mxu1 %v4472_v13  ;;  %v4526_v13 = vld [vmem:[#allocation8 + $0x20] sm:$0xff] }
 0x460   :  { %2370 = vmatprep.subr.mxu1 %v4473_v14  ;;  %v4527_v14 = vld [vmem:[#allocation8 + $0x98] sm:$0xff] }
 0x461   :  { %2371 = vmatpush2.msra.mxu1 %v4474_v15  ;;  %v4528_v15 = vld [vmem:[#allocation8 + $0x18] sm:$0xff] }
 0x462   :  { %2372 = vmatprep.subr.mxu1 %v4475_v16  ;;  %v4529_v16 = vld [vmem:[#allocation8 + $0x90] sm:$0xff] }
 0x463   :  { %2373 = vmatpush2.msra.mxu1 %v4476_v17  ;;  %v4530_v17 = vld [vmem:[#allocation8 + $0x10] sm:$0xff] }
 0x464   :  { %2374 = vmatprep.subr.mxu1 %v4477_v18  ;;  %v4531_v18 = vld [vmem:[#allocation8 + $0x88] sm:$0xff] }
 0x465   :  { %2375 = vmatpush2.msra.mxu1 %v4478_v9  ;;  %v4019_v9 = vpop.eup %4018 }
 0x466   :  { %2376 = vmatprep.subr.mxu1 %v4479_v19  ;;  %v4532_v19 = vld [vmem:[#allocation8 + $0x8] sm:$0xff] }
 0x467   :  { %2377 = vmatpush2.msra.mxu1 %v4480_v60  ;;  %v4021_v60 = vpop.eup %4020 }
 0x468   :  { %2378 = vmatprep.subr.mxu1 %v4481_v20  ;;  %v4533_v20 = vld [vmem:[#allocation8 + $0x80] sm:$0xff] }
 0x469   :  { %2379 = vmatpush2.msra.mxu1 %v4482_v23  ;;  %v4535_v23 = vld [vmem:[#allocation8 + $0x2f8] sm:$0xff] }
 0x46a   :  { %2380 = vmatprep.subr.mxu1 %v4483_v24  ;;  %v4536_v24 = vld [vmem:[#allocation8 + $0x278] sm:$0xff] }
 0x46b   :  { %2381 = vmatpush2.msra.mxu1 %v4484_v25  ;;  %v4537_v25 = vld [vmem:[#allocation8 + $0x2f0] sm:$0xff] }
 0x46c   :  { %2382 = vmatprep.subr.mxu1 %v4485_v26  ;;  %v4538_v26 = vld [vmem:[#allocation8 + $0x270] sm:$0xff] }
 0x46d   :  { %2383 = vmatpush2.msra.mxu1 %v4486_v28  ;;  %v4540_v28 = vld [vmem:[#allocation8 + $0x268] sm:$0xff] }
 0x46e   :  { %2384 = vmatprep.subr.mxu1 %v4487_v29  ;;  %v4541_v29 = vld [vmem:[#allocation8 + $0x2e0] sm:$0xff] }
 0x46f   :  { %2385 = vmatpush2.msra.mxu1 %v4488_v30  ;;  %v4542_v30 = vld [vmem:[#allocation8 + $0x260] sm:$0xff] }
 0x470   :  { %2386 = vmatprep.subr.mxu1 %v4489_v31  ;;  %v4543_v31 = vld [vmem:[#allocation8 + $0x2d8] sm:$0xff] }
 0x471   :  { %2387 = vmatpush2.msra.mxu1 %v4490_v32  ;;  %v4544_v32 = vld [vmem:[#allocation8 + $0x258] sm:$0xff] }
 0x472   :  { %2388 = vmatprep.subr.mxu1 %v4491_v33  ;;  %v4545_v33 = vld [vmem:[#allocation8 + $0x2d0] sm:$0xff] }
 0x473   :  { %2389 = vmatpush2.msra.mxu1 %v4492_v34 }
 0x474   :  { %2390 = vmatprep.subr.mxu1 %v4493_v35  ;;  %v4546_v35 = vld [vmem:[#allocation8 + $0x250] sm:$0xff] }
 0x475   :  { %2391 = vmatpush2.msra.mxu1 %v4494_v36  ;;  %v4547_v36 = vld [vmem:[#allocation8 + $0x2c8] sm:$0xff] }
 0x476   :  { %2392 = vmatprep.subr.mxu1 %v4495_v37  ;;  %v4548_v37 = vld [vmem:[#allocation8 + $0x248] sm:$0xff] }
 0x477   :  { %2393 = vmatpush2.msra.mxu1 %v4496_v38  ;;  %v4549_v38 = vld [vmem:[#allocation8 + $0x2c0] sm:$0xff] }
 0x478   :  { %2394 = vmatprep.subr.mxu1 %v4497_v39 }
 0x479   :  { %2395 = vmatpush2.msra.mxu1 %v4498_v40  ;;  %v5145_v34 = vpop.f32.mrf.mxu0  ;;  %v4550_v40 = vld [vmem:[#allocation8 + $0x240] sm:$0xff] }
 0x47a   :  { %2396 = vmatprep.subr.mxu1 %v4499_v41  ;;  %v4551_v41 = vld [vmem:[#allocation8 + $0x2b8] sm:$0xff] }
 0x47b   :  { %2397 = vmatpush2.msra.mxu1 %v4500_v42  ;;  %v2333_v39 = vpop.f32.mrf.mxu0  ;;  %v4552_v42 = vld [vmem:[#allocation8 + $0x238] sm:$0xff] }
 0x47c   :  { %2398 = vmatprep.subr.mxu1 %v4501_v44  ;;  %4024 = vtanh.f32 %v2333_v39  ;;  %v4554_v44 = vld [vmem:[#allocation8 + $0x230] sm:$0xff] }
 0x47d   :  { %2399 = vmatpush2.msra.mxu1 %v4502_v46  ;;  %v4555_v46 = vld [vmem:[#allocation8 + $0x2a8] sm:$0xff]  ;;  %v4604_v39 = vld [vmem:[#allocation8 + $0x3d0] sm:$0xff] }
 0x47e   :  { %2401 = vmatmul.mubr.f32.vlgmr.msra.gmra.mxu1 %v5119_v63  ;;  %v1964_v47 = vpop.f32.mrf.mxu1  ;;  %3500 = vmatprep.subr.mxu1 %v4503_v48  ;;  %v4509_v63 = vld [vmem:[#allocation8 + $0xe0] sm:$0xff] }
 0x47f   :  { %v5139_v49 = vadd.f32 %v5135_v45, %v1964_v47  ;;  %3501 = vmatpush3.msra.mxu1 %v4504_v50  ;;  %2554 = vmatprep.mubr.f32.mxu1 %v4017_v43  ;;  %v4553_v43 = vld [vmem:[#allocation8 + $0x2b0] sm:$0xff]  ;;  %v4556_v47 = vld [vmem:[#allocation8 + $0x228] sm:$0xff]  ;;  %v4557_v48 = vld [vmem:[#allocation8 + $0x2a0] sm:$0xff] }
 0x480   :  { %v3865_v51 = vpop.f32.mrf.mxu1  ;;  %3502 = vmatprep.subr.mxu1 %v4505_v52  ;;  %v4558_v50 = vld [vmem:[#allocation8 + $0x220] sm:$0xff]  ;;  %v4560_v52 = vld [vmem:[#allocation8 + $0x218] sm:$0xff] }
 0x481   :  { %1968 = vmax.xlane.f32.xlu0 %v5139_v49  ;;  %3503 = vmatpush3.msra.mxu1 %v4506_v21  ;;  %v4559_v51 = vld [vmem:[#allocation8 + $0x298] sm:$0xff]  ;;  %v4561_v21 = vld [vmem:[#allocation8 + $0x290] sm:$0xff] }
 0x482   :  { %3504 = vmatprep.subr.mxu1 %v4507_v53  ;;  %v4562_v53 = vld [vmem:[#allocation8 + $0x210] sm:$0xff] }
 0x483   :  { %3505 = vmatpush3.msra.mxu1 %v4508_v55  ;;  %v4563_v55 = vld [vmem:[#allocation8 + $0x288] sm:$0xff] }
 0x484   :  { %3506 = vmatprep.subr.mxu1 %v4509_v63  ;;  %v4023_v63 = vpop.eup %4022 }
 0x485   :  { %3507 = vmatpush3.msra.mxu1 %v4510_v56  ;;  %v4564_v56 = vld [vmem:[#allocation8 + $0x208] sm:$0xff] }
 0x486   :  { %3508 = vmatprep.subr.mxu1 %v4511_v57 }
 0x487   :  { %3509 = vmatpush3.msra.mxu1 %v4512_v58  ;;  %v4565_v58 = vld [vmem:[#allocation8 + $0x280] sm:$0xff] }
 0x488   :  { %3510 = vmatprep.subr.mxu1 %v4513_v59  ;;  %v4566_v59 = vld [vmem:[#allocation8 + $0x200] sm:$0xff] }
 0x489   :  { %3511 = vmatpush3.msra.mxu1 %v4514_v62  ;;  %v4025_v57 = vpop.eup %4024  ;;  %v4567_v62 = vld [vmem:[#allocation8 + $0x4f8] sm:$0xff] }
 0x48a   :  { %3512 = vmatprep.subr.mxu1 %v4515_v0  ;;  %v4568_v0 = vld [vmem:[#allocation8 + $0x478] sm:$0xff] }
 0x48b   :  { %3513 = vmatpush3.msra.mxu1 %v4516_v1 }
 0x48c   :  { %3514 = vmatprep.subr.mxu1 %v4517_v2  ;;  %v4569_v2 = vld [vmem:[#allocation8 + $0x4f0] sm:$0xff] }
 0x48d   :  { %3515 = vmatpush3.msra.mxu1 %v4518_v4  ;;  %v4571_v4 = vld [vmem:[#allocation8 + $0x4e8] sm:$0xff] }
 0x48e   :  { %3516 = vmatprep.subr.mxu1 %v4519_v5  ;;  %v4572_v5 = vld [vmem:[#allocation8 + $0x468] sm:$0xff] }
 0x48f   :  { %3517 = vmatpush3.msra.mxu1 %v4520_v6  ;;  %v4573_v6 = vld [vmem:[#allocation8 + $0x4e0] sm:$0xff] }
 0x490   :  { %3518 = vmatprep.subr.mxu1 %v4521_v7  ;;  %v4574_v7 = vld [vmem:[#allocation8 + $0x460] sm:$0xff] }
 0x491   :  { %3519 = vmatpush3.msra.mxu1 %v4522_v8  ;;  %v4575_v8 = vld [vmem:[#allocation8 + $0x4d8] sm:$0xff] }
 0x492   :  { %3520 = vmatprep.subr.mxu1 %v4523_v10  ;;  %v4576_v10 = vld [vmem:[#allocation8 + $0x458] sm:$0xff] }
 0x493   :  { %3521 = vmatpush3.msra.mxu1 %v4524_v11  ;;  %v4577_v11 = vld [vmem:[#allocation8 + $0x4d0] sm:$0xff] }
 0x494   :  { %3522 = vmatprep.subr.mxu1 %v4525_v12  ;;  %v4578_v12 = vld [vmem:[#allocation8 + $0x450] sm:$0xff] }
 0x495   :  { %3523 = vmatpush3.msra.mxu1 %v4526_v13  ;;  %v4579_v13 = vld [vmem:[#allocation8 + $0x4c8] sm:$0xff] }
 0x496   :  { %3524 = vmatprep.subr.mxu1 %v4527_v14  ;;  %v4580_v14 = vld [vmem:[#allocation8 + $0x448] sm:$0xff] }
 0x497   :  { %3525 = vmatpush3.msra.mxu1 %v4528_v15  ;;  %v4581_v15 = vld [vmem:[#allocation8 + $0x4c0] sm:$0xff] }
 0x498   :  { %3526 = vmatprep.subr.mxu1 %v4529_v16  ;;  %v4582_v16 = vld [vmem:[#allocation8 + $0x440] sm:$0xff] }
 0x499   :  { %3527 = vmatpush3.msra.mxu1 %v4530_v17 }
 0x49a   :  { %3528 = vmatprep.subr.mxu1 %v4531_v18  ;;  %v4583_v18 = vld [vmem:[#allocation8 + $0x4b8] sm:$0xff] }
 0x49b   :  { %3529 = vmatpush3.msra.mxu1 %v4532_v19  ;;  %v4584_v19 = vld [vmem:[#allocation8 + $0x438] sm:$0xff] }
 0x49c   :  { %3530 = vmatprep.subr.mxu1 %v4533_v20  ;;  %v4586_v20 = vld [vmem:[#allocation8 + $0x378] sm:$0xff] }
 0x49d   :  { %3531 = vmatpush3.msra.mxu1 %v4534_v22  ;;  %v4587_v22 = vld [vmem:[#allocation8 + $0x430] sm:$0xff] }
 0x49e   :  { %2555 = vmatmul.mubr.f32.vlgmr.msra.gmra.mxu1 %v4019_v9  ;;  %3570 = vmatprep.subr.mxu1 %v4535_v23  ;;  %v4588_v23 = vld [vmem:[#allocation8 + $0x3f0] sm:$0xff] }
 0x49f   :  { %3571 = vmatpush3.msra.mxu1 %v4536_v24  ;;  %2694 = vmatprep.mubr.f32.mxu1 %v4021_v60  ;;  %v4585_v60 = vld [vmem:[#allocation8 + $0x4b0] sm:$0xff]  ;;  %v4589_v24 = vld [vmem:[#allocation8 + $0x4a8] sm:$0xff] }
 0x4a0   :  { %3572 = vmatprep.subr.mxu1 %v4537_v25  ;;  %v4590_v25 = vld [vmem:[#allocation8 + $0x370] sm:$0xff] }
 0x4a1   :  { %3573 = vmatpush3.msra.mxu1 %v4538_v26  ;;  %v4591_v26 = vld [vmem:[#allocation8 + $0x428] sm:$0xff] }
 0x4a2   :  { %3574 = vmatprep.subr.mxu1 %v4539_v27  ;;  %v4592_v27 = vld [vmem:[#allocation8 + $0x3e8] sm:$0xff] }
 0x4a3   :  { %3575 = vmatpush3.msra.mxu1 %v4540_v28  ;;  %v4593_v28 = vld [vmem:[#allocation8 + $0x4a0] sm:$0xff] }
 0x4a4   :  { %3576 = vmatprep.subr.mxu1 %v4541_v29  ;;  %v4594_v29 = vld [vmem:[#allocation8 + $0x368] sm:$0xff] }
 0x4a5   :  { %3577 = vmatpush3.msra.mxu1 %v4542_v30  ;;  %v4595_v30 = vld [vmem:[#allocation8 + $0x420] sm:$0xff] }
 0x4a6   :  { %3578 = vmatprep.subr.mxu1 %v4543_v31  ;;  %v4596_v31 = vld [vmem:[#allocation8 + $0x3e0] sm:$0xff] }
 0x4a7   :  { %3579 = vmatpush3.msra.mxu1 %v4544_v32  ;;  %v4597_v32 = vld [vmem:[#allocation8 + $0x498] sm:$0xff] }
 0x4a8   :  { %3580 = vmatprep.subr.mxu1 %v4545_v33  ;;  %v4598_v33 = vld [vmem:[#allocation8 + $0x360] sm:$0xff] }
 0x4a9   :  { %3581 = vmatpush3.msra.mxu1 %v4546_v35  ;;  %v4600_v35 = vld [vmem:[#allocation8 + $0x3d8] sm:$0xff] }
 0x4aa   :  { %3582 = vmatprep.subr.mxu1 %v4547_v36  ;;  %v4601_v36 = vld [vmem:[#allocation8 + $0x490] sm:$0xff] }
 0x4ab   :  { %3583 = vmatpush3.msra.mxu1 %v4548_v37  ;;  %v4602_v37 = vld [vmem:[#allocation8 + $0x358] sm:$0xff] }
 0x4ac   :  { %3584 = vmatprep.subr.mxu1 %v4549_v38  ;;  %v4603_v38 = vld [vmem:[#allocation8 + $0x410] sm:$0xff] }
 0x4ad   :  { %3585 = vmatpush3.msra.mxu1 %v4550_v40  ;;  %v4605_v40 = vld [vmem:[#allocation8 + $0x488] sm:$0xff] }
 0x4ae   :  { %3586 = vmatprep.subr.mxu1 %v4551_v41 }
 0x4af   :  { %3587 = vmatpush3.msra.mxu1 %v4552_v42  ;;  %v4606_v42 = vld [vmem:[#allocation8 + $0x350] sm:$0xff] }
 0x4b0   :  { %3588 = vmatprep.subr.mxu1 %v4553_v43  ;;  %v4607_v43 = vld [vmem:[#allocation8 + $0x408] sm:$0xff] }
 0x4b1   :  { %3589 = vmatpush3.msra.mxu1 %v4554_v44  ;;  %v4608_v44 = vld [vmem:[#allocation8 + $0x3c8] sm:$0xff] }
 0x4b2   :  { %3590 = vmatprep.subr.mxu1 %v4555_v46  ;;  %v4609_v46 = vld [vmem:[#allocation8 + $0x480] sm:$0xff] }
 0x4b3   :  { %3591 = vmatpush3.msra.mxu1 %v4556_v47  ;;  %v4610_v47 = vld [vmem:[#allocation8 + $0x348] sm:$0xff] }
 0x4b4   :  { %3592 = vmatprep.subr.mxu1 %v4557_v48  ;;  %v4611_v48 = vld [vmem:[#allocation8 + $0x400] sm:$0xff] }
 0x4b5   :  { %3593 = vmatpush3.msra.mxu1 %v4558_v50  ;;  %v4612_v50 = vld [vmem:[#allocation8 + $0x3c0] sm:$0xff] }
 0x4b6   :  { %3594 = vmatprep.subr.mxu1 %v4559_v51  ;;  %v4613_v51 = vld [vmem:[#allocation8 + $0x340] sm:$0xff] }
 0x4b7   :  { %3595 = vmatpush3.msra.mxu1 %v4560_v52  ;;  %v4614_v52 = vld [vmem:[#allocation8 + $0x3b8] sm:$0xff] }
 0x4b8   :  { %3596 = vmatprep.subr.mxu1 %v4561_v21  ;;  %v4615_v21 = vld [vmem:[#allocation8 + $0x678] sm:$0xff] }
 0x4b9   :  { %3597 = vmatpush3.msra.mxu1 %v4562_v53  ;;  %v4616_v53 = vld [vmem:[#allocation8 + $0x338] sm:$0xff] }
 0x4ba   :  { %3598 = vmatprep.subr.mxu1 %v4563_v55  ;;  %v4617_v55 = vld [vmem:[#allocation8 + $0x3b0] sm:$0xff] }
 0x4bb   :  { %3599 = vmatpush3.msra.mxu1 %v4564_v56  ;;  %v4619_v56 = vld [vmem:[#allocation8 + $0x330] sm:$0xff] }
 0x4bc   :  { %3600 = vmatprep.subr.mxu1 %v4565_v58  ;;  %v4621_v58 = vld [vmem:[#allocation8 + $0x668] sm:$0xff] }
 0x4bd   :  { %3601 = vmatpush3.msra.mxu1 %v4566_v59  ;;  %v3497_v59 = vpop.f32.mrf.mxu0 }
 0x4be   :  { %v2118_v61 = vpop.f32.mrf.mxu1  ;;  %2695 = vmatmul.mubr.f32.vlgmr.msra.gmra.mxu1 %v4023_v63  ;;  %3640 = vmatprep.subr.mxu1 %v4567_v62  ;;  %v4618_v63 = vld [vmem:[#allocation8 + $0x670] sm:$0xff]  ;;  %v4623_v62 = vld [vmem:[#allocation8 + $0x3a0] sm:$0xff] }
 0x4bf   :  { %3641 = vmatpush3.msra.mxu1 %v4568_v0  ;;  %2834 = vmatprep.mubr.f32.mxu1 %v4025_v57  ;;  %v4620_v57 = vld [vmem:[#allocation8 + $0x3a8] sm:$0xff]  ;;  %v4624_v0 = vld [vmem:[#allocation8 + $0x660] sm:$0xff] }
 0x4c0   :  { %v2120_v1 = vpop.f32.mrf.mxu1  ;;  %3642 = vmatprep.subr.mxu1 %v4569_v2  ;;  %v4626_v2 = vld [vmem:[#allocation8 + $0x398] sm:$0xff] }
 0x4c1   :  { %4026 = vtanh.f32 %v2120_v1  ;;  %3643 = vmatpush3.msra.mxu1 %v4570_v3  ;;  %v4625_v1 = vld [vmem:[#allocation8 + $0x320] sm:$0xff]  ;;  %v4627_v3 = vld [vmem:[#allocation8 + $0x658] sm:$0xff] }
 0x4c2   :  { %4028 = vtanh.f32 %v2118_v61  ;;  %3644 = vmatprep.subr.mxu1 %v4571_v4  ;;  %v4622_v61 = vld [vmem:[#allocation8 + $0x328] sm:$0xff]  ;;  %v3498_v4 = vpop.f32.mrf.mxu0 }
 0x4c3   :  { %3645 = vmatpush3.msra.mxu1 %v4572_v5  ;;  %4030 = vtanh.f32 %v5145_v34  ;;  %v4599_v34 = vld [vmem:[#allocation8 + $0x418] sm:$0xff] }
 0x4c4   :  { %3646 = vmatprep.subr.mxu1 %v4573_v6  ;;  %v4628_v5 = vld [vmem:[#allocation8 + $0x318] sm:$0xff]  ;;  %v4629_v6 = vld [vmem:[#allocation8 + $0x390] sm:$0xff] }
 0x4c5   :  { %3647 = vmatpush3.msra.mxu1 %v4574_v7  ;;  %v4630_v7 = vld [vmem:[#allocation8 + $0x650] sm:$0xff] }
 0x4c6   :  { %3648 = vmatprep.subr.mxu1 %v4575_v8  ;;  %v4631_v8 = vld [vmem:[#allocation8 + $0x310] sm:$0xff] }
 0x4c7   :  { %3649 = vmatpush3.msra.mxu1 %v4576_v10  ;;  %v3499_v10 = vadd.f32 %v3498_v4, %v3497_v59  ;;  %v4672_v59 = vld [vmem:[#allocation8 + $0x5c8] sm:$0xff]  ;;  %v4679_v4 = vld [vmem:[#allocation8 + $0x538] sm:$0xff] }
 0x4c8   :  { %3650 = vmatprep.subr.mxu1 %v4577_v11  ;;  %v4632_v11 = vld [vmem:[#allocation8 + $0x388] sm:$0xff] }
 0x4c9   :  { %3651 = vmatpush3.msra.mxu1 %v4578_v12  ;;  %v4633_v12 = vld [vmem:[#allocation8 + $0x648] sm:$0xff]  ;;  %4032 = vtanh.f32 %v3499_v10  ;;  %v4684_v10 = vld [vmem:[#allocation8 + $0x5a0] sm:$0xff] }
 0x4ca   :  { %3652 = vmatprep.subr.mxu1 %v4579_v13  ;;  %v4634_v13 = vld [vmem:[#allocation8 + $0x308] sm:$0xff] }
 0x4cb   :  { %3653 = vmatpush3.msra.mxu1 %v4580_v14  ;;  %v4635_v14 = vld [vmem:[#allocation8 + $0x380] sm:$0xff] }
 0x4cc   :  { %3654 = vmatprep.subr.mxu1 %v4581_v15  ;;  %v4636_v15 = vld [vmem:[#allocation8 + $0x640] sm:$0xff] }
 0x4cd   :  { %3655 = vmatpush3.msra.mxu1 %v4582_v16  ;;  %v4637_v16 = vld [vmem:[#allocation8 + $0x300] sm:$0xff] }
 0x4ce   :  { %v4027_v17 = vpop.eup %4026  ;;  %3656 = vmatprep.subr.mxu1 %v4583_v18  ;;  %v4639_v18 = vld [vmem:[#allocation8 + $0x638] sm:$0xff] }
 0x4cf   :  { %v4029_v9 = vpop.eup %4028  ;;  %2624 = vmatprep.mubr.f32.mxu0 %v4027_v17  ;;  %3657 = vmatpush3.msra.mxu1 %v4584_v19  ;;  %v4638_v17 = vld [vmem:[#allocation8 + $0x5f8] sm:$0xff]  ;;  %v4641_v19 = vld [vmem:[#allocation8 + $0x628] sm:$0xff] }
 0x4d0   :  { %2625 = vmatmul.mubr.f32.vlgmr.msra.gmra.mxu0 %v4029_v9  ;;  %3658 = vmatprep.subr.mxu1 %v4585_v60  ;;  %v4031_v41 = vpop.eup %4030  ;;  %v4640_v9 = vld [vmem:[#allocation8 + $0x630] sm:$0xff]  ;;  %v4642_v60 = vld [vmem:[#allocation8 + $0x620] sm:$0xff] }
 0x4d1   :  { %3606 = vmatpush3.msra.mxu0 %v4586_v20  ;;  %3659 = vmatpush3.msra.mxu1 %v4587_v22  ;;  %v4643_v20 = vld [vmem:[#allocation8 + $0x618] sm:$0xff]  ;;  %v4644_v22 = vld [vmem:[#allocation8 + $0x610] sm:$0xff] }
 0x4d2   :  { %3607 = vmatprep.subr.mxu0 %v4588_v23  ;;  %3660 = vmatprep.subr.mxu1 %v4589_v24  ;;  %v4645_v24 = vld [vmem:[#allocation8 + $0x608] sm:$0xff] }
 0x4d3   :  { %3608 = vmatpush3.msra.mxu0 %v4590_v25  ;;  %3661 = vmatpush3.msra.mxu1 %v4591_v26  ;;  %v4646_v26 = vld [vmem:[#allocation8 + $0x600] sm:$0xff] }
 0x4d4   :  { %3609 = vmatprep.subr.mxu0 %v4592_v27  ;;  %3662 = vmatprep.subr.mxu1 %v4593_v28  ;;  %v4647_v28 = vld [vmem:[#allocation14 + $0x78] sm:$0xff] }
 0x4d5   :  { %3610 = vmatpush3.msra.mxu0 %v4594_v29  ;;  %3663 = vmatpush3.msra.mxu1 %v4595_v30  ;;  %v4648_v29 = vld [vmem:[#allocation14 + $0x70] sm:$0xff]  ;;  %v4649_v30 = vld [vmem:[#allocation14 + $0x68] sm:$0xff] }
 0x4d6   :  { %3611 = vmatprep.subr.mxu0 %v4596_v31  ;;  %3664 = vmatprep.subr.mxu1 %v4597_v32  ;;  %v4033_v23 = vpop.eup %4032  ;;  %v4650_v31 = vld [vmem:[#allocation14 + $0x60] sm:$0xff]  ;;  %v4651_v32 = vld [vmem:[#allocation14 + $0x58] sm:$0xff] }
 0x4d7   :  { %3612 = vmatpush3.msra.mxu0 %v4598_v33  ;;  %3665 = vmatpush3.msra.mxu1 %v4599_v34  ;;  %v4652_v34 = vld [vmem:[#allocation14 + $0x50] sm:$0xff] }
 0x4d8   :  { %3613 = vmatprep.subr.mxu0 %v4600_v35  ;;  %3666 = vmatprep.subr.mxu1 %v4601_v36  ;;  %v4653_v36 = vld [vmem:[#allocation14 + $0x48] sm:$0xff] }
 0x4d9   :  { %3614 = vmatpush3.msra.mxu0 %v4602_v37  ;;  %3667 = vmatpush3.msra.mxu1 %v4603_v38 }
 0x4da   :  { %3615 = vmatprep.subr.mxu0 %v4604_v39  ;;  %3668 = vmatprep.subr.mxu1 %v4605_v40  ;;  %v4654_v39 = vld [vmem:[#allocation14 + $0x40] sm:$0xff] }
 0x4db   :  { %3616 = vmatpush3.msra.mxu0 %v4606_v42  ;;  %3669 = vmatpush3.msra.mxu1 %v4607_v43  ;;  %v4657_v42 = vld [vmem:[#allocation8 + $0x5f0] sm:$0xff] }
 0x4dc   :  { %3617 = vmatprep.subr.mxu0 %v4608_v44  ;;  %3670 = vmatprep.subr.mxu1 %v4609_v46  ;;  %v4658_v43 = vld [vmem:[#allocation14 + $0x30] sm:$0xff]  ;;  %v4660_v46 = vld [vmem:[#allocation8 + $0x5e8] sm:$0xff] }
 0x4dd   :  { %3618 = vmatpush3.msra.mxu0 %v4610_v47  ;;  %3671 = vmatpush3.msra.mxu1 %v4611_v48  ;;  %v4659_v44 = vld [vmem:[#allocation8 + $0x570] sm:$0xff]  ;;  %v4662_v48 = vld [vmem:[#allocation8 + $0x568] sm:$0xff] }
 0x4de   :  { %3619 = vmatprep.subr.mxu0 %v4612_v50  ;;  %2835 = vmatmul.mubr.f32.vlgmr.msra.gmra.mxu1 %v4031_v41  ;;  %v4655_v41 = vld [vmem:[#allocation14 + $0x38] sm:$0xff]  ;;  %v4661_v47 = vld [vmem:[#allocation14 + $0x28] sm:$0xff] }
 0x4df   :  { %3620 = vmatpush3.msra.mxu0 %v4613_v51  ;;  %3866 = vmatprep.subr.mxu1 %v4959_v54  ;;  %v4663_v50 = vld [vmem:[#allocation8 + $0x5e0] sm:$0xff] }
 0x4e0   :  { %3621 = vmatprep.subr.mxu0 %v4614_v52  ;;  %3867 = vmatpush3.msra.mxu1 %v4615_v21  ;;  %v4664_v51 = vld [vmem:[#allocation14 + $0x20] sm:$0xff]  ;;  %v4666_v21 = vld [vmem:[#allocation8 + $0x5d8] sm:$0xff] }
 0x4e1   :  { %3622 = vmatpush3.msra.mxu0 %v4616_v53  ;;  %3868 = vmatprep.subr.mxu1 %v4959_v54  ;;  %v4665_v52 = vld [vmem:[#allocation8 + $0x560] sm:$0xff] }
 0x4e2   :  { %3623 = vmatprep.subr.mxu0 %v4617_v55  ;;  %3869 = vmatpush3.msra.mxu1 %v4618_v63  ;;  %v4667_v53 = vld [vmem:[#allocation14 + $0x18] sm:$0xff]  ;;  %v4669_v63 = vld [vmem:[#allocation8 + $0x5d0] sm:$0xff] }
 0x4e3   :  { %3624 = vmatpush3.msra.mxu0 %v4619_v56  ;;  %3870 = vmatprep.subr.mxu1 %v4959_v54  ;;  %v4668_v55 = vld [vmem:[#allocation8 + $0x558] sm:$0xff] }
 0x4e4   :  { %3625 = vmatprep.subr.mxu0 %v4620_v57  ;;  %3871 = vmatpush3.msra.mxu1 %v4621_v58  ;;  %v4670_v56 = vld [vmem:[#allocation14 + $0x10] sm:$0xff] }
 0x4e5   :  { %3626 = vmatpush3.msra.mxu0 %v4622_v61  ;;  %3872 = vmatprep.subr.mxu1 %v4959_v54  ;;  %v4671_v57 = vld [vmem:[#allocation8 + $0x550] sm:$0xff] }
 0x4e6   :  { %3627 = vmatprep.subr.mxu0 %v4623_v62  ;;  %3873 = vmatpush3.msra.mxu1 %v4624_v0  ;;  %v4673_v61 = vld [vmem:[#allocation14 + $0x8] sm:$0xff]  ;;  %v4675_v0 = vld [vmem:[#allocation8 + $0x5c0] sm:$0xff] }
 0x4e7   :  { %3628 = vmatpush3.msra.mxu0 %v4625_v1  ;;  %3874 = vmatprep.subr.mxu1 %v4959_v54  ;;  %v4674_v62 = vld [vmem:[#allocation8 + $0x548] sm:$0xff]  ;;  %v4676_v1 = vld [vmem:[#allocation8 + $0x540] sm:$0xff] }
 0x4e8   :  { %3629 = vmatprep.subr.mxu0 %v4626_v2  ;;  %3875 = vmatpush3.msra.mxu1 %v4627_v3  ;;  %v4677_v2 = vld [vmem:[#allocation14] sm:$0xff]  ;;  %v4678_v3 = vld [vmem:[#allocation8 + $0x5b8] sm:$0xff] }
 0x4e9   :  { %3630 = vmatpush3.msra.mxu0 %v4628_v5  ;;  %3876 = vmatprep.subr.mxu1 %v4959_v54  ;;  %v4680_v5 = vld [vmem:[#allocation8 + $0x5b0] sm:$0xff] }
 0x4ea   :  { %3631 = vmatprep.subr.mxu0 %v4629_v6  ;;  %3877 = vmatpush3.msra.mxu1 %v4630_v7  ;;  %v4681_v6 = vld [vmem:[#allocation8 + $0x530] sm:$0xff]  ;;  %v4682_v7 = vld [vmem:[#allocation8 + $0x5a8] sm:$0xff] }
 0x4eb   :  { %3632 = vmatpush3.msra.mxu0 %v4631_v8  ;;  %3878 = vmatprep.subr.mxu1 %v4959_v54  ;;  %v4683_v8 = vld [vmem:[#allocation8 + $0x528] sm:$0xff] }
 0x4ec   :  { %3633 = vmatprep.subr.mxu0 %v4632_v11  ;;  %3879 = vmatpush3.msra.mxu1 %v4633_v12  ;;  %v4685_v11 = vld [vmem:[#allocation8 + $0x520] sm:$0xff]  ;;  %v4686_v12 = vld [vmem:[#allocation8 + $0x598] sm:$0xff] }
 0x4ed   :  { %3634 = vmatpush3.msra.mxu0 %v4634_v13  ;;  %3880 = vmatprep.subr.mxu1 %v4959_v54  ;;  %v4687_v13 = vld [vmem:[#allocation8 + $0x518] sm:$0xff] }
 0x4ee   :  { %3635 = vmatprep.subr.mxu0 %v4635_v14  ;;  %3881 = vmatpush3.msra.mxu1 %v4636_v15  ;;  %v4688_v14 = vld [vmem:[#allocation8 + $0x590] sm:$0xff] }
 0x4ef   :  { %3636 = vmatpush3.msra.mxu0 %v4637_v16  ;;  %3882 = vmatprep.subr.mxu1 %v4959_v54  ;;  %v4689_v15 = vld [vmem:[#allocation8 + $0x510] sm:$0xff]  ;;  %v4690_v16 = vld [vmem:[#allocation8 + $0x588] sm:$0xff] }
 0x4f0   :  { %3675 = vmatprep.subr.mxu0 %v4638_v17  ;;  %3883 = vmatpush3.msra.mxu1 %v4639_v18  ;;  %v4691_v17 = vld [vmem:[#allocation8 + $0x508] sm:$0xff]  ;;  %v4692_v18 = vld [vmem:[#allocation8 + $0x580] sm:$0xff] }
 0x4f1   :  { %3884 = vmatprep.subr.mxu1 %v4959_v54  ;;  %3898 = vmatprep.mubr.msk.f32.mxu1 %vm4960_vm0, %v4959_v54 }
 0x4f2   :  { %3885 = vmatpush3.msra.mxu1 %v4640_v9  ;;  %v4693_v9 = vld [vmem:[#allocation8 + $0x500] sm:$0xff] }
 0x4f3   :  { %3886 = vmatprep.subr.mxu1 %v4959_v54 }
 0x4f4   :  { %3887 = vmatpush3.msra.mxu1 %v4641_v19 }
 0x4f5   :  { %3888 = vmatprep.subr.mxu1 %v4959_v54 }
 0x4f6   :  { %3889 = vmatpush3.msra.mxu1 %v4642_v60 }
 0x4f7   :  { %3890 = vmatprep.subr.mxu1 %v4959_v54 }
 0x4f8   :  { %3891 = vmatpush3.msra.mxu1 %v4643_v20 }
 0x4f9   :  { %3892 = vmatprep.subr.mxu1 %v4959_v54 }
 0x4fa   :  { %3893 = vmatpush3.msra.mxu1 %v4644_v22 }
 0x4fb   :  { %3894 = vmatprep.subr.mxu1 %v4959_v54 }
 0x4fc   :  { %3895 = vmatpush3.msra.mxu1 %v4645_v24  ;;  %v4695_v24 = vld [vmem:[#allocation11 + $0x70] sm:$0xff] }
 0x4fd   :  { %3896 = vmatprep.subr.mxu1 %v4959_v54 }
 0x4fe   :  { %v2260_v25 = vpop.f32.mrf.mxu1  ;;  %3897 = vmatpush3.msra.mxu1 %v4646_v26  ;;  %v4697_v26 = vld [vmem:[#allocation11 + $0x60] sm:$0xff] }
 0x4ff   :  { %3899 = vmatmul.mubr.f32.vlgmr.msra.gmra.mxu1 %v4033_v23  ;;  %3936 = vmatprep.subr.mxu1 %v4959_v54  ;;  %v4694_v23 = vld [vmem:[#allocation11 + $0x78] sm:$0xff] }
 0x500   :  { %v2262_v27 = vpop.f32.mrf.mxu1  ;;  %3937 = vmatpush3.msra.mxu1 %v4647_v28  ;;  %3968 = vmatprep.mubr.msk.f32.mxu1 %vm4960_vm0, %v4959_v54  ;;  %v4699_v28 = vld [vmem:[#allocation11 + $0x50] sm:$0xff] }
 0x501   :  { %4034 = vtanh.f32 %v2262_v27  ;;  %3938 = vmatprep.subr.mxu1 %v4959_v54  ;;  %v4698_v27 = vld [vmem:[#allocation11 + $0x58] sm:$0xff] }
 0x502   :  { %4036 = vtanh.f32 %v2260_v25  ;;  %3939 = vmatpush3.msra.mxu1 %v4648_v29  ;;  %v4696_v25 = vld [vmem:[#allocation11 + $0x68] sm:$0xff] }
 0x503   :  { %3940 = vmatprep.subr.mxu1 %v4959_v54  ;;  %v4700_v29 = vld [vmem:[#allocation11 + $0x48] sm:$0xff] }
 0x504   :  { %3941 = vmatpush3.msra.mxu1 %v4649_v30 }
 0x505   :  { %3942 = vmatprep.subr.mxu1 %v4959_v54 }
 0x506   :  { %3943 = vmatpush3.msra.mxu1 %v4650_v31  ;;  %v4701_v31 = vld [vmem:[#allocation11 + $0x40] sm:$0xff] }
 0x507   :  { %3944 = vmatprep.subr.mxu1 %v4959_v54 }
 0x508   :  { %3945 = vmatpush3.msra.mxu1 %v4651_v32 }
 0x509   :  { %3946 = vmatprep.subr.mxu1 %v4959_v54 }
 0x50a   :  { %v1969_v33 = vpop.xlane.xlu0 %1968  ;;  %3947 = vmatpush3.msra.mxu1 %v4652_v34  ;;  %v4702_v34 = vld [vmem:[#allocation11 + $0x38] sm:$0xff] }
 0x50b   :  { %v5176_v35 = vsub.f32 %v5139_v49, %v1969_v33  ;;  %3948 = vmatprep.subr.mxu1 %v4959_v54  ;;  %v4656_v49 = vld [vmem:[#allocation8 + $0x578] sm:$0xff] }
 0x50c   :  { %3949 = vmatpush3.msra.mxu1 %v4653_v36  ;;  %v4703_v36 = vld [vmem:[#allocation11 + $0x30] sm:$0xff] }
 0x50d   :  { %v1971_v37 = vmul.f32 1.442695, %v5176_v35  ;;  %3950 = vmatprep.subr.mxu1 %v4959_v54 }
 0x50e   :  { %v4035_v38 = vpop.eup %4034  ;;  %3951 = vmatpush3.msra.mxu1 %v4654_v39  ;;  %v4706_v39 = vld [vmem:[#allocation11 + $0x18] sm:$0xff] }
 0x50f   :  { %v4037_v40 = vpop.eup %4036  ;;  %2764 = vmatprep.mubr.f32.mxu0 %v4035_v38  ;;  %4038 = vpow2.f32 %v1971_v37  ;;  %3952 = vmatprep.subr.mxu1 %v4959_v54  ;;  %v4704_v37 = vld [vmem:[#allocation11 + $0x28] sm:$0xff]  ;;  %v4705_v38 = vld [vmem:[#allocation11 + $0x20] sm:$0xff] }
 0x510   :  { %2765 = vmatmul.mubr.f32.vlgmr.msra.gmra.mxu0 %v4037_v40  ;;  %3953 = vmatpush3.msra.mxu1 %v4655_v41  ;;  %v4707_v40 = vld [vmem:[#allocation11 + $0x10] sm:$0xff]  ;;  %v4708_v41 = vld [vmem:[#allocation11 + $0x8] sm:$0xff] }
 0x511   :  { %3676 = vmatpush3.msra.mxu0 %v4656_v49  ;;  %3954 = vmatprep.subr.mxu1 %v4959_v54  ;;  %v4709_v49 = vld [vmem:[#allocation11] sm:$0xff] }
 0x512   :  { %3677 = vmatprep.subr.mxu0 %v4657_v42  ;;  %3955 = vmatpush3.msra.mxu1 %v4658_v43 }
 0x513   :  { %3678 = vmatpush3.msra.mxu0 %v4659_v44  ;;  %3956 = vmatprep.subr.mxu1 %v4959_v54 }
 0x514   :  { %3679 = vmatprep.subr.mxu0 %v4660_v46  ;;  %3957 = vmatpush3.msra.mxu1 %v4661_v47 }
 0x515   :  { %3680 = vmatpush3.msra.mxu0 %v4662_v48  ;;  %3958 = vmatprep.subr.mxu1 %v4959_v54  ;;  %v4710_v48 = vld [vmem:[#allocation10] ss:$0 sm:$0xff] }
 0x516   :  { %3681 = vmatprep.subr.mxu0 %v4663_v50  ;;  %3959 = vmatpush3.msra.mxu1 %v4664_v51 }
 0x517   :  { %3682 = vmatpush3.msra.mxu0 %v4665_v52  ;;  %3960 = vmatprep.subr.mxu1 %v4959_v54 }
 0x518   :  { %3683 = vmatprep.subr.mxu0 %v4666_v21  ;;  %3961 = vmatpush3.msra.mxu1 %v4667_v53 }
 0x519   :  { %3684 = vmatpush3.msra.mxu0 %v4668_v55  ;;  %3962 = vmatprep.subr.mxu1 %v4959_v54 }
 0x51a   :  { %3685 = vmatprep.subr.mxu0 %v4669_v63  ;;  %3963 = vmatpush3.msra.mxu1 %v4670_v56 }
 0x51b   :  { %3686 = vmatpush3.msra.mxu0 %v4671_v57  ;;  %3964 = vmatprep.subr.mxu1 %v4959_v54 }
 0x51c   :  { %v4039_v58 = vpop.eup %4038  ;;  %3687 = vmatprep.subr.mxu0 %v4672_v59  ;;  %3965 = vmatpush3.msra.mxu1 %v4673_v61 }
 0x51d   :  { %1973 = vadd.xlane.f32.xlu1 %v4039_v58  ;;  %3688 = vmatpush3.msra.mxu0 %v4674_v62 }
 0x51e   :  { %3689 = vmatprep.subr.mxu0 %v4675_v0  ;;  %3966 = vmatprep.subr.mxu1 %v4959_v54 }
 0x51f   :  { %3690 = vmatpush3.msra.mxu0 %v4676_v1  ;;  %3967 = vmatpush3.msra.mxu1 %v4677_v2 }
 0x520   :  { %3691 = vmatprep.subr.mxu0 %v4678_v3 }
 0x521   :  { %3692 = vmatpush3.msra.mxu0 %v4679_v4 }
 0x522   :  { %3693 = vmatprep.subr.mxu0 %v4680_v5 }
 0x523   :  { %3694 = vmatpush3.msra.mxu0 %v4681_v6 }
 0x524   :  { %3695 = vmatprep.subr.mxu0 %v4682_v7 }
 0x525   :  { %3696 = vmatpush3.msra.mxu0 %v4683_v8 }
 0x526   :  { %3697 = vmatprep.subr.mxu0 %v4684_v10 }
 0x527   :  { %3698 = vmatpush3.msra.mxu0 %v4685_v11 }
 0x528   :  { %3699 = vmatprep.subr.mxu0 %v4686_v12  ;;  %v4711_v12 = vld [vmem:[#allocation13] ss:$0 sm:$0xff] }
 0x529   :  { %3700 = vmatpush3.msra.mxu0 %v4687_v13 }
 0x52a   :  { %3701 = vmatprep.subr.mxu0 %v4688_v14 }
 0x52b   :  { %3702 = vmatpush3.msra.mxu0 %v4689_v15 }
 0x52c   :  { %3703 = vmatprep.subr.mxu0 %v4690_v16 }
 0x52d   :  { %3704 = vmatpush3.msra.mxu0 %v4691_v17 }
 0x52e   :  { %3705 = vmatprep.subr.mxu0 %v4692_v18 }
 0x52f   :  { %3706 = vmatpush3.msra.mxu0 %v4693_v9 }
 0x530   :  { %3901 = vmatprep.subr.mxu0 %v4959_v54 }
 0x53e   :  { %v2402_v19 = vpop.f32.mrf.mxu1 }
 0x540   :  { %v2404_v60 = vpop.f32.mrf.mxu1 }
 0x541   :  { %4040 = vtanh.f32 %v2404_v60 }
 0x542   :  { %4042 = vtanh.f32 %v2402_v19 }
 0x54e   :  { %v4041_v20 = vpop.eup %4040 }
 0x54f   :  { %v4043_v22 = vpop.eup %4042  ;;  %2904 = vmatprep.mubr.f32.mxu0 %v4041_v20 }
 0x550   :  { %2905 = vmatmul.mubr.f32.vlgmr.msra.gmra.mxu0 %v4043_v22 }
 0x551   :  { %3902 = vmatpush3.msra.mxu0 %v4694_v23  ;;  %3933 = vmatprep.mubr.msk.f32.mxu0 %vm4960_vm0, %v4959_v54 }
 0x552   :  { %3903 = vmatprep.subr.mxu0 %v4959_v54 }
 0x553   :  { %3904 = vmatpush3.msra.mxu0 %v4695_v24 }
 0x554   :  { %3905 = vmatprep.subr.mxu0 %v4959_v54 }
 0x555   :  { %3906 = vmatpush3.msra.mxu0 %v4696_v25 }
 0x556   :  { %3907 = vmatprep.subr.mxu0 %v4959_v54 }
 0x557   :  { %3908 = vmatpush3.msra.mxu0 %v4697_v26 }
 0x558   :  { %3909 = vmatprep.subr.mxu0 %v4959_v54 }
 0x559   :  { %3910 = vmatpush3.msra.mxu0 %v4698_v27 }
 0x55a   :  { %3911 = vmatprep.subr.mxu0 %v4959_v54 }
 0x55b   :  { %3912 = vmatpush3.msra.mxu0 %v4699_v28 }
 0x55c   :  { %3913 = vmatprep.subr.mxu0 %v4959_v54 }
 0x55d   :  { %3914 = vmatpush3.msra.mxu0 %v4700_v29 }
 0x55e   :  { %v3532_v30 = vpop.f32.mrf.mxu1  ;;  %3915 = vmatprep.subr.mxu0 %v4959_v54 }
 0x55f   :  { %3916 = vmatpush3.msra.mxu0 %v4701_v31 }
 0x560   :  { %v3533_v32 = vpop.f32.mrf.mxu1  ;;  %3917 = vmatprep.subr.mxu0 %v4959_v54 }
 0x561   :  { %v3534_v33 = vadd.f32 %v3533_v32, %v3532_v30  ;;  %3918 = vmatpush3.msra.mxu0 %v4702_v34 }
 0x562   :  { %3919 = vmatprep.subr.mxu0 %v4959_v54 }
 0x563   :  { %3920 = vmatpush3.msra.mxu0 %v4703_v36  ;;  %v2557_v50 = vadd.f32 %v4710_v48, %v3534_v33 }
 0x564   :  { %3921 = vmatprep.subr.mxu0 %v4959_v54 }
 0x565   :  { %3922 = vmatpush3.msra.mxu0 %v4704_v37 }
 0x566   :  { %3923 = vmatprep.subr.mxu0 %v4959_v54 }
 0x567   :  { %3924 = vmatpush3.msra.mxu0 %v4705_v38 }
 0x568   :  { %3925 = vmatprep.subr.mxu0 %v4959_v54 }
 0x569   :  { %3926 = vmatpush3.msra.mxu0 %v4706_v39 }
 0x56a   :  { %3927 = vmatprep.subr.mxu0 %v4959_v54 }
 0x56b   :  { %3928 = vmatpush3.msra.mxu0 %v4707_v40 }
 0x56c   :  { %3929 = vmatprep.subr.mxu0 %v4959_v54 }
 0x56d   :  { %3930 = vmatpush3.msra.mxu0 %v4708_v41 }
 0x56e   :  { %3931 = vmatprep.subr.mxu0 %v4959_v54 }
 0x56f   :  { %3932 = vmatpush3.msra.mxu0 %v4709_v49 }
 0x57e   :  { %v3602_v42 = vpop.f32.mrf.mxu1 }
 0x580   :  { %v3603_v43 = vpop.f32.mrf.mxu1 }
 0x581   :  { %v3604_v44 = vadd.f32 %v3603_v43, %v3602_v42 }
 0x590   :  { %v3567_v46 = vpop.f32.mrf.mxu0 }
 0x592   :  { %v3568_v47 = vpop.f32.mrf.mxu0 }
 0x593   :  { %v3569_v51 = vadd.f32 %v3568_v47, %v3567_v46 }
 0x595   :  { %v2627_v52 = vadd.f32 %v3569_v51, %v2557_v50 }
 0x597   :  { %v2697_v21 = vadd.f32 %v3604_v44, %v2627_v52 }
 0x59e   :  { %v3672_v53 = vpop.f32.mrf.mxu1 }
 0x5a0   :  { %v3673_v55 = vpop.f32.mrf.mxu1 }
 0x5a1   :  { %v3674_v63 = vadd.f32 %v3673_v55, %v3672_v53 }
 0x5a6   :  { %v1974_v56 = vpop.xlane.xlu1 %1973 }
 0x5a7   :  { %4044 = vlog2.f32 %v1974_v56 }
 0x5b4   :  { %v4045_v57 = vpop.eup %4044 }
 0x5b5   :  { %v1976_v58 = vmul.f32 0.6931472, %v4045_v57 }
 0x5b7   :  { %v1977_v54 = vsub.f32 %v5176_v35, %v1976_v58 }
 0x5b9   :  { %1978 = vst [vmem:[#allocation17] sm:$0xff] %v1977_v54 }
 0x5bf   :  { %v2976_v59 = vpop.f32.mrf.mxu1 }
 0x5c1   :  { %v3900_v61 = vpop.f32.mrf.mxu1 }
 0x5d0   :  { %v3637_v62 = vpop.f32.mrf.mxu0 }
 0x5d2   :  { %v3638_v0 = vpop.f32.mrf.mxu0 }
 0x5d3   :  { %v3639_v1 = vadd.f32 %v3638_v0, %v3637_v62 }
 0x5d5   :  { %v2767_v2 = vadd.f32 %v3639_v1, %v2697_v21 }
 0x5d7   :  { %v2837_v3 = vadd.f32 %v3674_v63, %v2767_v2 }
 0x610   :  { %v3707_v4 = vpop.f32.mrf.mxu0 }
 0x612   :  { %v3708_v5 = vpop.f32.mrf.mxu0 }
 0x613   :  { %v3709_v6 = vadd.f32 %v3708_v5, %v3707_v4 }
 0x615   :  { %v2907_v7 = vadd.f32 %v3709_v6, %v2837_v3 }
 0x617   :  { %v2977_v8 = vadd.f32 %v2976_v59, %v2907_v7 }
 0x619   :  { %4046 = vtanh.f32 %v2977_v8 }
 0x626   :  { %v4047_v10 = vpop.eup %4046 }
 0x627   :  { %3934 = vmatmul.mubr.f32.vlgmr.msra.gmra.mxu0 %v4047_v10 }
 0x6e7   :  { %v3047_v11 = vpop.f32.mrf.mxu0 }
 0x6e8   :  { %v3048_v13 = vadd.f32 %v4711_v12, %v3047_v11 }
 0x6e9   :  { %v3935_v35 = vpop.f32.mrf.mxu0 }
 0x6ea   :  { %v3051_v14 = vmax.f32 %v3048_v13, 0.0 }
 0x6ec   :  { %3969 = vmatmul.mubr.f32.vlgmr.msra.gmra.mxu1 %v3051_v14 }
 0x7ac   :  { %v3118_v15 = vpop.f32.mrf.mxu1 }
 0x7ad   :  { %v3119_v16 = vadd.f32 %v5135_v45, %v3118_v15 }
 0x7ae   :  { %v3970_v17 = vpop.f32.mrf.mxu1 }
 0x7af   :  { %3122 = vmax.xlane.f32.xlu0 %v3119_v16 }
 0x838   :  { %v3123_v18 = vpop.xlane.xlu0 %3122 }
 0x839   :  { %v3124_v9 = vsub.f32 %v3119_v16, %v3123_v18 }
 0x83b   :  { %v3125_v19 = vmul.f32 1.442695, %v3124_v9 }
 0x83d   :  { %4048 = vpow2.f32 %v3125_v19 }
 0x84a   :  { %v4049_v60 = vpop.eup %4048 }
 0x84b   :  { %3127 = vadd.xlane.f32.xlu1 %v4049_v60 }
 0x84c   :  { %4903 = shalt.err (!%p4900_p7)
}
 0x84d   :  { %3142 = dma.vmem_to_hbm [thread:$0]  %s3140_s8, 128, %s5224_s9, [#allocation4]  }
 0x84e   :  { %s4962_s18 = smov [#allocation18]  }
 0x84f   :  { %s3149_s19 = sshll.u32 %s4962_s18, 4  ;;  %s3150_s19 = int_to_ptr.vmem [resolvable:$true] %s3149_s19 }
 0x850   :  { %s4912_s7 = scalar_lea.vmem %s3150_s19, 128  ;;  %p4917_p9 = scmp.lt.s32.totalorder %s3150_s19, %s3150_s19 }
 0x851   :  { %p4913_p8 = scmp.ne.s32.totalorder %s3150_s19, %s4912_s7  ;;  %p4918_p10 = scmp.lt.s32.totalorder %s4912_s7, %s4912_s7 }
 0x853   :  { %p4919_p11 = por %p4918_p10, %p4917_p9 }
 0x855   :  { %p4920_p12 = pnand %p4919_p11, %p4913_p8 }
 0x8d4   :  { %v3128_v45 = vpop.xlane.xlu1 %3127 }
 0x8d5   :  { %4050 = vlog2.f32 %v3128_v45 }
 0x8e2   :  { %v4051_v20 = vpop.eup %4050 }
 0x8e3   :  { %v3130_v22 = vmul.f32 0.6931472, %v4051_v20 }
 0x8e5   :  { %v3131_v23 = vsub.f32 %v3124_v9, %v3130_v22 }
 0x8e7   :  { %3132 = vst [vmem:[#allocation18] sm:$0xff] %v3131_v23 }
 0x8e8   :  { %4923 = shalt.err (!%p4920_p12)
}
 0x8e9   :  { %3152 = dma.vmem_to_hbm [thread:$0]  %s3150_s19, 128, %s5225_s10, [#allocation19]  }
 0x8ea   :  { %4942 = dma.done.wait [#allocation4], 128  }
 0x8eb   :  { %4943 = vsyncadd [#allocation4], 4294967168 }
 0x8ec   :  { %4944 = dma.done.wait [#allocation19], 128  }
 0x8ed   :  { %4945 = vsyncadd [#allocation19], 4294967168 }
 0x8ee   :  { %3159 = vsyncpa [#allocation3], 1 }
 0x8ef   :  { %3160 = vsyncpa [#allocation6], 1 }
 0x8f0   :  { %3161 = vsyncpa [#allocation9], 1 }
 0x8f1   :  { %3162 = vsyncpa [#allocation12], 1 }
 0x8f2   :  { %3163 = vsyncpa [#allocation15], 1 }
 0x8f3   :  { %3164 = vsyncpa [#allocation4], 1 }
 0x8f4   :  { %3165 = vsyncpa [#allocation19], 1 }

// kernel: tpu_custom_call.1
= control target key start
LH: loop header
LB: loop body
LE: loop exit
PB: predicated region body
PF: predicated region fallthrough
CT: control target
= control target key end

     0   :  { %16 = vsyncpa [#allocation3], 0  ;;  %s5215_s0 = inlined_call_operand.hbm [shape: f32[8,256], index: 0, kind: input, shape index: {}]   ;;  %s5216_s1 = inlined_call_operand.hbm [shape: f32[8,256], index: 1, kind: input, shape index: {}]   ;;  %s5217_s2 = inlined_call_operand.hbm [shape: f32[256,1664], index: 2, kind: input, shape index: {}]   ;;  %s5218_s3 = inlined_call_operand.hbm [shape: f32[1664,128], index: 3, kind: input, shape index: {}]   ;;  %s5219_s4 = inlined_call_operand.hbm [shape: f32[1,128], index: 4, kind: input, shape index: {}]   ;;  %s5220_s5 = inlined_call_operand.hbm [shape: f32[128,128], index: 5, kind: input, shape index: {}]   ;;  %s5221_s6 = inlined_call_operand.hbm [shape: f32[1,128], index: 6, kind: input, shape index: {}]   ;;  %s5222_s7 = inlined_call_operand.hbm [shape: f32[128,128], index: 7, kind: input, shape index: {}]   ;;  %s5223_s8 = inlined_call_operand.hbm [shape: f32[1,128], index: 8, kind: input, shape index: {}]   ;;  %s5224_s9 = inlined_call_operand.hbm [shape: f32[8,128], index: 9, kind: output, shape index: {0}]   ;;  %s5225_s10 = inlined_call_operand.hbm [shape: f32[8,128], index: 10, kind: output, shape index: {1}]  }
   0x1   :  { %17 = vsyncpa [#allocation6], 0 }
   0x2   :  { %18 = vsyncpa [#allocation9], 0 }
   0x3   :  { %19 = vsyncpa [#allocation12], 0 }
   0x4   :  { %20 = vsyncpa [#allocation15], 0 }
   0x5   :  { %21 = vsyncpa [#allocation4], 0 }
   0x6   :  { %22 = vsyncpa [#allocation19], 0  ;;  %s4946_s13 = smov [#allocation5]   ;;  %s4947_s15 = smov [#allocation8]  }
   0x7   :  { %s39_s14 = sshll.u32 %s4946_s13, 4  ;;  %s60_s16 = sshll.u32 %s4947_s15, 4  ;;  %s40_s14 = int_to_ptr.vmem [resolvable:$true] %s39_s14  ;;  %s61_s16 = int_to_ptr.vmem [resolvable:$true] %s60_s16 }
   0x8   :  { %s4720_s17 = scalar_lea.vmem %s40_s14, 256  ;;  %p4725_p1 = scmp.lt.s32.totalorder %s40_s14, %s40_s14 }
   0x9   :  { %p4721_p0 = scmp.ne.s32.totalorder %s40_s14, %s4720_s17  ;;  %p4726_p2 = scmp.lt.s32.totalorder %s4720_s17, %s4720_s17 }
   0xb   :  { %p4727_p3 = por %p4726_p2, %p4725_p1 }
   0xd   :  { %p4728_p4 = pnand %p4727_p3, %p4721_p0 }
   0xf   :  { %4731 = shalt.err (!%p4728_p4)
}
  0x10   :  { %42 = dma.hbm_to_vmem [thread:$0]  %s5216_s1, 256, %s40_s14, [#allocation6]  }
  0x11   :  { %s4740_s20 = scalar_lea.vmem %s61_s16, 26624  ;;  %p4745_p6 = scmp.lt.s32.totalorder %s61_s16, %s61_s16 }
  0x12   :  { %p4741_p5 = scmp.ne.s32.totalorder %s61_s16, %s4740_s20  ;;  %p4746_p7 = scmp.lt.s32.totalorder %s4740_s20, %s4740_s20 }
  0x14   :  { %p4747_p8 = por %p4746_p7, %p4745_p6 }
  0x16   :  { %p4748_p9 = pnand %p4747_p8, %p4741_p5 }
  0x18   :  { %4751 = shalt.err (!%p4748_p9)
}
  0x19   :  { %s4948_s21 = smov 128   ;;  %s4949_s22 = smov 8  }
  0x1a   :  { %66 = dma.hbm_to_vmem [thread:$0]  %s5218_s3, 26624, %s61_s16, [#allocation9], %s4948_s21, %s4948_s21, %s4949_s22  }
  0x1b   :  { %s4950_s25 = smov [#allocation11]   ;;  %s4951_s27 = smov [#allocation14]  }
  0x1c   :  { %s82_s26 = sshll.u32 %s4950_s25, 4  ;;  %s104_s28 = sshll.u32 %s4951_s27, 4  ;;  %s83_s26 = int_to_ptr.vmem [resolvable:$true] %s82_s26  ;;  %s105_s28 = int_to_ptr.vmem [resolvable:$true] %s104_s28 }
  0x1d   :  { %s4760_s1 = scalar_lea.vmem %s83_s26, 2048  ;;  %p4765_p11 = scmp.lt.s32.totalorder %s83_s26, %s83_s26 }
  0x1e   :  { %p4761_p10 = scmp.ne.s32.totalorder %s83_s26, %s4760_s1  ;;  %p4766_p12 = scmp.lt.s32.totalorder %s4760_s1, %s4760_s1 }
  0x20   :  { %p4767_p13 = por %p4766_p12, %p4765_p11 }
  0x22   :  { %p4768_p0 = pnand %p4767_p13, %p4761_p10 }
  0x24   :  { %4771 = shalt.err (!%p4768_p0)
}
  0x25   :  { %88 = dma.hbm_to_vmem [thread:$0]  %s5220_s5, 2048, %s83_s26, [#allocation12], %s4948_s21, %s4948_s21, %s4949_s22  }
  0x26   :  { %s4780_s11 = scalar_lea.vmem %s105_s28, 2048  ;;  %p4785_p2 = scmp.lt.s32.totalorder %s105_s28, %s105_s28 }
  0x27   :  { %p4781_p1 = scmp.ne.s32.totalorder %s105_s28, %s4780_s11  ;;  %p4786_p3 = scmp.lt.s32.totalorder %s4780_s11, %s4780_s11 }
  0x29   :  { %p4787_p4 = por %p4786_p3, %p4785_p2 }
  0x2b   :  { %p4788_p5 = pnand %p4787_p4, %p4781_p1 }
  0x2d   :  { %4791 = shalt.err (!%p4788_p5)
}
  0x2e   :  { %110 = dma.hbm_to_vmem [thread:$0]  %s5222_s7, 2048, %s105_s28, [#allocation15], %s4948_s21, %s4948_s21, %s4949_s22  }
  0x2f   :  { %s4952_s13 = smov [#allocation2]   ;;  %s4953_s15 = smov [#allocation7]  }
  0x30   :  { %s29_s14 = sshll.u32 %s4952_s13, 4  ;;  %s48_s16 = sshll.u32 %s4953_s15, 4  ;;  %s30_s14 = int_to_ptr.vmem [resolvable:$true] %s29_s14  ;;  %s49_s16 = int_to_ptr.vmem [resolvable:$true] %s48_s16 }
  0x31   :  { %s4800_s17 = scalar_lea.vmem %s30_s14, 256  ;;  %p4805_p7 = scmp.lt.s32.totalorder %s30_s14, %s30_s14 }
  0x32   :  { %p4801_p6 = scmp.ne.s32.totalorder %s30_s14, %s4800_s17  ;;  %p4806_p8 = scmp.lt.s32.totalorder %s4800_s17, %s4800_s17 }
  0x34   :  { %p4807_p9 = por %p4806_p8, %p4805_p7 }
  0x36   :  { %p4808_p10 = pnand %p4807_p9, %p4801_p6 }
  0x38   :  { %4811 = shalt.err (!%p4808_p10)
}
  0x39   :  { %32 = dma.hbm_to_vmem [thread:$0]  %s5215_s0, 256, %s30_s14, [#allocation3]  }
  0x3a   :  { %s4820_s19 = scalar_lea.vmem %s49_s16, 53248  ;;  %p4825_p12 = scmp.lt.s32.totalorder %s49_s16, %s49_s16 }
  0x3b   :  { %p4821_p11 = scmp.ne.s32.totalorder %s49_s16, %s4820_s19  ;;  %p4826_p13 = scmp.lt.s32.totalorder %s4820_s19, %s4820_s19 }
  0x3d   :  { %p4827_p0 = por %p4826_p13, %p4825_p12 }
  0x3f   :  { %p4828_p1 = pnand %p4827_p0, %p4821_p11 }
  0x41   :  { %4831 = shalt.err (!%p4828_p1)
}
  0x42   :  { %s4954_s7 = smov 1664   ;;  %s4955_s20 = smov 104  }
  0x43   :  { %54 = dma.hbm_to_vmem [thread:$0]  %s5217_s2, 53248, %s49_s16, [#allocation6], %s4954_s7, %s4954_s7, %s4955_s20  }
  0x44   :  { %s4956_s23 = smov [#allocation10]   ;;  %s4957_s25 = smov [#allocation13]  }
  0x45   :  { %s73_s24 = sshll.u32 %s4956_s23, 4  ;;  %s95_s26 = sshll.u32 %s4957_s25, 4  ;;  %s74_s24 = int_to_ptr.vmem [resolvable:$true] %s73_s24  ;;  %s96_s26 = int_to_ptr.vmem [resolvable:$true] %s95_s26 }
  0x46   :  { %s4840_s0 = scalar_lea.vmem %s74_s24, 16  ;;  %s4844_s27 = scalar_lea.vmem %s74_s24, 32 }
  0x47   :  { %p4841_p2 = scmp.ne.s32.totalorder %s74_s24, %s4840_s0  ;;  %p4845_p3 = scmp.lt.s32.totalorder %s74_s24, %s74_s24 }
  0x48   :  { %p4846_p4 = scmp.lt.s32.totalorder %s4844_s27, %s4840_s0 }
  0x4a   :  { %p4847_p5 = por %p4846_p4, %p4845_p3 }
  0x4c   :  { %p4848_p6 = pnand %p4847_p5, %p4841_p2 }
  0x4e   :  { %4851 = shalt.err (!%p4848_p6)
}
  0x4f   :  { %76 = dma.hbm_to_vmem [thread:$0]  %s5219_s4, 16, %s74_s24, [#allocation9]  }
  0x50   :  { %s4860_s29 = scalar_lea.vmem %s96_s26, 16  ;;  %s4864_s2 = scalar_lea.vmem %s96_s26, 32 }
  0x51   :  { %p4861_p7 = scmp.ne.s32.totalorder %s96_s26, %s4860_s29  ;;  %p4865_p8 = scmp.lt.s32.totalorder %s96_s26, %s96_s26 }
  0x52   :  { %p4866_p9 = scmp.lt.s32.totalorder %s4864_s2, %s4860_s29 }
  0x54   :  { %p4867_p10 = por %p4866_p9, %p4865_p8 }
  0x56   :  { %p4868_p11 = pnand %p4867_p10, %p4861_p7 }
  0x58   :  { %4871 = shalt.err (!%p4868_p11)
}
  0x59   :  { %98 = dma.hbm_to_vmem [thread:$0]  %s5221_s6, 16, %s96_s26, [#allocation12]  }
  0x5a   :  { %s4958_s3 = smov [#allocation16]  }
  0x5b   :  { %s117_s12 = sshll.u32 %s4958_s3, 4  ;;  %s118_s12 = int_to_ptr.vmem [resolvable:$true] %s117_s12 }
  0x5c   :  { %s4880_s13 = scalar_lea.vmem %s118_s12, 16  ;;  %s4884_s14 = scalar_lea.vmem %s118_s12, 32 }
  0x5d   :  { %p4881_p12 = scmp.ne.s32.totalorder %s118_s12, %s4880_s13  ;;  %p4885_p13 = scmp.lt.s32.totalorder %s118_s12, %s118_s12 }
  0x5e   :  { %p4886_p0 = scmp.lt.s32.totalorder %s4884_s14, %s4880_s13 }
  0x60   :  { %p4887_p1 = por %p4886_p0, %p4885_p13 }
  0x62   :  { %p4888_p2 = pnand %p4887_p1, %p4881_p12 }
  0x64   :  { %4891 = shalt.err (!%p4888_p2)
}
  0x65   :  { %120 = dma.hbm_to_vmem [thread:$0]  %s5223_s8, 16, %s118_s12, [#allocation15]  }
  0x66   :  { %4932 = dma.done.wait [#allocation3], 256  }
  0x67   :  { %4933 = vsyncadd [#allocation3], 4294967040 }
  0x68   :  { %4934 = dma.done.wait [#allocation6], 53504  }
  0x69   :  { %4935 = vsyncadd [#allocation6], 4294913792 }
  0x6a   :  { %4936 = dma.done.wait [#allocation9], 26640  }
  0x6b   :  { %4937 = vsyncadd [#allocation9], 4294940656 }
  0x6c   :  { %4938 = dma.done.wait [#allocation12], 2064  }
  0x6d   :  { %4939 = vsyncadd [#allocation12], 4294965232 }
  0x6e   :  { %4940 = dma.done.wait [#allocation15], 2064  }
  0x6f   :  { %4941 = vsyncadd [#allocation15], 4294965232  ;;  %v344_v0 = vld [vmem:[#allocation7 + $0x620] sm:$0xff]  ;;  %v343_v1 = vld [vmem:[#allocation7 + $0x618] sm:$0xff]  ;;  %vm4960_vm0 = vmmov 0   ;;  %s4961_s6 = smov [#allocation17]  }
  0x70   :  { %v331_v2 = vld [vmem:[#allocation7 + $0x5b8] sm:$0xff]  ;;  %809 = vmatprep.subr.mxu0 %v344_v0  ;;  %v346_v3 = vld [vmem:[#allocation7 + $0x630] sm:$0xff]  ;;  %v345_v5 = vld [vmem:[#allocation7 + $0x628] sm:$0xff]  ;;  %s3139_s8 = sshll.u32 %s4961_s6, 4  ;;  %s3140_s8 = int_to_ptr.vmem [resolvable:$true] %s3139_s8 }
  0x71   :  { %v330_v4 = vld [vmem:[#allocation7 + $0x5b0] sm:$0xff]  ;;  %810 = vmatpush1.msra.mxu0 %v343_v1  ;;  %880 = vmatprep.subr.mxu1 %v346_v3  ;;  %v333_v7 = vld [vmem:[#allocation7 + $0x5c8] sm:$0xff]  ;;  %v332_v9 = vld [vmem:[#allocation7 + $0x5c0] sm:$0xff]  ;;  %s4892_s16 = scalar_lea.vmem %s3140_s8, 128  ;;  %p4897_p4 = scmp.lt.s32.totalorder %s3140_s8, %s3140_s8 }
  0x72   :  { %v318_v6 = vld [vmem:[#allocation7 + $0x550] sm:$0xff]  ;;  %811 = vmatprep.subr.mxu0 %v331_v2  ;;  %881 = vmatpush1.msra.mxu1 %v345_v5  ;;  %v317_v8 = vld [vmem:[#allocation7 + $0x548] sm:$0xff]  ;;  %v320_v10 = vld [vmem:[#allocation7 + $0x560] sm:$0xff]  ;;  %p4893_p3 = scmp.ne.s32.totalorder %s3140_s8, %s4892_s16  ;;  %p4898_p5 = scmp.lt.s32.totalorder %s4892_s16, %s4892_s16 }
  0x73   :  { %812 = vmatpush1.msra.mxu0 %v330_v4  ;;  %882 = vmatprep.subr.mxu1 %v333_v7  ;;  %v305_v11 = vld [vmem:[#allocation7 + $0x4e8] sm:$0xff]  ;;  %v319_v12 = vld [vmem:[#allocation7 + $0x558] sm:$0xff]  ;;  %v304_v13 = vld [vmem:[#allocation7 + $0x4e0] sm:$0xff] }
  0x74   :  { %813 = vmatprep.subr.mxu0 %v318_v6  ;;  %883 = vmatpush1.msra.mxu1 %v332_v9  ;;  %v307_v14 = vld [vmem:[#allocation7 + $0x4f8] sm:$0xff]  ;;  %v292_v15 = vld [vmem:[#allocation7 + $0x480] sm:$0xff]  ;;  %v306_v16 = vld [vmem:[#allocation7 + $0x4f0] sm:$0xff]  ;;  %p4899_p6 = por %p4898_p5, %p4897_p4 }
  0x75   :  { %814 = vmatpush1.msra.mxu0 %v317_v8  ;;  %884 = vmatprep.subr.mxu1 %v320_v10  ;;  %v291_v17 = vld [vmem:[#allocation7 + $0x478] sm:$0xff]  ;;  %v294_v18 = vld [vmem:[#allocation7 + $0x490] sm:$0xff]  ;;  %v293_v20 = vld [vmem:[#allocation7 + $0x488] sm:$0xff] }
  0x76   :  { %815 = vmatprep.subr.mxu0 %v305_v11  ;;  %885 = vmatpush1.msra.mxu1 %v319_v12  ;;  %v279_v19 = vld [vmem:[#allocation7 + $0x418] sm:$0xff]  ;;  %v278_v21 = vld [vmem:[#allocation7 + $0x410] sm:$0xff]  ;;  %v281_v22 = vld [vmem:[#allocation7 + $0x428] sm:$0xff]  ;;  %p4900_p7 = pnand %p4899_p6, %p4893_p3 }
  0x77   :  { %816 = vmatpush1.msra.mxu0 %v304_v13  ;;  %886 = vmatprep.subr.mxu1 %v307_v14  ;;  %v266_v23 = vld [vmem:[#allocation7 + $0x3b0] sm:$0xff]  ;;  %v280_v24 = vld [vmem:[#allocation7 + $0x420] sm:$0xff]  ;;  %v265_v25 = vld [vmem:[#allocation7 + $0x3a8] sm:$0xff] }
  0x78   :  { %817 = vmatprep.subr.mxu0 %v292_v15  ;;  %887 = vmatpush1.msra.mxu1 %v306_v16  ;;  %v268_v26 = vld [vmem:[#allocation7 + $0x3c0] sm:$0xff]  ;;  %v253_v27 = vld [vmem:[#allocation7 + $0x348] sm:$0xff]  ;;  %v267_v28 = vld [vmem:[#allocation7 + $0x3b8] sm:$0xff] }
  0x79   :  { %818 = vmatpush1.msra.mxu0 %v291_v17  ;;  %888 = vmatprep.subr.mxu1 %v294_v18  ;;  %v252_v29 = vld [vmem:[#allocation7 + $0x340] sm:$0xff]  ;;  %v255_v30 = vld [vmem:[#allocation7 + $0x358] sm:$0xff]  ;;  %v254_v32 = vld [vmem:[#allocation7 + $0x350] sm:$0xff] }
  0x7a   :  { %819 = vmatprep.subr.mxu0 %v279_v19  ;;  %889 = vmatpush1.msra.mxu1 %v293_v20  ;;  %v240_v31 = vld [vmem:[#allocation7 + $0x2e0] sm:$0xff]  ;;  %v239_v33 = vld [vmem:[#allocation7 + $0x2d8] sm:$0xff]  ;;  %v242_v34 = vld [vmem:[#allocation7 + $0x2f0] sm:$0xff] }
  0x7b   :  { %820 = vmatpush1.msra.mxu0 %v278_v21  ;;  %890 = vmatprep.subr.mxu1 %v281_v22  ;;  %v227_v35 = vld [vmem:[#allocation7 + $0x278] sm:$0xff]  ;;  %v241_v36 = vld [vmem:[#allocation7 + $0x2e8] sm:$0xff]  ;;  %v226_v37 = vld [vmem:[#allocation7 + $0x270] sm:$0xff] }
  0x7c   :  { %821 = vmatprep.subr.mxu0 %v266_v23  ;;  %891 = vmatpush1.msra.mxu1 %v280_v24  ;;  %v229_v38 = vld [vmem:[#allocation7 + $0x288] sm:$0xff]  ;;  %v214_v39 = vld [vmem:[#allocation7 + $0x210] sm:$0xff]  ;;  %v228_v40 = vld [vmem:[#allocation7 + $0x280] sm:$0xff] }
  0x7d   :  { %822 = vmatpush1.msra.mxu0 %v265_v25  ;;  %892 = vmatprep.subr.mxu1 %v268_v26  ;;  %v213_v41 = vld [vmem:[#allocation7 + $0x208] sm:$0xff]  ;;  %v216_v42 = vld [vmem:[#allocation7 + $0x220] sm:$0xff]  ;;  %v215_v44 = vld [vmem:[#allocation7 + $0x218] sm:$0xff] }
  0x7e   :  { %823 = vmatprep.subr.mxu0 %v253_v27  ;;  %893 = vmatpush1.msra.mxu1 %v267_v28  ;;  %v201_v43 = vld [vmem:[#allocation7 + $0x1a8] sm:$0xff]  ;;  %v200_v45 = vld [vmem:[#allocation7 + $0x1a0] sm:$0xff]  ;;  %v203_v46 = vld [vmem:[#allocation7 + $0x1b8] sm:$0xff] }
  0x7f   :  { %824 = vmatpush1.msra.mxu0 %v252_v29  ;;  %894 = vmatprep.subr.mxu1 %v255_v30  ;;  %v188_v47 = vld [vmem:[#allocation7 + $0x140] sm:$0xff]  ;;  %v202_v48 = vld [vmem:[#allocation7 + $0x1b0] sm:$0xff]  ;;  %v187_v49 = vld [vmem:[#allocation7 + $0x138] sm:$0xff] }
  0x80   :  { %825 = vmatprep.subr.mxu0 %v240_v31  ;;  %895 = vmatpush1.msra.mxu1 %v254_v32  ;;  %v190_v50 = vld [vmem:[#allocation7 + $0x150] sm:$0xff]  ;;  %v175_v51 = vld [vmem:[#allocation7 + $0xd8] sm:$0xff]  ;;  %v189_v52 = vld [vmem:[#allocation7 + $0x148] sm:$0xff] }
  0x81   :  { %826 = vmatpush1.msra.mxu0 %v239_v33  ;;  %896 = vmatprep.subr.mxu1 %v242_v34  ;;  %v174_v53 = vld [vmem:[#allocation7 + $0xd0] sm:$0xff]  ;;  %v177_v54 = vld [vmem:[#allocation7 + $0xe8] sm:$0xff]  ;;  %v176_v56 = vld [vmem:[#allocation7 + $0xe0] sm:$0xff] }
  0x82   :  { %827 = vmatprep.subr.mxu0 %v227_v35  ;;  %897 = vmatpush1.msra.mxu1 %v241_v36  ;;  %v162_v55 = vld [vmem:[#allocation7 + $0x70] sm:$0xff]  ;;  %v161_v57 = vld [vmem:[#allocation7 + $0x68] sm:$0xff]  ;;  %v164_v58 = vld [vmem:[#allocation7 + $0x80] sm:$0xff] }
  0x83   :  { %828 = vmatpush1.msra.mxu0 %v226_v37  ;;  %898 = vmatprep.subr.mxu1 %v229_v38  ;;  %v149_v59 = vld [vmem:[#allocation7 + $0x8] sm:$0xff]  ;;  %v163_v60 = vld [vmem:[#allocation7 + $0x78] sm:$0xff]  ;;  %v148_v61 = vld [vmem:[#allocation7] sm:$0xff] }
  0x84   :  { %829 = vmatprep.subr.mxu0 %v214_v39  ;;  %899 = vmatpush1.msra.mxu1 %v228_v40  ;;  %v151_v62 = vld [vmem:[#allocation7 + $0x18] sm:$0xff]  ;;  %v552_v63 = vld [vmem:[#allocation7 + $0xca0] sm:$0xff]  ;;  %v150_v0 = vld [vmem:[#allocation7 + $0x10] sm:$0xff] }
  0x85   :  { %830 = vmatpush1.msra.mxu0 %v213_v41  ;;  %900 = vmatprep.subr.mxu1 %v216_v42  ;;  %v551_v1 = vld [vmem:[#allocation7 + $0xc98] sm:$0xff]  ;;  %v554_v2 = vld [vmem:[#allocation7 + $0xcb0] sm:$0xff]  ;;  %v553_v4 = vld [vmem:[#allocation7 + $0xca8] sm:$0xff] }
  0x86   :  { %831 = vmatprep.subr.mxu0 %v201_v43  ;;  %901 = vmatpush1.msra.mxu1 %v215_v44  ;;  %v539_v3 = vld [vmem:[#allocation7 + $0xc38] sm:$0xff]  ;;  %v538_v5 = vld [vmem:[#allocation7 + $0xc30] sm:$0xff]  ;;  %v541_v6 = vld [vmem:[#allocation7 + $0xc48] sm:$0xff] }
  0x87   :  { %832 = vmatpush1.msra.mxu0 %v200_v45  ;;  %902 = vmatprep.subr.mxu1 %v203_v46  ;;  %v526_v7 = vld [vmem:[#allocation7 + $0xbd0] sm:$0xff]  ;;  %v540_v8 = vld [vmem:[#allocation7 + $0xc40] sm:$0xff]  ;;  %v525_v9 = vld [vmem:[#allocation7 + $0xbc8] sm:$0xff] }
  0x88   :  { %833 = vmatprep.subr.mxu0 %v188_v47  ;;  %903 = vmatpush1.msra.mxu1 %v202_v48  ;;  %v528_v10 = vld [vmem:[#allocation7 + $0xbe0] sm:$0xff]  ;;  %v513_v11 = vld [vmem:[#allocation7 + $0xb68] sm:$0xff]  ;;  %v527_v12 = vld [vmem:[#allocation7 + $0xbd8] sm:$0xff] }
  0x89   :  { %834 = vmatpush1.msra.mxu0 %v187_v49  ;;  %904 = vmatprep.subr.mxu1 %v190_v50  ;;  %v512_v13 = vld [vmem:[#allocation7 + $0xb60] sm:$0xff]  ;;  %v515_v14 = vld [vmem:[#allocation7 + $0xb78] sm:$0xff]  ;;  %v514_v16 = vld [vmem:[#allocation7 + $0xb70] sm:$0xff] }
  0x8a   :  { %835 = vmatprep.subr.mxu0 %v175_v51  ;;  %905 = vmatpush1.msra.mxu1 %v189_v52  ;;  %v500_v15 = vld [vmem:[#allocation7 + $0xb00] sm:$0xff]  ;;  %v499_v17 = vld [vmem:[#allocation7 + $0xaf8] sm:$0xff]  ;;  %v502_v18 = vld [vmem:[#allocation7 + $0xb10] sm:$0xff] }
  0x8b   :  { %836 = vmatpush1.msra.mxu0 %v174_v53  ;;  %906 = vmatprep.subr.mxu1 %v177_v54  ;;  %v487_v19 = vld [vmem:[#allocation7 + $0xa98] sm:$0xff]  ;;  %v501_v20 = vld [vmem:[#allocation7 + $0xb08] sm:$0xff]  ;;  %v486_v21 = vld [vmem:[#allocation7 + $0xa90] sm:$0xff] }
  0x8c   :  { %837 = vmatprep.subr.mxu0 %v162_v55  ;;  %907 = vmatpush1.msra.mxu1 %v176_v56  ;;  %v489_v22 = vld [vmem:[#allocation7 + $0xaa8] sm:$0xff]  ;;  %v474_v23 = vld [vmem:[#allocation7 + $0xa30] sm:$0xff]  ;;  %v488_v24 = vld [vmem:[#allocation7 + $0xaa0] sm:$0xff] }
  0x8d   :  { %838 = vmatpush1.msra.mxu0 %v161_v57  ;;  %908 = vmatprep.subr.mxu1 %v164_v58  ;;  %v473_v25 = vld [vmem:[#allocation7 + $0xa28] sm:$0xff]  ;;  %v476_v26 = vld [vmem:[#allocation7 + $0xa40] sm:$0xff]  ;;  %v475_v28 = vld [vmem:[#allocation7 + $0xa38] sm:$0xff] }
  0x8e   :  { %839 = vmatprep.subr.mxu0 %v149_v59  ;;  %909 = vmatpush1.msra.mxu1 %v163_v60  ;;  %v461_v27 = vld [vmem:[#allocation7 + $0x9c8] sm:$0xff]  ;;  %v460_v29 = vld [vmem:[#allocation7 + $0x9c0] sm:$0xff]  ;;  %v463_v30 = vld [vmem:[#allocation7 + $0x9d8] sm:$0xff] }
  0x8f   :  { %840 = vmatpush1.msra.mxu0 %v148_v61  ;;  %910 = vmatprep.subr.mxu1 %v151_v62  ;;  %v448_v31 = vld [vmem:[#allocation7 + $0x960] sm:$0xff]  ;;  %v462_v32 = vld [vmem:[#allocation7 + $0x9d0] sm:$0xff]  ;;  %v447_v33 = vld [vmem:[#allocation7 + $0x958] sm:$0xff] }
  0x90   :  { %841 = vmatprep.subr.mxu0 %v552_v63  ;;  %911 = vmatpush1.msra.mxu1 %v150_v0  ;;  %v450_v34 = vld [vmem:[#allocation7 + $0x970] sm:$0xff]  ;;  %v435_v35 = vld [vmem:[#allocation7 + $0x8f8] sm:$0xff]  ;;  %v449_v36 = vld [vmem:[#allocation7 + $0x968] sm:$0xff] }
  0x91   :  { %842 = vmatpush2.msra.mxu0 %v551_v1  ;;  %912 = vmatprep.subr.mxu1 %v554_v2  ;;  %v434_v37 = vld [vmem:[#allocation7 + $0x8f0] sm:$0xff]  ;;  %v437_v38 = vld [vmem:[#allocation7 + $0x908] sm:$0xff]  ;;  %v436_v40 = vld [vmem:[#allocation7 + $0x900] sm:$0xff] }
  0x92   :  { %843 = vmatprep.subr.mxu0 %v539_v3  ;;  %913 = vmatpush2.msra.mxu1 %v553_v4  ;;  %v422_v39 = vld [vmem:[#allocation7 + $0x890] sm:$0xff]  ;;  %v421_v41 = vld [vmem:[#allocation7 + $0x888] sm:$0xff]  ;;  %v424_v42 = vld [vmem:[#allocation7 + $0x8a0] sm:$0xff] }
  0x93   :  { %844 = vmatpush2.msra.mxu0 %v538_v5  ;;  %914 = vmatprep.subr.mxu1 %v541_v6  ;;  %v409_v43 = vld [vmem:[#allocation7 + $0x828] sm:$0xff]  ;;  %v423_v44 = vld [vmem:[#allocation7 + $0x898] sm:$0xff]  ;;  %v408_v45 = vld [vmem:[#allocation7 + $0x820] sm:$0xff] }
  0x94   :  { %845 = vmatprep.subr.mxu0 %v526_v7  ;;  %915 = vmatpush2.msra.mxu1 %v540_v8  ;;  %v411_v46 = vld [vmem:[#allocation7 + $0x838] sm:$0xff]  ;;  %v396_v47 = vld [vmem:[#allocation7 + $0x7c0] sm:$0xff]  ;;  %v410_v48 = vld [vmem:[#allocation7 + $0x830] sm:$0xff] }
  0x95   :  { %846 = vmatpush2.msra.mxu0 %v525_v9  ;;  %916 = vmatprep.subr.mxu1 %v528_v10  ;;  %v395_v49 = vld [vmem:[#allocation7 + $0x7b8] sm:$0xff]  ;;  %v398_v50 = vld [vmem:[#allocation7 + $0x7d0] sm:$0xff]  ;;  %v397_v52 = vld [vmem:[#allocation7 + $0x7c8] sm:$0xff] }
  0x96   :  { %847 = vmatprep.subr.mxu0 %v513_v11  ;;  %917 = vmatpush2.msra.mxu1 %v527_v12  ;;  %v383_v51 = vld [vmem:[#allocation7 + $0x758] sm:$0xff]  ;;  %v382_v53 = vld [vmem:[#allocation7 + $0x750] sm:$0xff]  ;;  %v385_v54 = vld [vmem:[#allocation7 + $0x768] sm:$0xff] }
  0x97   :  { %848 = vmatpush2.msra.mxu0 %v512_v13  ;;  %918 = vmatprep.subr.mxu1 %v515_v14  ;;  %v370_v55 = vld [vmem:[#allocation7 + $0x6f0] sm:$0xff]  ;;  %v384_v56 = vld [vmem:[#allocation7 + $0x760] sm:$0xff]  ;;  %v369_v57 = vld [vmem:[#allocation7 + $0x6e8] sm:$0xff] }
  0x98   :  { %849 = vmatprep.subr.mxu0 %v500_v15  ;;  %919 = vmatpush2.msra.mxu1 %v514_v16  ;;  %v372_v58 = vld [vmem:[#allocation7 + $0x700] sm:$0xff]  ;;  %v357_v59 = vld [vmem:[#allocation7 + $0x688] sm:$0xff]  ;;  %v371_v62 = vld [vmem:[#allocation7 + $0x6f8] sm:$0xff] }
  0x99   :  { %850 = vmatpush2.msra.mxu0 %v499_v17  ;;  %920 = vmatprep.subr.mxu1 %v502_v18  ;;  %v5045_v60 = vld [vmem:[#allocation2 + $0x8] sm:$0xff]  ;;  %v356_v61 = vld [vmem:[#allocation7 + $0x680] sm:$0xff]  ;;  %v359_v0 = vld [vmem:[#allocation7 + $0x698] sm:$0xff] }
  0x9a   :  { %851 = vmatprep.subr.mxu0 %v487_v19  ;;  %921 = vmatpush2.msra.mxu1 %v501_v20  ;;  %v5047_v63 = vld [vmem:[#allocation2] sm:$0xff]  ;;  %v358_v2 = vld [vmem:[#allocation7 + $0x690] sm:$0xff]  ;;  %v347_v3 = vld [vmem:[#allocation7 + $0x638] sm:$0xff] }
  0x9b   :  { %852 = vmatpush2.msra.mxu0 %v486_v21  ;;  %922 = vmatprep.subr.mxu1 %v489_v22  ;;  %v348_v1 = vld [vmem:[#allocation7 + $0x640] sm:$0xff]  ;;  %v335_v4 = vld [vmem:[#allocation7 + $0x5d8] sm:$0xff]  ;;  %v350_v5 = vld [vmem:[#allocation7 + $0x650] sm:$0xff] }
  0x9c   :  { %853 = vmatprep.subr.mxu0 %v474_v23  ;;  %923 = vmatpush2.msra.mxu1 %v488_v24  ;;  %v334_v6 = vld [vmem:[#allocation7 + $0x5d0] sm:$0xff]  ;;  %v349_v7 = vld [vmem:[#allocation7 + $0x648] sm:$0xff]  ;;  %v336_v11 = vld [vmem:[#allocation7 + $0x5e0] sm:$0xff] }
  0x9d   :  { %854 = vmatpush2.msra.mxu0 %v473_v25  ;;  %924 = vmatprep.subr.mxu1 %v476_v26  ;;  %v322_v8 = vld [vmem:[#allocation7 + $0x570] sm:$0xff]  ;;  %v337_v9 = vld [vmem:[#allocation7 + $0x5e8] sm:$0xff]  ;;  %v324_v13 = vld [vmem:[#allocation7 + $0x580] sm:$0xff] }
  0x9e   :  { %855 = vmatprep.subr.mxu0 %v461_v27  ;;  %925 = vmatpush2.msra.mxu1 %v475_v28  ;;  %v321_v10 = vld [vmem:[#allocation7 + $0x568] sm:$0xff]  ;;  %v308_v14 = vld [vmem:[#allocation7 + $0x500] sm:$0xff]  ;;  %v323_v15 = vld [vmem:[#allocation7 + $0x578] sm:$0xff] }
  0x9f   :  { %856 = vmatpush2.msra.mxu0 %v460_v29  ;;  %926 = vmatprep.subr.mxu1 %v463_v30  ;;  %v309_v12 = vld [vmem:[#allocation7 + $0x508] sm:$0xff]  ;;  %v296_v16 = vld [vmem:[#allocation7 + $0x4a0] sm:$0xff]  ;;  %v311_v17 = vld [vmem:[#allocation7 + $0x518] sm:$0xff] }
  0xa0   :  { %857 = vmatprep.subr.mxu0 %v448_v31  ;;  %927 = vmatpush2.msra.mxu1 %v462_v32  ;;  %v295_v18 = vld [vmem:[#allocation7 + $0x498] sm:$0xff]  ;;  %v310_v19 = vld [vmem:[#allocation7 + $0x510] sm:$0xff]  ;;  %v297_v23 = vld [vmem:[#allocation7 + $0x4a8] sm:$0xff] }
  0xa1   :  { %858 = vmatpush2.msra.mxu0 %v447_v33  ;;  %928 = vmatprep.subr.mxu1 %v450_v34  ;;  %v283_v20 = vld [vmem:[#allocation7 + $0x438] sm:$0xff]  ;;  %v298_v21 = vld [vmem:[#allocation7 + $0x4b0] sm:$0xff]  ;;  %v285_v25 = vld [vmem:[#allocation7 + $0x448] sm:$0xff] }
  0xa2   :  { %859 = vmatprep.subr.mxu0 %v435_v35  ;;  %929 = vmatpush2.msra.mxu1 %v449_v36  ;;  %v282_v22 = vld [vmem:[#allocation7 + $0x430] sm:$0xff]  ;;  %v269_v26 = vld [vmem:[#allocation7 + $0x3c8] sm:$0xff]  ;;  %v284_v27 = vld [vmem:[#allocation7 + $0x440] sm:$0xff] }
  0xa3   :  { %860 = vmatpush2.msra.mxu0 %v434_v37  ;;  %930 = vmatprep.subr.mxu1 %v437_v38  ;;  %v270_v24 = vld [vmem:[#allocation7 + $0x3d0] sm:$0xff]  ;;  %v257_v28 = vld [vmem:[#allocation7 + $0x368] sm:$0xff]  ;;  %v272_v29 = vld [vmem:[#allocation7 + $0x3e0] sm:$0xff] }
  0xa4   :  { %861 = vmatprep.subr.mxu0 %v422_v39  ;;  %931 = vmatpush2.msra.mxu1 %v436_v40  ;;  %v256_v30 = vld [vmem:[#allocation7 + $0x360] sm:$0xff]  ;;  %v271_v31 = vld [vmem:[#allocation7 + $0x3d8] sm:$0xff]  ;;  %v258_v35 = vld [vmem:[#allocation7 + $0x370] sm:$0xff] }
  0xa5   :  { %862 = vmatpush2.msra.mxu0 %v421_v41  ;;  %932 = vmatprep.subr.mxu1 %v424_v42  ;;  %v244_v32 = vld [vmem:[#allocation7 + $0x300] sm:$0xff]  ;;  %v259_v33 = vld [vmem:[#allocation7 + $0x378] sm:$0xff]  ;;  %v246_v37 = vld [vmem:[#allocation7 + $0x310] sm:$0xff] }
  0xa6   :  { %863 = vmatprep.subr.mxu0 %v409_v43  ;;  %933 = vmatpush2.msra.mxu1 %v423_v44  ;;  %v243_v34 = vld [vmem:[#allocation7 + $0x2f8] sm:$0xff]  ;;  %v230_v38 = vld [vmem:[#allocation7 + $0x290] sm:$0xff]  ;;  %v245_v39 = vld [vmem:[#allocation7 + $0x308] sm:$0xff] }
  0xa7   :  { %864 = vmatpush2.msra.mxu0 %v408_v45  ;;  %934 = vmatprep.subr.mxu1 %v411_v46  ;;  %v231_v36 = vld [vmem:[#allocation7 + $0x298] sm:$0xff]  ;;  %v218_v40 = vld [vmem:[#allocation7 + $0x230] sm:$0xff]  ;;  %v233_v41 = vld [vmem:[#allocation7 + $0x2a8] sm:$0xff] }
  0xa8   :  { %865 = vmatprep.subr.mxu0 %v396_v47  ;;  %935 = vmatpush2.msra.mxu1 %v410_v48  ;;  %v217_v42 = vld [vmem:[#allocation7 + $0x228] sm:$0xff]  ;;  %v232_v43 = vld [vmem:[#allocation7 + $0x2a0] sm:$0xff]  ;;  %v219_v47 = vld [vmem:[#allocation7 + $0x238] sm:$0xff] }
  0xa9   :  { %866 = vmatpush2.msra.mxu0 %v395_v49  ;;  %936 = vmatprep.subr.mxu1 %v398_v50  ;;  %v205_v44 = vld [vmem:[#allocation7 + $0x1c8] sm:$0xff]  ;;  %v220_v45 = vld [vmem:[#allocation7 + $0x240] sm:$0xff]  ;;  %v207_v49 = vld [vmem:[#allocation7 + $0x1d8] sm:$0xff] }
  0xaa   :  { %867 = vmatprep.subr.mxu0 %v383_v51  ;;  %937 = vmatpush2.msra.mxu1 %v397_v52  ;;  %v204_v46 = vld [vmem:[#allocation7 + $0x1c0] sm:$0xff]  ;;  %v191_v50 = vld [vmem:[#allocation7 + $0x158] sm:$0xff]  ;;  %v206_v51 = vld [vmem:[#allocation7 + $0x1d0] sm:$0xff] }
  0xab   :  { %868 = vmatpush2.msra.mxu0 %v382_v53  ;;  %938 = vmatprep.subr.mxu1 %v385_v54  ;;  %v192_v48 = vld [vmem:[#allocation7 + $0x160] sm:$0xff]  ;;  %v179_v52 = vld [vmem:[#allocation7 + $0xf8] sm:$0xff]  ;;  %v194_v53 = vld [vmem:[#allocation7 + $0x170] sm:$0xff] }
  0xac   :  { %869 = vmatprep.subr.mxu0 %v370_v55  ;;  %939 = vmatpush2.msra.mxu1 %v384_v56  ;;  %v178_v54 = vld [vmem:[#allocation7 + $0xf0] sm:$0xff]  ;;  %v193_v55 = vld [vmem:[#allocation7 + $0x168] sm:$0xff] }
  0xad   :  { %870 = vmatpush2.msra.mxu0 %v369_v57  ;;  %940 = vmatprep.subr.mxu1 %v372_v58  ;;  %v166_v56 = vld [vmem:[#allocation7 + $0x90] sm:$0xff]  ;;  %v181_v57 = vld [vmem:[#allocation7 + $0x108] sm:$0xff] }
  0xae   :  { %871 = vmatprep.subr.mxu0 %v357_v59  ;;  %873 = vmatprep.mubr.f32.mxu0 %v5045_v60  ;;  %v165_v58 = vld [vmem:[#allocation7 + $0x88] sm:$0xff]  ;;  %v180_v59 = vld [vmem:[#allocation7 + $0x100] sm:$0xff] }
  0xaf   :  { %872 = vmatpush2.msra.mxu0 %v356_v61  ;;  %941 = vmatpush2.msra.mxu1 %v371_v62  ;;  %v153_v61 = vld [vmem:[#allocation7 + $0x28] sm:$0xff]  ;;  %v168_v62 = vld [vmem:[#allocation7 + $0xa0] sm:$0xff] }
  0xb0   :  { %874 = vmatmul.mubr.f32.vlgmr.msra.gmra.mxu0 %v5047_v63  ;;  %942 = vmatprep.subr.mxu1 %v359_v0  ;;  %v152_v0 = vld [vmem:[#allocation7 + $0x20] sm:$0xff] }
  0xb1   :  { %951 = vmatprep.subr.mxu0 %v348_v1  ;;  %943 = vmatpush2.msra.mxu1 %v358_v2  ;;  %v167_v1 = vld [vmem:[#allocation7 + $0x98] sm:$0xff]  ;;  %v556_v2 = vld [vmem:[#allocation7 + $0xcc0] sm:$0xff] }
  0xb2   :  { %944 = vmatprep.mubr.f32.mxu1 %v5045_v60  ;;  %952 = vmatpush1.msra.mxu0 %v347_v3  ;;  %v155_v3 = vld [vmem:[#allocation7 + $0x38] sm:$0xff] }
  0xb3   :  { %945 = vmatmul.mubr.f32.vlgmr.msra.gmra.mxu1 %v5047_v63  ;;  %953 = vmatprep.subr.mxu0 %v335_v4  ;;  %v555_v4 = vld [vmem:[#allocation7 + $0xcb8] sm:$0xff] }
  0xb4   :  { %1022 = vmatprep.subr.mxu1 %v350_v5  ;;  %954 = vmatpush1.msra.mxu0 %v334_v6  ;;  %v154_v5 = vld [vmem:[#allocation7 + $0x30] sm:$0xff]  ;;  %v543_v6 = vld [vmem:[#allocation7 + $0xc58] sm:$0xff] }
  0xb5   :  { %1023 = vmatpush1.msra.mxu1 %v349_v7  ;;  %955 = vmatprep.subr.mxu0 %v322_v8  ;;  %v558_v7 = vld [vmem:[#allocation7 + $0xcd0] sm:$0xff] }
  0xb6   :  { %1024 = vmatprep.subr.mxu1 %v337_v9  ;;  %956 = vmatpush1.msra.mxu0 %v321_v10  ;;  %v542_v8 = vld [vmem:[#allocation7 + $0xc50] sm:$0xff]  ;;  %v557_v9 = vld [vmem:[#allocation7 + $0xcc8] sm:$0xff] }
  0xb7   :  { %1025 = vmatpush1.msra.mxu1 %v336_v11  ;;  %957 = vmatprep.subr.mxu0 %v309_v12  ;;  %v530_v10 = vld [vmem:[#allocation7 + $0xbf0] sm:$0xff]  ;;  %v545_v11 = vld [vmem:[#allocation7 + $0xc68] sm:$0xff] }
  0xb8   :  { %1026 = vmatprep.subr.mxu1 %v324_v13  ;;  %958 = vmatpush1.msra.mxu0 %v308_v14  ;;  %v529_v12 = vld [vmem:[#allocation7 + $0xbe8] sm:$0xff]  ;;  %v544_v13 = vld [vmem:[#allocation7 + $0xc60] sm:$0xff] }
  0xb9   :  { %1027 = vmatpush1.msra.mxu1 %v323_v15  ;;  %959 = vmatprep.subr.mxu0 %v296_v16  ;;  %v517_v14 = vld [vmem:[#allocation7 + $0xb88] sm:$0xff]  ;;  %v532_v15 = vld [vmem:[#allocation7 + $0xc00] sm:$0xff] }
  0xba   :  { %1028 = vmatprep.subr.mxu1 %v311_v17  ;;  %960 = vmatpush1.msra.mxu0 %v295_v18  ;;  %v516_v16 = vld [vmem:[#allocation7 + $0xb80] sm:$0xff]  ;;  %v531_v17 = vld [vmem:[#allocation7 + $0xbf8] sm:$0xff] }
  0xbb   :  { %1029 = vmatpush1.msra.mxu1 %v310_v19  ;;  %961 = vmatprep.subr.mxu0 %v283_v20  ;;  %v504_v18 = vld [vmem:[#allocation7 + $0xb20] sm:$0xff]  ;;  %v519_v19 = vld [vmem:[#allocation7 + $0xb98] sm:$0xff] }
  0xbc   :  { %1030 = vmatprep.subr.mxu1 %v298_v21  ;;  %962 = vmatpush1.msra.mxu0 %v282_v22  ;;  %v503_v20 = vld [vmem:[#allocation7 + $0xb18] sm:$0xff]  ;;  %v518_v21 = vld [vmem:[#allocation7 + $0xb90] sm:$0xff] }
  0xbd   :  { %1031 = vmatpush1.msra.mxu1 %v297_v23  ;;  %963 = vmatprep.subr.mxu0 %v270_v24  ;;  %v491_v22 = vld [vmem:[#allocation7 + $0xab8] sm:$0xff]  ;;  %v506_v23 = vld [vmem:[#allocation7 + $0xb30] sm:$0xff] }
  0xbe   :  { %1032 = vmatprep.subr.mxu1 %v285_v25  ;;  %964 = vmatpush1.msra.mxu0 %v269_v26  ;;  %v490_v24 = vld [vmem:[#allocation7 + $0xab0] sm:$0xff]  ;;  %v505_v25 = vld [vmem:[#allocation7 + $0xb28] sm:$0xff] }
  0xbf   :  { %1033 = vmatpush1.msra.mxu1 %v284_v27  ;;  %965 = vmatprep.subr.mxu0 %v257_v28  ;;  %v478_v26 = vld [vmem:[#allocation7 + $0xa50] sm:$0xff]  ;;  %v493_v27 = vld [vmem:[#allocation7 + $0xac8] sm:$0xff] }
  0xc0   :  { %1034 = vmatprep.subr.mxu1 %v272_v29  ;;  %966 = vmatpush1.msra.mxu0 %v256_v30  ;;  %v477_v28 = vld [vmem:[#allocation7 + $0xa48] sm:$0xff]  ;;  %v492_v29 = vld [vmem:[#allocation7 + $0xac0] sm:$0xff] }
  0xc1   :  { %1035 = vmatpush1.msra.mxu1 %v271_v31  ;;  %967 = vmatprep.subr.mxu0 %v244_v32  ;;  %v465_v30 = vld [vmem:[#allocation7 + $0x9e8] sm:$0xff]  ;;  %v480_v31 = vld [vmem:[#allocation7 + $0xa60] sm:$0xff] }
  0xc2   :  { %1036 = vmatprep.subr.mxu1 %v259_v33  ;;  %968 = vmatpush1.msra.mxu0 %v243_v34  ;;  %v464_v32 = vld [vmem:[#allocation7 + $0x9e0] sm:$0xff]  ;;  %v479_v33 = vld [vmem:[#allocation7 + $0xa58] sm:$0xff] }
  0xc3   :  { %1037 = vmatpush1.msra.mxu1 %v258_v35  ;;  %969 = vmatprep.subr.mxu0 %v231_v36  ;;  %v452_v34 = vld [vmem:[#allocation7 + $0x980] sm:$0xff]  ;;  %v467_v35 = vld [vmem:[#allocation7 + $0x9f8] sm:$0xff] }
  0xc4   :  { %1038 = vmatprep.subr.mxu1 %v246_v37  ;;  %970 = vmatpush1.msra.mxu0 %v230_v38  ;;  %v451_v36 = vld [vmem:[#allocation7 + $0x978] sm:$0xff]  ;;  %v466_v37 = vld [vmem:[#allocation7 + $0x9f0] sm:$0xff] }
  0xc5   :  { %1039 = vmatpush1.msra.mxu1 %v245_v39  ;;  %971 = vmatprep.subr.mxu0 %v218_v40  ;;  %v439_v38 = vld [vmem:[#allocation7 + $0x918] sm:$0xff]  ;;  %v454_v39 = vld [vmem:[#allocation7 + $0x990] sm:$0xff] }
  0xc6   :  { %1040 = vmatprep.subr.mxu1 %v233_v41  ;;  %972 = vmatpush1.msra.mxu0 %v217_v42  ;;  %v438_v40 = vld [vmem:[#allocation7 + $0x910] sm:$0xff]  ;;  %v453_v41 = vld [vmem:[#allocation7 + $0x988] sm:$0xff] }
  0xc7   :  { %1041 = vmatpush1.msra.mxu1 %v232_v43  ;;  %973 = vmatprep.subr.mxu0 %v205_v44  ;;  %v426_v42 = vld [vmem:[#allocation7 + $0x8b0] sm:$0xff]  ;;  %v441_v43 = vld [vmem:[#allocation7 + $0x928] sm:$0xff] }
  0xc8   :  { %1042 = vmatprep.subr.mxu1 %v220_v45  ;;  %974 = vmatpush1.msra.mxu0 %v204_v46  ;;  %v425_v44 = vld [vmem:[#allocation7 + $0x8a8] sm:$0xff]  ;;  %v440_v45 = vld [vmem:[#allocation7 + $0x920] sm:$0xff] }
  0xc9   :  { %1043 = vmatpush1.msra.mxu1 %v219_v47  ;;  %975 = vmatprep.subr.mxu0 %v192_v48  ;;  %v413_v46 = vld [vmem:[#allocation7 + $0x848] sm:$0xff]  ;;  %v428_v47 = vld [vmem:[#allocation7 + $0x8c0] sm:$0xff] }
  0xca   :  { %1044 = vmatprep.subr.mxu1 %v207_v49  ;;  %976 = vmatpush1.msra.mxu0 %v191_v50  ;;  %v412_v48 = vld [vmem:[#allocation7 + $0x840] sm:$0xff]  ;;  %v427_v49 = vld [vmem:[#allocation7 + $0x8b8] sm:$0xff] }
  0xcb   :  { %1045 = vmatpush1.msra.mxu1 %v206_v51  ;;  %977 = vmatprep.subr.mxu0 %v179_v52  ;;  %v400_v50 = vld [vmem:[#allocation7 + $0x7e0] sm:$0xff]  ;;  %v415_v51 = vld [vmem:[#allocation7 + $0x858] sm:$0xff] }
  0xcc   :  { %1046 = vmatprep.subr.mxu1 %v194_v53  ;;  %978 = vmatpush1.msra.mxu0 %v178_v54  ;;  %v399_v52 = vld [vmem:[#allocation7 + $0x7d8] sm:$0xff]  ;;  %v414_v53 = vld [vmem:[#allocation7 + $0x850] sm:$0xff] }
  0xcd   :  { %1047 = vmatpush1.msra.mxu1 %v193_v55  ;;  %979 = vmatprep.subr.mxu0 %v166_v56  ;;  %v387_v54 = vld [vmem:[#allocation7 + $0x778] sm:$0xff]  ;;  %v402_v55 = vld [vmem:[#allocation7 + $0x7f0] sm:$0xff] }
  0xce   :  { %1048 = vmatprep.subr.mxu1 %v181_v57  ;;  %980 = vmatpush1.msra.mxu0 %v165_v58  ;;  %v386_v56 = vld [vmem:[#allocation7 + $0x770] sm:$0xff]  ;;  %v401_v57 = vld [vmem:[#allocation7 + $0x7e8] sm:$0xff] }
  0xcf   :  { %1049 = vmatpush1.msra.mxu1 %v180_v59  ;;  %981 = vmatprep.subr.mxu0 %v153_v61  ;;  %v374_v58 = vld [vmem:[#allocation7 + $0x710] sm:$0xff]  ;;  %v389_v59 = vld [vmem:[#allocation7 + $0x788] sm:$0xff] }
  0xd0   :  { %1050 = vmatprep.subr.mxu1 %v168_v62  ;;  %982 = vmatpush1.msra.mxu0 %v152_v0  ;;  %v373_v61 = vld [vmem:[#allocation7 + $0x708] sm:$0xff]  ;;  %v388_v62 = vld [vmem:[#allocation7 + $0x780] sm:$0xff] }
  0xd1   :  { %1051 = vmatpush1.msra.mxu1 %v167_v1  ;;  %983 = vmatprep.subr.mxu0 %v556_v2  ;;  %v361_v0 = vld [vmem:[#allocation7 + $0x6a8] sm:$0xff]  ;;  %v376_v1 = vld [vmem:[#allocation7 + $0x720] sm:$0xff] }
  0xd2   :  { %1052 = vmatprep.subr.mxu1 %v155_v3  ;;  %984 = vmatpush2.msra.mxu0 %v555_v4  ;;  %v360_v2 = vld [vmem:[#allocation7 + $0x6a0] sm:$0xff]  ;;  %v375_v3 = vld [vmem:[#allocation7 + $0x718] sm:$0xff] }
  0xd3   :  { %1053 = vmatpush1.msra.mxu1 %v154_v5  ;;  %985 = vmatprep.subr.mxu0 %v543_v6  ;;  %v363_v4 = vld [vmem:[#allocation7 + $0x6b8] sm:$0xff]  ;;  %v352_v5 = vld [vmem:[#allocation7 + $0x660] sm:$0xff]  ;;  %v362_v6 = vld [vmem:[#allocation7 + $0x6b0] sm:$0xff] }
  0xd4   :  { %1054 = vmatprep.subr.mxu1 %v558_v7  ;;  %986 = vmatpush2.msra.mxu0 %v542_v8  ;;  %v351_v7 = vld [vmem:[#allocation7 + $0x658] sm:$0xff] }
  0xd5   :  { %1055 = vmatpush2.msra.mxu1 %v557_v9  ;;  %987 = vmatprep.subr.mxu0 %v530_v10  ;;  %v339_v8 = vld [vmem:[#allocation7 + $0x5f8] sm:$0xff]  ;;  %v354_v9 = vld [vmem:[#allocation7 + $0x670] sm:$0xff] }
  0xd6   :  { %1056 = vmatprep.subr.mxu1 %v545_v11  ;;  %988 = vmatpush2.msra.mxu0 %v529_v12  ;;  %v338_v10 = vld [vmem:[#allocation7 + $0x5f0] sm:$0xff]  ;;  %v353_v11 = vld [vmem:[#allocation7 + $0x668] sm:$0xff] }
  0xd7   :  { %1057 = vmatpush2.msra.mxu1 %v544_v13  ;;  %989 = vmatprep.subr.mxu0 %v517_v14  ;;  %v326_v12 = vld [vmem:[#allocation7 + $0x590] sm:$0xff]  ;;  %v341_v13 = vld [vmem:[#allocation7 + $0x608] sm:$0xff] }
  0xd8   :  { %1058 = vmatprep.subr.mxu1 %v532_v15  ;;  %990 = vmatpush2.msra.mxu0 %v516_v16  ;;  %v325_v14 = vld [vmem:[#allocation7 + $0x588] sm:$0xff]  ;;  %v340_v15 = vld [vmem:[#allocation7 + $0x600] sm:$0xff] }
  0xd9   :  { %1059 = vmatpush2.msra.mxu1 %v531_v17  ;;  %991 = vmatprep.subr.mxu0 %v504_v18  ;;  %v313_v16 = vld [vmem:[#allocation7 + $0x528] sm:$0xff]  ;;  %v328_v17 = vld [vmem:[#allocation7 + $0x5a0] sm:$0xff] }
  0xda   :  { %1060 = vmatprep.subr.mxu1 %v519_v19  ;;  %992 = vmatpush2.msra.mxu0 %v503_v20  ;;  %v312_v18 = vld [vmem:[#allocation7 + $0x520] sm:$0xff]  ;;  %v327_v19 = vld [vmem:[#allocation7 + $0x598] sm:$0xff] }
  0xdb   :  { %1061 = vmatpush2.msra.mxu1 %v518_v21  ;;  %993 = vmatprep.subr.mxu0 %v491_v22  ;;  %v315_v20 = vld [vmem:[#allocation7 + $0x538] sm:$0xff] }
  0xdc   :  { %1062 = vmatprep.subr.mxu1 %v506_v23  ;;  %994 = vmatpush2.msra.mxu0 %v490_v24  ;;  %v299_v21 = vld [vmem:[#allocation7 + $0x4b8] sm:$0xff]  ;;  %v302_v23 = vld [vmem:[#allocation7 + $0x4d0] sm:$0xff] }
  0xdd   :  { %1063 = vmatpush2.msra.mxu1 %v505_v25  ;;  %995 = vmatprep.subr.mxu0 %v478_v26  ;;  %v287_v22 = vld [vmem:[#allocation7 + $0x458] sm:$0xff]  ;;  %v286_v24 = vld [vmem:[#allocation7 + $0x450] sm:$0xff]  ;;  %v301_v25 = vld [vmem:[#allocation7 + $0x4c8] sm:$0xff] }
  0xde   :  { %1064 = vmatprep.subr.mxu1 %v493_v27  ;;  %996 = vmatpush2.msra.mxu0 %v477_v28  ;;  %v274_v26 = vld [vmem:[#allocation7 + $0x3f0] sm:$0xff]  ;;  %v289_v27 = vld [vmem:[#allocation7 + $0x468] sm:$0xff] }
  0xdf   :  { %1065 = vmatpush2.msra.mxu1 %v492_v29  ;;  %997 = vmatprep.subr.mxu0 %v465_v30  ;;  %v273_v28 = vld [vmem:[#allocation7 + $0x3e8] sm:$0xff]  ;;  %v288_v29 = vld [vmem:[#allocation7 + $0x460] sm:$0xff] }
  0xe0   :  { %1066 = vmatprep.subr.mxu1 %v480_v31  ;;  %998 = vmatpush2.msra.mxu0 %v464_v32  ;;  %v261_v30 = vld [vmem:[#allocation7 + $0x388] sm:$0xff]  ;;  %v276_v31 = vld [vmem:[#allocation7 + $0x400] sm:$0xff] }
  0xe1   :  { %1067 = vmatpush2.msra.mxu1 %v479_v33  ;;  %999 = vmatprep.subr.mxu0 %v452_v34  ;;  %v260_v32 = vld [vmem:[#allocation7 + $0x380] sm:$0xff]  ;;  %v275_v33 = vld [vmem:[#allocation7 + $0x3f8] sm:$0xff] }
  0xe2   :  { %1068 = vmatprep.subr.mxu1 %v467_v35  ;;  %1000 = vmatpush2.msra.mxu0 %v451_v36  ;;  %v248_v34 = vld [vmem:[#allocation7 + $0x320] sm:$0xff]  ;;  %v263_v35 = vld [vmem:[#allocation7 + $0x398] sm:$0xff] }
  0xe3   :  { %1069 = vmatpush2.msra.mxu1 %v466_v37  ;;  %1001 = vmatprep.subr.mxu0 %v439_v38  ;;  %v247_v36 = vld [vmem:[#allocation7 + $0x318] sm:$0xff]  ;;  %v262_v37 = vld [vmem:[#allocation7 + $0x390] sm:$0xff] }
  0xe4   :  { %1070 = vmatprep.subr.mxu1 %v454_v39  ;;  %1002 = vmatpush2.msra.mxu0 %v438_v40  ;;  %v235_v38 = vld [vmem:[#allocation7 + $0x2b8] sm:$0xff]  ;;  %v250_v39 = vld [vmem:[#allocation7 + $0x330] sm:$0xff] }
  0xe5   :  { %1071 = vmatpush2.msra.mxu1 %v453_v41  ;;  %1003 = vmatprep.subr.mxu0 %v426_v42  ;;  %v234_v40 = vld [vmem:[#allocation7 + $0x2b0] sm:$0xff]  ;;  %v249_v41 = vld [vmem:[#allocation7 + $0x328] sm:$0xff] }
  0xe6   :  { %1072 = vmatprep.subr.mxu1 %v441_v43  ;;  %1004 = vmatpush2.msra.mxu0 %v425_v44  ;;  %v222_v42 = vld [vmem:[#allocation7 + $0x250] sm:$0xff]  ;;  %v237_v43 = vld [vmem:[#allocation7 + $0x2c8] sm:$0xff] }
  0xe7   :  { %1073 = vmatpush2.msra.mxu1 %v440_v45  ;;  %1005 = vmatprep.subr.mxu0 %v413_v46  ;;  %v221_v44 = vld [vmem:[#allocation7 + $0x248] sm:$0xff]  ;;  %v236_v45 = vld [vmem:[#allocation7 + $0x2c0] sm:$0xff] }
  0xe8   :  { %1074 = vmatprep.subr.mxu1 %v428_v47  ;;  %1006 = vmatpush2.msra.mxu0 %v412_v48  ;;  %v209_v46 = vld [vmem:[#allocation7 + $0x1e8] sm:$0xff]  ;;  %v224_v47 = vld [vmem:[#allocation7 + $0x260] sm:$0xff] }
  0xe9   :  { %1075 = vmatpush2.msra.mxu1 %v427_v49  ;;  %1007 = vmatprep.subr.mxu0 %v400_v50  ;;  %v208_v48 = vld [vmem:[#allocation7 + $0x1e0] sm:$0xff]  ;;  %v223_v49 = vld [vmem:[#allocation7 + $0x258] sm:$0xff] }
  0xea   :  { %1076 = vmatprep.subr.mxu1 %v415_v51  ;;  %1008 = vmatpush2.msra.mxu0 %v399_v52  ;;  %v196_v50 = vld [vmem:[#allocation7 + $0x180] sm:$0xff]  ;;  %v211_v51 = vld [vmem:[#allocation7 + $0x1f8] sm:$0xff] }
  0xeb   :  { %1077 = vmatpush2.msra.mxu1 %v414_v53  ;;  %1009 = vmatprep.subr.mxu0 %v387_v54  ;;  %v195_v52 = vld [vmem:[#allocation7 + $0x178] sm:$0xff]  ;;  %v210_v53 = vld [vmem:[#allocation7 + $0x1f0] sm:$0xff] }
  0xec   :  { %1078 = vmatprep.subr.mxu1 %v402_v55  ;;  %1010 = vmatpush2.msra.mxu0 %v386_v56  ;;  %v183_v54 = vld [vmem:[#allocation7 + $0x118] sm:$0xff]  ;;  %v198_v55 = vld [vmem:[#allocation7 + $0x190] sm:$0xff] }
  0xed   :  { %1079 = vmatpush2.msra.mxu1 %v401_v57  ;;  %1011 = vmatprep.subr.mxu0 %v374_v58  ;;  %v182_v56 = vld [vmem:[#allocation7 + $0x110] sm:$0xff]  ;;  %v197_v57 = vld [vmem:[#allocation7 + $0x188] sm:$0xff] }
  0xee   :  { %1080 = vmatprep.subr.mxu1 %v389_v59  ;;  %1012 = vmatpush2.msra.mxu0 %v373_v61  ;;  %v170_v58 = vld [vmem:[#allocation7 + $0xb0] sm:$0xff]  ;;  %v185_v59 = vld [vmem:[#allocation7 + $0x128] sm:$0xff] }
  0xef   :  { %1081 = vmatpush2.msra.mxu1 %v388_v62  ;;  %1013 = vmatprep.subr.mxu0 %v361_v0  ;;  %v169_v61 = vld [vmem:[#allocation7 + $0xa8] sm:$0xff]  ;;  %v184_v62 = vld [vmem:[#allocation7 + $0x120] sm:$0xff] }
  0xf0   :  { %1082 = vmatprep.subr.mxu1 %v376_v1  ;;  %1014 = vmatpush2.msra.mxu0 %v360_v2  ;;  %v157_v0 = vld [vmem:[#allocation7 + $0x48] sm:$0xff]  ;;  %v172_v1 = vld [vmem:[#allocation7 + $0xc0] sm:$0xff] }
  0xf1   :  { %1015 = vmatprep.mubr.f32.mxu0 %v5045_v60  ;;  %1083 = vmatpush2.msra.mxu1 %v375_v3  ;;  %v156_v2 = vld [vmem:[#allocation7 + $0x40] sm:$0xff]  ;;  %v171_v3 = vld [vmem:[#allocation7 + $0xb8] sm:$0xff] }
  0xf2   :  { %1016 = vmatmul.mubr.f32.vlgmr.msra.gmra.mxu0 %v5047_v63  ;;  %1084 = vmatprep.subr.mxu1 %v363_v4  ;;  %v560_v4 = vld [vmem:[#allocation7 + $0xce0] sm:$0xff] }
  0xf3   :  { %1093 = vmatprep.subr.mxu0 %v352_v5  ;;  %1085 = vmatpush2.msra.mxu1 %v362_v6  ;;  %v159_v5 = vld [vmem:[#allocation7 + $0x58] sm:$0xff] }
  0xf4   :  { %1086 = vmatprep.mubr.f32.mxu1 %v5045_v60  ;;  %1094 = vmatpush1.msra.mxu0 %v351_v7  ;;  %v300_v60 = vld [vmem:[#allocation7 + $0x4c0] sm:$0xff]  ;;  %v559_v6 = vld [vmem:[#allocation7 + $0xcd8] sm:$0xff]  ;;  %v158_v7 = vld [vmem:[#allocation7 + $0x50] sm:$0xff] }
  0xf5   :  { %1087 = vmatmul.mubr.f32.vlgmr.msra.gmra.mxu1 %v5047_v63  ;;  %1095 = vmatprep.subr.mxu0 %v339_v8  ;;  %v314_v63 = vld [vmem:[#allocation7 + $0x530] sm:$0xff]  ;;  %v547_v8 = vld [vmem:[#allocation7 + $0xc78] sm:$0xff] }
  0xf6   :  { %1164 = vmatprep.subr.mxu1 %v354_v9  ;;  %1096 = vmatpush1.msra.mxu0 %v338_v10  ;;  %v562_v9 = vld [vmem:[#allocation7 + $0xcf0] sm:$0xff] }
  0xf7   :  { %1165 = vmatpush1.msra.mxu1 %v353_v11  ;;  %1097 = vmatprep.subr.mxu0 %v326_v12  ;;  %v546_v10 = vld [vmem:[#allocation7 + $0xc70] sm:$0xff]  ;;  %v561_v11 = vld [vmem:[#allocation7 + $0xce8] sm:$0xff] }
  0xf8   :  { %1166 = vmatprep.subr.mxu1 %v341_v13  ;;  %1098 = vmatpush1.msra.mxu0 %v325_v14  ;;  %v534_v12 = vld [vmem:[#allocation7 + $0xc10] sm:$0xff]  ;;  %v549_v13 = vld [vmem:[#allocation7 + $0xc88] sm:$0xff] }
  0xf9   :  { %1167 = vmatpush1.msra.mxu1 %v340_v15  ;;  %1099 = vmatprep.subr.mxu0 %v313_v16  ;;  %v533_v14 = vld [vmem:[#allocation7 + $0xc08] sm:$0xff]  ;;  %v548_v15 = vld [vmem:[#allocation7 + $0xc80] sm:$0xff] }
  0xfa   :  { %1168 = vmatprep.subr.mxu1 %v328_v17  ;;  %1100 = vmatpush1.msra.mxu0 %v312_v18  ;;  %v521_v16 = vld [vmem:[#allocation7 + $0xba8] sm:$0xff]  ;;  %v536_v17 = vld [vmem:[#allocation7 + $0xc20] sm:$0xff] }
  0xfb   :  { %1169 = vmatpush1.msra.mxu1 %v327_v19  ;;  %1101 = vmatprep.subr.mxu0 %v300_v60  ;;  %v520_v18 = vld [vmem:[#allocation7 + $0xba0] sm:$0xff]  ;;  %v535_v19 = vld [vmem:[#allocation7 + $0xc18] sm:$0xff] }
  0xfc   :  { %1170 = vmatprep.subr.mxu1 %v315_v20  ;;  %1102 = vmatpush1.msra.mxu0 %v299_v21  ;;  %v508_v60 = vld [vmem:[#allocation7 + $0xb40] sm:$0xff]  ;;  %v523_v20 = vld [vmem:[#allocation7 + $0xbb8] sm:$0xff] }
  0xfd   :  { %1171 = vmatpush1.msra.mxu1 %v314_v63  ;;  %1103 = vmatprep.subr.mxu0 %v287_v22  ;;  %v507_v21 = vld [vmem:[#allocation7 + $0xb38] sm:$0xff]  ;;  %v522_v63 = vld [vmem:[#allocation7 + $0xbb0] sm:$0xff] }
  0xfe   :  { %1172 = vmatprep.subr.mxu1 %v302_v23  ;;  %1104 = vmatpush1.msra.mxu0 %v286_v24  ;;  %v495_v22 = vld [vmem:[#allocation7 + $0xad8] sm:$0xff]  ;;  %v510_v23 = vld [vmem:[#allocation7 + $0xb50] sm:$0xff] }
  0xff   :  { %1173 = vmatpush1.msra.mxu1 %v301_v25  ;;  %1105 = vmatprep.subr.mxu0 %v274_v26  ;;  %v494_v24 = vld [vmem:[#allocation7 + $0xad0] sm:$0xff]  ;;  %v509_v25 = vld [vmem:[#allocation7 + $0xb48] sm:$0xff] }
 0x100   :  { %1174 = vmatprep.subr.mxu1 %v289_v27  ;;  %1106 = vmatpush1.msra.mxu0 %v273_v28  ;;  %v482_v26 = vld [vmem:[#allocation7 + $0xa70] sm:$0xff]  ;;  %v497_v27 = vld [vmem:[#allocation7 + $0xae8] sm:$0xff] }
 0x101   :  { %1175 = vmatpush1.msra.mxu1 %v288_v29  ;;  %1107 = vmatprep.subr.mxu0 %v261_v30  ;;  %v481_v28 = vld [vmem:[#allocation7 + $0xa68] sm:$0xff]  ;;  %v496_v29 = vld [vmem:[#allocation7 + $0xae0] sm:$0xff] }
 0x102   :  { %1176 = vmatprep.subr.mxu1 %v276_v31  ;;  %1108 = vmatpush1.msra.mxu0 %v260_v32  ;;  %v469_v30 = vld [vmem:[#allocation7 + $0xa08] sm:$0xff]  ;;  %v484_v31 = vld [vmem:[#allocation7 + $0xa80] sm:$0xff] }
 0x103   :  { %1177 = vmatpush1.msra.mxu1 %v275_v33  ;;  %1109 = vmatprep.subr.mxu0 %v248_v34  ;;  %v468_v32 = vld [vmem:[#allocation7 + $0xa00] sm:$0xff]  ;;  %v483_v33 = vld [vmem:[#allocation7 + $0xa78] sm:$0xff] }
 0x104   :  { %1178 = vmatprep.subr.mxu1 %v263_v35  ;;  %1110 = vmatpush1.msra.mxu0 %v247_v36  ;;  %v456_v34 = vld [vmem:[#allocation7 + $0x9a0] sm:$0xff]  ;;  %v471_v35 = vld [vmem:[#allocation7 + $0xa18] sm:$0xff] }
 0x105   :  { %1179 = vmatpush1.msra.mxu1 %v262_v37  ;;  %1111 = vmatprep.subr.mxu0 %v235_v38  ;;  %v455_v36 = vld [vmem:[#allocation7 + $0x998] sm:$0xff]  ;;  %v470_v37 = vld [vmem:[#allocation7 + $0xa10] sm:$0xff] }
 0x106   :  { %1180 = vmatprep.subr.mxu1 %v250_v39  ;;  %1112 = vmatpush1.msra.mxu0 %v234_v40  ;;  %v443_v38 = vld [vmem:[#allocation7 + $0x938] sm:$0xff]  ;;  %v458_v39 = vld [vmem:[#allocation7 + $0x9b0] sm:$0xff] }
 0x107   :  { %1181 = vmatpush1.msra.mxu1 %v249_v41  ;;  %1113 = vmatprep.subr.mxu0 %v222_v42  ;;  %v442_v40 = vld [vmem:[#allocation7 + $0x930] sm:$0xff]  ;;  %v457_v41 = vld [vmem:[#allocation7 + $0x9a8] sm:$0xff] }
 0x108   :  { %1182 = vmatprep.subr.mxu1 %v237_v43  ;;  %1114 = vmatpush1.msra.mxu0 %v221_v44  ;;  %v430_v42 = vld [vmem:[#allocation7 + $0x8d0] sm:$0xff]  ;;  %v445_v43 = vld [vmem:[#allocation7 + $0x948] sm:$0xff] }
 0x109   :  { %1183 = vmatpush1.msra.mxu1 %v236_v45  ;;  %1115 = vmatprep.subr.mxu0 %v209_v46  ;;  %v429_v44 = vld [vmem:[#allocation7 + $0x8c8] sm:$0xff]  ;;  %v444_v45 = vld [vmem:[#allocation7 + $0x940] sm:$0xff] }
 0x10a   :  { %1184 = vmatprep.subr.mxu1 %v224_v47  ;;  %1116 = vmatpush1.msra.mxu0 %v208_v48  ;;  %v417_v46 = vld [vmem:[#allocation7 + $0x868] sm:$0xff]  ;;  %v432_v47 = vld [vmem:[#allocation7 + $0x8e0] sm:$0xff] }
 0x10b   :  { %1185 = vmatpush1.msra.mxu1 %v223_v49  ;;  %1117 = vmatprep.subr.mxu0 %v196_v50  ;;  %v416_v48 = vld [vmem:[#allocation7 + $0x860] sm:$0xff]  ;;  %v431_v49 = vld [vmem:[#allocation7 + $0x8d8] sm:$0xff] }
 0x10c   :  { %1186 = vmatprep.subr.mxu1 %v211_v51  ;;  %1118 = vmatpush1.msra.mxu0 %v195_v52  ;;  %v404_v50 = vld [vmem:[#allocation7 + $0x800] sm:$0xff]  ;;  %v419_v51 = vld [vmem:[#allocation7 + $0x878] sm:$0xff] }
 0x10d   :  { %1187 = vmatpush1.msra.mxu1 %v210_v53  ;;  %1119 = vmatprep.subr.mxu0 %v183_v54  ;;  %v403_v52 = vld [vmem:[#allocation7 + $0x7f8] sm:$0xff]  ;;  %v418_v53 = vld [vmem:[#allocation7 + $0x870] sm:$0xff] }
 0x10e   :  { %1188 = vmatprep.subr.mxu1 %v198_v55  ;;  %1120 = vmatpush1.msra.mxu0 %v182_v56  ;;  %v391_v54 = vld [vmem:[#allocation7 + $0x798] sm:$0xff]  ;;  %v406_v55 = vld [vmem:[#allocation7 + $0x810] sm:$0xff] }
 0x10f   :  { %1189 = vmatpush1.msra.mxu1 %v197_v57  ;;  %1121 = vmatprep.subr.mxu0 %v170_v58  ;;  %v390_v56 = vld [vmem:[#allocation7 + $0x790] sm:$0xff]  ;;  %v405_v57 = vld [vmem:[#allocation7 + $0x808] sm:$0xff] }
 0x110   :  { %1190 = vmatprep.subr.mxu1 %v185_v59  ;;  %1122 = vmatpush1.msra.mxu0 %v169_v61  ;;  %v378_v58 = vld [vmem:[#allocation7 + $0x730] sm:$0xff]  ;;  %v393_v59 = vld [vmem:[#allocation7 + $0x7a8] sm:$0xff] }
 0x111   :  { %1191 = vmatpush1.msra.mxu1 %v184_v62  ;;  %1123 = vmatprep.subr.mxu0 %v157_v0  ;;  %v377_v61 = vld [vmem:[#allocation7 + $0x728] sm:$0xff]  ;;  %v392_v62 = vld [vmem:[#allocation7 + $0x7a0] sm:$0xff] }
 0x112   :  { %1192 = vmatprep.subr.mxu1 %v172_v1  ;;  %1124 = vmatpush1.msra.mxu0 %v156_v2  ;;  %v365_v0 = vld [vmem:[#allocation7 + $0x6c8] sm:$0xff]  ;;  %v380_v1 = vld [vmem:[#allocation7 + $0x740] sm:$0xff] }
 0x113   :  { %1193 = vmatpush1.msra.mxu1 %v171_v3  ;;  %1125 = vmatprep.subr.mxu0 %v560_v4  ;;  %v364_v2 = vld [vmem:[#allocation7 + $0x6c0] sm:$0xff]  ;;  %v379_v3 = vld [vmem:[#allocation7 + $0x738] sm:$0xff] }
 0x114   :  { %1194 = vmatprep.subr.mxu1 %v159_v5  ;;  %1126 = vmatpush2.msra.mxu0 %v559_v6  ;;  %v367_v4 = vld [vmem:[#allocation7 + $0x6d8] sm:$0xff]  ;;  %v366_v6 = vld [vmem:[#allocation7 + $0x6d0] sm:$0xff] }
 0x115   :  { %1195 = vmatpush1.msra.mxu1 %v158_v7  ;;  %1127 = vmatprep.subr.mxu0 %v547_v8  ;;  %v563_v5 = vld [vmem:[#allocation7 + $0xcf8] sm:$0xff]  ;;  %v4052_v7 = vld [vmem:[#allocation2 + $0x8] sm:$0xff] }
 0x116   :  { %1196 = vmatprep.subr.mxu1 %v562_v9  ;;  %1128 = vmatpush2.msra.mxu0 %v546_v10  ;;  %v355_v8 = vld [vmem:[#allocation7 + $0x678] sm:$0xff]  ;;  %v5057_v9 = vld [vmem:[#allocation2] sm:$0xff]  ;;  %v550_v10 = vld [vmem:[#allocation7 + $0xc90] sm:$0xff] }
 0x117   :  { %1197 = vmatpush2.msra.mxu1 %v561_v11  ;;  %1129 = vmatprep.subr.mxu0 %v534_v12  ;;  %v342_v11 = vld [vmem:[#allocation7 + $0x610] sm:$0xff]  ;;  %v537_v12 = vld [vmem:[#allocation7 + $0xc28] sm:$0xff] }
 0x118   :  { %1198 = vmatprep.subr.mxu1 %v549_v13  ;;  %1130 = vmatpush2.msra.mxu0 %v533_v14  ;;  %v595_v13 = vld [vmem:[#allocation8 + $0xf8] sm:$0xff]  ;;  %v329_v14 = vld [vmem:[#allocation7 + $0x5a8] sm:$0xff] }
 0x119   :  { %1199 = vmatpush2.msra.mxu1 %v548_v15  ;;  %1131 = vmatprep.subr.mxu0 %v521_v16  ;;  %v579_v15 = vld [vmem:[#allocation8 + $0x78] sm:$0xff]  ;;  %v524_v16 = vld [vmem:[#allocation7 + $0xbc0] sm:$0xff] }
 0x11a   :  { %1200 = vmatprep.subr.mxu1 %v536_v17  ;;  %1132 = vmatpush2.msra.mxu0 %v520_v18  ;;  %v594_v17 = vld [vmem:[#allocation8 + $0xf0] sm:$0xff]  ;;  %v316_v18 = vld [vmem:[#allocation7 + $0x540] sm:$0xff] }
 0x11b   :  { %1201 = vmatpush2.msra.mxu1 %v535_v19  ;;  %1133 = vmatprep.subr.mxu0 %v508_v60  ;;  %v578_v19 = vld [vmem:[#allocation8 + $0x70] sm:$0xff]  ;;  %v511_v60 = vld [vmem:[#allocation7 + $0xb58] sm:$0xff] }
 0x11c   :  { %1202 = vmatprep.subr.mxu1 %v523_v20  ;;  %1134 = vmatpush2.msra.mxu0 %v507_v21  ;;  %v593_v20 = vld [vmem:[#allocation8 + $0xe8] sm:$0xff]  ;;  %v303_v21 = vld [vmem:[#allocation7 + $0x4d8] sm:$0xff] }
 0x11d   :  { %1203 = vmatpush2.msra.mxu1 %v522_v63  ;;  %1135 = vmatprep.subr.mxu0 %v495_v22  ;;  %v577_v63 = vld [vmem:[#allocation8 + $0x68] sm:$0xff]  ;;  %v498_v22 = vld [vmem:[#allocation7 + $0xaf0] sm:$0xff] }
 0x11e   :  { %1204 = vmatprep.subr.mxu1 %v510_v23  ;;  %1136 = vmatpush2.msra.mxu0 %v494_v24  ;;  %v592_v23 = vld [vmem:[#allocation8 + $0xe0] sm:$0xff]  ;;  %v290_v24 = vld [vmem:[#allocation7 + $0x470] sm:$0xff] }
 0x11f   :  { %1205 = vmatpush2.msra.mxu1 %v509_v25  ;;  %1137 = vmatprep.subr.mxu0 %v482_v26  ;;  %v576_v25 = vld [vmem:[#allocation8 + $0x60] sm:$0xff]  ;;  %v485_v26 = vld [vmem:[#allocation7 + $0xa88] sm:$0xff] }
 0x120   :  { %1206 = vmatprep.subr.mxu1 %v497_v27  ;;  %1138 = vmatpush2.msra.mxu0 %v481_v28  ;;  %v591_v27 = vld [vmem:[#allocation8 + $0xd8] sm:$0xff]  ;;  %v277_v28 = vld [vmem:[#allocation7 + $0x408] sm:$0xff] }
 0x121   :  { %1207 = vmatpush2.msra.mxu1 %v496_v29  ;;  %1139 = vmatprep.subr.mxu0 %v469_v30  ;;  %v575_v29 = vld [vmem:[#allocation8 + $0x58] sm:$0xff]  ;;  %v472_v30 = vld [vmem:[#allocation7 + $0xa20] sm:$0xff] }
 0x122   :  { %1208 = vmatprep.subr.mxu1 %v484_v31  ;;  %1140 = vmatpush2.msra.mxu0 %v468_v32  ;;  %v590_v31 = vld [vmem:[#allocation8 + $0xd0] sm:$0xff]  ;;  %v264_v32 = vld [vmem:[#allocation7 + $0x3a0] sm:$0xff] }
 0x123   :  { %1209 = vmatpush2.msra.mxu1 %v483_v33  ;;  %1141 = vmatprep.subr.mxu0 %v456_v34  ;;  %v574_v33 = vld [vmem:[#allocation8 + $0x50] sm:$0xff]  ;;  %v459_v34 = vld [vmem:[#allocation7 + $0x9b8] sm:$0xff] }
 0x124   :  { %1210 = vmatprep.subr.mxu1 %v471_v35  ;;  %1142 = vmatpush2.msra.mxu0 %v455_v36  ;;  %v589_v35 = vld [vmem:[#allocation8 + $0xc8] sm:$0xff]  ;;  %v251_v36 = vld [vmem:[#allocation7 + $0x338] sm:$0xff] }
 0x125   :  { %1211 = vmatpush2.msra.mxu1 %v470_v37  ;;  %1143 = vmatprep.subr.mxu0 %v443_v38  ;;  %v573_v37 = vld [vmem:[#allocation8 + $0x48] sm:$0xff]  ;;  %v446_v38 = vld [vmem:[#allocation7 + $0x950] sm:$0xff] }
 0x126   :  { %1212 = vmatprep.subr.mxu1 %v458_v39  ;;  %1144 = vmatpush2.msra.mxu0 %v442_v40  ;;  %v588_v39 = vld [vmem:[#allocation8 + $0xc0] sm:$0xff]  ;;  %v238_v40 = vld [vmem:[#allocation7 + $0x2d0] sm:$0xff] }
 0x127   :  { %1213 = vmatpush2.msra.mxu1 %v457_v41  ;;  %1145 = vmatprep.subr.mxu0 %v430_v42  ;;  %v572_v41 = vld [vmem:[#allocation8 + $0x40] sm:$0xff]  ;;  %v433_v42 = vld [vmem:[#allocation7 + $0x8e8] sm:$0xff] }
 0x128   :  { %1214 = vmatprep.subr.mxu1 %v445_v43  ;;  %1146 = vmatpush2.msra.mxu0 %v429_v44  ;;  %v587_v43 = vld [vmem:[#allocation8 + $0xb8] sm:$0xff]  ;;  %v225_v44 = vld [vmem:[#allocation7 + $0x268] sm:$0xff] }
 0x129   :  { %1215 = vmatpush2.msra.mxu1 %v444_v45  ;;  %1147 = vmatprep.subr.mxu0 %v417_v46  ;;  %v571_v45 = vld [vmem:[#allocation8 + $0x38] sm:$0xff]  ;;  %v420_v46 = vld [vmem:[#allocation7 + $0x880] sm:$0xff] }
 0x12a   :  { %1216 = vmatprep.subr.mxu1 %v432_v47  ;;  %1148 = vmatpush2.msra.mxu0 %v416_v48  ;;  %v586_v47 = vld [vmem:[#allocation8 + $0xb0] sm:$0xff]  ;;  %v212_v48 = vld [vmem:[#allocation7 + $0x200] sm:$0xff] }
 0x12b   :  { %1217 = vmatpush2.msra.mxu1 %v431_v49  ;;  %1149 = vmatprep.subr.mxu0 %v404_v50  ;;  %v570_v49 = vld [vmem:[#allocation8 + $0x30] sm:$0xff]  ;;  %v407_v50 = vld [vmem:[#allocation7 + $0x818] sm:$0xff] }
 0x12c   :  { %1218 = vmatprep.subr.mxu1 %v419_v51  ;;  %1150 = vmatpush2.msra.mxu0 %v403_v52  ;;  %v585_v51 = vld [vmem:[#allocation8 + $0xa8] sm:$0xff]  ;;  %v199_v52 = vld [vmem:[#allocation7 + $0x198] sm:$0xff] }
 0x12d   :  { %1219 = vmatpush2.msra.mxu1 %v418_v53  ;;  %1151 = vmatprep.subr.mxu0 %v391_v54  ;;  %v569_v53 = vld [vmem:[#allocation8 + $0x28] sm:$0xff]  ;;  %v394_v54 = vld [vmem:[#allocation7 + $0x7b0] sm:$0xff] }
 0x12e   :  { %1220 = vmatprep.subr.mxu1 %v406_v55  ;;  %1152 = vmatpush2.msra.mxu0 %v390_v56  ;;  %v584_v55 = vld [vmem:[#allocation8 + $0xa0] sm:$0xff]  ;;  %v186_v56 = vld [vmem:[#allocation7 + $0x130] sm:$0xff] }
 0x12f   :  { %1221 = vmatpush2.msra.mxu1 %v405_v57  ;;  %1153 = vmatprep.subr.mxu0 %v378_v58  ;;  %v568_v57 = vld [vmem:[#allocation8 + $0x20] sm:$0xff]  ;;  %v381_v58 = vld [vmem:[#allocation7 + $0x748] sm:$0xff] }
 0x130   :  { %1222 = vmatprep.subr.mxu1 %v393_v59  ;;  %1154 = vmatpush2.msra.mxu0 %v377_v61  ;;  %v583_v59 = vld [vmem:[#allocation8 + $0x98] sm:$0xff]  ;;  %v173_v61 = vld [vmem:[#allocation7 + $0xc8] sm:$0xff] }
 0x131   :  { %1223 = vmatpush2.msra.mxu1 %v392_v62  ;;  %1155 = vmatprep.subr.mxu0 %v365_v0  ;;  %v567_v62 = vld [vmem:[#allocation8 + $0x18] sm:$0xff]  ;;  %v368_v0 = vld [vmem:[#allocation7 + $0x6e0] sm:$0xff] }
 0x132   :  { %1224 = vmatprep.subr.mxu1 %v380_v1  ;;  %1156 = vmatpush2.msra.mxu0 %v364_v2  ;;  %v582_v1 = vld [vmem:[#allocation8 + $0x90] sm:$0xff]  ;;  %v160_v2 = vld [vmem:[#allocation7 + $0x60] sm:$0xff] }
 0x133   :  { %1157 = vmatprep.mubr.f32.mxu0 %v4052_v7  ;;  %1225 = vmatpush2.msra.mxu1 %v379_v3  ;;  %v566_v3 = vld [vmem:[#allocation8 + $0x10] sm:$0xff] }
 0x134   :  { %1158 = vmatmul.mubr.f32.vlgmr.msra.gmra.mxu0 %v5057_v9  ;;  %1226 = vmatprep.subr.mxu1 %v367_v4  ;;  %v627_v4 = vld [vmem:[#allocation8 + $0x1f8] sm:$0xff] }
 0x135   :  { %3169 = vmatprep.subr.mxu0 %v563_v5  ;;  %1227 = vmatpush2.msra.mxu1 %v366_v6  ;;  %v611_v5 = vld [vmem:[#allocation8 + $0x178] sm:$0xff]  ;;  %v581_v6 = vld [vmem:[#allocation8 + $0x88] sm:$0xff] }
 0x136   :  { %1228 = vmatprep.mubr.f32.mxu1 %v4052_v7  ;;  %3170 = vmatpush3.msra.mxu0 %v355_v8  ;;  %v565_v8 = vld [vmem:[#allocation8 + $0x8] sm:$0xff] }
 0x137   :  { %1229 = vmatmul.mubr.f32.vlgmr.msra.gmra.mxu1 %v5057_v9  ;;  %3171 = vmatprep.subr.mxu0 %v550_v10  ;;  %v610_v10 = vld [vmem:[#allocation8 + $0x170] sm:$0xff] }
 0x138   :  { %3172 = vmatpush3.msra.mxu0 %v342_v11  ;;  %1299 = vmatprep.mubr.f32.mxu0 %v4052_v7  ;;  %v626_v7 = vld [vmem:[#allocation8 + $0x1f0] sm:$0xff]  ;;  %v580_v11 = vld [vmem:[#allocation8 + $0x80] sm:$0xff] }
 0x139   :  { %3173 = vmatprep.subr.mxu0 %v537_v12  ;;  %3204 = vmatprep.subr.mxu1 %v595_v13  ;;  %v625_v12 = vld [vmem:[#allocation8 + $0x1e8] sm:$0xff]  ;;  %v564_v13 = vld [vmem:[#allocation8] sm:$0xff] }
 0x13a   :  { %3174 = vmatpush3.msra.mxu0 %v329_v14  ;;  %3205 = vmatpush3.msra.mxu1 %v579_v15  ;;  %v609_v14 = vld [vmem:[#allocation8 + $0x168] sm:$0xff]  ;;  %v659_v15 = vld [vmem:[#allocation8 + $0x2f8] sm:$0xff] }
 0x13b   :  { %3175 = vmatprep.subr.mxu0 %v524_v16  ;;  %3206 = vmatprep.subr.mxu1 %v594_v17  ;;  %v624_v16 = vld [vmem:[#allocation8 + $0x1e0] sm:$0xff] }
 0x13c   :  { %3176 = vmatpush3.msra.mxu0 %v316_v18  ;;  %3207 = vmatpush3.msra.mxu1 %v578_v19  ;;  %v608_v17 = vld [vmem:[#allocation8 + $0x160] sm:$0xff]  ;;  %v623_v18 = vld [vmem:[#allocation8 + $0x1d8] sm:$0xff]  ;;  %v622_v19 = vld [vmem:[#allocation8 + $0x1d0] sm:$0xff] }
 0x13d   :  { %3177 = vmatprep.subr.mxu0 %v511_v60  ;;  %3208 = vmatprep.subr.mxu1 %v593_v20  ;;  %v606_v60 = vld [vmem:[#allocation8 + $0x150] sm:$0xff]  ;;  %v621_v20 = vld [vmem:[#allocation8 + $0x1c8] sm:$0xff] }
 0x13e   :  { %3178 = vmatpush3.msra.mxu0 %v303_v21  ;;  %3209 = vmatpush3.msra.mxu1 %v577_v63  ;;  %v605_v21 = vld [vmem:[#allocation8 + $0x148] sm:$0xff]  ;;  %v620_v63 = vld [vmem:[#allocation8 + $0x1c0] sm:$0xff] }
 0x13f   :  { %3179 = vmatprep.subr.mxu0 %v498_v22  ;;  %3210 = vmatprep.subr.mxu1 %v592_v23  ;;  %v604_v22 = vld [vmem:[#allocation8 + $0x140] sm:$0xff]  ;;  %v619_v23 = vld [vmem:[#allocation8 + $0x1b8] sm:$0xff] }
 0x140   :  { %3180 = vmatpush3.msra.mxu0 %v290_v24  ;;  %3211 = vmatpush3.msra.mxu1 %v576_v25  ;;  %v603_v24 = vld [vmem:[#allocation8 + $0x138] sm:$0xff]  ;;  %v618_v25 = vld [vmem:[#allocation8 + $0x1b0] sm:$0xff] }
 0x141   :  { %3181 = vmatprep.subr.mxu0 %v485_v26  ;;  %3212 = vmatprep.subr.mxu1 %v591_v27  ;;  %v602_v26 = vld [vmem:[#allocation8 + $0x130] sm:$0xff]  ;;  %v617_v27 = vld [vmem:[#allocation8 + $0x1a8] sm:$0xff] }
 0x142   :  { %3182 = vmatpush3.msra.mxu0 %v277_v28  ;;  %3213 = vmatpush3.msra.mxu1 %v575_v29  ;;  %v601_v28 = vld [vmem:[#allocation8 + $0x128] sm:$0xff]  ;;  %v616_v29 = vld [vmem:[#allocation8 + $0x1a0] sm:$0xff] }
 0x143   :  { %3183 = vmatprep.subr.mxu0 %v472_v30  ;;  %3214 = vmatprep.subr.mxu1 %v590_v31  ;;  %v600_v30 = vld [vmem:[#allocation8 + $0x120] sm:$0xff]  ;;  %v615_v31 = vld [vmem:[#allocation8 + $0x198] sm:$0xff] }
 0x144   :  { %3184 = vmatpush3.msra.mxu0 %v264_v32  ;;  %3215 = vmatpush3.msra.mxu1 %v574_v33  ;;  %v599_v32 = vld [vmem:[#allocation8 + $0x118] sm:$0xff]  ;;  %v614_v33 = vld [vmem:[#allocation8 + $0x190] sm:$0xff] }
 0x145   :  { %3185 = vmatprep.subr.mxu0 %v459_v34  ;;  %3216 = vmatprep.subr.mxu1 %v589_v35  ;;  %v598_v34 = vld [vmem:[#allocation8 + $0x110] sm:$0xff]  ;;  %v613_v35 = vld [vmem:[#allocation8 + $0x188] sm:$0xff] }
 0x146   :  { %3186 = vmatpush3.msra.mxu0 %v251_v36  ;;  %3217 = vmatpush3.msra.mxu1 %v573_v37  ;;  %v597_v36 = vld [vmem:[#allocation8 + $0x108] sm:$0xff] }
 0x147   :  { %3187 = vmatprep.subr.mxu0 %v446_v38  ;;  %3218 = vmatprep.subr.mxu1 %v588_v39  ;;  %v612_v38 = vld [vmem:[#allocation8 + $0x180] sm:$0xff] }
 0x148   :  { %3188 = vmatpush3.msra.mxu0 %v238_v40  ;;  %3219 = vmatpush3.msra.mxu1 %v572_v41  ;;  %v596_v39 = vld [vmem:[#allocation8 + $0x100] sm:$0xff]  ;;  %v691_v41 = vld [vmem:[#allocation8 + $0x3f8] sm:$0xff] }
 0x149   :  { %3189 = vmatprep.subr.mxu0 %v433_v42  ;;  %3220 = vmatprep.subr.mxu1 %v587_v43 }
 0x14a   :  { %3190 = vmatpush3.msra.mxu0 %v225_v44  ;;  %3221 = vmatpush3.msra.mxu1 %v571_v45  ;;  %v643_v45 = vld [vmem:[#allocation8 + $0x278] sm:$0xff] }
 0x14b   :  { %3191 = vmatprep.subr.mxu0 %v420_v46  ;;  %3222 = vmatprep.subr.mxu1 %v586_v47  ;;  %v658_v47 = vld [vmem:[#allocation8 + $0x2f0] sm:$0xff] }
 0x14c   :  { %3192 = vmatpush3.msra.mxu0 %v212_v48  ;;  %3223 = vmatpush3.msra.mxu1 %v570_v49  ;;  %v642_v49 = vld [vmem:[#allocation8 + $0x270] sm:$0xff] }
 0x14d   :  { %3193 = vmatprep.subr.mxu0 %v407_v50  ;;  %3224 = vmatprep.subr.mxu1 %v585_v51  ;;  %v675_v51 = vld [vmem:[#allocation8 + $0x378] sm:$0xff] }
 0x14e   :  { %3194 = vmatpush3.msra.mxu0 %v199_v52  ;;  %3225 = vmatpush3.msra.mxu1 %v569_v53  ;;  %v657_v52 = vld [vmem:[#allocation8 + $0x2e8] sm:$0xff]  ;;  %v690_v53 = vld [vmem:[#allocation8 + $0x3f0] sm:$0xff] }
 0x14f   :  { %3195 = vmatprep.subr.mxu0 %v394_v54  ;;  %3226 = vmatprep.subr.mxu1 %v584_v55  ;;  %v641_v54 = vld [vmem:[#allocation8 + $0x268] sm:$0xff]  ;;  %v674_v55 = vld [vmem:[#allocation8 + $0x370] sm:$0xff] }
 0x150   :  { %3196 = vmatpush3.msra.mxu0 %v186_v56  ;;  %3227 = vmatpush3.msra.mxu1 %v568_v57  ;;  %v656_v56 = vld [vmem:[#allocation8 + $0x2e0] sm:$0xff]  ;;  %v689_v57 = vld [vmem:[#allocation8 + $0x3e8] sm:$0xff] }
 0x151   :  { %3197 = vmatprep.subr.mxu0 %v381_v58  ;;  %3228 = vmatprep.subr.mxu1 %v583_v59  ;;  %v640_v58 = vld [vmem:[#allocation8 + $0x260] sm:$0xff]  ;;  %v673_v59 = vld [vmem:[#allocation8 + $0x368] sm:$0xff] }
 0x152   :  { %3198 = vmatpush3.msra.mxu0 %v173_v61  ;;  %3229 = vmatpush3.msra.mxu1 %v567_v62  ;;  %v655_v61 = vld [vmem:[#allocation8 + $0x2d8] sm:$0xff]  ;;  %v688_v62 = vld [vmem:[#allocation8 + $0x3e0] sm:$0xff] }
 0x153   :  { %3199 = vmatprep.subr.mxu0 %v368_v0  ;;  %3230 = vmatprep.subr.mxu1 %v582_v1  ;;  %v639_v0 = vld [vmem:[#allocation8 + $0x258] sm:$0xff]  ;;  %v672_v1 = vld [vmem:[#allocation8 + $0x360] sm:$0xff] }
 0x154   :  { %3200 = vmatpush3.msra.mxu0 %v160_v2  ;;  %3231 = vmatpush3.msra.mxu1 %v566_v3  ;;  %v654_v2 = vld [vmem:[#allocation8 + $0x2d0] sm:$0xff]  ;;  %v687_v3 = vld [vmem:[#allocation8 + $0x3d8] sm:$0xff] }
 0x155   :  { %1300 = vmatmul.mubr.f32.vlgmr.msra.gmra.mxu0 %v5057_v9  ;;  %3239 = vmatprep.subr.mxu0 %v627_v4  ;;  %v607_v9 = vld [vmem:[#allocation8 + $0x158] sm:$0xff]  ;;  %v638_v4 = vld [vmem:[#allocation8 + $0x250] sm:$0xff] }
 0x156   :  { %3240 = vmatpush3.msra.mxu0 %v611_v5  ;;  %3232 = vmatprep.subr.mxu1 %v581_v6  ;;  %v671_v5 = vld [vmem:[#allocation8 + $0x358] sm:$0xff]  ;;  %v653_v6 = vld [vmem:[#allocation8 + $0x2c8] sm:$0xff] }
 0x157   :  { %3241 = vmatprep.subr.mxu0 %v626_v7  ;;  %3233 = vmatpush3.msra.mxu1 %v565_v8  ;;  %v686_v7 = vld [vmem:[#allocation8 + $0x3d0] sm:$0xff]  ;;  %v637_v8 = vld [vmem:[#allocation8 + $0x248] sm:$0xff] }
 0x158   :  { %3242 = vmatpush3.msra.mxu0 %v610_v10  ;;  %3234 = vmatprep.subr.mxu1 %v580_v11  ;;  %v670_v10 = vld [vmem:[#allocation8 + $0x350] sm:$0xff]  ;;  %v652_v11 = vld [vmem:[#allocation8 + $0x2c0] sm:$0xff] }
 0x159   :  { %3243 = vmatprep.subr.mxu0 %v625_v12  ;;  %3235 = vmatpush3.msra.mxu1 %v564_v13  ;;  %v685_v12 = vld [vmem:[#allocation8 + $0x3c8] sm:$0xff]  ;;  %v636_v13 = vld [vmem:[#allocation8 + $0x240] sm:$0xff] }
 0x15a   :  { %3244 = vmatpush3.msra.mxu0 %v609_v14  ;;  %3274 = vmatprep.subr.mxu1 %v659_v15  ;;  %v669_v14 = vld [vmem:[#allocation8 + $0x348] sm:$0xff]  ;;  %v651_v15 = vld [vmem:[#allocation8 + $0x2b8] sm:$0xff] }
 0x15b   :  { %3245 = vmatprep.subr.mxu0 %v624_v16  ;;  %v684_v16 = vld [vmem:[#allocation8 + $0x3c0] sm:$0xff] }
 0x15c   :  { %3246 = vmatpush3.msra.mxu0 %v608_v17  ;;  %v635_v17 = vld [vmem:[#allocation8 + $0x238] sm:$0xff] }
 0x15d   :  { %3247 = vmatprep.subr.mxu0 %v623_v18  ;;  %v668_v18 = vld [vmem:[#allocation8 + $0x340] sm:$0xff] }
 0x15e   :  { %3248 = vmatpush3.msra.mxu0 %v607_v9  ;;  %v650_v9 = vld [vmem:[#allocation8 + $0x2b0] sm:$0xff] }
 0x15f   :  { %3249 = vmatprep.subr.mxu0 %v622_v19  ;;  %v683_v19 = vld [vmem:[#allocation8 + $0x3b8] sm:$0xff] }
 0x160   :  { %3250 = vmatpush3.msra.mxu0 %v606_v60  ;;  %v634_v60 = vld [vmem:[#allocation8 + $0x230] sm:$0xff] }
 0x161   :  { %3251 = vmatprep.subr.mxu0 %v621_v20  ;;  %v667_v20 = vld [vmem:[#allocation8 + $0x338] sm:$0xff] }
 0x162   :  { %3252 = vmatpush3.msra.mxu0 %v605_v21  ;;  %v649_v21 = vld [vmem:[#allocation8 + $0x2a8] sm:$0xff] }
 0x163   :  { %3253 = vmatprep.subr.mxu0 %v620_v63  ;;  %v682_v63 = vld [vmem:[#allocation8 + $0x3b0] sm:$0xff] }
 0x164   :  { %3254 = vmatpush3.msra.mxu0 %v604_v22  ;;  %v633_v22 = vld [vmem:[#allocation8 + $0x228] sm:$0xff] }
 0x165   :  { %3255 = vmatprep.subr.mxu0 %v619_v23  ;;  %v666_v23 = vld [vmem:[#allocation8 + $0x330] sm:$0xff] }
 0x166   :  { %3256 = vmatpush3.msra.mxu0 %v603_v24  ;;  %v648_v24 = vld [vmem:[#allocation8 + $0x2a0] sm:$0xff] }
 0x167   :  { %3257 = vmatprep.subr.mxu0 %v618_v25  ;;  %v681_v25 = vld [vmem:[#allocation8 + $0x3a8] sm:$0xff] }
 0x168   :  { %3258 = vmatpush3.msra.mxu0 %v602_v26  ;;  %v632_v26 = vld [vmem:[#allocation8 + $0x220] sm:$0xff] }
 0x169   :  { %3259 = vmatprep.subr.mxu0 %v617_v27  ;;  %v665_v27 = vld [vmem:[#allocation8 + $0x328] sm:$0xff] }
 0x16a   :  { %3260 = vmatpush3.msra.mxu0 %v601_v28  ;;  %v647_v28 = vld [vmem:[#allocation8 + $0x298] sm:$0xff] }
 0x16b   :  { %3261 = vmatprep.subr.mxu0 %v616_v29  ;;  %v680_v29 = vld [vmem:[#allocation8 + $0x3a0] sm:$0xff] }
 0x16c   :  { %3262 = vmatpush3.msra.mxu0 %v600_v30  ;;  %v631_v30 = vld [vmem:[#allocation8 + $0x218] sm:$0xff] }
 0x16d   :  { %3263 = vmatprep.subr.mxu0 %v615_v31  ;;  %v664_v31 = vld [vmem:[#allocation8 + $0x320] sm:$0xff] }
 0x16e   :  { %3264 = vmatpush3.msra.mxu0 %v599_v32  ;;  %v646_v32 = vld [vmem:[#allocation8 + $0x290] sm:$0xff] }
 0x16f   :  { %3265 = vmatprep.subr.mxu0 %v614_v33  ;;  %v679_v33 = vld [vmem:[#allocation8 + $0x398] sm:$0xff] }
 0x170   :  { %v875_v37 = vpop.f32.mrf.mxu0  ;;  %3266 = vmatpush3.msra.mxu0 %v598_v34  ;;  %v630_v34 = vld [vmem:[#allocation8 + $0x210] sm:$0xff] }
 0x171   :  { %3267 = vmatprep.subr.mxu0 %v613_v35  ;;  %v663_v35 = vld [vmem:[#allocation8 + $0x318] sm:$0xff] }
 0x172   :  { %v877_v40 = vpop.f32.mrf.mxu0  ;;  %3268 = vmatpush3.msra.mxu0 %v597_v36  ;;  %v645_v36 = vld [vmem:[#allocation8 + $0x288] sm:$0xff] }
 0x173   :  { %3988 = vtanh.f32 %v877_v40  ;;  %v946_v42 = vpop.f32.mrf.mxu1  ;;  %3269 = vmatprep.subr.mxu0 %v612_v38  ;;  %v629_v38 = vld [vmem:[#allocation8 + $0x208] sm:$0xff]  ;;  %v644_v40 = vld [vmem:[#allocation8 + $0x280] sm:$0xff] }
 0x174   :  { %3990 = vtanh.f32 %v875_v37  ;;  %3270 = vmatpush3.msra.mxu0 %v596_v39  ;;  %v678_v37 = vld [vmem:[#allocation8 + $0x390] sm:$0xff] }
 0x175   :  { %3992 = vtanh.f32 %v946_v42  ;;  %v948_v43 = vpop.f32.mrf.mxu1  ;;  %3309 = vmatprep.subr.mxu0 %v691_v41  ;;  %v662_v39 = vld [vmem:[#allocation8 + $0x310] sm:$0xff]  ;;  %v677_v41 = vld [vmem:[#allocation8 + $0x388] sm:$0xff]  ;;  %v628_v42 = vld [vmem:[#allocation8 + $0x200] sm:$0xff] }
 0x176   :  { %3994 = vtanh.f32 %v948_v43  ;;  %v661_v43 = vld [vmem:[#allocation8 + $0x308] sm:$0xff] }
 0x180   :  { %v3989_v44 = vpop.eup %3988 }
 0x181   :  { %v3991_v46 = vpop.eup %3990  ;;  %1388 = vmatprep.mubr.f32.mxu1 %v3989_v44  ;;  %v723_v44 = vld [vmem:[#allocation8 + $0x4f8] sm:$0xff] }
 0x182   :  { %v3993_v48 = vpop.eup %3992  ;;  %1389 = vmatmul.mubr.f32.vlgmr.msra.gmra.mxu1 %v3991_v46  ;;  %v660_v46 = vld [vmem:[#allocation8 + $0x300] sm:$0xff] }
 0x183   :  { %v3995_v50 = vpop.eup %3994  ;;  %3275 = vmatpush3.msra.mxu1 %v643_v45  ;;  %v676_v45 = vld [vmem:[#allocation8 + $0x380] sm:$0xff] }
 0x184   :  { %1458 = vmatprep.mubr.f32.mxu0 %v3995_v50  ;;  %3276 = vmatprep.subr.mxu1 %v658_v47  ;;  %v755_v47 = vld [vmem:[#allocation8 + $0x5f8] sm:$0xff] }
 0x185   :  { %1459 = vmatmul.mubr.f32.vlgmr.msra.gmra.mxu0 %v3993_v48  ;;  %3277 = vmatpush3.msra.mxu1 %v642_v49 }
 0x186   :  { %3310 = vmatpush3.msra.mxu0 %v675_v51  ;;  %3278 = vmatprep.subr.mxu1 %v657_v52 }
 0x187   :  { %3311 = vmatprep.subr.mxu0 %v690_v53  ;;  %3279 = vmatpush3.msra.mxu1 %v641_v54  ;;  %v707_v53 = vld [vmem:[#allocation8 + $0x478] sm:$0xff] }
 0x188   :  { %3312 = vmatpush3.msra.mxu0 %v674_v55  ;;  %3280 = vmatprep.subr.mxu1 %v656_v56  ;;  %v722_v55 = vld [vmem:[#allocation8 + $0x4f0] sm:$0xff] }
 0x189   :  { %3313 = vmatprep.subr.mxu0 %v689_v57  ;;  %3281 = vmatpush3.msra.mxu1 %v640_v58  ;;  %v706_v57 = vld [vmem:[#allocation8 + $0x470] sm:$0xff] }
 0x18a   :  { %3314 = vmatpush3.msra.mxu0 %v673_v59  ;;  %3282 = vmatprep.subr.mxu1 %v655_v61  ;;  %v739_v59 = vld [vmem:[#allocation8 + $0x578] sm:$0xff]  ;;  %v721_v61 = vld [vmem:[#allocation8 + $0x4e8] sm:$0xff] }
 0x18b   :  { %3315 = vmatprep.subr.mxu0 %v688_v62  ;;  %3283 = vmatpush3.msra.mxu1 %v639_v0  ;;  %v754_v62 = vld [vmem:[#allocation8 + $0x5f0] sm:$0xff]  ;;  %v705_v0 = vld [vmem:[#allocation8 + $0x468] sm:$0xff] }
 0x18c   :  { %3316 = vmatpush3.msra.mxu0 %v672_v1  ;;  %3284 = vmatprep.subr.mxu1 %v654_v2  ;;  %v738_v1 = vld [vmem:[#allocation8 + $0x570] sm:$0xff]  ;;  %v720_v2 = vld [vmem:[#allocation8 + $0x4e0] sm:$0xff] }
 0x18d   :  { %3317 = vmatprep.subr.mxu0 %v687_v3  ;;  %3285 = vmatpush3.msra.mxu1 %v638_v4  ;;  %v753_v3 = vld [vmem:[#allocation8 + $0x5e8] sm:$0xff]  ;;  %v704_v4 = vld [vmem:[#allocation8 + $0x460] sm:$0xff] }
 0x18e   :  { %3318 = vmatpush3.msra.mxu0 %v671_v5  ;;  %3286 = vmatprep.subr.mxu1 %v653_v6  ;;  %v737_v5 = vld [vmem:[#allocation8 + $0x568] sm:$0xff]  ;;  %v719_v6 = vld [vmem:[#allocation8 + $0x4d8] sm:$0xff] }
 0x18f   :  { %3319 = vmatprep.subr.mxu0 %v686_v7  ;;  %3287 = vmatpush3.msra.mxu1 %v637_v8  ;;  %v752_v7 = vld [vmem:[#allocation8 + $0x5e0] sm:$0xff]  ;;  %v703_v8 = vld [vmem:[#allocation8 + $0x458] sm:$0xff] }
 0x190   :  { %3320 = vmatpush3.msra.mxu0 %v670_v10  ;;  %3288 = vmatprep.subr.mxu1 %v652_v11  ;;  %v736_v10 = vld [vmem:[#allocation8 + $0x560] sm:$0xff]  ;;  %v718_v11 = vld [vmem:[#allocation8 + $0x4d0] sm:$0xff] }
 0x191   :  { %3321 = vmatprep.subr.mxu0 %v685_v12  ;;  %3289 = vmatpush3.msra.mxu1 %v636_v13  ;;  %v751_v12 = vld [vmem:[#allocation8 + $0x5d8] sm:$0xff]  ;;  %v702_v13 = vld [vmem:[#allocation8 + $0x450] sm:$0xff] }
 0x192   :  { %3322 = vmatpush3.msra.mxu0 %v669_v14  ;;  %3290 = vmatprep.subr.mxu1 %v651_v15  ;;  %v735_v14 = vld [vmem:[#allocation8 + $0x558] sm:$0xff]  ;;  %v717_v15 = vld [vmem:[#allocation8 + $0x4c8] sm:$0xff] }
 0x193   :  { %3323 = vmatprep.subr.mxu0 %v684_v16  ;;  %3291 = vmatpush3.msra.mxu1 %v635_v17  ;;  %v750_v16 = vld [vmem:[#allocation8 + $0x5d0] sm:$0xff]  ;;  %v701_v17 = vld [vmem:[#allocation8 + $0x448] sm:$0xff] }
 0x194   :  { %3324 = vmatpush3.msra.mxu0 %v668_v18  ;;  %3292 = vmatprep.subr.mxu1 %v650_v9  ;;  %v734_v18 = vld [vmem:[#allocation8 + $0x550] sm:$0xff]  ;;  %v716_v9 = vld [vmem:[#allocation8 + $0x4c0] sm:$0xff] }
 0x195   :  { %3325 = vmatprep.subr.mxu0 %v683_v19  ;;  %3293 = vmatpush3.msra.mxu1 %v634_v60  ;;  %v749_v19 = vld [vmem:[#allocation8 + $0x5c8] sm:$0xff]  ;;  %v700_v60 = vld [vmem:[#allocation8 + $0x440] sm:$0xff] }
 0x196   :  { %3326 = vmatpush3.msra.mxu0 %v667_v20  ;;  %3294 = vmatprep.subr.mxu1 %v649_v21  ;;  %v733_v20 = vld [vmem:[#allocation8 + $0x548] sm:$0xff]  ;;  %v715_v21 = vld [vmem:[#allocation8 + $0x4b8] sm:$0xff] }
 0x197   :  { %3327 = vmatprep.subr.mxu0 %v682_v63  ;;  %3295 = vmatpush3.msra.mxu1 %v633_v22  ;;  %v748_v63 = vld [vmem:[#allocation8 + $0x5c0] sm:$0xff]  ;;  %v699_v22 = vld [vmem:[#allocation8 + $0x438] sm:$0xff] }
 0x198   :  { %3328 = vmatpush3.msra.mxu0 %v666_v23  ;;  %3296 = vmatprep.subr.mxu1 %v648_v24  ;;  %v732_v23 = vld [vmem:[#allocation8 + $0x540] sm:$0xff]  ;;  %v714_v24 = vld [vmem:[#allocation8 + $0x4b0] sm:$0xff] }
 0x199   :  { %3329 = vmatprep.subr.mxu0 %v681_v25  ;;  %3297 = vmatpush3.msra.mxu1 %v632_v26  ;;  %v747_v25 = vld [vmem:[#allocation8 + $0x5b8] sm:$0xff]  ;;  %v698_v26 = vld [vmem:[#allocation8 + $0x430] sm:$0xff] }
 0x19a   :  { %3330 = vmatpush3.msra.mxu0 %v665_v27  ;;  %3298 = vmatprep.subr.mxu1 %v647_v28  ;;  %v731_v27 = vld [vmem:[#allocation8 + $0x538] sm:$0xff]  ;;  %v713_v28 = vld [vmem:[#allocation8 + $0x4a8] sm:$0xff] }
 0x19b   :  { %3331 = vmatprep.subr.mxu0 %v680_v29  ;;  %3299 = vmatpush3.msra.mxu1 %v631_v30  ;;  %v746_v29 = vld [vmem:[#allocation8 + $0x5b0] sm:$0xff]  ;;  %v697_v30 = vld [vmem:[#allocation8 + $0x428] sm:$0xff] }
 0x19c   :  { %3332 = vmatpush3.msra.mxu0 %v664_v31  ;;  %3300 = vmatprep.subr.mxu1 %v646_v32  ;;  %v730_v31 = vld [vmem:[#allocation8 + $0x530] sm:$0xff]  ;;  %v712_v32 = vld [vmem:[#allocation8 + $0x4a0] sm:$0xff] }
 0x19d   :  { %3333 = vmatprep.subr.mxu0 %v679_v33  ;;  %3301 = vmatpush3.msra.mxu1 %v630_v34  ;;  %v745_v33 = vld [vmem:[#allocation8 + $0x5a8] sm:$0xff]  ;;  %v696_v34 = vld [vmem:[#allocation8 + $0x420] sm:$0xff] }
 0x19e   :  { %3334 = vmatpush3.msra.mxu0 %v663_v35  ;;  %3302 = vmatprep.subr.mxu1 %v645_v36  ;;  %v729_v35 = vld [vmem:[#allocation8 + $0x528] sm:$0xff]  ;;  %v711_v36 = vld [vmem:[#allocation8 + $0x498] sm:$0xff] }
 0x19f   :  { %3335 = vmatprep.subr.mxu0 %v678_v37  ;;  %3303 = vmatpush3.msra.mxu1 %v629_v38  ;;  %v744_v37 = vld [vmem:[#allocation8 + $0x5a0] sm:$0xff]  ;;  %v695_v38 = vld [vmem:[#allocation8 + $0x418] sm:$0xff] }
 0x1a0   :  { %3336 = vmatpush3.msra.mxu0 %v662_v39  ;;  %3304 = vmatprep.subr.mxu1 %v644_v40  ;;  %v728_v39 = vld [vmem:[#allocation8 + $0x520] sm:$0xff]  ;;  %v710_v40 = vld [vmem:[#allocation8 + $0x490] sm:$0xff] }
 0x1a1   :  { %3337 = vmatprep.subr.mxu0 %v677_v41  ;;  %3305 = vmatpush3.msra.mxu1 %v628_v42  ;;  %v743_v41 = vld [vmem:[#allocation8 + $0x598] sm:$0xff]  ;;  %v694_v42 = vld [vmem:[#allocation8 + $0x410] sm:$0xff] }
 0x1a2   :  { %3338 = vmatpush3.msra.mxu0 %v661_v43  ;;  %3344 = vmatprep.subr.mxu1 %v723_v44  ;;  %v727_v43 = vld [vmem:[#allocation8 + $0x518] sm:$0xff]  ;;  %v709_v44 = vld [vmem:[#allocation8 + $0x488] sm:$0xff] }
 0x1a3   :  { %3339 = vmatprep.subr.mxu0 %v676_v45  ;;  %v742_v45 = vld [vmem:[#allocation8 + $0x590] sm:$0xff] }
 0x1a4   :  { %3340 = vmatpush3.msra.mxu0 %v660_v46  ;;  %v693_v46 = vld [vmem:[#allocation8 + $0x408] sm:$0xff] }
 0x1a5   :  { %3379 = vmatprep.subr.mxu0 %v755_v47  ;;  %v726_v47 = vld [vmem:[#allocation8 + $0x510] sm:$0xff] }
 0x1b2   :  { %v1017_v48 = vpop.f32.mrf.mxu0 }
 0x1b4   :  { %v1019_v49 = vpop.f32.mrf.mxu0 }
 0x1b5   :  { %3996 = vtanh.f32 %v1019_v49  ;;  %v1088_v50 = vpop.f32.mrf.mxu1  ;;  %v741_v49 = vld [vmem:[#allocation8 + $0x588] sm:$0xff] }
 0x1b6   :  { %3998 = vtanh.f32 %v1017_v48  ;;  %v708_v48 = vld [vmem:[#allocation8 + $0x480] sm:$0xff] }
 0x1b7   :  { %4000 = vtanh.f32 %v1088_v50  ;;  %v1090_v51 = vpop.f32.mrf.mxu1  ;;  %v692_v50 = vld [vmem:[#allocation8 + $0x400] sm:$0xff] }
 0x1b8   :  { %4002 = vtanh.f32 %v1090_v51  ;;  %v725_v51 = vld [vmem:[#allocation8 + $0x508] sm:$0xff] }
 0x1c2   :  { %v3997_v52 = vpop.eup %3996 }
 0x1c3   :  { %v3999_v54 = vpop.eup %3998  ;;  %1528 = vmatprep.mubr.f32.mxu1 %v3997_v52  ;;  %v740_v52 = vld [vmem:[#allocation8 + $0x580] sm:$0xff] }
 0x1c4   :  { %v4001_v56 = vpop.eup %4000  ;;  %1529 = vmatmul.mubr.f32.vlgmr.msra.gmra.mxu1 %v3999_v54  ;;  %v4959_v54 = vmov 0.0  }
 0x1c5   :  { %v4003_v58 = vpop.eup %4002  ;;  %3345 = vmatpush3.msra.mxu1 %v707_v53  ;;  %v724_v53 = vld [vmem:[#allocation8 + $0x500] sm:$0xff] }
 0x1c6   :  { %1598 = vmatprep.mubr.f32.mxu0 %v4003_v58  ;;  %3346 = vmatprep.subr.mxu1 %v722_v55 }
 0x1c7   :  { %1599 = vmatmul.mubr.f32.vlgmr.msra.gmra.mxu0 %v4001_v56  ;;  %3347 = vmatpush3.msra.mxu1 %v706_v57 }
 0x1c8   :  { %3380 = vmatpush3.msra.mxu0 %v739_v59  ;;  %3348 = vmatprep.subr.mxu1 %v721_v61  ;;  %v771_v61 = vld [vmem:[#allocation8 + $0x678] sm:$0xff] }
 0x1c9   :  { %3381 = vmatprep.subr.mxu0 %v754_v62  ;;  %3349 = vmatpush3.msra.mxu1 %v705_v0 }
 0x1ca   :  { %3382 = vmatpush3.msra.mxu0 %v738_v1  ;;  %3350 = vmatprep.subr.mxu1 %v720_v2  ;;  %v770_v1 = vld [vmem:[#allocation8 + $0x670] sm:$0xff] }
 0x1cb   :  { %3383 = vmatprep.subr.mxu0 %v753_v3  ;;  %3351 = vmatpush3.msra.mxu1 %v704_v4  ;;  %v769_v3 = vld [vmem:[#allocation8 + $0x668] sm:$0xff]  ;;  %v768_v4 = vld [vmem:[#allocation8 + $0x660] sm:$0xff] }
 0x1cc   :  { %3384 = vmatpush3.msra.mxu0 %v737_v5  ;;  %3352 = vmatprep.subr.mxu1 %v719_v6  ;;  %v767_v5 = vld [vmem:[#allocation8 + $0x658] sm:$0xff]  ;;  %v766_v6 = vld [vmem:[#allocation8 + $0x650] sm:$0xff] }
 0x1cd   :  { %3385 = vmatprep.subr.mxu0 %v752_v7  ;;  %3353 = vmatpush3.msra.mxu1 %v703_v8  ;;  %v765_v7 = vld [vmem:[#allocation8 + $0x648] sm:$0xff]  ;;  %v764_v8 = vld [vmem:[#allocation8 + $0x640] sm:$0xff] }
 0x1ce   :  { %3386 = vmatpush3.msra.mxu0 %v736_v10  ;;  %3354 = vmatprep.subr.mxu1 %v718_v11  ;;  %v763_v10 = vld [vmem:[#allocation8 + $0x638] sm:$0xff] }
 0x1cf   :  { %3387 = vmatprep.subr.mxu0 %v751_v12  ;;  %3355 = vmatpush3.msra.mxu1 %v702_v13  ;;  %v762_v12 = vld [vmem:[#allocation8 + $0x630] sm:$0xff] }
 0x1d0   :  { %3388 = vmatpush3.msra.mxu0 %v735_v14  ;;  %3356 = vmatprep.subr.mxu1 %v717_v15  ;;  %v761_v15 = vld [vmem:[#allocation8 + $0x628] sm:$0xff] }
 0x1d1   :  { %3389 = vmatprep.subr.mxu0 %v750_v16  ;;  %3357 = vmatpush3.msra.mxu1 %v701_v17  ;;  %v760_v16 = vld [vmem:[#allocation8 + $0x620] sm:$0xff]  ;;  %v759_v17 = vld [vmem:[#allocation8 + $0x618] sm:$0xff] }
 0x1d2   :  { %3390 = vmatpush3.msra.mxu0 %v734_v18  ;;  %3358 = vmatprep.subr.mxu1 %v716_v9  ;;  %v758_v18 = vld [vmem:[#allocation8 + $0x610] sm:$0xff]  ;;  %v757_v9 = vld [vmem:[#allocation8 + $0x608] sm:$0xff] }
 0x1d3   :  { %3391 = vmatprep.subr.mxu0 %v749_v19  ;;  %3359 = vmatpush3.msra.mxu1 %v700_v60  ;;  %v756_v19 = vld [vmem:[#allocation8 + $0x600] sm:$0xff] }
 0x1d4   :  { %3392 = vmatpush3.msra.mxu0 %v733_v20  ;;  %3360 = vmatprep.subr.mxu1 %v715_v21  ;;  %v788_v20 = vld [vmem:[#allocation11 + $0x78] sm:$0xff]  ;;  %v787_v21 = vld [vmem:[#allocation11 + $0x70] sm:$0xff] }
 0x1d5   :  { %3393 = vmatprep.subr.mxu0 %v748_v63  ;;  %3361 = vmatpush3.msra.mxu1 %v699_v22  ;;  %v786_v63 = vld [vmem:[#allocation11 + $0x68] sm:$0xff]  ;;  %v785_v22 = vld [vmem:[#allocation11 + $0x60] sm:$0xff] }
 0x1d6   :  { %3394 = vmatpush3.msra.mxu0 %v732_v23  ;;  %3362 = vmatprep.subr.mxu1 %v714_v24  ;;  %v784_v23 = vld [vmem:[#allocation11 + $0x58] sm:$0xff]  ;;  %v783_v24 = vld [vmem:[#allocation11 + $0x50] sm:$0xff] }
 0x1d7   :  { %3395 = vmatprep.subr.mxu0 %v747_v25  ;;  %3363 = vmatpush3.msra.mxu1 %v698_v26  ;;  %v782_v25 = vld [vmem:[#allocation11 + $0x48] sm:$0xff]  ;;  %v781_v26 = vld [vmem:[#allocation11 + $0x40] sm:$0xff] }
 0x1d8   :  { %3396 = vmatpush3.msra.mxu0 %v731_v27  ;;  %3364 = vmatprep.subr.mxu1 %v713_v28  ;;  %v780_v27 = vld [vmem:[#allocation11 + $0x38] sm:$0xff]  ;;  %v779_v28 = vld [vmem:[#allocation11 + $0x30] sm:$0xff] }
 0x1d9   :  { %3397 = vmatprep.subr.mxu0 %v746_v29  ;;  %3365 = vmatpush3.msra.mxu1 %v697_v30  ;;  %v778_v29 = vld [vmem:[#allocation11 + $0x28] sm:$0xff]  ;;  %v777_v30 = vld [vmem:[#allocation11 + $0x20] sm:$0xff] }
 0x1da   :  { %3398 = vmatpush3.msra.mxu0 %v730_v31  ;;  %3366 = vmatprep.subr.mxu1 %v712_v32  ;;  %v776_v31 = vld [vmem:[#allocation11 + $0x18] sm:$0xff]  ;;  %v775_v32 = vld [vmem:[#allocation11 + $0x10] sm:$0xff] }
 0x1db   :  { %3399 = vmatprep.subr.mxu0 %v745_v33  ;;  %3367 = vmatpush3.msra.mxu1 %v696_v34  ;;  %v774_v33 = vld [vmem:[#allocation11 + $0x8] sm:$0xff]  ;;  %v773_v34 = vld [vmem:[#allocation11] sm:$0xff] }
 0x1dc   :  { %3400 = vmatpush3.msra.mxu0 %v729_v35  ;;  %3368 = vmatprep.subr.mxu1 %v711_v36  ;;  %v4054_v35 = vld [vmem:[#allocation7 + $0x620] sm:$0xff] }
 0x1dd   :  { %3401 = vmatprep.subr.mxu0 %v744_v37  ;;  %3369 = vmatpush3.msra.mxu1 %v695_v38  ;;  %v805_v36 = vld [vmem:[#allocation14 + $0x78] sm:$0xff]  ;;  %v804_v37 = vld [vmem:[#allocation14 + $0x70] sm:$0xff]  ;;  %v803_v38 = vld [vmem:[#allocation14 + $0x68] sm:$0xff] }
 0x1de   :  { %3402 = vmatpush3.msra.mxu0 %v728_v39  ;;  %3370 = vmatprep.subr.mxu1 %v710_v40  ;;  %v802_v39 = vld [vmem:[#allocation14 + $0x60] sm:$0xff]  ;;  %v801_v40 = vld [vmem:[#allocation14 + $0x58] sm:$0xff] }
 0x1df   :  { %3403 = vmatprep.subr.mxu0 %v743_v41  ;;  %3371 = vmatpush3.msra.mxu1 %v694_v42  ;;  %v800_v41 = vld [vmem:[#allocation14 + $0x50] sm:$0xff]  ;;  %v799_v42 = vld [vmem:[#allocation14 + $0x48] sm:$0xff] }
 0x1e0   :  { %3404 = vmatpush3.msra.mxu0 %v727_v43  ;;  %3372 = vmatprep.subr.mxu1 %v709_v44  ;;  %v798_v43 = vld [vmem:[#allocation14 + $0x40] sm:$0xff]  ;;  %v797_v44 = vld [vmem:[#allocation14 + $0x38] sm:$0xff] }
 0x1e1   :  { %3405 = vmatprep.subr.mxu0 %v742_v45  ;;  %3373 = vmatpush3.msra.mxu1 %v693_v46  ;;  %v796_v45 = vld [vmem:[#allocation14 + $0x30] sm:$0xff]  ;;  %v795_v46 = vld [vmem:[#allocation14 + $0x28] sm:$0xff] }
 0x1e2   :  { %3406 = vmatpush3.msra.mxu0 %v726_v47  ;;  %3374 = vmatprep.subr.mxu1 %v708_v48  ;;  %v794_v47 = vld [vmem:[#allocation14 + $0x20] sm:$0xff]  ;;  %v793_v48 = vld [vmem:[#allocation14 + $0x18] sm:$0xff] }
 0x1e3   :  { %3407 = vmatprep.subr.mxu0 %v741_v49  ;;  %3375 = vmatpush3.msra.mxu1 %v692_v50  ;;  %v792_v49 = vld [vmem:[#allocation14 + $0x10] sm:$0xff] }
 0x1e4   :  { %3408 = vmatpush3.msra.mxu0 %v725_v51  ;;  %3761 = vmatprep.subr.mxu1 %v4959_v54 }
 0x1e5   :  { %3409 = vmatprep.subr.mxu0 %v740_v52 }
 0x1e6   :  { %3410 = vmatpush3.msra.mxu0 %v724_v53 }
 0x1e7   :  { %3796 = vmatprep.subr.mxu0 %v4959_v54 }
 0x1f4   :  { %v1159_v55 = vpop.f32.mrf.mxu0 }
 0x1f6   :  { %v1161_v56 = vpop.f32.mrf.mxu0 }
 0x1f7   :  { %4004 = vtanh.f32 %v1161_v56  ;;  %v1230_v57 = vpop.f32.mrf.mxu1  ;;  %v3166_v56 = vld [vmem:[#allocation10] ss:$0 sm:$0xff] }
 0x1f8   :  { %4006 = vtanh.f32 %v1159_v55 }
 0x1f9   :  { %4008 = vtanh.f32 %v1230_v57  ;;  %v1232_v58 = vpop.f32.mrf.mxu1 }
 0x1fa   :  { %4010 = vtanh.f32 %v1232_v58 }
 0x204   :  { %v4005_v59 = vpop.eup %4004 }
 0x205   :  { %v4007_v62 = vpop.eup %4006  ;;  %1668 = vmatprep.mubr.f32.mxu1 %v4005_v59 }
 0x206   :  { %v4009_v0 = vpop.eup %4008  ;;  %1669 = vmatmul.mubr.f32.vlgmr.msra.gmra.mxu1 %v4007_v62 }
 0x207   :  { %v4011_v2 = vpop.eup %4010  ;;  %3762 = vmatpush3.msra.mxu1 %v771_v61  ;;  %3793 = vmatprep.mubr.msk.f32.mxu1 %vm4960_vm0, %v4959_v54 }
 0x208   :  { %1738 = vmatprep.mubr.f32.mxu0 %v4011_v2  ;;  %3763 = vmatprep.subr.mxu1 %v4959_v54 }
 0x209   :  { %1739 = vmatmul.mubr.f32.vlgmr.msra.gmra.mxu0 %v4009_v0  ;;  %3764 = vmatpush3.msra.mxu1 %v770_v1 }
 0x20a   :  { %3765 = vmatprep.subr.mxu1 %v4959_v54  ;;  %3828 = vmatprep.mubr.msk.f32.mxu0 %vm4960_vm0, %v4959_v54 }
 0x20b   :  { %3766 = vmatpush3.msra.mxu1 %v769_v3  ;;  %3797 = vmatpush3.msra.mxu0 %v788_v20  ;;  %v4058_v20 = vld [vmem:[#allocation7 + $0x550] sm:$0xff] }
 0x20c   :  { %3767 = vmatprep.subr.mxu1 %v4959_v54  ;;  %3798 = vmatprep.subr.mxu0 %v4959_v54 }
 0x20d   :  { %3768 = vmatpush3.msra.mxu1 %v768_v4  ;;  %3799 = vmatpush3.msra.mxu0 %v787_v21  ;;  %v4059_v21 = vld [vmem:[#allocation7 + $0x548] sm:$0xff] }
 0x20e   :  { %3769 = vmatprep.subr.mxu1 %v4959_v54  ;;  %3800 = vmatprep.subr.mxu0 %v4959_v54 }
 0x20f   :  { %3770 = vmatpush3.msra.mxu1 %v767_v5  ;;  %3801 = vmatpush3.msra.mxu0 %v786_v63  ;;  %v4060_v63 = vld [vmem:[#allocation7 + $0x4e8] sm:$0xff] }
 0x210   :  { %3771 = vmatprep.subr.mxu1 %v4959_v54  ;;  %3802 = vmatprep.subr.mxu0 %v4959_v54 }
 0x211   :  { %3772 = vmatpush3.msra.mxu1 %v766_v6  ;;  %3803 = vmatpush3.msra.mxu0 %v785_v22  ;;  %v4061_v22 = vld [vmem:[#allocation7 + $0x4e0] sm:$0xff] }
 0x212   :  { %3773 = vmatprep.subr.mxu1 %v4959_v54  ;;  %3804 = vmatprep.subr.mxu0 %v4959_v54 }
 0x213   :  { %3774 = vmatpush3.msra.mxu1 %v765_v7  ;;  %3805 = vmatpush3.msra.mxu0 %v784_v23  ;;  %v4062_v23 = vld [vmem:[#allocation7 + $0x480] sm:$0xff] }
 0x214   :  { %3775 = vmatprep.subr.mxu1 %v4959_v54  ;;  %3806 = vmatprep.subr.mxu0 %v4959_v54 }
 0x215   :  { %v3201_v11 = vpop.f32.mrf.mxu0  ;;  %3776 = vmatpush3.msra.mxu1 %v764_v8  ;;  %3807 = vmatpush3.msra.mxu0 %v783_v24  ;;  %v4063_v24 = vld [vmem:[#allocation7 + $0x478] sm:$0xff] }
 0x216   :  { %3777 = vmatprep.subr.mxu1 %v4959_v54  ;;  %3808 = vmatprep.subr.mxu0 %v4959_v54 }
 0x217   :  { %v3202_v13 = vpop.f32.mrf.mxu0  ;;  %3778 = vmatpush3.msra.mxu1 %v763_v10  ;;  %3809 = vmatpush3.msra.mxu0 %v782_v25  ;;  %v4064_v25 = vld [vmem:[#allocation7 + $0x418] sm:$0xff] }
 0x218   :  { %v3203_v14 = vadd.f32 %v3202_v13, %v3201_v11  ;;  %3779 = vmatprep.subr.mxu1 %v4959_v54  ;;  %3810 = vmatprep.subr.mxu0 %v4959_v54 }
 0x219   :  { %3780 = vmatpush3.msra.mxu1 %v762_v12  ;;  %3811 = vmatpush3.msra.mxu0 %v781_v26  ;;  %v4065_v26 = vld [vmem:[#allocation7 + $0x410] sm:$0xff] }
 0x21a   :  { %4012 = vtanh.f32 %v3203_v14  ;;  %3781 = vmatprep.subr.mxu1 %v4959_v54  ;;  %3812 = vmatprep.subr.mxu0 %v4959_v54 }
 0x21b   :  { %3782 = vmatpush3.msra.mxu1 %v761_v15  ;;  %3813 = vmatpush3.msra.mxu0 %v780_v27  ;;  %v4066_v27 = vld [vmem:[#allocation7 + $0x3b0] sm:$0xff] }
 0x21c   :  { %3783 = vmatprep.subr.mxu1 %v4959_v54  ;;  %3814 = vmatprep.subr.mxu0 %v4959_v54 }
 0x21d   :  { %3784 = vmatpush3.msra.mxu1 %v760_v16  ;;  %3815 = vmatpush3.msra.mxu0 %v779_v28  ;;  %v4067_v28 = vld [vmem:[#allocation7 + $0x3a8] sm:$0xff] }
 0x21e   :  { %3785 = vmatprep.subr.mxu1 %v4959_v54  ;;  %3816 = vmatprep.subr.mxu0 %v4959_v54 }
 0x21f   :  { %3786 = vmatpush3.msra.mxu1 %v759_v17  ;;  %3817 = vmatpush3.msra.mxu0 %v778_v29  ;;  %v4068_v29 = vld [vmem:[#allocation7 + $0x348] sm:$0xff] }
 0x220   :  { %3787 = vmatprep.subr.mxu1 %v4959_v54  ;;  %3818 = vmatprep.subr.mxu0 %v4959_v54 }
 0x221   :  { %3788 = vmatpush3.msra.mxu1 %v758_v18  ;;  %3819 = vmatpush3.msra.mxu0 %v777_v30  ;;  %v4069_v30 = vld [vmem:[#allocation7 + $0x340] sm:$0xff] }
 0x222   :  { %3789 = vmatprep.subr.mxu1 %v4959_v54  ;;  %3820 = vmatprep.subr.mxu0 %v4959_v54 }
 0x223   :  { %3790 = vmatpush3.msra.mxu1 %v757_v9  ;;  %3821 = vmatpush3.msra.mxu0 %v776_v31  ;;  %v4055_v9 = vld [vmem:[#allocation7 + $0x618] sm:$0xff]  ;;  %v4070_v31 = vld [vmem:[#allocation7 + $0x2e0] sm:$0xff] }
 0x224   :  { %3791 = vmatprep.subr.mxu1 %v4959_v54  ;;  %3822 = vmatprep.subr.mxu0 %v4959_v54 }
 0x225   :  { %3792 = vmatpush3.msra.mxu1 %v756_v19  ;;  %3823 = vmatpush3.msra.mxu0 %v775_v32  ;;  %v4056_v19 = vld [vmem:[#allocation7 + $0x5b8] sm:$0xff] }
 0x226   :  { %3831 = vmatprep.subr.mxu1 %v4959_v54  ;;  %3824 = vmatprep.subr.mxu0 %v4959_v54  ;;  %v4071_v32 = vld [vmem:[#allocation7 + $0x2d8] sm:$0xff] }
 0x227   :  { %v4013_v60 = vpop.eup %4012  ;;  %3825 = vmatpush3.msra.mxu0 %v774_v33  ;;  %v4072_v33 = vld [vmem:[#allocation7 + $0x278] sm:$0xff] }
 0x228   :  { %3794 = vmatmul.mubr.f32.vlgmr.msra.gmra.mxu1 %v4013_v60  ;;  %3826 = vmatprep.subr.mxu0 %v4959_v54  ;;  %v4057_v60 = vld [vmem:[#allocation7 + $0x5b0] sm:$0xff] }
 0x229   :  { %3863 = vmatprep.mubr.msk.f32.mxu1 %vm4960_vm0, %v4959_v54  ;;  %3827 = vmatpush3.msra.mxu0 %v773_v34  ;;  %v4073_v34 = vld [vmem:[#allocation7 + $0x270] sm:$0xff] }
 0x22a   :  { %1981 = vmatprep.subr.mxu0 %v4054_v35  ;;  %3832 = vmatpush3.msra.mxu1 %v805_v36  ;;  %v4074_v35 = vld [vmem:[#allocation7 + $0x210] sm:$0xff]  ;;  %v4075_v36 = vld [vmem:[#allocation7 + $0x208] sm:$0xff] }
 0x22b   :  { %3833 = vmatprep.subr.mxu1 %v4959_v54 }
 0x22c   :  { %3834 = vmatpush3.msra.mxu1 %v804_v37  ;;  %v4076_v37 = vld [vmem:[#allocation7 + $0x1a8] sm:$0xff] }
 0x22d   :  { %3835 = vmatprep.subr.mxu1 %v4959_v54 }
 0x22e   :  { %3836 = vmatpush3.msra.mxu1 %v803_v38  ;;  %v4077_v38 = vld [vmem:[#allocation7 + $0x1a0] sm:$0xff] }
 0x22f   :  { %3837 = vmatprep.subr.mxu1 %v4959_v54 }
 0x230   :  { %3838 = vmatpush3.msra.mxu1 %v802_v39  ;;  %v4078_v39 = vld [vmem:[#allocation7 + $0x140] sm:$0xff] }
 0x231   :  { %3839 = vmatprep.subr.mxu1 %v4959_v54 }
 0x232   :  { %3840 = vmatpush3.msra.mxu1 %v801_v40  ;;  %v4079_v40 = vld [vmem:[#allocation7 + $0x138] sm:$0xff] }
 0x233   :  { %3841 = vmatprep.subr.mxu1 %v4959_v54 }
 0x234   :  { %3842 = vmatpush3.msra.mxu1 %v800_v41  ;;  %v4080_v41 = vld [vmem:[#allocation7 + $0xd8] sm:$0xff] }
 0x235   :  { %3843 = vmatprep.subr.mxu1 %v4959_v54 }
 0x236   :  { %3844 = vmatpush3.msra.mxu1 %v799_v42  ;;  %v4081_v42 = vld [vmem:[#allocation7 + $0xd0] sm:$0xff] }
 0x237   :  { %3845 = vmatprep.subr.mxu1 %v4959_v54 }
 0x238   :  { %3846 = vmatpush3.msra.mxu1 %v798_v43  ;;  %v4082_v43 = vld [vmem:[#allocation7 + $0x70] sm:$0xff] }
 0x239   :  { %3847 = vmatprep.subr.mxu1 %v4959_v54 }
 0x23a   :  { %3848 = vmatpush3.msra.mxu1 %v797_v44  ;;  %v4083_v44 = vld [vmem:[#allocation7 + $0x68] sm:$0xff] }
 0x23b   :  { %3849 = vmatprep.subr.mxu1 %v4959_v54 }
 0x23c   :  { %3850 = vmatpush3.msra.mxu1 %v796_v45  ;;  %v4084_v45 = vld [vmem:[#allocation7 + $0x8] sm:$0xff] }
 0x23d   :  { %3851 = vmatprep.subr.mxu1 %v4959_v54 }
 0x23e   :  { %3852 = vmatpush3.msra.mxu1 %v795_v46  ;;  %v4085_v46 = vld [vmem:[#allocation7] sm:$0xff] }
 0x23f   :  { %3853 = vmatprep.subr.mxu1 %v4959_v54 }
 0x240   :  { %3854 = vmatpush3.msra.mxu1 %v794_v47  ;;  %v4086_v47 = vld [vmem:[#allocation7 + $0xca0] sm:$0xff] }
 0x241   :  { %3855 = vmatprep.subr.mxu1 %v4959_v54 }
 0x242   :  { %3856 = vmatpush3.msra.mxu1 %v793_v48  ;;  %v3236_v50 = vpop.f32.mrf.mxu1  ;;  %v4087_v48 = vld [vmem:[#allocation7 + $0xc98] sm:$0xff] }
 0x243   :  { %3857 = vmatprep.subr.mxu1 %v4959_v54 }
 0x244   :  { %3858 = vmatpush3.msra.mxu1 %v792_v49  ;;  %v3237_v51 = vpop.f32.mrf.mxu1  ;;  %v4088_v49 = vld [vmem:[#allocation7 + $0xc38] sm:$0xff] }
 0x245   :  { %3859 = vmatprep.subr.mxu1 %v4959_v54  ;;  %v3271_v52 = vpop.f32.mrf.mxu0  ;;  %v3238_v55 = vadd.f32 %v3237_v51, %v3236_v50  ;;  %v4089_v50 = vld [vmem:[#allocation7 + $0xc30] sm:$0xff] }
 0x246   :  { %v4090_v51 = vld [vmem:[#allocation7 + $0xbd0] sm:$0xff] }
 0x247   :  { %v3272_v57 = vpop.f32.mrf.mxu0  ;;  %v1391_v61 = vadd.f32 %v3238_v55, %v3166_v56  ;;  %v4093_v55 = vld [vmem:[#allocation7 + $0xb60] sm:$0xff] }
 0x248   :  { %v3273_v62 = vadd.f32 %v3272_v57, %v3271_v52  ;;  %v4091_v52 = vld [vmem:[#allocation7 + $0xbc8] sm:$0xff]  ;;  %v4094_v56 = vld [vmem:[#allocation7 + $0xb00] sm:$0xff]  ;;  %v4095_v57 = vld [vmem:[#allocation7 + $0xaf8] sm:$0xff] }
 0x24a   :  { %v1461_v3 = vadd.f32 %v3273_v62, %v1391_v61  ;;  %v4098_v61 = vld [vmem:[#allocation7 + $0xa30] sm:$0xff]  ;;  %v4099_v62 = vld [vmem:[#allocation7 + $0xa28] sm:$0xff] }
 0x284   :  { %v3306_v53 = vpop.f32.mrf.mxu1 }
 0x286   :  { %v3307_v58 = vpop.f32.mrf.mxu1 }
 0x287   :  { %v3341_v59 = vpop.f32.mrf.mxu0  ;;  %v3308_v1 = vadd.f32 %v3307_v58, %v3306_v53  ;;  %v4092_v53 = vld [vmem:[#allocation7 + $0xb68] sm:$0xff]  ;;  %v4096_v58 = vld [vmem:[#allocation7 + $0xa98] sm:$0xff] }
 0x289   :  { %v3342_v2 = vpop.f32.mrf.mxu0  ;;  %v1531_v6 = vadd.f32 %v3308_v1, %v1461_v3  ;;  %v4101_v1 = vld [vmem:[#allocation7 + $0x9c0] sm:$0xff]  ;;  %v4103_v3 = vld [vmem:[#allocation7 + $0x958] sm:$0xff] }
 0x28a   :  { %v3343_v7 = vadd.f32 %v3342_v2, %v3341_v59  ;;  %v4097_v59 = vld [vmem:[#allocation7 + $0xa90] sm:$0xff]  ;;  %v4102_v2 = vld [vmem:[#allocation7 + $0x960] sm:$0xff] }
 0x28c   :  { %v1601_v11 = vadd.f32 %v3343_v7, %v1531_v6  ;;  %v4106_v6 = vld [vmem:[#allocation7 + $0x890] sm:$0xff]  ;;  %v4107_v7 = vld [vmem:[#allocation7 + $0x888] sm:$0xff] }
 0x2c6   :  { %v3376_v0 = vpop.f32.mrf.mxu1 }
 0x2c8   :  { %v3377_v4 = vpop.f32.mrf.mxu1 }
 0x2c9   :  { %v3411_v5 = vpop.f32.mrf.mxu0  ;;  %v3378_v8 = vadd.f32 %v3377_v4, %v3376_v0  ;;  %v4100_v0 = vld [vmem:[#allocation7 + $0x9c8] sm:$0xff]  ;;  %v4104_v4 = vld [vmem:[#allocation7 + $0x8f8] sm:$0xff] }
 0x2cb   :  { %v3412_v10 = vpop.f32.mrf.mxu0  ;;  %v1671_v12 = vadd.f32 %v3378_v8, %v1601_v11  ;;  %v4108_v8 = vld [vmem:[#allocation7 + $0x828] sm:$0xff]  ;;  %v4110_v11 = vld [vmem:[#allocation7 + $0x7c0] sm:$0xff] }
 0x2cc   :  { %v3413_v13 = vadd.f32 %v3412_v10, %v3411_v5  ;;  %v4105_v5 = vld [vmem:[#allocation7 + $0x8f0] sm:$0xff]  ;;  %v4109_v10 = vld [vmem:[#allocation7 + $0x820] sm:$0xff] }
 0x2ce   :  { %v1741_v14 = vadd.f32 %v3413_v13, %v1671_v12  ;;  %v4111_v12 = vld [vmem:[#allocation7 + $0x7b8] sm:$0xff] }
 0x2cf   :  { %v4112_v13 = vld [vmem:[#allocation7 + $0x758] sm:$0xff] }
 0x2e8   :  { %v1810_v15 = vpop.f32.mrf.mxu1 }
 0x2e9   :  { %v1811_v16 = vadd.f32 %v1810_v15, %v1741_v14  ;;  %v4113_v14 = vld [vmem:[#allocation7 + $0x750] sm:$0xff] }
 0x2ea   :  { %v3795_v17 = vpop.f32.mrf.mxu1  ;;  %v4114_v15 = vld [vmem:[#allocation7 + $0x6f0] sm:$0xff] }
 0x2eb   :  { %4014 = vtanh.f32 %v1811_v16  ;;  %v4115_v16 = vld [vmem:[#allocation7 + $0x6e8] sm:$0xff] }
 0x2ec   :  { %v4116_v17 = vld [vmem:[#allocation7 + $0x688] sm:$0xff] }
 0x2f8   :  { %v4015_v18 = vpop.eup %4014 }
 0x2f9   :  { %3829 = vmatmul.mubr.f32.vlgmr.msra.gmra.mxu0 %v4015_v18  ;;  %v4117_v18 = vld [vmem:[#allocation7 + $0x680] sm:$0xff] }
 0x2fa   :  { %1982 = vmatpush1.msra.mxu0 %v4055_v9  ;;  %v791_v9 = vld [vmem:[#allocation14 + $0x8] sm:$0xff] }
 0x2fb   :  { %1983 = vmatprep.subr.mxu0 %v4056_v19  ;;  %v4118_v19 = vld [vmem:[#allocation7 + $0x640] sm:$0xff]  ;;  %3860 = vmatpush3.msra.mxu1 %v791_v9  ;;  %v4177_v9 = vld [vmem:[#allocation7 + $0x778] sm:$0xff] }
 0x2fc   :  { %1984 = vmatpush1.msra.mxu0 %v4057_v60  ;;  %3861 = vmatprep.subr.mxu1 %v4959_v54  ;;  %v790_v60 = vld [vmem:[#allocation14] sm:$0xff] }
 0x2fd   :  { %1985 = vmatprep.subr.mxu0 %v4058_v20  ;;  %3862 = vmatpush3.msra.mxu1 %v790_v60  ;;  %v4119_v20 = vld [vmem:[#allocation7 + $0x630] sm:$0xff] }
 0x2fe   :  { %1986 = vmatpush1.msra.mxu0 %v4059_v21  ;;  %2052 = vmatprep.subr.mxu1 %v4119_v20  ;;  %v5116_v21 = vld [vmem:[#allocation5 + $0x8] sm:$0xff]  ;;  %v4179_v60 = vld [vmem:[#allocation7 + $0x710] sm:$0xff]  ;;  %v4180_v20 = vld [vmem:[#allocation7 + $0x708] sm:$0xff] }
 0x2ff   :  { %1987 = vmatprep.subr.mxu0 %v4060_v63  ;;  %2045 = vmatprep.mubr.f32.mxu0 %v5116_v21  ;;  %v5119_v63 = vld [vmem:[#allocation5] sm:$0xff] }
 0x300   :  { %1988 = vmatpush1.msra.mxu0 %v4061_v22  ;;  %v4120_v22 = vld [vmem:[#allocation7 + $0x638] sm:$0xff] }
 0x301   :  { %1989 = vmatprep.subr.mxu0 %v4062_v23  ;;  %v4121_v23 = vld [vmem:[#allocation7 + $0x5d8] sm:$0xff] }
 0x302   :  { %1990 = vmatpush1.msra.mxu0 %v4063_v24  ;;  %v4122_v24 = vld [vmem:[#allocation7 + $0x5d0] sm:$0xff] }
 0x303   :  { %1991 = vmatprep.subr.mxu0 %v4064_v25  ;;  %v4123_v25 = vld [vmem:[#allocation7 + $0x570] sm:$0xff] }
 0x304   :  { %1992 = vmatpush1.msra.mxu0 %v4065_v26  ;;  %v4124_v26 = vld [vmem:[#allocation7 + $0x568] sm:$0xff] }
 0x305   :  { %1993 = vmatprep.subr.mxu0 %v4066_v27  ;;  %v4125_v27 = vld [vmem:[#allocation7 + $0x508] sm:$0xff] }
 0x306   :  { %1994 = vmatpush1.msra.mxu0 %v4067_v28  ;;  %v4126_v28 = vld [vmem:[#allocation7 + $0x500] sm:$0xff] }
 0x307   :  { %1995 = vmatprep.subr.mxu0 %v4068_v29  ;;  %v4127_v29 = vld [vmem:[#allocation7 + $0x4a0] sm:$0xff] }
 0x308   :  { %1996 = vmatpush1.msra.mxu0 %v4069_v30  ;;  %v4128_v30 = vld [vmem:[#allocation7 + $0x498] sm:$0xff] }
 0x309   :  { %1997 = vmatprep.subr.mxu0 %v4070_v31  ;;  %v4129_v31 = vld [vmem:[#allocation7 + $0x438] sm:$0xff] }
 0x30a   :  { %1998 = vmatpush1.msra.mxu0 %v4071_v32  ;;  %v4130_v32 = vld [vmem:[#allocation7 + $0x430] sm:$0xff] }
 0x30b   :  { %1999 = vmatprep.subr.mxu0 %v4072_v33  ;;  %v4131_v33 = vld [vmem:[#allocation7 + $0x3d0] sm:$0xff] }
 0x30c   :  { %2000 = vmatpush1.msra.mxu0 %v4073_v34  ;;  %v4132_v34 = vld [vmem:[#allocation7 + $0x3c8] sm:$0xff] }
 0x30d   :  { %2001 = vmatprep.subr.mxu0 %v4074_v35  ;;  %v4133_v35 = vld [vmem:[#allocation7 + $0x368] sm:$0xff] }
 0x30e   :  { %2002 = vmatpush1.msra.mxu0 %v4075_v36  ;;  %v4134_v36 = vld [vmem:[#allocation7 + $0x360] sm:$0xff] }
 0x30f   :  { %2003 = vmatprep.subr.mxu0 %v4076_v37  ;;  %v4135_v37 = vld [vmem:[#allocation7 + $0x300] sm:$0xff] }
 0x310   :  { %2004 = vmatpush1.msra.mxu0 %v4077_v38  ;;  %v4136_v38 = vld [vmem:[#allocation7 + $0x2f8] sm:$0xff] }
 0x311   :  { %2005 = vmatprep.subr.mxu0 %v4078_v39  ;;  %v4137_v39 = vld [vmem:[#allocation7 + $0x298] sm:$0xff] }
 0x312   :  { %2006 = vmatpush1.msra.mxu0 %v4079_v40  ;;  %v4138_v40 = vld [vmem:[#allocation7 + $0x290] sm:$0xff] }
 0x313   :  { %2007 = vmatprep.subr.mxu0 %v4080_v41  ;;  %v4139_v41 = vld [vmem:[#allocation7 + $0x230] sm:$0xff] }
 0x314   :  { %2008 = vmatpush1.msra.mxu0 %v4081_v42  ;;  %v4140_v42 = vld [vmem:[#allocation7 + $0x228] sm:$0xff] }
 0x315   :  { %2009 = vmatprep.subr.mxu0 %v4082_v43  ;;  %v4141_v43 = vld [vmem:[#allocation7 + $0x1c8] sm:$0xff] }
 0x316   :  { %2010 = vmatpush1.msra.mxu0 %v4083_v44  ;;  %v4142_v44 = vld [vmem:[#allocation7 + $0x1c0] sm:$0xff] }
 0x317   :  { %2011 = vmatprep.subr.mxu0 %v4084_v45  ;;  %v4143_v45 = vld [vmem:[#allocation7 + $0x160] sm:$0xff] }
 0x318   :  { %2012 = vmatpush1.msra.mxu0 %v4085_v46  ;;  %v4144_v46 = vld [vmem:[#allocation7 + $0x158] sm:$0xff] }
 0x319   :  { %2013 = vmatprep.subr.mxu0 %v4086_v47  ;;  %v4145_v47 = vld [vmem:[#allocation7 + $0xf8] sm:$0xff] }
 0x31a   :  { %2014 = vmatpush2.msra.mxu0 %v4087_v48  ;;  %v4146_v48 = vld [vmem:[#allocation7 + $0xf0] sm:$0xff] }
 0x31b   :  { %2015 = vmatprep.subr.mxu0 %v4088_v49  ;;  %v4147_v49 = vld [vmem:[#allocation7 + $0x90] sm:$0xff] }
 0x31c   :  { %2016 = vmatpush2.msra.mxu0 %v4089_v50  ;;  %v4148_v50 = vld [vmem:[#allocation7 + $0x88] sm:$0xff] }
 0x31d   :  { %2017 = vmatprep.subr.mxu0 %v4090_v51  ;;  %v4149_v51 = vld [vmem:[#allocation7 + $0x28] sm:$0xff] }
 0x31e   :  { %2018 = vmatpush2.msra.mxu0 %v4091_v52  ;;  %v4150_v52 = vld [vmem:[#allocation7 + $0x20] sm:$0xff] }
 0x31f   :  { %2019 = vmatprep.subr.mxu0 %v4092_v53  ;;  %v4151_v53 = vld [vmem:[#allocation7 + $0xcc0] sm:$0xff] }
 0x320   :  { %2020 = vmatpush2.msra.mxu0 %v4093_v55  ;;  %v4152_v55 = vld [vmem:[#allocation7 + $0xcb8] sm:$0xff] }
 0x321   :  { %2021 = vmatprep.subr.mxu0 %v4094_v56  ;;  %v4153_v56 = vld [vmem:[#allocation7 + $0xc58] sm:$0xff] }
 0x322   :  { %2022 = vmatpush2.msra.mxu0 %v4095_v57  ;;  %v4154_v57 = vld [vmem:[#allocation7 + $0xc50] sm:$0xff] }
 0x323   :  { %2023 = vmatprep.subr.mxu0 %v4096_v58  ;;  %v4155_v58 = vld [vmem:[#allocation7 + $0xbf0] sm:$0xff] }
 0x324   :  { %2024 = vmatpush2.msra.mxu0 %v4097_v59  ;;  %v4156_v59 = vld [vmem:[#allocation7 + $0xbe8] sm:$0xff] }
 0x325   :  { %2025 = vmatprep.subr.mxu0 %v4098_v61  ;;  %v4157_v61 = vld [vmem:[#allocation7 + $0xb88] sm:$0xff] }
 0x326   :  { %2026 = vmatpush2.msra.mxu0 %v4099_v62  ;;  %v4158_v62 = vld [vmem:[#allocation7 + $0xb80] sm:$0xff] }
 0x327   :  { %2027 = vmatprep.subr.mxu0 %v4100_v0  ;;  %v4159_v0 = vld [vmem:[#allocation7 + $0xb20] sm:$0xff] }
 0x328   :  { %2028 = vmatpush2.msra.mxu0 %v4101_v1  ;;  %v4160_v1 = vld [vmem:[#allocation7 + $0xb18] sm:$0xff] }
 0x329   :  { %2029 = vmatprep.subr.mxu0 %v4102_v2  ;;  %v4161_v2 = vld [vmem:[#allocation7 + $0xab8] sm:$0xff] }
 0x32a   :  { %2030 = vmatpush2.msra.mxu0 %v4103_v3  ;;  %v4162_v3 = vld [vmem:[#allocation7 + $0xab0] sm:$0xff] }
 0x32b   :  { %2031 = vmatprep.subr.mxu0 %v4104_v4  ;;  %v4163_v4 = vld [vmem:[#allocation7 + $0xa50] sm:$0xff] }
 0x32c   :  { %2032 = vmatpush2.msra.mxu0 %v4105_v5  ;;  %v4164_v5 = vld [vmem:[#allocation7 + $0xa48] sm:$0xff] }
 0x32d   :  { %2033 = vmatprep.subr.mxu0 %v4106_v6  ;;  %v4165_v6 = vld [vmem:[#allocation7 + $0x9e8] sm:$0xff] }
 0x32e   :  { %2034 = vmatpush2.msra.mxu0 %v4107_v7  ;;  %v4166_v7 = vld [vmem:[#allocation7 + $0x9e0] sm:$0xff] }
 0x32f   :  { %2035 = vmatprep.subr.mxu0 %v4108_v8  ;;  %v4167_v8 = vld [vmem:[#allocation7 + $0x980] sm:$0xff] }
 0x330   :  { %2036 = vmatpush2.msra.mxu0 %v4109_v10  ;;  %v4168_v10 = vld [vmem:[#allocation7 + $0x978] sm:$0xff] }
 0x331   :  { %2037 = vmatprep.subr.mxu0 %v4110_v11  ;;  %v4169_v11 = vld [vmem:[#allocation7 + $0x918] sm:$0xff] }
 0x332   :  { %2038 = vmatpush2.msra.mxu0 %v4111_v12  ;;  %v4170_v12 = vld [vmem:[#allocation7 + $0x910] sm:$0xff] }
 0x333   :  { %2039 = vmatprep.subr.mxu0 %v4112_v13  ;;  %v4171_v13 = vld [vmem:[#allocation7 + $0x8b0] sm:$0xff] }
 0x334   :  { %2040 = vmatpush2.msra.mxu0 %v4113_v14  ;;  %v4172_v14 = vld [vmem:[#allocation7 + $0x8a8] sm:$0xff] }
 0x335   :  { %2041 = vmatprep.subr.mxu0 %v4114_v15  ;;  %v4173_v15 = vld [vmem:[#allocation7 + $0x848] sm:$0xff] }
 0x336   :  { %2042 = vmatpush2.msra.mxu0 %v4115_v16  ;;  %v4174_v16 = vld [vmem:[#allocation7 + $0x840] sm:$0xff] }
 0x337   :  { %2043 = vmatprep.subr.mxu0 %v4116_v17  ;;  %v4175_v17 = vld [vmem:[#allocation7 + $0x7e0] sm:$0xff] }
 0x338   :  { %2044 = vmatpush2.msra.mxu0 %v4117_v18  ;;  %v4176_v18 = vld [vmem:[#allocation7 + $0x7d8] sm:$0xff] }
 0x339   :  { %2123 = vmatprep.subr.mxu0 %v4118_v19  ;;  %2046 = vmatmul.mubr.f32.vlgmr.msra.gmra.mxu0 %v5119_v63  ;;  %v4178_v19 = vld [vmem:[#allocation7 + $0x770] sm:$0xff] }
 0x33a   :  { %2124 = vmatpush1.msra.mxu0 %v4120_v22  ;;  %2187 = vmatprep.mubr.f32.mxu0 %v5116_v21  ;;  %v4181_v22 = vld [vmem:[#allocation7 + $0x6a8] sm:$0xff] }
 0x33b   :  { %2125 = vmatprep.subr.mxu0 %v4121_v23  ;;  %v4182_v23 = vld [vmem:[#allocation7 + $0x6a0] sm:$0xff] }
 0x33c   :  { %2126 = vmatpush1.msra.mxu0 %v4122_v24  ;;  %v4183_v24 = vld [vmem:[#allocation7 + $0x660] sm:$0xff] }
 0x33d   :  { %2127 = vmatprep.subr.mxu0 %v4123_v25  ;;  %v4184_v25 = vld [vmem:[#allocation7 + $0x658] sm:$0xff] }
 0x33e   :  { %2128 = vmatpush1.msra.mxu0 %v4124_v26  ;;  %v4185_v26 = vld [vmem:[#allocation7 + $0x5f8] sm:$0xff] }
 0x33f   :  { %2129 = vmatprep.subr.mxu0 %v4125_v27  ;;  %v4186_v27 = vld [vmem:[#allocation7 + $0x5f0] sm:$0xff] }
 0x340   :  { %2130 = vmatpush1.msra.mxu0 %v4126_v28  ;;  %v4187_v28 = vld [vmem:[#allocation7 + $0x590] sm:$0xff] }
 0x341   :  { %2131 = vmatprep.subr.mxu0 %v4127_v29  ;;  %v4188_v29 = vld [vmem:[#allocation7 + $0x588] sm:$0xff] }
 0x342   :  { %2132 = vmatpush1.msra.mxu0 %v4128_v30  ;;  %v4189_v30 = vld [vmem:[#allocation7 + $0x528] sm:$0xff] }
 0x343   :  { %2133 = vmatprep.subr.mxu0 %v4129_v31  ;;  %v4190_v31 = vld [vmem:[#allocation7 + $0x520] sm:$0xff] }
 0x344   :  { %2134 = vmatpush1.msra.mxu0 %v4130_v32  ;;  %v4191_v32 = vld [vmem:[#allocation7 + $0x4c0] sm:$0xff] }
 0x345   :  { %2135 = vmatprep.subr.mxu0 %v4131_v33  ;;  %v4192_v33 = vld [vmem:[#allocation7 + $0x4b8] sm:$0xff] }
 0x346   :  { %2136 = vmatpush1.msra.mxu0 %v4132_v34  ;;  %v4193_v34 = vld [vmem:[#allocation7 + $0x458] sm:$0xff] }
 0x347   :  { %2137 = vmatprep.subr.mxu0 %v4133_v35  ;;  %v4194_v35 = vld [vmem:[#allocation7 + $0x450] sm:$0xff] }
 0x348   :  { %2138 = vmatpush1.msra.mxu0 %v4134_v36  ;;  %v4195_v36 = vld [vmem:[#allocation7 + $0x3f0] sm:$0xff] }
 0x349   :  { %2139 = vmatprep.subr.mxu0 %v4135_v37  ;;  %v4196_v37 = vld [vmem:[#allocation7 + $0x3e8] sm:$0xff] }
 0x34a   :  { %2140 = vmatpush1.msra.mxu0 %v4136_v38  ;;  %v4197_v38 = vld [vmem:[#allocation7 + $0x388] sm:$0xff] }
 0x34b   :  { %2141 = vmatprep.subr.mxu0 %v4137_v39  ;;  %v4198_v39 = vld [vmem:[#allocation7 + $0x380] sm:$0xff] }
 0x34c   :  { %2142 = vmatpush1.msra.mxu0 %v4138_v40  ;;  %v4199_v40 = vld [vmem:[#allocation7 + $0x320] sm:$0xff] }
 0x34d   :  { %2143 = vmatprep.subr.mxu0 %v4139_v41  ;;  %v4200_v41 = vld [vmem:[#allocation7 + $0x318] sm:$0xff] }
 0x34e   :  { %2144 = vmatpush1.msra.mxu0 %v4140_v42  ;;  %v4201_v42 = vld [vmem:[#allocation7 + $0x2b8] sm:$0xff] }
 0x34f   :  { %2145 = vmatprep.subr.mxu0 %v4141_v43  ;;  %v4202_v43 = vld [vmem:[#allocation7 + $0x2b0] sm:$0xff] }
 0x350   :  { %2146 = vmatpush1.msra.mxu0 %v4142_v44  ;;  %v4203_v44 = vld [vmem:[#allocation7 + $0x250] sm:$0xff] }
 0x351   :  { %2147 = vmatprep.subr.mxu0 %v4143_v45  ;;  %v4204_v45 = vld [vmem:[#allocation7 + $0x248] sm:$0xff] }
 0x352   :  { %2148 = vmatpush1.msra.mxu0 %v4144_v46  ;;  %v4205_v46 = vld [vmem:[#allocation7 + $0x1e8] sm:$0xff] }
 0x353   :  { %2149 = vmatprep.subr.mxu0 %v4145_v47  ;;  %v4206_v47 = vld [vmem:[#allocation7 + $0x1e0] sm:$0xff] }
 0x354   :  { %2150 = vmatpush1.msra.mxu0 %v4146_v48  ;;  %v4207_v48 = vld [vmem:[#allocation7 + $0x180] sm:$0xff] }
 0x355   :  { %2151 = vmatprep.subr.mxu0 %v4147_v49  ;;  %v4208_v49 = vld [vmem:[#allocation7 + $0x178] sm:$0xff] }
 0x356   :  { %2152 = vmatpush1.msra.mxu0 %v4148_v50  ;;  %v4209_v50 = vld [vmem:[#allocation7 + $0x118] sm:$0xff] }
 0x357   :  { %2153 = vmatprep.subr.mxu0 %v4149_v51  ;;  %v4210_v51 = vld [vmem:[#allocation7 + $0x110] sm:$0xff] }
 0x358   :  { %2154 = vmatpush1.msra.mxu0 %v4150_v52  ;;  %v4211_v52 = vld [vmem:[#allocation7 + $0xb0] sm:$0xff] }
 0x359   :  { %2155 = vmatprep.subr.mxu0 %v4151_v53  ;;  %v4212_v53 = vld [vmem:[#allocation7 + $0xa8] sm:$0xff] }
 0x35a   :  { %2156 = vmatpush2.msra.mxu0 %v4152_v55  ;;  %v4213_v55 = vld [vmem:[#allocation7 + $0x48] sm:$0xff] }
 0x35b   :  { %2157 = vmatprep.subr.mxu0 %v4153_v56  ;;  %v4214_v56 = vld [vmem:[#allocation7 + $0x40] sm:$0xff] }
 0x35c   :  { %2158 = vmatpush2.msra.mxu0 %v4154_v57  ;;  %v4215_v57 = vld [vmem:[#allocation7 + $0xce0] sm:$0xff] }
 0x35d   :  { %2159 = vmatprep.subr.mxu0 %v4155_v58  ;;  %v4216_v58 = vld [vmem:[#allocation7 + $0xcd8] sm:$0xff] }
 0x35e   :  { %2160 = vmatpush2.msra.mxu0 %v4156_v59  ;;  %v4217_v59 = vld [vmem:[#allocation7 + $0xc78] sm:$0xff] }
 0x35f   :  { %2161 = vmatprep.subr.mxu0 %v4157_v61  ;;  %v4218_v61 = vld [vmem:[#allocation7 + $0xc70] sm:$0xff] }
 0x360   :  { %2162 = vmatpush2.msra.mxu0 %v4158_v62  ;;  %v4219_v62 = vld [vmem:[#allocation7 + $0xc10] sm:$0xff] }
 0x361   :  { %2163 = vmatprep.subr.mxu0 %v4159_v0  ;;  %v4220_v0 = vld [vmem:[#allocation7 + $0xc08] sm:$0xff] }
 0x362   :  { %2164 = vmatpush2.msra.mxu0 %v4160_v1  ;;  %v4221_v1 = vld [vmem:[#allocation7 + $0xba8] sm:$0xff] }
 0x363   :  { %2165 = vmatprep.subr.mxu0 %v4161_v2  ;;  %v4222_v2 = vld [vmem:[#allocation7 + $0xba0] sm:$0xff] }
 0x364   :  { %2166 = vmatpush2.msra.mxu0 %v4162_v3  ;;  %v4223_v3 = vld [vmem:[#allocation7 + $0xb40] sm:$0xff] }
 0x365   :  { %2167 = vmatprep.subr.mxu0 %v4163_v4  ;;  %v4224_v4 = vld [vmem:[#allocation7 + $0xb38] sm:$0xff] }
 0x366   :  { %2168 = vmatpush2.msra.mxu0 %v4164_v5  ;;  %v4225_v5 = vld [vmem:[#allocation7 + $0xad8] sm:$0xff] }
 0x367   :  { %2169 = vmatprep.subr.mxu0 %v4165_v6  ;;  %v4226_v6 = vld [vmem:[#allocation7 + $0xad0] sm:$0xff] }
 0x368   :  { %2170 = vmatpush2.msra.mxu0 %v4166_v7  ;;  %v4227_v7 = vld [vmem:[#allocation7 + $0xa70] sm:$0xff] }
 0x369   :  { %2171 = vmatprep.subr.mxu0 %v4167_v8  ;;  %v4228_v8 = vld [vmem:[#allocation7 + $0xa68] sm:$0xff] }
 0x36a   :  { %2172 = vmatpush2.msra.mxu0 %v4168_v10  ;;  %v4229_v10 = vld [vmem:[#allocation7 + $0xa08] sm:$0xff] }
 0x36b   :  { %2173 = vmatprep.subr.mxu0 %v4169_v11  ;;  %v4230_v11 = vld [vmem:[#allocation7 + $0xa00] sm:$0xff] }
 0x36c   :  { %2174 = vmatpush2.msra.mxu0 %v4170_v12  ;;  %v4231_v12 = vld [vmem:[#allocation7 + $0x9a0] sm:$0xff] }
 0x36d   :  { %2175 = vmatprep.subr.mxu0 %v4171_v13  ;;  %v4232_v13 = vld [vmem:[#allocation7 + $0x998] sm:$0xff] }
 0x36e   :  { %2176 = vmatpush2.msra.mxu0 %v4172_v14  ;;  %v4233_v14 = vld [vmem:[#allocation7 + $0x938] sm:$0xff] }
 0x36f   :  { %2177 = vmatprep.subr.mxu0 %v4173_v15  ;;  %v4234_v15 = vld [vmem:[#allocation7 + $0x930] sm:$0xff] }
 0x370   :  { %2178 = vmatpush2.msra.mxu0 %v4174_v16  ;;  %v4235_v16 = vld [vmem:[#allocation7 + $0x8d0] sm:$0xff] }
 0x371   :  { %2179 = vmatprep.subr.mxu0 %v4175_v17  ;;  %v4236_v17 = vld [vmem:[#allocation7 + $0x8c8] sm:$0xff] }
 0x372   :  { %2180 = vmatpush2.msra.mxu0 %v4176_v18  ;;  %v3167_v18 = vld [vmem:[#allocation13] ss:$0 sm:$0xff] }
 0x373   :  { %2181 = vmatprep.subr.mxu0 %v4177_v9  ;;  %v4237_v9 = vld [vmem:[#allocation7 + $0x868] sm:$0xff] }
 0x374   :  { %2182 = vmatpush2.msra.mxu0 %v4178_v19  ;;  %v4238_v19 = vld [vmem:[#allocation7 + $0x860] sm:$0xff] }
 0x375   :  { %2183 = vmatprep.subr.mxu0 %v4179_v60 }
 0x376   :  { %2184 = vmatpush2.msra.mxu0 %v4180_v20  ;;  %v4239_v20 = vld [vmem:[#allocation7 + $0x800] sm:$0xff] }
 0x377   :  { %2185 = vmatprep.subr.mxu0 %v4181_v22 }
 0x378   :  { %2186 = vmatpush2.msra.mxu0 %v4182_v23  ;;  %v4240_v23 = vld [vmem:[#allocation7 + $0x7f8] sm:$0xff] }
 0x379   :  { %2188 = vmatmul.mubr.f32.vlgmr.msra.gmra.mxu0 %v5119_v63  ;;  %2265 = vmatprep.subr.mxu0 %v4183_v24 }
 0x37a   :  { %2266 = vmatpush1.msra.mxu0 %v4184_v25  ;;  %2329 = vmatprep.mubr.f32.mxu0 %v5116_v21  ;;  %v4241_v25 = vld [vmem:[#allocation7 + $0x798] sm:$0xff] }
 0x37b   :  { %2267 = vmatprep.subr.mxu0 %v4185_v26 }
 0x37c   :  { %2268 = vmatpush1.msra.mxu0 %v4186_v27  ;;  %v4242_v27 = vld [vmem:[#allocation7 + $0x790] sm:$0xff] }
 0x37d   :  { %2269 = vmatprep.subr.mxu0 %v4187_v28  ;;  %v4243_v28 = vld [vmem:[#allocation7 + $0x730] sm:$0xff] }
 0x37e   :  { %2270 = vmatpush1.msra.mxu0 %v4188_v29  ;;  %v4244_v29 = vld [vmem:[#allocation7 + $0x728] sm:$0xff] }
 0x37f   :  { %2271 = vmatprep.subr.mxu0 %v4189_v30  ;;  %v4245_v30 = vld [vmem:[#allocation7 + $0x628] sm:$0xff] }
 0x380   :  { %2272 = vmatpush1.msra.mxu0 %v4190_v31  ;;  %v4246_v31 = vld [vmem:[#allocation7 + $0x5c8] sm:$0xff] }
 0x381   :  { %2273 = vmatprep.subr.mxu0 %v4191_v32  ;;  %v4247_v32 = vld [vmem:[#allocation7 + $0x6c8] sm:$0xff] }
 0x382   :  { %2274 = vmatpush1.msra.mxu0 %v4192_v33  ;;  %v4248_v33 = vld [vmem:[#allocation7 + $0x5c0] sm:$0xff] }
 0x383   :  { %2275 = vmatprep.subr.mxu0 %v4193_v34  ;;  %v4249_v34 = vld [vmem:[#allocation7 + $0x6c0] sm:$0xff] }
 0x384   :  { %2276 = vmatpush1.msra.mxu0 %v4194_v35  ;;  %v4250_v35 = vld [vmem:[#allocation7 + $0x560] sm:$0xff] }
 0x385   :  { %2277 = vmatprep.subr.mxu0 %v4195_v36  ;;  %v4251_v36 = vld [vmem:[#allocation7 + $0x558] sm:$0xff] }
 0x386   :  { %2278 = vmatpush1.msra.mxu0 %v4196_v37  ;;  %v4252_v37 = vld [vmem:[#allocation7 + $0xcf8] sm:$0xff] }
 0x387   :  { %2279 = vmatprep.subr.mxu0 %v4197_v38  ;;  %v4253_v38 = vld [vmem:[#allocation7 + $0x4f8] sm:$0xff] }
 0x388   :  { %2280 = vmatpush1.msra.mxu0 %v4198_v39  ;;  %v4254_v39 = vld [vmem:[#allocation7 + $0x678] sm:$0xff] }
 0x389   :  { %2281 = vmatprep.subr.mxu0 %v4199_v40  ;;  %v4255_v40 = vld [vmem:[#allocation7 + $0x4f0] sm:$0xff] }
 0x38a   :  { %2282 = vmatpush1.msra.mxu0 %v4200_v41  ;;  %v4256_v41 = vld [vmem:[#allocation7 + $0xc90] sm:$0xff] }
 0x38b   :  { %2283 = vmatprep.subr.mxu0 %v4201_v42  ;;  %v4257_v42 = vld [vmem:[#allocation7 + $0x490] sm:$0xff] }
 0x38c   :  { %2284 = vmatpush1.msra.mxu0 %v4202_v43  ;;  %v4258_v43 = vld [vmem:[#allocation7 + $0x610] sm:$0xff] }
 0x38d   :  { %2285 = vmatprep.subr.mxu0 %v4203_v44  ;;  %v4259_v44 = vld [vmem:[#allocation7 + $0x488] sm:$0xff] }
 0x38e   :  { %2286 = vmatpush1.msra.mxu0 %v4204_v45  ;;  %v4260_v45 = vld [vmem:[#allocation7 + $0xc28] sm:$0xff] }
 0x38f   :  { %2287 = vmatprep.subr.mxu0 %v4205_v46  ;;  %v4261_v46 = vld [vmem:[#allocation7 + $0x428] sm:$0xff] }
 0x390   :  { %2288 = vmatpush1.msra.mxu0 %v4206_v47  ;;  %v4262_v47 = vld [vmem:[#allocation7 + $0x5a8] sm:$0xff] }
 0x391   :  { %2289 = vmatprep.subr.mxu0 %v4207_v48  ;;  %v4263_v48 = vld [vmem:[#allocation7 + $0x420] sm:$0xff] }
 0x392   :  { %2290 = vmatpush1.msra.mxu0 %v4208_v49  ;;  %v4264_v49 = vld [vmem:[#allocation7 + $0xbc0] sm:$0xff] }
 0x393   :  { %2291 = vmatprep.subr.mxu0 %v4209_v50  ;;  %v4265_v50 = vld [vmem:[#allocation7 + $0x3c0] sm:$0xff] }
 0x394   :  { %2292 = vmatpush1.msra.mxu0 %v4210_v51  ;;  %v4266_v51 = vld [vmem:[#allocation7 + $0x540] sm:$0xff] }
 0x395   :  { %2293 = vmatprep.subr.mxu0 %v4211_v52  ;;  %v4267_v52 = vld [vmem:[#allocation7 + $0x3b8] sm:$0xff] }
 0x396   :  { %2294 = vmatpush1.msra.mxu0 %v4212_v53  ;;  %v4268_v53 = vld [vmem:[#allocation7 + $0xb58] sm:$0xff] }
 0x397   :  { %2295 = vmatprep.subr.mxu0 %v4213_v55  ;;  %v4269_v55 = vld [vmem:[#allocation7 + $0x358] sm:$0xff] }
 0x398   :  { %2296 = vmatpush1.msra.mxu0 %v4214_v56  ;;  %v4270_v56 = vld [vmem:[#allocation7 + $0x4d8] sm:$0xff] }
 0x399   :  { %2297 = vmatprep.subr.mxu0 %v4215_v57  ;;  %v4271_v57 = vld [vmem:[#allocation7 + $0x350] sm:$0xff] }
 0x39a   :  { %2298 = vmatpush2.msra.mxu0 %v4216_v58  ;;  %v4272_v58 = vld [vmem:[#allocation7 + $0xaf0] sm:$0xff] }
 0x39b   :  { %2299 = vmatprep.subr.mxu0 %v4217_v59  ;;  %v4273_v59 = vld [vmem:[#allocation7 + $0x2f0] sm:$0xff] }
 0x39c   :  { %2300 = vmatpush2.msra.mxu0 %v4218_v61  ;;  %v4274_v61 = vld [vmem:[#allocation7 + $0x470] sm:$0xff] }
 0x39d   :  { %2301 = vmatprep.subr.mxu0 %v4219_v62  ;;  %v4275_v62 = vld [vmem:[#allocation7 + $0x2e8] sm:$0xff] }
 0x39e   :  { %2302 = vmatpush2.msra.mxu0 %v4220_v0  ;;  %v4276_v0 = vld [vmem:[#allocation7 + $0xa88] sm:$0xff] }
 0x39f   :  { %2303 = vmatprep.subr.mxu0 %v4221_v1  ;;  %v4277_v1 = vld [vmem:[#allocation7 + $0x288] sm:$0xff] }
 0x3a0   :  { %2304 = vmatpush2.msra.mxu0 %v4222_v2  ;;  %v4278_v2 = vld [vmem:[#allocation7 + $0x408] sm:$0xff] }
 0x3a1   :  { %2305 = vmatprep.subr.mxu0 %v4223_v3  ;;  %v4279_v3 = vld [vmem:[#allocation7 + $0x280] sm:$0xff] }
 0x3a2   :  { %2306 = vmatpush2.msra.mxu0 %v4224_v4  ;;  %v4280_v4 = vld [vmem:[#allocation7 + $0xa20] sm:$0xff] }
 0x3a3   :  { %2307 = vmatprep.subr.mxu0 %v4225_v5  ;;  %v4281_v5 = vld [vmem:[#allocation7 + $0x220] sm:$0xff] }
 0x3a4   :  { %2308 = vmatpush2.msra.mxu0 %v4226_v6  ;;  %v4282_v6 = vld [vmem:[#allocation7 + $0x3a0] sm:$0xff] }
 0x3a5   :  { %2309 = vmatprep.subr.mxu0 %v4227_v7  ;;  %v4283_v7 = vld [vmem:[#allocation7 + $0x218] sm:$0xff] }
 0x3a6   :  { %2310 = vmatpush2.msra.mxu0 %v4228_v8  ;;  %v4284_v8 = vld [vmem:[#allocation7 + $0x9b8] sm:$0xff] }
 0x3a7   :  { %2311 = vmatprep.subr.mxu0 %v4229_v10  ;;  %v4285_v10 = vld [vmem:[#allocation7 + $0x1b8] sm:$0xff] }
 0x3a8   :  { %2312 = vmatpush2.msra.mxu0 %v4230_v11  ;;  %v4286_v11 = vld [vmem:[#allocation7 + $0x338] sm:$0xff] }
 0x3a9   :  { %2313 = vmatprep.subr.mxu0 %v4231_v12  ;;  %v4287_v12 = vld [vmem:[#allocation7 + $0x1b0] sm:$0xff] }
 0x3aa   :  { %2314 = vmatpush2.msra.mxu0 %v4232_v13  ;;  %v4288_v13 = vld [vmem:[#allocation7 + $0x950] sm:$0xff] }
 0x3ab   :  { %2315 = vmatprep.subr.mxu0 %v4233_v14  ;;  %v4289_v14 = vld [vmem:[#allocation7 + $0x150] sm:$0xff] }
 0x3ac   :  { %2316 = vmatpush2.msra.mxu0 %v4234_v15  ;;  %v4290_v15 = vld [vmem:[#allocation7 + $0x2d0] sm:$0xff] }
 0x3ad   :  { %2317 = vmatprep.subr.mxu0 %v4235_v16  ;;  %v4291_v16 = vld [vmem:[#allocation7 + $0x148] sm:$0xff] }
 0x3ae   :  { %2318 = vmatpush2.msra.mxu0 %v4236_v17  ;;  %v4292_v17 = vld [vmem:[#allocation7 + $0x8e8] sm:$0xff] }
 0x3af   :  { %2319 = vmatprep.subr.mxu0 %v4237_v9  ;;  %v4294_v9 = vld [vmem:[#allocation7 + $0x268] sm:$0xff] }
 0x3b0   :  { %2320 = vmatpush2.msra.mxu0 %v4238_v19  ;;  %v4295_v19 = vld [vmem:[#allocation7 + $0xe0] sm:$0xff] }
 0x3b1   :  { %2321 = vmatprep.subr.mxu0 %v4239_v20  ;;  %v4297_v20 = vld [vmem:[#allocation7 + $0x80] sm:$0xff] }
 0x3b2   :  { %2322 = vmatpush2.msra.mxu0 %v4240_v23  ;;  %v4299_v23 = vld [vmem:[#allocation7 + $0x78] sm:$0xff] }
 0x3b3   :  { %2323 = vmatprep.subr.mxu0 %v4241_v25  ;;  %v4301_v25 = vld [vmem:[#allocation7 + $0x18] sm:$0xff] }
 0x3b4   :  { %2324 = vmatpush2.msra.mxu0 %v4242_v27  ;;  %v4303_v27 = vld [vmem:[#allocation7 + $0x10] sm:$0xff] }
 0x3b5   :  { %2325 = vmatprep.subr.mxu0 %v4243_v28  ;;  %v4304_v28 = vld [vmem:[#allocation7 + $0x7b0] sm:$0xff] }
 0x3b6   :  { %2326 = vmatpush2.msra.mxu0 %v4244_v29  ;;  %v4305_v29 = vld [vmem:[#allocation7 + $0xcb0] sm:$0xff] }
 0x3b7   :  { %2327 = vmatprep.subr.mxu0 %v4247_v32  ;;  %v4308_v32 = vld [vmem:[#allocation7 + $0x748] sm:$0xff] }
 0x3b8   :  { %2328 = vmatpush2.msra.mxu0 %v4249_v34  ;;  %v4310_v34 = vld [vmem:[#allocation7 + $0xc8] sm:$0xff] }
 0x3b9   :  { %v1887_v60 = vpop.f32.mrf.mxu0  ;;  %2330 = vmatmul.mubr.f32.vlgmr.msra.gmra.mxu0 %v5119_v63  ;;  %3465 = vmatprep.subr.mxu0 %v4252_v37  ;;  %v4313_v37 = vld [vmem:[#allocation7 + $0xbe0] sm:$0xff] }
 0x3ba   :  { %v1888_v22 = vadd.f32 %v3167_v18, %v1887_v60  ;;  %3466 = vmatpush3.msra.mxu0 %v4254_v39  ;;  %v4293_v18 = vld [vmem:[#allocation7 + $0xe8] sm:$0xff]  ;;  %v4296_v60 = vld [vmem:[#allocation7 + $0x880] sm:$0xff]  ;;  %v4315_v39 = vld [vmem:[#allocation7 + $0xbd8] sm:$0xff]  ;;  %2471 = vmatprep.mubr.f32.mxu0 %v5116_v21 }
 0x3bb   :  { %v3830_v24 = vpop.f32.mrf.mxu0  ;;  %3467 = vmatprep.subr.mxu0 %v4256_v41  ;;  %v4317_v41 = vld [vmem:[#allocation7 + $0xb70] sm:$0xff] }
 0x3bc   :  { %v1891_v26 = vmax.f32 %v1888_v22, 0.0  ;;  %3468 = vmatpush3.msra.mxu0 %v4258_v43  ;;  %v4298_v22 = vld [vmem:[#allocation7 + $0x200] sm:$0xff]  ;;  %v4300_v24 = vld [vmem:[#allocation7 + $0x818] sm:$0xff]  ;;  %v4319_v43 = vld [vmem:[#allocation7 + $0xb10] sm:$0xff] }
 0x3bd   :  { %3469 = vmatprep.subr.mxu0 %v4260_v45  ;;  %v4321_v45 = vld [vmem:[#allocation7 + $0xb08] sm:$0xff] }
 0x3be   :  { %3864 = vmatmul.mubr.f32.vlgmr.msra.gmra.mxu1 %v1891_v26  ;;  %3470 = vmatpush3.msra.mxu0 %v4262_v47  ;;  %v4302_v26 = vld [vmem:[#allocation7 + $0x198] sm:$0xff]  ;;  %v4323_v47 = vld [vmem:[#allocation7 + $0xaa8] sm:$0xff] }
 0x3bf   :  { %2053 = vmatpush1.msra.mxu1 %v4245_v30  ;;  %2116 = vmatprep.mubr.f32.mxu1 %v5116_v21  ;;  %v4306_v30 = vld [vmem:[#allocation7 + $0x130] sm:$0xff] }
 0x3c0   :  { %2054 = vmatprep.subr.mxu1 %v4246_v31  ;;  %3471 = vmatprep.subr.mxu0 %v4264_v49  ;;  %v4307_v31 = vld [vmem:[#allocation7 + $0xca8] sm:$0xff]  ;;  %v4325_v49 = vld [vmem:[#allocation7 + $0xaa0] sm:$0xff] }
 0x3c1   :  { %2055 = vmatpush1.msra.mxu1 %v4248_v33  ;;  %3472 = vmatpush3.msra.mxu0 %v4266_v51  ;;  %v4309_v33 = vld [vmem:[#allocation7 + $0xc48] sm:$0xff]  ;;  %v4327_v51 = vld [vmem:[#allocation7 + $0xa40] sm:$0xff] }
 0x3c2   :  { %2056 = vmatprep.subr.mxu1 %v4250_v35  ;;  %3473 = vmatprep.subr.mxu0 %v4268_v53  ;;  %v4311_v35 = vld [vmem:[#allocation7 + $0xc40] sm:$0xff]  ;;  %v4329_v53 = vld [vmem:[#allocation7 + $0xa38] sm:$0xff] }
 0x3c3   :  { %2057 = vmatpush1.msra.mxu1 %v4251_v36  ;;  %3474 = vmatpush3.msra.mxu0 %v4270_v56  ;;  %v4312_v36 = vld [vmem:[#allocation7 + $0x6e0] sm:$0xff]  ;;  %v4331_v56 = vld [vmem:[#allocation7 + $0x9d8] sm:$0xff] }
 0x3c4   :  { %2058 = vmatprep.subr.mxu1 %v4253_v38  ;;  %3475 = vmatprep.subr.mxu0 %v4272_v58  ;;  %v4314_v38 = vld [vmem:[#allocation7 + $0x60] sm:$0xff]  ;;  %v4333_v58 = vld [vmem:[#allocation7 + $0x9d0] sm:$0xff] }
 0x3c5   :  { %2059 = vmatpush1.msra.mxu1 %v4255_v40  ;;  %3476 = vmatpush3.msra.mxu0 %v4274_v61  ;;  %v4316_v40 = vld [vmem:[#allocation7 + $0xb78] sm:$0xff]  ;;  %v4335_v61 = vld [vmem:[#allocation7 + $0x970] sm:$0xff] }
 0x3c6   :  { %2060 = vmatprep.subr.mxu1 %v4257_v42  ;;  %3477 = vmatprep.subr.mxu0 %v4276_v0  ;;  %v4318_v42 = vld [vmem:[#allocation8 + $0x1f8] sm:$0xff]  ;;  %v4337_v0 = vld [vmem:[#allocation7 + $0x968] sm:$0xff] }
 0x3c7   :  { %2061 = vmatpush1.msra.mxu1 %v4259_v44  ;;  %3478 = vmatpush3.msra.mxu0 %v4278_v2  ;;  %v4320_v44 = vld [vmem:[#allocation8 + $0x178] sm:$0xff]  ;;  %v4339_v2 = vld [vmem:[#allocation7 + $0x908] sm:$0xff] }
 0x3c8   :  { %2062 = vmatprep.subr.mxu1 %v4261_v46  ;;  %3479 = vmatprep.subr.mxu0 %v4280_v4  ;;  %v4322_v46 = vld [vmem:[#allocation8 + $0x1f0] sm:$0xff]  ;;  %v4341_v4 = vld [vmem:[#allocation7 + $0x900] sm:$0xff] }
 0x3c9   :  { %2063 = vmatpush1.msra.mxu1 %v4263_v48  ;;  %3480 = vmatpush3.msra.mxu0 %v4282_v6  ;;  %v4324_v48 = vld [vmem:[#allocation8 + $0x170] sm:$0xff]  ;;  %v4343_v6 = vld [vmem:[#allocation7 + $0x8a0] sm:$0xff] }
 0x3ca   :  { %2064 = vmatprep.subr.mxu1 %v4265_v50  ;;  %3481 = vmatprep.subr.mxu0 %v4284_v8  ;;  %v4326_v50 = vld [vmem:[#allocation8 + $0x1e8] sm:$0xff]  ;;  %v4345_v8 = vld [vmem:[#allocation7 + $0x898] sm:$0xff] }
 0x3cb   :  { %2065 = vmatpush1.msra.mxu1 %v4267_v52  ;;  %3482 = vmatpush3.msra.mxu0 %v4286_v11  ;;  %v4328_v52 = vld [vmem:[#allocation8 + $0x168] sm:$0xff]  ;;  %v4347_v11 = vld [vmem:[#allocation7 + $0x838] sm:$0xff] }
 0x3cc   :  { %2066 = vmatprep.subr.mxu1 %v4269_v55  ;;  %3483 = vmatprep.subr.mxu0 %v4288_v13  ;;  %v4330_v55 = vld [vmem:[#allocation8 + $0x1e0] sm:$0xff]  ;;  %v4349_v13 = vld [vmem:[#allocation7 + $0x830] sm:$0xff] }
 0x3cd   :  { %2067 = vmatpush1.msra.mxu1 %v4271_v57  ;;  %3484 = vmatpush3.msra.mxu0 %v4290_v15  ;;  %v4332_v57 = vld [vmem:[#allocation8 + $0x160] sm:$0xff]  ;;  %v4351_v15 = vld [vmem:[#allocation7 + $0x7d0] sm:$0xff] }
 0x3ce   :  { %2068 = vmatprep.subr.mxu1 %v4273_v59  ;;  %3485 = vmatprep.subr.mxu0 %v4292_v17  ;;  %v4334_v59 = vld [vmem:[#allocation8 + $0x1d8] sm:$0xff]  ;;  %v4353_v17 = vld [vmem:[#allocation7 + $0x7c8] sm:$0xff] }
 0x3cf   :  { %2069 = vmatpush1.msra.mxu1 %v4275_v62  ;;  %3486 = vmatpush3.msra.mxu0 %v4294_v9  ;;  %v4336_v62 = vld [vmem:[#allocation8 + $0x158] sm:$0xff]  ;;  %v4355_v9 = vld [vmem:[#allocation7 + $0x768] sm:$0xff] }
 0x3d0   :  { %2070 = vmatprep.subr.mxu1 %v4277_v1  ;;  %3487 = vmatprep.subr.mxu0 %v4296_v60  ;;  %v4338_v1 = vld [vmem:[#allocation8 + $0x1d0] sm:$0xff]  ;;  %v4357_v60 = vld [vmem:[#allocation7 + $0x760] sm:$0xff] }
 0x3d1   :  { %2071 = vmatpush1.msra.mxu1 %v4279_v3  ;;  %3488 = vmatpush3.msra.mxu0 %v4298_v22  ;;  %v4340_v3 = vld [vmem:[#allocation8 + $0x150] sm:$0xff]  ;;  %v4359_v22 = vld [vmem:[#allocation7 + $0x700] sm:$0xff] }
 0x3d2   :  { %2072 = vmatprep.subr.mxu1 %v4281_v5  ;;  %3489 = vmatprep.subr.mxu0 %v4300_v24  ;;  %v4342_v5 = vld [vmem:[#allocation8 + $0x1c8] sm:$0xff]  ;;  %v4361_v24 = vld [vmem:[#allocation7 + $0x6f8] sm:$0xff] }
 0x3d3   :  { %2073 = vmatpush1.msra.mxu1 %v4283_v7  ;;  %3490 = vmatpush3.msra.mxu0 %v4302_v26  ;;  %v4344_v7 = vld [vmem:[#allocation8 + $0x148] sm:$0xff]  ;;  %v4363_v26 = vld [vmem:[#allocation7 + $0x698] sm:$0xff] }
 0x3d4   :  { %2074 = vmatprep.subr.mxu1 %v4285_v10  ;;  %3491 = vmatprep.subr.mxu0 %v4304_v28  ;;  %v4346_v10 = vld [vmem:[#allocation8 + $0x1c0] sm:$0xff]  ;;  %v4365_v28 = vld [vmem:[#allocation7 + $0x690] sm:$0xff] }
 0x3d5   :  { %2075 = vmatpush1.msra.mxu1 %v4287_v12  ;;  %3492 = vmatpush3.msra.mxu0 %v4306_v30  ;;  %v4348_v12 = vld [vmem:[#allocation8 + $0x140] sm:$0xff]  ;;  %v4367_v30 = vld [vmem:[#allocation7 + $0x650] sm:$0xff] }
 0x3d6   :  { %2076 = vmatprep.subr.mxu1 %v4289_v14  ;;  %3493 = vmatprep.subr.mxu0 %v4308_v32  ;;  %v4350_v14 = vld [vmem:[#allocation8 + $0x1b8] sm:$0xff]  ;;  %v4369_v32 = vld [vmem:[#allocation7 + $0x5e8] sm:$0xff] }
 0x3d7   :  { %2077 = vmatpush1.msra.mxu1 %v4291_v16  ;;  %3494 = vmatpush3.msra.mxu0 %v4310_v34  ;;  %v4352_v16 = vld [vmem:[#allocation8 + $0x138] sm:$0xff]  ;;  %v4371_v34 = vld [vmem:[#allocation7 + $0x5e0] sm:$0xff] }
 0x3d8   :  { %2078 = vmatprep.subr.mxu1 %v4293_v18  ;;  %3495 = vmatprep.subr.mxu0 %v4312_v36  ;;  %v4354_v18 = vld [vmem:[#allocation8 + $0x1b0] sm:$0xff]  ;;  %v4373_v36 = vld [vmem:[#allocation7 + $0x580] sm:$0xff] }
 0x3d9   :  { %2079 = vmatpush1.msra.mxu1 %v4295_v19  ;;  %3496 = vmatpush3.msra.mxu0 %v4314_v38  ;;  %v4356_v19 = vld [vmem:[#allocation8 + $0x130] sm:$0xff]  ;;  %v4375_v38 = vld [vmem:[#allocation7 + $0x578] sm:$0xff] }
 0x3da   :  { %2080 = vmatprep.subr.mxu1 %v4297_v20  ;;  %2472 = vmatmul.mubr.f32.vlgmr.msra.gmra.mxu0 %v5119_v63  ;;  %v4358_v20 = vld [vmem:[#allocation8 + $0x1a8] sm:$0xff] }
 0x3db   :  { %2081 = vmatpush1.msra.mxu1 %v4299_v23  ;;  %3535 = vmatprep.subr.mxu0 %v4318_v42  ;;  %v4360_v23 = vld [vmem:[#allocation8 + $0x128] sm:$0xff]  ;;  %v4379_v42 = vld [vmem:[#allocation7 + $0x510] sm:$0xff] }
 0x3dc   :  { %2082 = vmatprep.subr.mxu1 %v4301_v25  ;;  %3536 = vmatpush3.msra.mxu0 %v4320_v44  ;;  %v4362_v25 = vld [vmem:[#allocation8 + $0x1a0] sm:$0xff]  ;;  %v4381_v44 = vld [vmem:[#allocation7 + $0x4b0] sm:$0xff] }
 0x3dd   :  { %2083 = vmatpush1.msra.mxu1 %v4303_v27  ;;  %3537 = vmatprep.subr.mxu0 %v4322_v46  ;;  %v4364_v27 = vld [vmem:[#allocation8 + $0x120] sm:$0xff]  ;;  %v4383_v46 = vld [vmem:[#allocation7 + $0x4a8] sm:$0xff] }
 0x3de   :  { %2084 = vmatprep.subr.mxu1 %v4305_v29  ;;  %3538 = vmatpush3.msra.mxu0 %v4324_v48  ;;  %v4366_v29 = vld [vmem:[#allocation8 + $0x198] sm:$0xff]  ;;  %v4385_v48 = vld [vmem:[#allocation7 + $0x448] sm:$0xff] }
 0x3df   :  { %2085 = vmatpush2.msra.mxu1 %v4307_v31  ;;  %3539 = vmatprep.subr.mxu0 %v4326_v50  ;;  %v4368_v31 = vld [vmem:[#allocation7 + $0x648] sm:$0xff]  ;;  %v4387_v50 = vld [vmem:[#allocation7 + $0x3e0] sm:$0xff] }
 0x3e0   :  { %2086 = vmatprep.subr.mxu1 %v4309_v33  ;;  %3540 = vmatpush3.msra.mxu0 %v4328_v52  ;;  %v4370_v33 = vld [vmem:[#allocation8 + $0x118] sm:$0xff] }
 0x3e1   :  { %2087 = vmatpush2.msra.mxu1 %v4311_v35  ;;  %3541 = vmatprep.subr.mxu0 %v4330_v55  ;;  %v4372_v35 = vld [vmem:[#allocation8 + $0x190] sm:$0xff]  ;;  %v4389_v52 = vld [vmem:[#allocation7 + $0x378] sm:$0xff] }
 0x3e2   :  { %2088 = vmatprep.subr.mxu1 %v4313_v37  ;;  %3542 = vmatpush3.msra.mxu0 %v4332_v57  ;;  %v4374_v37 = vld [vmem:[#allocation8 + $0x110] sm:$0xff]  ;;  %v4393_v57 = vld [vmem:[#allocation7 + $0x2a8] sm:$0xff] }
 0x3e3   :  { %2089 = vmatpush2.msra.mxu1 %v4315_v39  ;;  %3543 = vmatprep.subr.mxu0 %v4334_v59  ;;  %v4376_v39 = vld [vmem:[#allocation8 + $0x188] sm:$0xff]  ;;  %v4391_v55 = vld [vmem:[#allocation7 + $0x310] sm:$0xff]  ;;  %v4395_v59 = vld [vmem:[#allocation7 + $0x240] sm:$0xff] }
 0x3e4   :  { %2090 = vmatprep.subr.mxu1 %v4316_v40  ;;  %3544 = vmatpush3.msra.mxu0 %v4336_v62  ;;  %v4377_v40 = vld [vmem:[#allocation7 + $0x518] sm:$0xff] }
 0x3e5   :  { %2091 = vmatpush2.msra.mxu1 %v4317_v41  ;;  %3545 = vmatprep.subr.mxu0 %v4338_v1  ;;  %v4378_v41 = vld [vmem:[#allocation8 + $0x108] sm:$0xff]  ;;  %v4397_v62 = vld [vmem:[#allocation7 + $0x1d8] sm:$0xff]  ;;  %v4399_v1 = vld [vmem:[#allocation7 + $0x170] sm:$0xff] }
 0x3e6   :  { %2092 = vmatprep.subr.mxu1 %v4319_v43  ;;  %3546 = vmatpush3.msra.mxu0 %v4340_v3  ;;  %v4380_v43 = vld [vmem:[#allocation8 + $0x180] sm:$0xff]  ;;  %v4401_v3 = vld [vmem:[#allocation7 + $0x108] sm:$0xff] }
 0x3e7   :  { %2093 = vmatpush2.msra.mxu1 %v4321_v45  ;;  %3547 = vmatprep.subr.mxu0 %v4342_v5  ;;  %v4382_v45 = vld [vmem:[#allocation8 + $0x100] sm:$0xff] }
 0x3e8   :  { %2094 = vmatprep.subr.mxu1 %v4323_v47  ;;  %3548 = vmatpush3.msra.mxu0 %v4344_v7  ;;  %v4384_v47 = vld [vmem:[#allocation8 + $0x3f8] sm:$0xff]  ;;  %v4403_v5 = vld [vmem:[#allocation7 + $0xa0] sm:$0xff] }
 0x3e9   :  { %2095 = vmatpush2.msra.mxu1 %v4325_v49  ;;  %3549 = vmatprep.subr.mxu0 %v4346_v10  ;;  %v4386_v49 = vld [vmem:[#allocation7 + $0x440] sm:$0xff]  ;;  %v4405_v7 = vld [vmem:[#allocation7 + $0x38] sm:$0xff]  ;;  %v4407_v10 = vld [vmem:[#allocation7 + $0xcd0] sm:$0xff] }
 0x3ea   :  { %2096 = vmatprep.subr.mxu1 %v4327_v51  ;;  %3550 = vmatpush3.msra.mxu0 %v4348_v12  ;;  %v4388_v51 = vld [vmem:[#allocation7 + $0x3d8] sm:$0xff]  ;;  %v4409_v12 = vld [vmem:[#allocation7 + $0xc68] sm:$0xff] }
 0x3eb   :  { %2097 = vmatpush2.msra.mxu1 %v4329_v53  ;;  %3551 = vmatprep.subr.mxu0 %v4350_v14  ;;  %v4390_v53 = vld [vmem:[#allocation7 + $0x370] sm:$0xff]  ;;  %v4411_v14 = vld [vmem:[#allocation7 + $0xc00] sm:$0xff] }
 0x3ec   :  { %2098 = vmatprep.subr.mxu1 %v4331_v56  ;;  %3552 = vmatpush3.msra.mxu0 %v4352_v16  ;;  %v4392_v56 = vld [vmem:[#allocation7 + $0x308] sm:$0xff]  ;;  %v4413_v16 = vld [vmem:[#allocation7 + $0xb98] sm:$0xff] }
 0x3ed   :  { %2099 = vmatpush2.msra.mxu1 %v4333_v58  ;;  %3553 = vmatprep.subr.mxu0 %v4354_v18  ;;  %v4394_v58 = vld [vmem:[#allocation7 + $0x2a0] sm:$0xff]  ;;  %v4415_v18 = vld [vmem:[#allocation7 + $0xb30] sm:$0xff] }
 0x3ee   :  { %2100 = vmatprep.subr.mxu1 %v4335_v61  ;;  %3554 = vmatpush3.msra.mxu0 %v4356_v19  ;;  %v4396_v61 = vld [vmem:[#allocation7 + $0x238] sm:$0xff]  ;;  %v4417_v19 = vld [vmem:[#allocation7 + $0xac8] sm:$0xff] }
 0x3ef   :  { %2101 = vmatpush2.msra.mxu1 %v4337_v0  ;;  %3555 = vmatprep.subr.mxu0 %v4358_v20  ;;  %v4398_v0 = vld [vmem:[#allocation7 + $0x1d0] sm:$0xff]  ;;  %v4419_v20 = vld [vmem:[#allocation7 + $0xa60] sm:$0xff] }
 0x3f0   :  { %2102 = vmatprep.subr.mxu1 %v4339_v2  ;;  %3556 = vmatpush3.msra.mxu0 %v4360_v23  ;;  %v4400_v2 = vld [vmem:[#allocation7 + $0x168] sm:$0xff]  ;;  %v4421_v23 = vld [vmem:[#allocation7 + $0x9f8] sm:$0xff] }
 0x3f1   :  { %2103 = vmatpush2.msra.mxu1 %v4341_v4  ;;  %3557 = vmatprep.subr.mxu0 %v4362_v25  ;;  %v4402_v4 = vld [vmem:[#allocation7 + $0x100] sm:$0xff]  ;;  %v4423_v25 = vld [vmem:[#allocation7 + $0x990] sm:$0xff] }
 0x3f2   :  { %2104 = vmatprep.subr.mxu1 %v4343_v6  ;;  %3558 = vmatpush3.msra.mxu0 %v4364_v27  ;;  %v4404_v6 = vld [vmem:[#allocation7 + $0x98] sm:$0xff]  ;;  %v4425_v27 = vld [vmem:[#allocation7 + $0x928] sm:$0xff] }
 0x3f3   :  { %2105 = vmatpush2.msra.mxu1 %v4345_v8  ;;  %3559 = vmatprep.subr.mxu0 %v4366_v29  ;;  %v4406_v8 = vld [vmem:[#allocation7 + $0x30] sm:$0xff]  ;;  %v4427_v29 = vld [vmem:[#allocation7 + $0x8c0] sm:$0xff] }
 0x3f4   :  { %2106 = vmatprep.subr.mxu1 %v4347_v11  ;;  %3560 = vmatpush3.msra.mxu0 %v4370_v33  ;;  %v4408_v11 = vld [vmem:[#allocation7 + $0xcc8] sm:$0xff]  ;;  %v4431_v33 = vld [vmem:[#allocation7 + $0x7f0] sm:$0xff] }
 0x3f5   :  { %2107 = vmatpush2.msra.mxu1 %v4349_v13  ;;  %3561 = vmatprep.subr.mxu0 %v4372_v35  ;;  %v4410_v13 = vld [vmem:[#allocation7 + $0xc60] sm:$0xff]  ;;  %v4433_v35 = vld [vmem:[#allocation7 + $0x788] sm:$0xff] }
 0x3f6   :  { %2108 = vmatprep.subr.mxu1 %v4351_v15  ;;  %3562 = vmatpush3.msra.mxu0 %v4374_v37  ;;  %v4412_v15 = vld [vmem:[#allocation7 + $0xbf8] sm:$0xff]  ;;  %v4435_v37 = vld [vmem:[#allocation7 + $0x720] sm:$0xff] }
 0x3f7   :  { %2109 = vmatpush2.msra.mxu1 %v4353_v17  ;;  %3563 = vmatprep.subr.mxu0 %v4376_v39  ;;  %v4414_v17 = vld [vmem:[#allocation7 + $0xb90] sm:$0xff]  ;;  %v4437_v39 = vld [vmem:[#allocation7 + $0x6b8] sm:$0xff] }
 0x3f8   :  { %2110 = vmatprep.subr.mxu1 %v4355_v9  ;;  %3564 = vmatpush3.msra.mxu0 %v4378_v41  ;;  %v4416_v9 = vld [vmem:[#allocation7 + $0xb28] sm:$0xff]  ;;  %v4439_v41 = vld [vmem:[#allocation7 + $0x670] sm:$0xff] }
 0x3f9   :  { %2111 = vmatpush2.msra.mxu1 %v4357_v60  ;;  %3565 = vmatprep.subr.mxu0 %v4380_v43  ;;  %v4418_v60 = vld [vmem:[#allocation7 + $0xac0] sm:$0xff]  ;;  %v4441_v43 = vld [vmem:[#allocation7 + $0x608] sm:$0xff] }
 0x3fa   :  { %2112 = vmatprep.subr.mxu1 %v4359_v22  ;;  %3566 = vmatpush3.msra.mxu0 %v4382_v45  ;;  %v4420_v22 = vld [vmem:[#allocation7 + $0xa58] sm:$0xff]  ;;  %v4443_v45 = vld [vmem:[#allocation7 + $0x5a0] sm:$0xff] }
 0x3fb   :  { %2113 = vmatpush2.msra.mxu1 %v4361_v24  ;;  %3605 = vmatprep.subr.mxu0 %v4384_v47  ;;  %v4422_v24 = vld [vmem:[#allocation7 + $0x9f0] sm:$0xff]  ;;  %v4445_v47 = vld [vmem:[#allocation7 + $0x538] sm:$0xff] }
 0x3fc   :  { %2114 = vmatprep.subr.mxu1 %v4363_v26  ;;  %v4424_v26 = vld [vmem:[#allocation7 + $0x988] sm:$0xff] }
 0x3fd   :  { %2115 = vmatpush2.msra.mxu1 %v4365_v28  ;;  %v4426_v28 = vld [vmem:[#allocation7 + $0x920] sm:$0xff] }
 0x3fe   :  { %2117 = vmatmul.mubr.f32.vlgmr.msra.gmra.mxu1 %v5119_v63  ;;  %2194 = vmatprep.subr.mxu1 %v4367_v30  ;;  %v4428_v30 = vld [vmem:[#allocation7 + $0x8b8] sm:$0xff] }
 0x3ff   :  { %2195 = vmatpush1.msra.mxu1 %v4368_v31  ;;  %2258 = vmatprep.mubr.f32.mxu1 %v5116_v21  ;;  %v4429_v31 = vld [vmem:[#allocation7 + $0x858] sm:$0xff] }
 0x400   :  { %2196 = vmatprep.subr.mxu1 %v4369_v32  ;;  %v4430_v32 = vld [vmem:[#allocation7 + $0x850] sm:$0xff] }
 0x401   :  { %2197 = vmatpush1.msra.mxu1 %v4371_v34  ;;  %v4432_v34 = vld [vmem:[#allocation7 + $0x7e8] sm:$0xff] }
 0x402   :  { %2198 = vmatprep.subr.mxu1 %v4373_v36  ;;  %v4434_v36 = vld [vmem:[#allocation7 + $0x780] sm:$0xff] }
 0x403   :  { %2199 = vmatpush1.msra.mxu1 %v4375_v38  ;;  %v4436_v38 = vld [vmem:[#allocation7 + $0x718] sm:$0xff] }
 0x404   :  { %2200 = vmatprep.subr.mxu1 %v4377_v40  ;;  %v4438_v40 = vld [vmem:[#allocation7 + $0x6b0] sm:$0xff] }
 0x405   :  { %2201 = vmatpush1.msra.mxu1 %v4379_v42  ;;  %v4440_v42 = vld [vmem:[#allocation7 + $0x668] sm:$0xff] }
 0x406   :  { %2202 = vmatprep.subr.mxu1 %v4381_v44  ;;  %v4442_v44 = vld [vmem:[#allocation7 + $0x600] sm:$0xff] }
 0x407   :  { %2203 = vmatpush1.msra.mxu1 %v4383_v46  ;;  %v4444_v46 = vld [vmem:[#allocation7 + $0x598] sm:$0xff] }
 0x408   :  { %2204 = vmatprep.subr.mxu1 %v4385_v48  ;;  %v4446_v48 = vld [vmem:[#allocation7 + $0x530] sm:$0xff] }
 0x409   :  { %2205 = vmatpush1.msra.mxu1 %v4386_v49  ;;  %v4447_v49 = vld [vmem:[#allocation7 + $0x4d0] sm:$0xff] }
 0x40a   :  { %2206 = vmatprep.subr.mxu1 %v4387_v50  ;;  %v4448_v50 = vld [vmem:[#allocation7 + $0x4c8] sm:$0xff] }
 0x40b   :  { %2207 = vmatpush1.msra.mxu1 %v4388_v51  ;;  %v4449_v51 = vld [vmem:[#allocation7 + $0x468] sm:$0xff] }
 0x40c   :  { %2208 = vmatprep.subr.mxu1 %v4389_v52  ;;  %v4450_v52 = vld [vmem:[#allocation7 + $0x460] sm:$0xff] }
 0x40d   :  { %2209 = vmatpush1.msra.mxu1 %v4390_v53  ;;  %v4452_v53 = vld [vmem:[#allocation7 + $0x3f8] sm:$0xff] }
 0x40e   :  { %2210 = vmatprep.subr.mxu1 %v4391_v55  ;;  %v4453_v55 = vld [vmem:[#allocation7 + $0x398] sm:$0xff] }
 0x40f   :  { %2211 = vmatpush1.msra.mxu1 %v4392_v56  ;;  %v4454_v56 = vld [vmem:[#allocation7 + $0x390] sm:$0xff] }
 0x410   :  { %2212 = vmatprep.subr.mxu1 %v4393_v57  ;;  %v4455_v57 = vld [vmem:[#allocation7 + $0x330] sm:$0xff] }
 0x411   :  { %2213 = vmatpush1.msra.mxu1 %v4394_v58  ;;  %v4456_v58 = vld [vmem:[#allocation7 + $0x328] sm:$0xff] }
 0x412   :  { %2214 = vmatprep.subr.mxu1 %v4395_v59  ;;  %v4457_v59 = vld [vmem:[#allocation7 + $0x2c8] sm:$0xff] }
 0x413   :  { %2215 = vmatpush1.msra.mxu1 %v4396_v61  ;;  %v4458_v61 = vld [vmem:[#allocation7 + $0x2c0] sm:$0xff] }
 0x414   :  { %2216 = vmatprep.subr.mxu1 %v4397_v62  ;;  %v4459_v62 = vld [vmem:[#allocation7 + $0x260] sm:$0xff] }
 0x415   :  { %2217 = vmatpush1.msra.mxu1 %v4398_v0  ;;  %v4460_v0 = vld [vmem:[#allocation7 + $0x258] sm:$0xff] }
 0x416   :  { %2218 = vmatprep.subr.mxu1 %v4399_v1  ;;  %v4461_v1 = vld [vmem:[#allocation7 + $0x1f8] sm:$0xff] }
 0x417   :  { %2219 = vmatpush1.msra.mxu1 %v4400_v2  ;;  %v4462_v2 = vld [vmem:[#allocation7 + $0x1f0] sm:$0xff] }
 0x418   :  { %2220 = vmatprep.subr.mxu1 %v4401_v3  ;;  %v4463_v3 = vld [vmem:[#allocation7 + $0x190] sm:$0xff] }
 0x419   :  { %2221 = vmatpush1.msra.mxu1 %v4402_v4  ;;  %v4464_v4 = vld [vmem:[#allocation7 + $0x188] sm:$0xff] }
 0x41a   :  { %2222 = vmatprep.subr.mxu1 %v4403_v5  ;;  %v4465_v5 = vld [vmem:[#allocation7 + $0x128] sm:$0xff] }
 0x41b   :  { %2223 = vmatpush1.msra.mxu1 %v4404_v6  ;;  %v4466_v6 = vld [vmem:[#allocation7 + $0x120] sm:$0xff] }
 0x41c   :  { %2224 = vmatprep.subr.mxu1 %v4405_v7  ;;  %v4467_v7 = vld [vmem:[#allocation7 + $0xc0] sm:$0xff] }
 0x41d   :  { %2225 = vmatpush1.msra.mxu1 %v4406_v8  ;;  %v4468_v8 = vld [vmem:[#allocation7 + $0xb8] sm:$0xff] }
 0x41e   :  { %2226 = vmatprep.subr.mxu1 %v4407_v10  ;;  %v4469_v10 = vld [vmem:[#allocation7 + $0x58] sm:$0xff] }
 0x41f   :  { %2227 = vmatpush2.msra.mxu1 %v4408_v11  ;;  %v4470_v11 = vld [vmem:[#allocation7 + $0x50] sm:$0xff] }
 0x420   :  { %2228 = vmatprep.subr.mxu1 %v4409_v12  ;;  %v4471_v12 = vld [vmem:[#allocation7 + $0xcf0] sm:$0xff] }
 0x421   :  { %2229 = vmatpush2.msra.mxu1 %v4410_v13  ;;  %v4472_v13 = vld [vmem:[#allocation7 + $0xce8] sm:$0xff] }
 0x422   :  { %2230 = vmatprep.subr.mxu1 %v4411_v14  ;;  %v4473_v14 = vld [vmem:[#allocation7 + $0xc88] sm:$0xff] }
 0x423   :  { %2231 = vmatpush2.msra.mxu1 %v4412_v15  ;;  %v4474_v15 = vld [vmem:[#allocation7 + $0xc80] sm:$0xff] }
 0x424   :  { %2232 = vmatprep.subr.mxu1 %v4413_v16  ;;  %v4475_v16 = vld [vmem:[#allocation7 + $0xc20] sm:$0xff] }
 0x425   :  { %2233 = vmatpush2.msra.mxu1 %v4414_v17  ;;  %v4476_v17 = vld [vmem:[#allocation7 + $0xc18] sm:$0xff] }
 0x426   :  { %2234 = vmatprep.subr.mxu1 %v4415_v18  ;;  %v4477_v18 = vld [vmem:[#allocation7 + $0xbb8] sm:$0xff] }
 0x427   :  { %2235 = vmatpush2.msra.mxu1 %v4416_v9  ;;  %v4478_v9 = vld [vmem:[#allocation7 + $0xbb0] sm:$0xff] }
 0x428   :  { %2236 = vmatprep.subr.mxu1 %v4417_v19  ;;  %v4479_v19 = vld [vmem:[#allocation7 + $0xb50] sm:$0xff] }
 0x429   :  { %2237 = vmatpush2.msra.mxu1 %v4418_v60  ;;  %v4480_v60 = vld [vmem:[#allocation7 + $0xb48] sm:$0xff] }
 0x42a   :  { %2238 = vmatprep.subr.mxu1 %v4419_v20  ;;  %v4481_v20 = vld [vmem:[#allocation7 + $0xae8] sm:$0xff] }
 0x42b   :  { %2239 = vmatpush2.msra.mxu1 %v4420_v22  ;;  %v5133_v22 = vpop.f32.mrf.mxu0 }
 0x42c   :  { %2240 = vmatprep.subr.mxu1 %v4421_v23  ;;  %v4482_v23 = vld [vmem:[#allocation7 + $0xae0] sm:$0xff] }
 0x42d   :  { %2241 = vmatpush2.msra.mxu1 %v4422_v24  ;;  %v4483_v24 = vld [vmem:[#allocation7 + $0xa80] sm:$0xff] }
 0x42e   :  { %2242 = vmatprep.subr.mxu1 %v4423_v25  ;;  %v4484_v25 = vld [vmem:[#allocation7 + $0xa78] sm:$0xff] }
 0x42f   :  { %2243 = vmatpush2.msra.mxu1 %v4424_v26  ;;  %v4485_v26 = vld [vmem:[#allocation7 + $0xa18] sm:$0xff] }
 0x430   :  { %2244 = vmatprep.subr.mxu1 %v4425_v27  ;;  %v2049_v27 = vpop.f32.mrf.mxu0 }
 0x431   :  { %2245 = vmatpush2.msra.mxu1 %v4426_v28  ;;  %v4486_v28 = vld [vmem:[#allocation7 + $0xa10] sm:$0xff]  ;;  %4016 = vtanh.f32 %v2049_v27  ;;  %v4539_v27 = vld [vmem:[#allocation8 + $0x2e8] sm:$0xff] }
 0x432   :  { %2246 = vmatprep.subr.mxu1 %v4427_v29  ;;  %v4487_v29 = vld [vmem:[#allocation7 + $0x9b0] sm:$0xff]  ;;  %4018 = vtanh.f32 %v5133_v22  ;;  %v4534_v22 = vld [vmem:[#allocation8] sm:$0xff] }
 0x433   :  { %2247 = vmatpush2.msra.mxu1 %v4428_v30  ;;  %v4488_v30 = vld [vmem:[#allocation7 + $0x9a8] sm:$0xff] }
 0x434   :  { %2248 = vmatprep.subr.mxu1 %v4429_v31  ;;  %v4489_v31 = vld [vmem:[#allocation7 + $0x948] sm:$0xff] }
 0x435   :  { %2249 = vmatpush2.msra.mxu1 %v4430_v32  ;;  %v4490_v32 = vld [vmem:[#allocation7 + $0x940] sm:$0xff] }
 0x436   :  { %2250 = vmatprep.subr.mxu1 %v4431_v33  ;;  %v4491_v33 = vld [vmem:[#allocation7 + $0x8e0] sm:$0xff] }
 0x437   :  { %2251 = vmatpush2.msra.mxu1 %v4432_v34  ;;  %v4492_v34 = vld [vmem:[#allocation7 + $0x8d8] sm:$0xff] }
 0x438   :  { %2252 = vmatprep.subr.mxu1 %v4433_v35  ;;  %v4493_v35 = vld [vmem:[#allocation7 + $0x878] sm:$0xff] }
 0x439   :  { %2253 = vmatpush2.msra.mxu1 %v4434_v36  ;;  %v4494_v36 = vld [vmem:[#allocation7 + $0x870] sm:$0xff] }
 0x43a   :  { %2254 = vmatprep.subr.mxu1 %v4435_v37  ;;  %v4495_v37 = vld [vmem:[#allocation7 + $0x810] sm:$0xff] }
 0x43b   :  { %2255 = vmatpush2.msra.mxu1 %v4436_v38  ;;  %v4496_v38 = vld [vmem:[#allocation7 + $0x808] sm:$0xff] }
 0x43c   :  { %2256 = vmatprep.subr.mxu1 %v4437_v39  ;;  %v4497_v39 = vld [vmem:[#allocation7 + $0x7a8] sm:$0xff] }
 0x43d   :  { %2257 = vmatpush2.msra.mxu1 %v4438_v40  ;;  %v4498_v40 = vld [vmem:[#allocation7 + $0x7a0] sm:$0xff] }
 0x43e   :  { %2259 = vmatmul.mubr.f32.vlgmr.msra.gmra.mxu1 %v5119_v63  ;;  %2336 = vmatprep.subr.mxu1 %v4439_v41  ;;  %v4499_v41 = vld [vmem:[#allocation7 + $0x740] sm:$0xff] }
 0x43f   :  { %2337 = vmatpush1.msra.mxu1 %v4440_v42  ;;  %2400 = vmatprep.mubr.f32.mxu1 %v5116_v21  ;;  %v4451_v21 = vld [vmem:[#allocation7 + $0x400] sm:$0xff]  ;;  %v4500_v42 = vld [vmem:[#allocation7 + $0x738] sm:$0xff] }
 0x440   :  { %2338 = vmatprep.subr.mxu1 %v4441_v43  ;;  %v4017_v43 = vpop.eup %4016 }
 0x441   :  { %2339 = vmatpush1.msra.mxu1 %v4442_v44  ;;  %v4501_v44 = vld [vmem:[#allocation7 + $0x6d8] sm:$0xff] }
 0x442   :  { %2340 = vmatprep.subr.mxu1 %v4443_v45  ;;  %v5135_v45 = vld [vmem:[#allocation16] ss:$0 sm:$0xff] }
 0x443   :  { %2341 = vmatpush1.msra.mxu1 %v4444_v46  ;;  %v4502_v46 = vld [vmem:[#allocation7 + $0x6d0] sm:$0xff] }
 0x444   :  { %2342 = vmatprep.subr.mxu1 %v4445_v47 }
 0x445   :  { %2343 = vmatpush1.msra.mxu1 %v4446_v48  ;;  %v4503_v48 = vld [vmem:[#allocation8 + $0xf8] sm:$0xff] }
 0x446   :  { %2344 = vmatprep.subr.mxu1 %v4447_v49 }
 0x447   :  { %2345 = vmatpush1.msra.mxu1 %v4448_v50  ;;  %v4504_v50 = vld [vmem:[#allocation8 + $0x78] sm:$0xff] }
 0x448   :  { %2346 = vmatprep.subr.mxu1 %v4449_v51 }
 0x449   :  { %2347 = vmatpush1.msra.mxu1 %v4450_v52  ;;  %v4505_v52 = vld [vmem:[#allocation8 + $0xf0] sm:$0xff] }
 0x44a   :  { %2348 = vmatprep.subr.mxu1 %v4451_v21  ;;  %v4506_v21 = vld [vmem:[#allocation8 + $0x70] sm:$0xff] }
 0x44b   :  { %2349 = vmatpush1.msra.mxu1 %v4452_v53  ;;  %v4507_v53 = vld [vmem:[#allocation8 + $0xe8] sm:$0xff] }
 0x44c   :  { %2350 = vmatprep.subr.mxu1 %v4453_v55  ;;  %v4508_v55 = vld [vmem:[#allocation8 + $0x68] sm:$0xff] }
 0x44d   :  { %2351 = vmatpush1.msra.mxu1 %v4454_v56  ;;  %v4510_v56 = vld [vmem:[#allocation8 + $0x60] sm:$0xff] }
 0x44e   :  { %2352 = vmatprep.subr.mxu1 %v4455_v57  ;;  %v4511_v57 = vld [vmem:[#allocation8 + $0xd8] sm:$0xff] }
 0x44f   :  { %2353 = vmatpush1.msra.mxu1 %v4456_v58  ;;  %v4512_v58 = vld [vmem:[#allocation8 + $0x58] sm:$0xff] }
 0x450   :  { %2354 = vmatprep.subr.mxu1 %v4457_v59  ;;  %v4513_v59 = vld [vmem:[#allocation8 + $0xd0] sm:$0xff] }
 0x451   :  { %2355 = vmatpush1.msra.mxu1 %v4458_v61  ;;  %v5142_v61 = vpop.f32.mrf.mxu0 }
 0x452   :  { %2356 = vmatprep.subr.mxu1 %v4459_v62  ;;  %v4514_v62 = vld [vmem:[#allocation8 + $0x50] sm:$0xff] }
 0x453   :  { %2357 = vmatpush1.msra.mxu1 %v4460_v0  ;;  %v4515_v0 = vld [vmem:[#allocation8 + $0xc8] sm:$0xff] }
 0x454   :  { %2358 = vmatprep.subr.mxu1 %v4461_v1  ;;  %v4516_v1 = vld [vmem:[#allocation8 + $0x48] sm:$0xff] }
 0x455   :  { %2359 = vmatpush1.msra.mxu1 %v4462_v2  ;;  %v4517_v2 = vld [vmem:[#allocation8 + $0xc0] sm:$0xff] }
 0x456   :  { %2360 = vmatprep.subr.mxu1 %v4463_v3  ;;  %v2191_v3 = vpop.f32.mrf.mxu0 }
 0x457   :  { %2361 = vmatpush1.msra.mxu1 %v4464_v4  ;;  %v4518_v4 = vld [vmem:[#allocation8 + $0x40] sm:$0xff]  ;;  %4020 = vtanh.f32 %v2191_v3  ;;  %v4570_v3 = vld [vmem:[#allocation8 + $0x470] sm:$0xff] }
 0x458   :  { %2362 = vmatprep.subr.mxu1 %v4465_v5  ;;  %v4519_v5 = vld [vmem:[#allocation8 + $0xb8] sm:$0xff]  ;;  %4022 = vtanh.f32 %v5142_v61 }
 0x459   :  { %2363 = vmatpush1.msra.mxu1 %v4466_v6  ;;  %v4520_v6 = vld [vmem:[#allocation8 + $0x38] sm:$0xff] }
 0x45a   :  { %2364 = vmatprep.subr.mxu1 %v4467_v7  ;;  %v4521_v7 = vld [vmem:[#allocation8 + $0xb0] sm:$0xff] }
 0x45b   :  { %2365 = vmatpush1.msra.mxu1 %v4468_v8  ;;  %v4522_v8 = vld [vmem:[#allocation8 + $0x30] sm:$0xff] }
 0x45c   :  { %2366 = vmatprep.subr.mxu1 %v4469_v10  ;;  %v4523_v10 = vld [vmem:[#allocation8 + $0xa8] sm:$0xff] }
 0x45d   :  { %2367 = vmatpush1.msra.mxu1 %v4470_v11  ;;  %v4524_v11 = vld [vmem:[#allocation8 + $0x28] sm:$0xff] }
 0x45e   :  { %2368 = vmatprep.subr.mxu1 %v4471_v12  ;;  %v4525_v12 = vld [vmem:[#allocation8 + $0xa0] sm:$0xff] }
 0x45f   :  { %2369 = vmatpush2.msra.mxu1 %v4472_v13  ;;  %v4526_v13 = vld [vmem:[#allocation8 + $0x20] sm:$0xff] }
 0x460   :  { %2370 = vmatprep.subr.mxu1 %v4473_v14  ;;  %v4527_v14 = vld [vmem:[#allocation8 + $0x98] sm:$0xff] }
 0x461   :  { %2371 = vmatpush2.msra.mxu1 %v4474_v15  ;;  %v4528_v15 = vld [vmem:[#allocation8 + $0x18] sm:$0xff] }
 0x462   :  { %2372 = vmatprep.subr.mxu1 %v4475_v16  ;;  %v4529_v16 = vld [vmem:[#allocation8 + $0x90] sm:$0xff] }
 0x463   :  { %2373 = vmatpush2.msra.mxu1 %v4476_v17  ;;  %v4530_v17 = vld [vmem:[#allocation8 + $0x10] sm:$0xff] }
 0x464   :  { %2374 = vmatprep.subr.mxu1 %v4477_v18  ;;  %v4531_v18 = vld [vmem:[#allocation8 + $0x88] sm:$0xff] }
 0x465   :  { %2375 = vmatpush2.msra.mxu1 %v4478_v9  ;;  %v4019_v9 = vpop.eup %4018 }
 0x466   :  { %2376 = vmatprep.subr.mxu1 %v4479_v19  ;;  %v4532_v19 = vld [vmem:[#allocation8 + $0x8] sm:$0xff] }
 0x467   :  { %2377 = vmatpush2.msra.mxu1 %v4480_v60  ;;  %v4021_v60 = vpop.eup %4020 }
 0x468   :  { %2378 = vmatprep.subr.mxu1 %v4481_v20  ;;  %v4533_v20 = vld [vmem:[#allocation8 + $0x80] sm:$0xff] }
 0x469   :  { %2379 = vmatpush2.msra.mxu1 %v4482_v23  ;;  %v4535_v23 = vld [vmem:[#allocation8 + $0x2f8] sm:$0xff] }
 0x46a   :  { %2380 = vmatprep.subr.mxu1 %v4483_v24  ;;  %v4536_v24 = vld [vmem:[#allocation8 + $0x278] sm:$0xff] }
 0x46b   :  { %2381 = vmatpush2.msra.mxu1 %v4484_v25  ;;  %v4537_v25 = vld [vmem:[#allocation8 + $0x2f0] sm:$0xff] }
 0x46c   :  { %2382 = vmatprep.subr.mxu1 %v4485_v26  ;;  %v4538_v26 = vld [vmem:[#allocation8 + $0x270] sm:$0xff] }
 0x46d   :  { %2383 = vmatpush2.msra.mxu1 %v4486_v28  ;;  %v4540_v28 = vld [vmem:[#allocation8 + $0x268] sm:$0xff] }
 0x46e   :  { %2384 = vmatprep.subr.mxu1 %v4487_v29  ;;  %v4541_v29 = vld [vmem:[#allocation8 + $0x2e0] sm:$0xff] }
 0x46f   :  { %2385 = vmatpush2.msra.mxu1 %v4488_v30  ;;  %v4542_v30 = vld [vmem:[#allocation8 + $0x260] sm:$0xff] }
 0x470   :  { %2386 = vmatprep.subr.mxu1 %v4489_v31  ;;  %v4543_v31 = vld [vmem:[#allocation8 + $0x2d8] sm:$0xff] }
 0x471   :  { %2387 = vmatpush2.msra.mxu1 %v4490_v32  ;;  %v4544_v32 = vld [vmem:[#allocation8 + $0x258] sm:$0xff] }
 0x472   :  { %2388 = vmatprep.subr.mxu1 %v4491_v33  ;;  %v4545_v33 = vld [vmem:[#allocation8 + $0x2d0] sm:$0xff] }
 0x473   :  { %2389 = vmatpush2.msra.mxu1 %v4492_v34 }
 0x474   :  { %2390 = vmatprep.subr.mxu1 %v4493_v35  ;;  %v4546_v35 = vld [vmem:[#allocation8 + $0x250] sm:$0xff] }
 0x475   :  { %2391 = vmatpush2.msra.mxu1 %v4494_v36  ;;  %v4547_v36 = vld [vmem:[#allocation8 + $0x2c8] sm:$0xff] }
 0x476   :  { %2392 = vmatprep.subr.mxu1 %v4495_v37  ;;  %v4548_v37 = vld [vmem:[#allocation8 + $0x248] sm:$0xff] }
 0x477   :  { %2393 = vmatpush2.msra.mxu1 %v4496_v38  ;;  %v4549_v38 = vld [vmem:[#allocation8 + $0x2c0] sm:$0xff] }
 0x478   :  { %2394 = vmatprep.subr.mxu1 %v4497_v39 }
 0x479   :  { %2395 = vmatpush2.msra.mxu1 %v4498_v40  ;;  %v5145_v34 = vpop.f32.mrf.mxu0  ;;  %v4550_v40 = vld [vmem:[#allocation8 + $0x240] sm:$0xff] }
 0x47a   :  { %2396 = vmatprep.subr.mxu1 %v4499_v41  ;;  %v4551_v41 = vld [vmem:[#allocation8 + $0x2b8] sm:$0xff] }
 0x47b   :  { %2397 = vmatpush2.msra.mxu1 %v4500_v42  ;;  %v2333_v39 = vpop.f32.mrf.mxu0  ;;  %v4552_v42 = vld [vmem:[#allocation8 + $0x238] sm:$0xff] }
 0x47c   :  { %2398 = vmatprep.subr.mxu1 %v4501_v44  ;;  %4024 = vtanh.f32 %v2333_v39  ;;  %v4554_v44 = vld [vmem:[#allocation8 + $0x230] sm:$0xff] }
 0x47d   :  { %2399 = vmatpush2.msra.mxu1 %v4502_v46  ;;  %v4555_v46 = vld [vmem:[#allocation8 + $0x2a8] sm:$0xff]  ;;  %v4604_v39 = vld [vmem:[#allocation8 + $0x3d0] sm:$0xff] }
 0x47e   :  { %2401 = vmatmul.mubr.f32.vlgmr.msra.gmra.mxu1 %v5119_v63  ;;  %v1964_v47 = vpop.f32.mrf.mxu1  ;;  %3500 = vmatprep.subr.mxu1 %v4503_v48  ;;  %v4509_v63 = vld [vmem:[#allocation8 + $0xe0] sm:$0xff] }
 0x47f   :  { %v5139_v49 = vadd.f32 %v5135_v45, %v1964_v47  ;;  %3501 = vmatpush3.msra.mxu1 %v4504_v50  ;;  %2554 = vmatprep.mubr.f32.mxu1 %v4017_v43  ;;  %v4553_v43 = vld [vmem:[#allocation8 + $0x2b0] sm:$0xff]  ;;  %v4556_v47 = vld [vmem:[#allocation8 + $0x228] sm:$0xff]  ;;  %v4557_v48 = vld [vmem:[#allocation8 + $0x2a0] sm:$0xff] }
 0x480   :  { %v3865_v51 = vpop.f32.mrf.mxu1  ;;  %3502 = vmatprep.subr.mxu1 %v4505_v52  ;;  %v4558_v50 = vld [vmem:[#allocation8 + $0x220] sm:$0xff]  ;;  %v4560_v52 = vld [vmem:[#allocation8 + $0x218] sm:$0xff] }
 0x481   :  { %1968 = vmax.xlane.f32.xlu0 %v5139_v49  ;;  %3503 = vmatpush3.msra.mxu1 %v4506_v21  ;;  %v4559_v51 = vld [vmem:[#allocation8 + $0x298] sm:$0xff]  ;;  %v4561_v21 = vld [vmem:[#allocation8 + $0x290] sm:$0xff] }
 0x482   :  { %3504 = vmatprep.subr.mxu1 %v4507_v53  ;;  %v4562_v53 = vld [vmem:[#allocation8 + $0x210] sm:$0xff] }
 0x483   :  { %3505 = vmatpush3.msra.mxu1 %v4508_v55  ;;  %v4563_v55 = vld [vmem:[#allocation8 + $0x288] sm:$0xff] }
 0x484   :  { %3506 = vmatprep.subr.mxu1 %v4509_v63  ;;  %v4023_v63 = vpop.eup %4022 }
 0x485   :  { %3507 = vmatpush3.msra.mxu1 %v4510_v56  ;;  %v4564_v56 = vld [vmem:[#allocation8 + $0x208] sm:$0xff] }
 0x486   :  { %3508 = vmatprep.subr.mxu1 %v4511_v57 }
 0x487   :  { %3509 = vmatpush3.msra.mxu1 %v4512_v58  ;;  %v4565_v58 = vld [vmem:[#allocation8 + $0x280] sm:$0xff] }
 0x488   :  { %3510 = vmatprep.subr.mxu1 %v4513_v59  ;;  %v4566_v59 = vld [vmem:[#allocation8 + $0x200] sm:$0xff] }
 0x489   :  { %3511 = vmatpush3.msra.mxu1 %v4514_v62  ;;  %v4025_v57 = vpop.eup %4024  ;;  %v4567_v62 = vld [vmem:[#allocation8 + $0x4f8] sm:$0xff] }
 0x48a   :  { %3512 = vmatprep.subr.mxu1 %v4515_v0  ;;  %v4568_v0 = vld [vmem:[#allocation8 + $0x478] sm:$0xff] }
 0x48b   :  { %3513 = vmatpush3.msra.mxu1 %v4516_v1 }
 0x48c   :  { %3514 = vmatprep.subr.mxu1 %v4517_v2  ;;  %v4569_v2 = vld [vmem:[#allocation8 + $0x4f0] sm:$0xff] }
 0x48d   :  { %3515 = vmatpush3.msra.mxu1 %v4518_v4  ;;  %v4571_v4 = vld [vmem:[#allocation8 + $0x4e8] sm:$0xff] }
 0x48e   :  { %3516 = vmatprep.subr.mxu1 %v4519_v5  ;;  %v4572_v5 = vld [vmem:[#allocation8 + $0x468] sm:$0xff] }
 0x48f   :  { %3517 = vmatpush3.msra.mxu1 %v4520_v6  ;;  %v4573_v6 = vld [vmem:[#allocation8 + $0x4e0] sm:$0xff] }
 0x490   :  { %3518 = vmatprep.subr.mxu1 %v4521_v7  ;;  %v4574_v7 = vld [vmem:[#allocation8 + $0x460] sm:$0xff] }
 0x491   :  { %3519 = vmatpush3.msra.mxu1 %v4522_v8  ;;  %v4575_v8 = vld [vmem:[#allocation8 + $0x4d8] sm:$0xff] }
 0x492   :  { %3520 = vmatprep.subr.mxu1 %v4523_v10  ;;  %v4576_v10 = vld [vmem:[#allocation8 + $0x458] sm:$0xff] }
 0x493   :  { %3521 = vmatpush3.msra.mxu1 %v4524_v11  ;;  %v4577_v11 = vld [vmem:[#allocation8 + $0x4d0] sm:$0xff] }
 0x494   :  { %3522 = vmatprep.subr.mxu1 %v4525_v12  ;;  %v4578_v12 = vld [vmem:[#allocation8 + $0x450] sm:$0xff] }
 0x495   :  { %3523 = vmatpush3.msra.mxu1 %v4526_v13  ;;  %v4579_v13 = vld [vmem:[#allocation8 + $0x4c8] sm:$0xff] }
 0x496   :  { %3524 = vmatprep.subr.mxu1 %v4527_v14  ;;  %v4580_v14 = vld [vmem:[#allocation8 + $0x448] sm:$0xff] }
 0x497   :  { %3525 = vmatpush3.msra.mxu1 %v4528_v15  ;;  %v4581_v15 = vld [vmem:[#allocation8 + $0x4c0] sm:$0xff] }
 0x498   :  { %3526 = vmatprep.subr.mxu1 %v4529_v16  ;;  %v4582_v16 = vld [vmem:[#allocation8 + $0x440] sm:$0xff] }
 0x499   :  { %3527 = vmatpush3.msra.mxu1 %v4530_v17 }
 0x49a   :  { %3528 = vmatprep.subr.mxu1 %v4531_v18  ;;  %v4583_v18 = vld [vmem:[#allocation8 + $0x4b8] sm:$0xff] }
 0x49b   :  { %3529 = vmatpush3.msra.mxu1 %v4532_v19  ;;  %v4584_v19 = vld [vmem:[#allocation8 + $0x438] sm:$0xff] }
 0x49c   :  { %3530 = vmatprep.subr.mxu1 %v4533_v20  ;;  %v4586_v20 = vld [vmem:[#allocation8 + $0x378] sm:$0xff] }
 0x49d   :  { %3531 = vmatpush3.msra.mxu1 %v4534_v22  ;;  %v4587_v22 = vld [vmem:[#allocation8 + $0x430] sm:$0xff] }
 0x49e   :  { %2555 = vmatmul.mubr.f32.vlgmr.msra.gmra.mxu1 %v4019_v9  ;;  %3570 = vmatprep.subr.mxu1 %v4535_v23  ;;  %v4588_v23 = vld [vmem:[#allocation8 + $0x3f0] sm:$0xff] }
 0x49f   :  { %3571 = vmatpush3.msra.mxu1 %v4536_v24  ;;  %2694 = vmatprep.mubr.f32.mxu1 %v4021_v60  ;;  %v4585_v60 = vld [vmem:[#allocation8 + $0x4b0] sm:$0xff]  ;;  %v4589_v24 = vld [vmem:[#allocation8 + $0x4a8] sm:$0xff] }
 0x4a0   :  { %3572 = vmatprep.subr.mxu1 %v4537_v25  ;;  %v4590_v25 = vld [vmem:[#allocation8 + $0x370] sm:$0xff] }
 0x4a1   :  { %3573 = vmatpush3.msra.mxu1 %v4538_v26  ;;  %v4591_v26 = vld [vmem:[#allocation8 + $0x428] sm:$0xff] }
 0x4a2   :  { %3574 = vmatprep.subr.mxu1 %v4539_v27  ;;  %v4592_v27 = vld [vmem:[#allocation8 + $0x3e8] sm:$0xff] }
 0x4a3   :  { %3575 = vmatpush3.msra.mxu1 %v4540_v28  ;;  %v4593_v28 = vld [vmem:[#allocation8 + $0x4a0] sm:$0xff] }
 0x4a4   :  { %3576 = vmatprep.subr.mxu1 %v4541_v29  ;;  %v4594_v29 = vld [vmem:[#allocation8 + $0x368] sm:$0xff] }
 0x4a5   :  { %3577 = vmatpush3.msra.mxu1 %v4542_v30  ;;  %v4595_v30 = vld [vmem:[#allocation8 + $0x420] sm:$0xff] }
 0x4a6   :  { %3578 = vmatprep.subr.mxu1 %v4543_v31  ;;  %v4596_v31 = vld [vmem:[#allocation8 + $0x3e0] sm:$0xff] }
 0x4a7   :  { %3579 = vmatpush3.msra.mxu1 %v4544_v32  ;;  %v4597_v32 = vld [vmem:[#allocation8 + $0x498] sm:$0xff] }
 0x4a8   :  { %3580 = vmatprep.subr.mxu1 %v4545_v33  ;;  %v4598_v33 = vld [vmem:[#allocation8 + $0x360] sm:$0xff] }
 0x4a9   :  { %3581 = vmatpush3.msra.mxu1 %v4546_v35  ;;  %v4600_v35 = vld [vmem:[#allocation8 + $0x3d8] sm:$0xff] }
 0x4aa   :  { %3582 = vmatprep.subr.mxu1 %v4547_v36  ;;  %v4601_v36 = vld [vmem:[#allocation8 + $0x490] sm:$0xff] }
 0x4ab   :  { %3583 = vmatpush3.msra.mxu1 %v4548_v37  ;;  %v4602_v37 = vld [vmem:[#allocation8 + $0x358] sm:$0xff] }
 0x4ac   :  { %3584 = vmatprep.subr.mxu1 %v4549_v38  ;;  %v4603_v38 = vld [vmem:[#allocation8 + $0x410] sm:$0xff] }
 0x4ad   :  { %3585 = vmatpush3.msra.mxu1 %v4550_v40  ;;  %v4605_v40 = vld [vmem:[#allocation8 + $0x488] sm:$0xff] }
 0x4ae   :  { %3586 = vmatprep.subr.mxu1 %v4551_v41 }
 0x4af   :  { %3587 = vmatpush3.msra.mxu1 %v4552_v42  ;;  %v4606_v42 = vld [vmem:[#allocation8 + $0x350] sm:$0xff] }
 0x4b0   :  { %3588 = vmatprep.subr.mxu1 %v4553_v43  ;;  %v4607_v43 = vld [vmem:[#allocation8 + $0x408] sm:$0xff] }
 0x4b1   :  { %3589 = vmatpush3.msra.mxu1 %v4554_v44  ;;  %v4608_v44 = vld [vmem:[#allocation8 + $0x3c8] sm:$0xff] }
 0x4b2   :  { %3590 = vmatprep.subr.mxu1 %v4555_v46  ;;  %v4609_v46 = vld [vmem:[#allocation8 + $0x480] sm:$0xff] }
 0x4b3   :  { %3591 = vmatpush3.msra.mxu1 %v4556_v47  ;;  %v4610_v47 = vld [vmem:[#allocation8 + $0x348] sm:$0xff] }
 0x4b4   :  { %3592 = vmatprep.subr.mxu1 %v4557_v48  ;;  %v4611_v48 = vld [vmem:[#allocation8 + $0x400] sm:$0xff] }
 0x4b5   :  { %3593 = vmatpush3.msra.mxu1 %v4558_v50  ;;  %v4612_v50 = vld [vmem:[#allocation8 + $0x3c0] sm:$0xff] }
 0x4b6   :  { %3594 = vmatprep.subr.mxu1 %v4559_v51  ;;  %v4613_v51 = vld [vmem:[#allocation8 + $0x340] sm:$0xff] }
 0x4b7   :  { %3595 = vmatpush3.msra.mxu1 %v4560_v52  ;;  %v4614_v52 = vld [vmem:[#allocation8 + $0x3b8] sm:$0xff] }
 0x4b8   :  { %3596 = vmatprep.subr.mxu1 %v4561_v21  ;;  %v4615_v21 = vld [vmem:[#allocation8 + $0x678] sm:$0xff] }
 0x4b9   :  { %3597 = vmatpush3.msra.mxu1 %v4562_v53  ;;  %v4616_v53 = vld [vmem:[#allocation8 + $0x338] sm:$0xff] }
 0x4ba   :  { %3598 = vmatprep.subr.mxu1 %v4563_v55  ;;  %v4617_v55 = vld [vmem:[#allocation8 + $0x3b0] sm:$0xff] }
 0x4bb   :  { %3599 = vmatpush3.msra.mxu1 %v4564_v56  ;;  %v4619_v56 = vld [vmem:[#allocation8 + $0x330] sm:$0xff] }
 0x4bc   :  { %3600 = vmatprep.subr.mxu1 %v4565_v58  ;;  %v4621_v58 = vld [vmem:[#allocation8 + $0x668] sm:$0xff] }
 0x4bd   :  { %3601 = vmatpush3.msra.mxu1 %v4566_v59  ;;  %v3497_v59 = vpop.f32.mrf.mxu0 }
 0x4be   :  { %v2118_v61 = vpop.f32.mrf.mxu1  ;;  %2695 = vmatmul.mubr.f32.vlgmr.msra.gmra.mxu1 %v4023_v63  ;;  %3640 = vmatprep.subr.mxu1 %v4567_v62  ;;  %v4618_v63 = vld [vmem:[#allocation8 + $0x670] sm:$0xff]  ;;  %v4623_v62 = vld [vmem:[#allocation8 + $0x3a0] sm:$0xff] }
 0x4bf   :  { %3641 = vmatpush3.msra.mxu1 %v4568_v0  ;;  %2834 = vmatprep.mubr.f32.mxu1 %v4025_v57  ;;  %v4620_v57 = vld [vmem:[#allocation8 + $0x3a8] sm:$0xff]  ;;  %v4624_v0 = vld [vmem:[#allocation8 + $0x660] sm:$0xff] }
 0x4c0   :  { %v2120_v1 = vpop.f32.mrf.mxu1  ;;  %3642 = vmatprep.subr.mxu1 %v4569_v2  ;;  %v4626_v2 = vld [vmem:[#allocation8 + $0x398] sm:$0xff] }
 0x4c1   :  { %4026 = vtanh.f32 %v2120_v1  ;;  %3643 = vmatpush3.msra.mxu1 %v4570_v3  ;;  %v4625_v1 = vld [vmem:[#allocation8 + $0x320] sm:$0xff]  ;;  %v4627_v3 = vld [vmem:[#allocation8 + $0x658] sm:$0xff] }
 0x4c2   :  { %4028 = vtanh.f32 %v2118_v61  ;;  %3644 = vmatprep.subr.mxu1 %v4571_v4  ;;  %v4622_v61 = vld [vmem:[#allocation8 + $0x328] sm:$0xff]  ;;  %v3498_v4 = vpop.f32.mrf.mxu0 }
 0x4c3   :  { %3645 = vmatpush3.msra.mxu1 %v4572_v5  ;;  %4030 = vtanh.f32 %v5145_v34  ;;  %v4599_v34 = vld [vmem:[#allocation8 + $0x418] sm:$0xff] }
 0x4c4   :  { %3646 = vmatprep.subr.mxu1 %v4573_v6  ;;  %v4628_v5 = vld [vmem:[#allocation8 + $0x318] sm:$0xff]  ;;  %v4629_v6 = vld [vmem:[#allocation8 + $0x390] sm:$0xff] }
 0x4c5   :  { %3647 = vmatpush3.msra.mxu1 %v4574_v7  ;;  %v4630_v7 = vld [vmem:[#allocation8 + $0x650] sm:$0xff] }
 0x4c6   :  { %3648 = vmatprep.subr.mxu1 %v4575_v8  ;;  %v4631_v8 = vld [vmem:[#allocation8 + $0x310] sm:$0xff] }
 0x4c7   :  { %3649 = vmatpush3.msra.mxu1 %v4576_v10  ;;  %v3499_v10 = vadd.f32 %v3498_v4, %v3497_v59  ;;  %v4672_v59 = vld [vmem:[#allocation8 + $0x5c8] sm:$0xff]  ;;  %v4679_v4 = vld [vmem:[#allocation8 + $0x538] sm:$0xff] }
 0x4c8   :  { %3650 = vmatprep.subr.mxu1 %v4577_v11  ;;  %v4632_v11 = vld [vmem:[#allocation8 + $0x388] sm:$0xff] }
 0x4c9   :  { %3651 = vmatpush3.msra.mxu1 %v4578_v12  ;;  %v4633_v12 = vld [vmem:[#allocation8 + $0x648] sm:$0xff]  ;;  %4032 = vtanh.f32 %v3499_v10  ;;  %v4684_v10 = vld [vmem:[#allocation8 + $0x5a0] sm:$0xff] }
 0x4ca   :  { %3652 = vmatprep.subr.mxu1 %v4579_v13  ;;  %v4634_v13 = vld [vmem:[#allocation8 + $0x308] sm:$0xff] }
 0x4cb   :  { %3653 = vmatpush3.msra.mxu1 %v4580_v14  ;;  %v4635_v14 = vld [vmem:[#allocation8 + $0x380] sm:$0xff] }
 0x4cc   :  { %3654 = vmatprep.subr.mxu1 %v4581_v15  ;;  %v4636_v15 = vld [vmem:[#allocation8 + $0x640] sm:$0xff] }
 0x4cd   :  { %3655 = vmatpush3.msra.mxu1 %v4582_v16  ;;  %v4637_v16 = vld [vmem:[#allocation8 + $0x300] sm:$0xff] }
 0x4ce   :  { %v4027_v17 = vpop.eup %4026  ;;  %3656 = vmatprep.subr.mxu1 %v4583_v18  ;;  %v4639_v18 = vld [vmem:[#allocation8 + $0x638] sm:$0xff] }
 0x4cf   :  { %v4029_v9 = vpop.eup %4028  ;;  %2624 = vmatprep.mubr.f32.mxu0 %v4027_v17  ;;  %3657 = vmatpush3.msra.mxu1 %v4584_v19  ;;  %v4638_v17 = vld [vmem:[#allocation8 + $0x5f8] sm:$0xff]  ;;  %v4641_v19 = vld [vmem:[#allocation8 + $0x628] sm:$0xff] }
 0x4d0   :  { %2625 = vmatmul.mubr.f32.vlgmr.msra.gmra.mxu0 %v4029_v9  ;;  %3658 = vmatprep.subr.mxu1 %v4585_v60  ;;  %v4031_v41 = vpop.eup %4030  ;;  %v4640_v9 = vld [vmem:[#allocation8 + $0x630] sm:$0xff]  ;;  %v4642_v60 = vld [vmem:[#allocation8 + $0x620] sm:$0xff] }
 0x4d1   :  { %3606 = vmatpush3.msra.mxu0 %v4586_v20  ;;  %3659 = vmatpush3.msra.mxu1 %v4587_v22  ;;  %v4643_v20 = vld [vmem:[#allocation8 + $0x618] sm:$0xff]  ;;  %v4644_v22 = vld [vmem:[#allocation8 + $0x610] sm:$0xff] }
 0x4d2   :  { %3607 = vmatprep.subr.mxu0 %v4588_v23  ;;  %3660 = vmatprep.subr.mxu1 %v4589_v24  ;;  %v4645_v24 = vld [vmem:[#allocation8 + $0x608] sm:$0xff] }
 0x4d3   :  { %3608 = vmatpush3.msra.mxu0 %v4590_v25  ;;  %3661 = vmatpush3.msra.mxu1 %v4591_v26  ;;  %v4646_v26 = vld [vmem:[#allocation8 + $0x600] sm:$0xff] }
 0x4d4   :  { %3609 = vmatprep.subr.mxu0 %v4592_v27  ;;  %3662 = vmatprep.subr.mxu1 %v4593_v28  ;;  %v4647_v28 = vld [vmem:[#allocation14 + $0x78] sm:$0xff] }
 0x4d5   :  { %3610 = vmatpush3.msra.mxu0 %v4594_v29  ;;  %3663 = vmatpush3.msra.mxu1 %v4595_v30  ;;  %v4648_v29 = vld [vmem:[#allocation14 + $0x70] sm:$0xff]  ;;  %v4649_v30 = vld [vmem:[#allocation14 + $0x68] sm:$0xff] }
 0x4d6   :  { %3611 = vmatprep.subr.mxu0 %v4596_v31  ;;  %3664 = vmatprep.subr.mxu1 %v4597_v32  ;;  %v4033_v23 = vpop.eup %4032  ;;  %v4650_v31 = vld [vmem:[#allocation14 + $0x60] sm:$0xff]  ;;  %v4651_v32 = vld [vmem:[#allocation14 + $0x58] sm:$0xff] }
 0x4d7   :  { %3612 = vmatpush3.msra.mxu0 %v4598_v33  ;;  %3665 = vmatpush3.msra.mxu1 %v4599_v34  ;;  %v4652_v34 = vld [vmem:[#allocation14 + $0x50] sm:$0xff] }
 0x4d8   :  { %3613 = vmatprep.subr.mxu0 %v4600_v35  ;;  %3666 = vmatprep.subr.mxu1 %v4601_v36  ;;  %v4653_v36 = vld [vmem:[#allocation14 + $0x48] sm:$0xff] }
 0x4d9   :  { %3614 = vmatpush3.msra.mxu0 %v4602_v37  ;;  %3667 = vmatpush3.msra.mxu1 %v4603_v38 }
 0x4da   :  { %3615 = vmatprep.subr.mxu0 %v4604_v39  ;;  %3668 = vmatprep.subr.mxu1 %v4605_v40  ;;  %v4654_v39 = vld [vmem:[#allocation14 + $0x40] sm:$0xff] }
 0x4db   :  { %3616 = vmatpush3.msra.mxu0 %v4606_v42  ;;  %3669 = vmatpush3.msra.mxu1 %v4607_v43  ;;  %v4657_v42 = vld [vmem:[#allocation8 + $0x5f0] sm:$0xff] }
 0x4dc   :  { %3617 = vmatprep.subr.mxu0 %v4608_v44  ;;  %3670 = vmatprep.subr.mxu1 %v4609_v46  ;;  %v4658_v43 = vld [vmem:[#allocation14 + $0x30] sm:$0xff]  ;;  %v4660_v46 = vld [vmem:[#allocation8 + $0x5e8] sm:$0xff] }
 0x4dd   :  { %3618 = vmatpush3.msra.mxu0 %v4610_v47  ;;  %3671 = vmatpush3.msra.mxu1 %v4611_v48  ;;  %v4659_v44 = vld [vmem:[#allocation8 + $0x570] sm:$0xff]  ;;  %v4662_v48 = vld [vmem:[#allocation8 + $0x568] sm:$0xff] }
 0x4de   :  { %3619 = vmatprep.subr.mxu0 %v4612_v50  ;;  %2835 = vmatmul.mubr.f32.vlgmr.msra.gmra.mxu1 %v4031_v41  ;;  %v4655_v41 = vld [vmem:[#allocation14 + $0x38] sm:$0xff]  ;;  %v4661_v47 = vld [vmem:[#allocation14 + $0x28] sm:$0xff] }
 0x4df   :  { %3620 = vmatpush3.msra.mxu0 %v4613_v51  ;;  %3866 = vmatprep.subr.mxu1 %v4959_v54  ;;  %v4663_v50 = vld [vmem:[#allocation8 + $0x5e0] sm:$0xff] }
 0x4e0   :  { %3621 = vmatprep.subr.mxu0 %v4614_v52  ;;  %3867 = vmatpush3.msra.mxu1 %v4615_v21  ;;  %v4664_v51 = vld [vmem:[#allocation14 + $0x20] sm:$0xff]  ;;  %v4666_v21 = vld [vmem:[#allocation8 + $0x5d8] sm:$0xff] }
 0x4e1   :  { %3622 = vmatpush3.msra.mxu0 %v4616_v53  ;;  %3868 = vmatprep.subr.mxu1 %v4959_v54  ;;  %v4665_v52 = vld [vmem:[#allocation8 + $0x560] sm:$0xff] }
 0x4e2   :  { %3623 = vmatprep.subr.mxu0 %v4617_v55  ;;  %3869 = vmatpush3.msra.mxu1 %v4618_v63  ;;  %v4667_v53 = vld [vmem:[#allocation14 + $0x18] sm:$0xff]  ;;  %v4669_v63 = vld [vmem:[#allocation8 + $0x5d0] sm:$0xff] }
 0x4e3   :  { %3624 = vmatpush3.msra.mxu0 %v4619_v56  ;;  %3870 = vmatprep.subr.mxu1 %v4959_v54  ;;  %v4668_v55 = vld [vmem:[#allocation8 + $0x558] sm:$0xff] }
 0x4e4   :  { %3625 = vmatprep.subr.mxu0 %v4620_v57  ;;  %3871 = vmatpush3.msra.mxu1 %v4621_v58  ;;  %v4670_v56 = vld [vmem:[#allocation14 + $0x10] sm:$0xff] }
 0x4e5   :  { %3626 = vmatpush3.msra.mxu0 %v4622_v61  ;;  %3872 = vmatprep.subr.mxu1 %v4959_v54  ;;  %v4671_v57 = vld [vmem:[#allocation8 + $0x550] sm:$0xff] }
 0x4e6   :  { %3627 = vmatprep.subr.mxu0 %v4623_v62  ;;  %3873 = vmatpush3.msra.mxu1 %v4624_v0  ;;  %v4673_v61 = vld [vmem:[#allocation14 + $0x8] sm:$0xff]  ;;  %v4675_v0 = vld [vmem:[#allocation8 + $0x5c0] sm:$0xff] }
 0x4e7   :  { %3628 = vmatpush3.msra.mxu0 %v4625_v1  ;;  %3874 = vmatprep.subr.mxu1 %v4959_v54  ;;  %v4674_v62 = vld [vmem:[#allocation8 + $0x548] sm:$0xff]  ;;  %v4676_v1 = vld [vmem:[#allocation8 + $0x540] sm:$0xff] }
 0x4e8   :  { %3629 = vmatprep.subr.mxu0 %v4626_v2  ;;  %3875 = vmatpush3.msra.mxu1 %v4627_v3  ;;  %v4677_v2 = vld [vmem:[#allocation14] sm:$0xff]  ;;  %v4678_v3 = vld [vmem:[#allocation8 + $0x5b8] sm:$0xff] }
 0x4e9   :  { %3630 = vmatpush3.msra.mxu0 %v4628_v5  ;;  %3876 = vmatprep.subr.mxu1 %v4959_v54  ;;  %v4680_v5 = vld [vmem:[#allocation8 + $0x5b0] sm:$0xff] }
 0x4ea   :  { %3631 = vmatprep.subr.mxu0 %v4629_v6  ;;  %3877 = vmatpush3.msra.mxu1 %v4630_v7  ;;  %v4681_v6 = vld [vmem:[#allocation8 + $0x530] sm:$0xff]  ;;  %v4682_v7 = vld [vmem:[#allocation8 + $0x5a8] sm:$0xff] }
 0x4eb   :  { %3632 = vmatpush3.msra.mxu0 %v4631_v8  ;;  %3878 = vmatprep.subr.mxu1 %v4959_v54  ;;  %v4683_v8 = vld [vmem:[#allocation8 + $0x528] sm:$0xff] }
 0x4ec   :  { %3633 = vmatprep.subr.mxu0 %v4632_v11  ;;  %3879 = vmatpush3.msra.mxu1 %v4633_v12  ;;  %v4685_v11 = vld [vmem:[#allocation8 + $0x520] sm:$0xff]  ;;  %v4686_v12 = vld [vmem:[#allocation8 + $0x598] sm:$0xff] }
 0x4ed   :  { %3634 = vmatpush3.msra.mxu0 %v4634_v13  ;;  %3880 = vmatprep.subr.mxu1 %v4959_v54  ;;  %v4687_v13 = vld [vmem:[#allocation8 + $0x518] sm:$0xff] }
 0x4ee   :  { %3635 = vmatprep.subr.mxu0 %v4635_v14  ;;  %3881 = vmatpush3.msra.mxu1 %v4636_v15  ;;  %v4688_v14 = vld [vmem:[#allocation8 + $0x590] sm:$0xff] }
 0x4ef   :  { %3636 = vmatpush3.msra.mxu0 %v4637_v16  ;;  %3882 = vmatprep.subr.mxu1 %v4959_v54  ;;  %v4689_v15 = vld [vmem:[#allocation8 + $0x510] sm:$0xff]  ;;  %v4690_v16 = vld [vmem:[#allocation8 + $0x588] sm:$0xff] }
 0x4f0   :  { %3675 = vmatprep.subr.mxu0 %v4638_v17  ;;  %3883 = vmatpush3.msra.mxu1 %v4639_v18  ;;  %v4691_v17 = vld [vmem:[#allocation8 + $0x508] sm:$0xff]  ;;  %v4692_v18 = vld [vmem:[#allocation8 + $0x580] sm:$0xff] }
 0x4f1   :  { %3884 = vmatprep.subr.mxu1 %v4959_v54  ;;  %3898 = vmatprep.mubr.msk.f32.mxu1 %vm4960_vm0, %v4959_v54 }
 0x4f2   :  { %3885 = vmatpush3.msra.mxu1 %v4640_v9  ;;  %v4693_v9 = vld [vmem:[#allocation8 + $0x500] sm:$0xff] }
 0x4f3   :  { %3886 = vmatprep.subr.mxu1 %v4959_v54 }
 0x4f4   :  { %3887 = vmatpush3.msra.mxu1 %v4641_v19 }
 0x4f5   :  { %3888 = vmatprep.subr.mxu1 %v4959_v54 }
 0x4f6   :  { %3889 = vmatpush3.msra.mxu1 %v4642_v60 }
 0x4f7   :  { %3890 = vmatprep.subr.mxu1 %v4959_v54 }
 0x4f8   :  { %3891 = vmatpush3.msra.mxu1 %v4643_v20 }
 0x4f9   :  { %3892 = vmatprep.subr.mxu1 %v4959_v54 }
 0x4fa   :  { %3893 = vmatpush3.msra.mxu1 %v4644_v22 }
 0x4fb   :  { %3894 = vmatprep.subr.mxu1 %v4959_v54 }
 0x4fc   :  { %3895 = vmatpush3.msra.mxu1 %v4645_v24  ;;  %v4695_v24 = vld [vmem:[#allocation11 + $0x70] sm:$0xff] }
 0x4fd   :  { %3896 = vmatprep.subr.mxu1 %v4959_v54 }
 0x4fe   :  { %v2260_v25 = vpop.f32.mrf.mxu1  ;;  %3897 = vmatpush3.msra.mxu1 %v4646_v26  ;;  %v4697_v26 = vld [vmem:[#allocation11 + $0x60] sm:$0xff] }
 0x4ff   :  { %3899 = vmatmul.mubr.f32.vlgmr.msra.gmra.mxu1 %v4033_v23  ;;  %3936 = vmatprep.subr.mxu1 %v4959_v54  ;;  %v4694_v23 = vld [vmem:[#allocation11 + $0x78] sm:$0xff] }
 0x500   :  { %v2262_v27 = vpop.f32.mrf.mxu1  ;;  %3937 = vmatpush3.msra.mxu1 %v4647_v28  ;;  %3968 = vmatprep.mubr.msk.f32.mxu1 %vm4960_vm0, %v4959_v54  ;;  %v4699_v28 = vld [vmem:[#allocation11 + $0x50] sm:$0xff] }
 0x501   :  { %4034 = vtanh.f32 %v2262_v27  ;;  %3938 = vmatprep.subr.mxu1 %v4959_v54  ;;  %v4698_v27 = vld [vmem:[#allocation11 + $0x58] sm:$0xff] }
 0x502   :  { %4036 = vtanh.f32 %v2260_v25  ;;  %3939 = vmatpush3.msra.mxu1 %v4648_v29  ;;  %v4696_v25 = vld [vmem:[#allocation11 + $0x68] sm:$0xff] }
 0x503   :  { %3940 = vmatprep.subr.mxu1 %v4959_v54  ;;  %v4700_v29 = vld [vmem:[#allocation11 + $0x48] sm:$0xff] }
 0x504   :  { %3941 = vmatpush3.msra.mxu1 %v4649_v30 }
 0x505   :  { %3942 = vmatprep.subr.mxu1 %v4959_v54 }
 0x506   :  { %3943 = vmatpush3.msra.mxu1 %v4650_v31  ;;  %v4701_v31 = vld [vmem:[#allocation11 + $0x40] sm:$0xff] }
 0x507   :  { %3944 = vmatprep.subr.mxu1 %v4959_v54 }
 0x508   :  { %3945 = vmatpush3.msra.mxu1 %v4651_v32 }
 0x509   :  { %3946 = vmatprep.subr.mxu1 %v4959_v54 }
 0x50a   :  { %v1969_v33 = vpop.xlane.xlu0 %1968  ;;  %3947 = vmatpush3.msra.mxu1 %v4652_v34  ;;  %v4702_v34 = vld [vmem:[#allocation11 + $0x38] sm:$0xff] }
 0x50b   :  { %v5176_v35 = vsub.f32 %v5139_v49, %v1969_v33  ;;  %3948 = vmatprep.subr.mxu1 %v4959_v54  ;;  %v4656_v49 = vld [vmem:[#allocation8 + $0x578] sm:$0xff] }
 0x50c   :  { %3949 = vmatpush3.msra.mxu1 %v4653_v36  ;;  %v4703_v36 = vld [vmem:[#allocation11 + $0x30] sm:$0xff] }
 0x50d   :  { %v1971_v37 = vmul.f32 1.442695, %v5176_v35  ;;  %3950 = vmatprep.subr.mxu1 %v4959_v54 }
 0x50e   :  { %v4035_v38 = vpop.eup %4034  ;;  %3951 = vmatpush3.msra.mxu1 %v4654_v39  ;;  %v4706_v39 = vld [vmem:[#allocation11 + $0x18] sm:$0xff] }
 0x50f   :  { %v4037_v40 = vpop.eup %4036  ;;  %2764 = vmatprep.mubr.f32.mxu0 %v4035_v38  ;;  %4038 = vpow2.f32 %v1971_v37  ;;  %3952 = vmatprep.subr.mxu1 %v4959_v54  ;;  %v4704_v37 = vld [vmem:[#allocation11 + $0x28] sm:$0xff]  ;;  %v4705_v38 = vld [vmem:[#allocation11 + $0x20] sm:$0xff] }
 0x510   :  { %2765 = vmatmul.mubr.f32.vlgmr.msra.gmra.mxu0 %v4037_v40  ;;  %3953 = vmatpush3.msra.mxu1 %v4655_v41  ;;  %v4707_v40 = vld [vmem:[#allocation11 + $0x10] sm:$0xff]  ;;  %v4708_v41 = vld [vmem:[#allocation11 + $0x8] sm:$0xff] }
 0x511   :  { %3676 = vmatpush3.msra.mxu0 %v4656_v49  ;;  %3954 = vmatprep.subr.mxu1 %v4959_v54  ;;  %v4709_v49 = vld [vmem:[#allocation11] sm:$0xff] }
 0x512   :  { %3677 = vmatprep.subr.mxu0 %v4657_v42  ;;  %3955 = vmatpush3.msra.mxu1 %v4658_v43 }
 0x513   :  { %3678 = vmatpush3.msra.mxu0 %v4659_v44  ;;  %3956 = vmatprep.subr.mxu1 %v4959_v54 }
 0x514   :  { %3679 = vmatprep.subr.mxu0 %v4660_v46  ;;  %3957 = vmatpush3.msra.mxu1 %v4661_v47 }
 0x515   :  { %3680 = vmatpush3.msra.mxu0 %v4662_v48  ;;  %3958 = vmatprep.subr.mxu1 %v4959_v54  ;;  %v4710_v48 = vld [vmem:[#allocation10] ss:$0 sm:$0xff] }
 0x516   :  { %3681 = vmatprep.subr.mxu0 %v4663_v50  ;;  %3959 = vmatpush3.msra.mxu1 %v4664_v51 }
 0x517   :  { %3682 = vmatpush3.msra.mxu0 %v4665_v52  ;;  %3960 = vmatprep.subr.mxu1 %v4959_v54 }
 0x518   :  { %3683 = vmatprep.subr.mxu0 %v4666_v21  ;;  %3961 = vmatpush3.msra.mxu1 %v4667_v53 }
 0x519   :  { %3684 = vmatpush3.msra.mxu0 %v4668_v55  ;;  %3962 = vmatprep.subr.mxu1 %v4959_v54 }
 0x51a   :  { %3685 = vmatprep.subr.mxu0 %v4669_v63  ;;  %3963 = vmatpush3.msra.mxu1 %v4670_v56 }
 0x51b   :  { %3686 = vmatpush3.msra.mxu0 %v4671_v57  ;;  %3964 = vmatprep.subr.mxu1 %v4959_v54 }
 0x51c   :  { %v4039_v58 = vpop.eup %4038  ;;  %3687 = vmatprep.subr.mxu0 %v4672_v59  ;;  %3965 = vmatpush3.msra.mxu1 %v4673_v61 }
 0x51d   :  { %1973 = vadd.xlane.f32.xlu1 %v4039_v58  ;;  %3688 = vmatpush3.msra.mxu0 %v4674_v62 }
 0x51e   :  { %3689 = vmatprep.subr.mxu0 %v4675_v0  ;;  %3966 = vmatprep.subr.mxu1 %v4959_v54 }
 0x51f   :  { %3690 = vmatpush3.msra.mxu0 %v4676_v1  ;;  %3967 = vmatpush3.msra.mxu1 %v4677_v2 }
 0x520   :  { %3691 = vmatprep.subr.mxu0 %v4678_v3 }
 0x521   :  { %3692 = vmatpush3.msra.mxu0 %v4679_v4 }
 0x522   :  { %3693 = vmatprep.subr.mxu0 %v4680_v5 }
 0x523   :  { %3694 = vmatpush3.msra.mxu0 %v4681_v6 }
 0x524   :  { %3695 = vmatprep.subr.mxu0 %v4682_v7 }
 0x525   :  { %3696 = vmatpush3.msra.mxu0 %v4683_v8 }
 0x526   :  { %3697 = vmatprep.subr.mxu0 %v4684_v10 }
 0x527   :  { %3698 = vmatpush3.msra.mxu0 %v4685_v11 }
 0x528   :  { %3699 = vmatprep.subr.mxu0 %v4686_v12  ;;  %v4711_v12 = vld [vmem:[#allocation13] ss:$0 sm:$0xff] }
 0x529   :  { %3700 = vmatpush3.msra.mxu0 %v4687_v13 }
 0x52a   :  { %3701 = vmatprep.subr.mxu0 %v4688_v14 }
 0x52b   :  { %3702 = vmatpush3.msra.mxu0 %v4689_v15 }
 0x52c   :  { %3703 = vmatprep.subr.mxu0 %v4690_v16 }
 0x52d   :  { %3704 = vmatpush3.msra.mxu0 %v4691_v17 }
 0x52e   :  { %3705 = vmatprep.subr.mxu0 %v4692_v18 }
 0x52f   :  { %3706 = vmatpush3.msra.mxu0 %v4693_v9 }
 0x530   :  { %3901 = vmatprep.subr.mxu0 %v4959_v54 }
 0x53e   :  { %v2402_v19 = vpop.f32.mrf.mxu1 }
 0x540   :  { %v2404_v60 = vpop.f32.mrf.mxu1 }
 0x541   :  { %4040 = vtanh.f32 %v2404_v60 }
 0x542   :  { %4042 = vtanh.f32 %v2402_v19 }
 0x54e   :  { %v4041_v20 = vpop.eup %4040 }
 0x54f   :  { %v4043_v22 = vpop.eup %4042  ;;  %2904 = vmatprep.mubr.f32.mxu0 %v4041_v20 }
 0x550   :  { %2905 = vmatmul.mubr.f32.vlgmr.msra.gmra.mxu0 %v4043_v22 }
 0x551   :  { %3902 = vmatpush3.msra.mxu0 %v4694_v23  ;;  %3933 = vmatprep.mubr.msk.f32.mxu0 %vm4960_vm0, %v4959_v54 }
 0x552   :  { %3903 = vmatprep.subr.mxu0 %v4959_v54 }
 0x553   :  { %3904 = vmatpush3.msra.mxu0 %v4695_v24 }
 0x554   :  { %3905 = vmatprep.subr.mxu0 %v4959_v54 }
 0x555   :  { %3906 = vmatpush3.msra.mxu0 %v4696_v25 }
 0x556   :  { %3907 = vmatprep.subr.mxu0 %v4959_v54 }
 0x557   :  { %3908 = vmatpush3.msra.mxu0 %v4697_v26 }
 0x558   :  { %3909 = vmatprep.subr.mxu0 %v4959_v54 }
 0x559   :  { %3910 = vmatpush3.msra.mxu0 %v4698_v27 }
 0x55a   :  { %3911 = vmatprep.subr.mxu0 %v4959_v54 }
 0x55b   :  { %3912 = vmatpush3.msra.mxu0 %v4699_v28 }
 0x55c   :  { %3913 = vmatprep.subr.mxu0 %v4959_v54 }
 0x55d   :  { %3914 = vmatpush3.msra.mxu0 %v4700_v29 }
 0x55e   :  { %v3532_v30 = vpop.f32.mrf.mxu1  ;;  %3915 = vmatprep.subr.mxu0 %v4959_v54 }
 0x55f   :  { %3916 = vmatpush3.msra.mxu0 %v4701_v31 }
 0x560   :  { %v3533_v32 = vpop.f32.mrf.mxu1  ;;  %3917 = vmatprep.subr.mxu0 %v4959_v54 }
 0x561   :  { %v3534_v33 = vadd.f32 %v3533_v32, %v3532_v30  ;;  %3918 = vmatpush3.msra.mxu0 %v4702_v34 }
 0x562   :  { %3919 = vmatprep.subr.mxu0 %v4959_v54 }
 0x563   :  { %3920 = vmatpush3.msra.mxu0 %v4703_v36  ;;  %v2557_v50 = vadd.f32 %v4710_v48, %v3534_v33 }
 0x564   :  { %3921 = vmatprep.subr.mxu0 %v4959_v54 }
 0x565   :  { %3922 = vmatpush3.msra.mxu0 %v4704_v37 }
 0x566   :  { %3923 = vmatprep.subr.mxu0 %v4959_v54 }
 0x567   :  { %3924 = vmatpush3.msra.mxu0 %v4705_v38 }
 0x568   :  { %3925 = vmatprep.subr.mxu0 %v4959_v54 }
 0x569   :  { %3926 = vmatpush3.msra.mxu0 %v4706_v39 }
 0x56a   :  { %3927 = vmatprep.subr.mxu0 %v4959_v54 }
 0x56b   :  { %3928 = vmatpush3.msra.mxu0 %v4707_v40 }
 0x56c   :  { %3929 = vmatprep.subr.mxu0 %v4959_v54 }
 0x56d   :  { %3930 = vmatpush3.msra.mxu0 %v4708_v41 }
 0x56e   :  { %3931 = vmatprep.subr.mxu0 %v4959_v54 }
 0x56f   :  { %3932 = vmatpush3.msra.mxu0 %v4709_v49 }
 0x57e   :  { %v3602_v42 = vpop.f32.mrf.mxu1 }
 0x580   :  { %v3603_v43 = vpop.f32.mrf.mxu1 }
 0x581   :  { %v3604_v44 = vadd.f32 %v3603_v43, %v3602_v42 }
 0x590   :  { %v3567_v46 = vpop.f32.mrf.mxu0 }
 0x592   :  { %v3568_v47 = vpop.f32.mrf.mxu0 }
 0x593   :  { %v3569_v51 = vadd.f32 %v3568_v47, %v3567_v46 }
 0x595   :  { %v2627_v52 = vadd.f32 %v3569_v51, %v2557_v50 }
 0x597   :  { %v2697_v21 = vadd.f32 %v3604_v44, %v2627_v52 }
 0x59e   :  { %v3672_v53 = vpop.f32.mrf.mxu1 }
 0x5a0   :  { %v3673_v55 = vpop.f32.mrf.mxu1 }
 0x5a1   :  { %v3674_v63 = vadd.f32 %v3673_v55, %v3672_v53 }
 0x5a6   :  { %v1974_v56 = vpop.xlane.xlu1 %1973 }
 0x5a7   :  { %4044 = vlog2.f32 %v1974_v56 }
 0x5b4   :  { %v4045_v57 = vpop.eup %4044 }
 0x5b5   :  { %v1976_v58 = vmul.f32 0.6931472, %v4045_v57 }
 0x5b7   :  { %v1977_v54 = vsub.f32 %v5176_v35, %v1976_v58 }
 0x5b9   :  { %1978 = vst [vmem:[#allocation17] sm:$0xff] %v1977_v54 }
 0x5bf   :  { %v2976_v59 = vpop.f32.mrf.mxu1 }
 0x5c1   :  { %v3900_v61 = vpop.f32.mrf.mxu1 }
 0x5d0   :  { %v3637_v62 = vpop.f32.mrf.mxu0 }
 0x5d2   :  { %v3638_v0 = vpop.f32.mrf.mxu0 }
 0x5d3   :  { %v3639_v1 = vadd.f32 %v3638_v0, %v3637_v62 }
 0x5d5   :  { %v2767_v2 = vadd.f32 %v3639_v1, %v2697_v21 }
 0x5d7   :  { %v2837_v3 = vadd.f32 %v3674_v63, %v2767_v2 }
 0x610   :  { %v3707_v4 = vpop.f32.mrf.mxu0 }
 0x612   :  { %v3708_v5 = vpop.f32.mrf.mxu0 }
 0x613   :  { %v3709_v6 = vadd.f32 %v3708_v5, %v3707_v4 }
 0x615   :  { %v2907_v7 = vadd.f32 %v3709_v6, %v2837_v3 }
 0x617   :  { %v2977_v8 = vadd.f32 %v2976_v59, %v2907_v7 }
 0x619   :  { %4046 = vtanh.f32 %v2977_v8 }
 0x626   :  { %v4047_v10 = vpop.eup %4046 }
 0x627   :  { %3934 = vmatmul.mubr.f32.vlgmr.msra.gmra.mxu0 %v4047_v10 }
 0x6e7   :  { %v3047_v11 = vpop.f32.mrf.mxu0 }
 0x6e8   :  { %v3048_v13 = vadd.f32 %v4711_v12, %v3047_v11 }
 0x6e9   :  { %v3935_v35 = vpop.f32.mrf.mxu0 }
 0x6ea   :  { %v3051_v14 = vmax.f32 %v3048_v13, 0.0 }
 0x6ec   :  { %3969 = vmatmul.mubr.f32.vlgmr.msra.gmra.mxu1 %v3051_v14 }
 0x7ac   :  { %v3118_v15 = vpop.f32.mrf.mxu1 }
 0x7ad   :  { %v3119_v16 = vadd.f32 %v5135_v45, %v3118_v15 }
 0x7ae   :  { %v3970_v17 = vpop.f32.mrf.mxu1 }
 0x7af   :  { %3122 = vmax.xlane.f32.xlu0 %v3119_v16 }
 0x838   :  { %v3123_v18 = vpop.xlane.xlu0 %3122 }
 0x839   :  { %v3124_v9 = vsub.f32 %v3119_v16, %v3123_v18 }
 0x83b   :  { %v3125_v19 = vmul.f32 1.442695, %v3124_v9 }
 0x83d   :  { %4048 = vpow2.f32 %v3125_v19 }
 0x84a   :  { %v4049_v60 = vpop.eup %4048 }
 0x84b   :  { %3127 = vadd.xlane.f32.xlu1 %v4049_v60 }
 0x84c   :  { %4903 = shalt.err (!%p4900_p7)
}
 0x84d   :  { %3142 = dma.vmem_to_hbm [thread:$0]  %s3140_s8, 128, %s5224_s9, [#allocation4]  }
 0x84e   :  { %s4962_s18 = smov [#allocation18]  }
 0x84f   :  { %s3149_s19 = sshll.u32 %s4962_s18, 4  ;;  %s3150_s19 = int_to_ptr.vmem [resolvable:$true] %s3149_s19 }
 0x850   :  { %s4912_s7 = scalar_lea.vmem %s3150_s19, 128  ;;  %p4917_p9 = scmp.lt.s32.totalorder %s3150_s19, %s3150_s19 }
 0x851   :  { %p4913_p8 = scmp.ne.s32.totalorder %s3150_s19, %s4912_s7  ;;  %p4918_p10 = scmp.lt.s32.totalorder %s4912_s7, %s4912_s7 }
 0x853   :  { %p4919_p11 = por %p4918_p10, %p4917_p9 }
 0x855   :  { %p4920_p12 = pnand %p4919_p11, %p4913_p8 }
 0x8d4   :  { %v3128_v45 = vpop.xlane.xlu1 %3127 }
 0x8d5   :  { %4050 = vlog2.f32 %v3128_v45 }
 0x8e2   :  { %v4051_v20 = vpop.eup %4050 }
 0x8e3   :  { %v3130_v22 = vmul.f32 0.6931472, %v4051_v20 }
 0x8e5   :  { %v3131_v23 = vsub.f32 %v3124_v9, %v3130_v22 }
 0x8e7   :  { %3132 = vst [vmem:[#allocation18] sm:$0xff] %v3131_v23 }
 0x8e8   :  { %4923 = shalt.err (!%p4920_p12)
}
 0x8e9   :  { %3152 = dma.vmem_to_hbm [thread:$0]  %s3150_s19, 128, %s5225_s10, [#allocation19]  }
 0x8ea   :  { %4942 = dma.done.wait [#allocation4], 128  }
 0x8eb   :  { %4943 = vsyncadd [#allocation4], 4294967168 }
 0x8ec   :  { %4944 = dma.done.wait [#allocation19], 128  }
 0x8ed   :  { %4945 = vsyncadd [#allocation19], 4294967168 }
 0x8ee   :  { %3159 = vsyncpa [#allocation3], 1 }
 0x8ef   :  { %3160 = vsyncpa [#allocation6], 1 }
 0x8f0   :  { %3161 = vsyncpa [#allocation9], 1 }
 0x8f1   :  { %3162 = vsyncpa [#allocation12], 1 }
 0x8f2   :  { %3163 = vsyncpa [#allocation15], 1 }
 0x8f3   :  { %3164 = vsyncpa [#allocation4], 1 }
 0x8f4   :  { %3165 = vsyncpa [#allocation19], 1 }

</bundles_post_ra>
